<compile_context>
chip_gen: v6e
topology: v6e:2x2x1
jax: 0.10.0
libtpu: 0.0.40
codegen_flags: <defaults>
</compile_context>

<pallas_src>
import jax
import jax.numpy as jnp
from jax.experimental import pallas as pl
from jax.experimental.pallas import tpu as pltpu

C_IN, C1, C2, C_OUT = 2, 8, 16, 2      # RefineNetBlock channels: 2 -> 8 -> 16 -> 2
K1, K2, K3 = 7, 5, 3                   # kernel sizes of the three ConvLayers


def _fold_bn(w_oihw, gamma, beta, mean, var, eps=1e-5):
    """Fold inference BatchNorm into the conv weight; repack to (Cout, KK*Cin)."""
    cout, cin, k, _ = w_oihw.shape
    scale = gamma / jnp.sqrt(var + eps)
    shift = (beta - mean * scale).reshape(cout, 1)
    # column index = (dy*K + dx)*Cin + ci  -- matches the in-kernel tap rows
    w = jnp.transpose(w_oihw, (0, 2, 3, 1)).reshape(cout, k * k * cin)
    return w * scale[:, None], shift


def _boundary_masks(K, N, H, W):
    """(K*K, N*H*W) f32 masks: 1 where tap (dy,dx) reads inside its own image."""
    p = (K - 1) // 2
    lane = jnp.arange(N * H * W)
    h = (lane % (H * W)) // W
    w = lane % W
    rows = []
    for dy in range(K):
        for dx in range(K):
            oy, ox = dy - p, dx - p
            ok = (h + oy >= 0) & (h + oy < H) & (w + ox >= 0) & (w + ox < W)
            rows.append(ok.astype(jnp.float32))
    return jnp.stack(rows, axis=0)


def _make_kernel(N, H, W, halo, kdim1, kdim1_pad):
    NHW = N * H * W
    padw = NHW + 2 * halo

    def leaky(y):
        return jnp.where(y > 0, y, 0.3 * y)              # LeakyReLU(0.3)

    def kernel(xres_ref, w1_ref, w2_ref, w3_ref,
               sh1_ref, sh2_ref, sh3_ref,
               m7_ref, m5_ref, m3_ref,
               o_ref,
               xpad_ref, taps1_ref, h1pad_ref, taps2_ref, h2pad_ref, taps3_ref):

        def stash(pad_ref, val, c):
            # Flat activation with a zero halo so every shifted tap is a
            # static lane slice; the center store is 128-lane aligned.
            pad_ref[...] = jnp.zeros((c, padw), jnp.float32)
            pad_ref[:, pl.ds(halo, NHW)] = val

        def build_taps(pad_ref, taps_ref, mask_ref, K, cin):
            p = (K - 1) // 2
            for t in range(K * K):                        # static unroll
                dy, dx = t // K, t % K
                off = (dy - p) * W + (dx - p)
                piece = (pad_ref[:, pl.ds(halo + off, NHW)]
                         * mask_ref[pl.ds(t, 1), :])
                taps_ref[pl.ds(cin * t, cin), :] = piece

        # ---- layer 1: 7x7 conv (BN folded in) + LeakyReLU, one MXU pass ----
        stash(xpad_ref, xres_ref[...], C_IN)
        if kdim1_pad > kdim1:                             # zero contraction pad rows
            taps1_ref[pl.ds(kdim1, kdim1_pad - kdim1), :] = (
                jnp.zeros((kdim1_pad - kdim1, NHW), jnp.float32))
        build_taps(xpad_ref, taps1_ref, m7_ref, K1, C_IN)
        h1 = leaky(jnp.dot(w1_ref[...], taps1_ref[...],
                           preferred_element_type=jnp.float32) + sh1_ref[...])

        # ---- layer 2: 5x5 conv (BN folded in) + LeakyReLU ----
        stash(h1pad_ref, h1, C1)
        build_taps(h1pad_ref, taps2_ref, m5_ref, K2, C1)
        h2 = leaky(jnp.dot(w2_ref[...], taps2_ref[...],
                           preferred_element_type=jnp.float32) + sh2_ref[...])

        # ---- layer 3: 3x3 conv (BN folded) + Tanh, fused residual + ReLU ----
        stash(h2pad_ref, h2, C2)
        build_taps(h2pad_ref, taps3_ref, m3_ref, K3, C2)
        y = jnp.tanh(jnp.dot(w3_ref[...], taps3_ref[...],
                             preferred_element_type=jnp.float32) + sh3_ref[...])
        o_ref[...] = jnp.maximum(y + xres_ref[...], 0.0)  # + identity, ReLU

    return kernel


def refinenet_block(x, params):
    """out = ReLU( direct(x) + x ), direct = 7x7 -> 5x5 -> 3x3 ConvLayers."""
    N, C, H, W = x.shape
    assert C == C_IN
    NHW = N * H * W
    # halo >= largest flat tap offset (p1*(W+1)); round up to a lane tile so the
    # center store in `stash` is 128-aligned (tap reads are unavoidably shifted).
    halo = -(-((K1 // 2) * (W + 1)) // 128) * 128
    padw = NHW + 2 * halo

    w1f, sh1 = _fold_bn(params["w1"], *params["bn1"])
    w2f, sh2 = _fold_bn(params["w2"], *params["bn2"])
    w3f, sh3 = _fold_bn(params["w3"], *params["bn3"])

    # pad layer-1 contraction dim (7*7*2 = 98) up to a multiple of 8
    kdim1 = K1 * K1 * C_IN
    kdim1_pad = -(-kdim1 // 8) * 8
    w1f = jnp.pad(w1f, ((0, 0), (0, kdim1_pad - kdim1)))

    # (C, n*hw) layout: layer-1 conv input AND the residual of the block
    xres = x.transpose(1, 0, 2, 3).reshape(C_IN, NHW)
    m7 = _boundary_masks(K1, N, H, W)
    m5 = _boundary_masks(K2, N, H, W)
    m3 = _boundary_masks(K3, N, H, W)

    def full(a):
        return pl.BlockSpec(a.shape, lambda i, _nd=a.ndim: (0,) * _nd)

    inputs = (xres, w1f, w2f, w3f, sh1, sh2, sh3, m7, m5, m3)

    out = pl.pallas_call(
        _make_kernel(N, H, W, halo, kdim1, kdim1_pad),
        out_shape=jax.ShapeDtypeStruct((C_OUT, NHW), jnp.float32),
        grid_spec=pltpu.PrefetchScalarGridSpec(
            num_scalar_prefetch=0,
            grid=(1,),
            in_specs=[full(a) for a in inputs],
            out_specs=pl.BlockSpec((C_OUT, NHW), lambda i: (0, 0)),
            scratch_shapes=[
                pltpu.VMEM((C_IN, padw), jnp.float32),         # x with zero halo
                pltpu.VMEM((kdim1_pad, NHW), jnp.float32),     # layer-1 tap stack
                pltpu.VMEM((C1, padw), jnp.float32),           # h1 with zero halo
                pltpu.VMEM((K2 * K2 * C1, NHW), jnp.float32),  # layer-2 tap stack
                pltpu.VMEM((C2, padw), jnp.float32),           # h2 with zero halo
                pltpu.VMEM((K3 * K3 * C2, NHW), jnp.float32),  # layer-3 tap stack
            ],
        ),
        compiler_params=pltpu.CompilerParams(
            dimension_semantics=("arbitrary",)),
    )(*inputs)

    return out.reshape(C_OUT, N, H, W).transpose(1, 0, 2, 3)


def init_params(key):
    """Deterministic synthetic parameters matching the module's shapes."""
    ks = jax.random.split(key, 6)

    def conv_w(k, cout, cin, ksz):
        fan_in = cin * ksz * ksz
        bound = 1.0 / (fan_in ** 0.5)
        return jax.random.uniform(k, (cout, cin, ksz, ksz), jnp.float32,
                                  -bound, bound)

    def bn(k, c):
        k1, k2, k3 = jax.random.split(k, 3)
        gamma = 1.0 + 0.1 * jax.random.normal(k1, (c,), jnp.float32)
        beta = 0.1 * jax.random.normal(k2, (c,), jnp.float32)
        mean = 0.1 * jax.random.normal(k3, (c,), jnp.float32)
        var = jnp.ones((c,), jnp.float32)
        return (gamma, beta, mean, var)

    return {
        "w1": conv_w(ks[0], 8, 2, 7),  "bn1": bn(ks[1], 8),
        "w2": conv_w(ks[2], 16, 8, 5), "bn2": bn(ks[3], 16),
        "w3": conv_w(ks[4], 2, 16, 3), "bn3": bn(ks[5], 2),
    }


def reference(x, params, eps=1e-5):
    """Pure-JAX reference of the PyTorch forward (inference-mode BN)."""
    def conv(h, w):
        return jax.lax.conv_general_dilated(
            h, w, (1, 1), "SAME", dimension_numbers=("NCHW", "OIHW", "NCHW"))

    def bn(h, g, b, m, v):
        sh = (1, -1, 1, 1)
        return (g.reshape(sh) * (h - m.reshape(sh)) /
                jnp.sqrt(v.reshape(sh) + eps) + b.reshape(sh))

    h = conv(x, params["w1"]); h = bn(h, *params["bn1"])
    h = jnp.where(h > 0, h, 0.3 * h)
    h = conv(h, params["w2"]); h = bn(h, *params["bn2"])
    h = jnp.where(h > 0, h, 0.3 * h)
    h = conv(h, params["w3"]); h = bn(h, *params["bn3"])
    h = jnp.tanh(h)
    return jnp.maximum(h + x, 0.0)


if __name__ == "__main__":
    key = jax.random.PRNGKey(0)
    kx, kp = jax.random.split(key)

    # NCHW input; this module requires exactly 2 channels.
    x = jax.random.normal(kx, (2, 2, 16, 16), jnp.float32)
    params = init_params(kp)

    fwd = jax.jit(refinenet_block)
    out = jax.block_until_ready(fwd(x, params))

    ref = reference(x, params)
    assert out.shape == x.shape, (out.shape, x.shape)
    assert jnp.allclose(out, ref, atol=1e-4, rtol=1e-4), \
        float(jnp.max(jnp.abs(out - ref)))

    print("KERNEL_OK")
</pallas_src>

<mosaic_0001>
module attributes {stable_mosaic.version = 11 : i64} {
  func.func @kernel(%arg0: i32, %arg1: memref<2x512xf32, #tpu.memory_space<vmem>>, %arg2: memref<8x104xf32, #tpu.memory_space<vmem>>, %arg3: memref<16x200xf32, #tpu.memory_space<vmem>>, %arg4: memref<2x144xf32, #tpu.memory_space<vmem>>, %arg5: memref<8x1xf32, #tpu.memory_space<vmem>>, %arg6: memref<16x1xf32, #tpu.memory_space<vmem>>, %arg7: memref<2x1xf32, #tpu.memory_space<vmem>>, %arg8: memref<49x512xf32, #tpu.memory_space<vmem>>, %arg9: memref<25x512xf32, #tpu.memory_space<vmem>>, %arg10: memref<9x512xf32, #tpu.memory_space<vmem>>, %arg11: memref<2x512xf32, #tpu.memory_space<vmem>>, %arg12: memref<2x768xf32, #tpu.memory_space<vmem>>, %arg13: memref<104x512xf32, #tpu.memory_space<vmem>>, %arg14: memref<8x768xf32, #tpu.memory_space<vmem>>, %arg15: memref<200x512xf32, #tpu.memory_space<vmem>>, %arg16: memref<16x768xf32, #tpu.memory_space<vmem>>, %arg17: memref<144x512xf32, #tpu.memory_space<vmem>>) attributes {dimension_semantics = [#tpu.dimension_semantics<arbitrary>], iteration_bounds = array<i64: 1>, scalar_prefetch = 0 : i64, scratch_operands = 6 : i64, tpu.core_type = #tpu.core_type<tc>, window_params = [{pipeline_mode = #tpu.pipeline_mode<synchronous>, transform_indices = @transform_0, window_bounds = array<i64: 2, 512>}, {pipeline_mode = #tpu.pipeline_mode<synchronous>, transform_indices = @transform_1, window_bounds = array<i64: 8, 104>}, {pipeline_mode = #tpu.pipeline_mode<synchronous>, transform_indices = @transform_2, window_bounds = array<i64: 16, 200>}, {pipeline_mode = #tpu.pipeline_mode<synchronous>, transform_indices = @transform_3, window_bounds = array<i64: 2, 144>}, {pipeline_mode = #tpu.pipeline_mode<synchronous>, transform_indices = @transform_4, window_bounds = array<i64: 8, 1>}, {pipeline_mode = #tpu.pipeline_mode<synchronous>, transform_indices = @transform_5, window_bounds = array<i64: 16, 1>}, {pipeline_mode = #tpu.pipeline_mode<synchronous>, transform_indices = @transform_6, window_bounds = array<i64: 2, 1>}, {pipeline_mode = #tpu.pipeline_mode<synchronous>, transform_indices = @transform_7, window_bounds = array<i64: 49, 512>}, {pipeline_mode = #tpu.pipeline_mode<synchronous>, transform_indices = @transform_8, window_bounds = array<i64: 25, 512>}, {pipeline_mode = #tpu.pipeline_mode<synchronous>, transform_indices = @transform_9, window_bounds = array<i64: 9, 512>}, {pipeline_mode = #tpu.pipeline_mode<synchronous>, transform_indices = @transform_10, window_bounds = array<i64: 2, 512>}]} {
    %c0 = arith.constant 0 : index
    %c0_0 = arith.constant 0 : index
    %0 = vector.load %arg1[%c0, %c0_0] : memref<2x512xf32, #tpu.memory_space<vmem>>, vector<2x512xf32>
    %cst = arith.constant 0.000000e+00 : f32
    %1 = vector.broadcast %cst : f32 to vector<2x768xf32>
    %c0_1 = arith.constant 0 : index
    %c0_2 = arith.constant 0 : index
    %2 = vector.load %arg12[%c0_1, %c0_2] : memref<2x768xf32, #tpu.memory_space<vmem>>, vector<2x768xf32>
    tpu.vector_store %arg12[%c0_1, %c0_2], %1 {strides = array<i32>} : memref<2x768xf32, #tpu.memory_space<vmem>>, vector<2x768xf32>,
    %c0_3 = arith.constant 0 : index
    %c128 = arith.constant 128 : index
    %3 = vector.load %arg12[%c0_3, %c128] : memref<2x768xf32, #tpu.memory_space<vmem>>, vector<2x512xf32>
    tpu.vector_store %arg12[%c0_3, %c128], %0 {strides = array<i32>} : memref<2x768xf32, #tpu.memory_space<vmem>>, vector<2x512xf32>,
    %cst_4 = arith.constant 0.000000e+00 : f32
    %4 = vector.broadcast %cst_4 : f32 to vector<6x512xf32>
    %c98 = arith.constant 98 : index
    %c0_5 = arith.constant 0 : index
    %5 = vector.load %arg13[%c98, %c0_5] : memref<104x512xf32, #tpu.memory_space<vmem>>, vector<6x512xf32>
    tpu.vector_store %arg13[%c98, %c0_5], %4 {strides = array<i32>} : memref<104x512xf32, #tpu.memory_space<vmem>>, vector<6x512xf32>,
    %c0_6 = arith.constant 0 : index
    %c77 = arith.constant 77 : index
    %6 = vector.load %arg12[%c0_6, %c77] : memref<2x768xf32, #tpu.memory_space<vmem>>, vector<2x512xf32>
    %c0_7 = arith.constant 0 : index
    %c0_8 = arith.constant 0 : index
    %7 = vector.load %arg8[%c0_7, %c0_8] : memref<49x512xf32, #tpu.memory_space<vmem>>, vector<1x512xf32>
    %8 = vector.broadcast %7 : vector<1x512xf32> to vector<2x512xf32>
    %9 = arith.mulf %6, %8 : vector<2x512xf32>
    %c0_9 = arith.constant 0 : index
    %c0_10 = arith.constant 0 : index
    %10 = vector.load %arg13[%c0_9, %c0_10] : memref<104x512xf32, #tpu.memory_space<vmem>>, vector<2x512xf32>
    tpu.vector_store %arg13[%c0_9, %c0_10], %9 {strides = array<i32>} : memref<104x512xf32, #tpu.memory_space<vmem>>, vector<2x512xf32>,
    %c0_11 = arith.constant 0 : index
    %c78 = arith.constant 78 : index
    %11 = vector.load %arg12[%c0_11, %c78] : memref<2x768xf32, #tpu.memory_space<vmem>>, vector<2x512xf32>
    %c1 = arith.constant 1 : index
    %c0_12 = arith.constant 0 : index
    %12 = vector.load %arg8[%c1, %c0_12] : memref<49x512xf32, #tpu.memory_space<vmem>>, vector<1x512xf32>
    %13 = vector.broadcast %12 : vector<1x512xf32> to vector<2x512xf32>
    %14 = arith.mulf %11, %13 : vector<2x512xf32>
    %c2 = arith.constant 2 : index
    %c0_13 = arith.constant 0 : index
    %15 = vector.load %arg13[%c2, %c0_13] : memref<104x512xf32, #tpu.memory_space<vmem>>, vector<2x512xf32>
    tpu.vector_store %arg13[%c2, %c0_13], %14 {strides = array<i32>} : memref<104x512xf32, #tpu.memory_space<vmem>>, vector<2x512xf32>,
    %c0_14 = arith.constant 0 : index
    %c79 = arith.constant 79 : index
    %16 = vector.load %arg12[%c0_14, %c79] : memref<2x768xf32, #tpu.memory_space<vmem>>, vector<2x512xf32>
    %c2_15 = arith.constant 2 : index
    %c0_16 = arith.constant 0 : index
    %17 = vector.load %arg8[%c2_15, %c0_16] : memref<49x512xf32, #tpu.memory_space<vmem>>, vector<1x512xf32>
    %18 = vector.broadcast %17 : vector<1x512xf32> to vector<2x512xf32>
    %19 = arith.mulf %16, %18 : vector<2x512xf32>
    %c4 = arith.constant 4 : index
    %c0_17 = arith.constant 0 : index
    %20 = vector.load %arg13[%c4, %c0_17] : memref<104x512xf32, #tpu.memory_space<vmem>>, vector<2x512xf32>
    tpu.vector_store %arg13[%c4, %c0_17], %19 {strides = array<i32>} : memref<104x512xf32, #tpu.memory_space<vmem>>, vector<2x512xf32>,
    %c0_18 = arith.constant 0 : index
    %c80 = arith.constant 80 : index
    %21 = vector.load %arg12[%c0_18, %c80] : memref<2x768xf32, #tpu.memory_space<vmem>>, vector<2x512xf32>
    %c3 = arith.constant 3 : index
    %c0_19 = arith.constant 0 : index
    %22 = vector.load %arg8[%c3, %c0_19] : memref<49x512xf32, #tpu.memory_space<vmem>>, vector<1x512xf32>
    %23 = vector.broadcast %22 : vector<1x512xf32> to vector<2x512xf32>
    %24 = arith.mulf %21, %23 : vector<2x512xf32>
    %c6 = arith.constant 6 : index
    %c0_20 = arith.constant 0 : index
    %25 = vector.load %arg13[%c6, %c0_20] : memref<104x512xf32, #tpu.memory_space<vmem>>, vector<2x512xf32>
    tpu.vector_store %arg13[%c6, %c0_20], %24 {strides = array<i32>} : memref<104x512xf32, #tpu.memory_space<vmem>>, vector<2x512xf32>,
    %c0_21 = arith.constant 0 : index
    %c81 = arith.constant 81 : index
    %26 = vector.load %arg12[%c0_21, %c81] : memref<2x768xf32, #tpu.memory_space<vmem>>, vector<2x512xf32>
    %c4_22 = arith.constant 4 : index
    %c0_23 = arith.constant 0 : index
    %27 = vector.load %arg8[%c4_22, %c0_23] : memref<49x512xf32, #tpu.memory_space<vmem>>, vector<1x512xf32>
    %28 = vector.broadcast %27 : vector<1x512xf32> to vector<2x512xf32>
    %29 = arith.mulf %26, %28 : vector<2x512xf32>
    %c8 = arith.constant 8 : index
    %c0_24 = arith.constant 0 : index
    %30 = vector.load %arg13[%c8, %c0_24] : memref<104x512xf32, #tpu.memory_space<vmem>>, vector<2x512xf32>
    tpu.vector_store %arg13[%c8, %c0_24], %29 {strides = array<i32>} : memref<104x512xf32, #tpu.memory_space<vmem>>, vector<2x512xf32>,
    %c0_25 = arith.constant 0 : index
    %c82 = arith.constant 82 : index
    %31 = vector.load %arg12[%c0_25, %c82] : memref<2x768xf32, #tpu.memory_space<vmem>>, vector<2x512xf32>
    %c5 = arith.constant 5 : index
    %c0_26 = arith.constant 0 : index
    %32 = vector.load %arg8[%c5, %c0_26] : memref<49x512xf32, #tpu.memory_space<vmem>>, vector<1x512xf32>
    %33 = vector.broadcast %32 : vector<1x512xf32> to vector<2x512xf32>
    %34 = arith.mulf %31, %33 : vector<2x512xf32>
    %c10 = arith.constant 10 : index
    %c0_27 = arith.constant 0 : index
    %35 = vector.load %arg13[%c10, %c0_27] : memref<104x512xf32, #tpu.memory_space<vmem>>, vector<2x512xf32>
    tpu.vector_store %arg13[%c10, %c0_27], %34 {strides = array<i32>} : memref<104x512xf32, #tpu.memory_space<vmem>>, vector<2x512xf32>,
    %c0_28 = arith.constant 0 : index
    %c83 = arith.constant 83 : index
    %36 = vector.load %arg12[%c0_28, %c83] : memref<2x768xf32, #tpu.memory_space<vmem>>, vector<2x512xf32>
    %c6_29 = arith.constant 6 : index
    %c0_30 = arith.constant 0 : index
    %37 = vector.load %arg8[%c6_29, %c0_30] : memref<49x512xf32, #tpu.memory_space<vmem>>, vector<1x512xf32>
    %38 = vector.broadcast %37 : vector<1x512xf32> to vector<2x512xf32>
    %39 = arith.mulf %36, %38 : vector<2x512xf32>
    %c12 = arith.constant 12 : index
    %c0_31 = arith.constant 0 : index
    %40 = vector.load %arg13[%c12, %c0_31] : memref<104x512xf32, #tpu.memory_space<vmem>>, vector<2x512xf32>
    tpu.vector_store %arg13[%c12, %c0_31], %39 {strides = array<i32>} : memref<104x512xf32, #tpu.memory_space<vmem>>, vector<2x512xf32>,
    %c0_32 = arith.constant 0 : index
    %c93 = arith.constant 93 : index
    %41 = vector.load %arg12[%c0_32, %c93] : memref<2x768xf32, #tpu.memory_space<vmem>>, vector<2x512xf32>
    %c7 = arith.constant 7 : index
    %c0_33 = arith.constant 0 : index
    %42 = vector.load %arg8[%c7, %c0_33] : memref<49x512xf32, #tpu.memory_space<vmem>>, vector<1x512xf32>
    %43 = vector.broadcast %42 : vector<1x512xf32> to vector<2x512xf32>
    %44 = arith.mulf %41, %43 : vector<2x512xf32>
    %c14 = arith.constant 14 : index
    %c0_34 = arith.constant 0 : index
    %45 = vector.load %arg13[%c14, %c0_34] : memref<104x512xf32, #tpu.memory_space<vmem>>, vector<2x512xf32>
    tpu.vector_store %arg13[%c14, %c0_34], %44 {strides = array<i32>} : memref<104x512xf32, #tpu.memory_space<vmem>>, vector<2x512xf32>,
    %c0_35 = arith.constant 0 : index
    %c94 = arith.constant 94 : index
    %46 = vector.load %arg12[%c0_35, %c94] : memref<2x768xf32, #tpu.memory_space<vmem>>, vector<2x512xf32>
    %c8_36 = arith.constant 8 : index
    %c0_37 = arith.constant 0 : index
    %47 = vector.load %arg8[%c8_36, %c0_37] : memref<49x512xf32, #tpu.memory_space<vmem>>, vector<1x512xf32>
    %48 = vector.broadcast %47 : vector<1x512xf32> to vector<2x512xf32>
    %49 = arith.mulf %46, %48 : vector<2x512xf32>
    %c16 = arith.constant 16 : index
    %c0_38 = arith.constant 0 : index
    %50 = vector.load %arg13[%c16, %c0_38] : memref<104x512xf32, #tpu.memory_space<vmem>>, vector<2x512xf32>
    tpu.vector_store %arg13[%c16, %c0_38], %49 {strides = array<i32>} : memref<104x512xf32, #tpu.memory_space<vmem>>, vector<2x512xf32>,
    %c0_39 = arith.constant 0 : index
    %c95 = arith.constant 95 : index
    %51 = vector.load %arg12[%c0_39, %c95] : memref<2x768xf32, #tpu.memory_space<vmem>>, vector<2x512xf32>
    %c9 = arith.constant 9 : index
    %c0_40 = arith.constant 0 : index
    %52 = vector.load %arg8[%c9, %c0_40] : memref<49x512xf32, #tpu.memory_space<vmem>>, vector<1x512xf32>
    %53 = vector.broadcast %52 : vector<1x512xf32> to vector<2x512xf32>
    %54 = arith.mulf %51, %53 : vector<2x512xf32>
    %c18 = arith.constant 18 : index
    %c0_41 = arith.constant 0 : index
    %55 = vector.load %arg13[%c18, %c0_41] : memref<104x512xf32, #tpu.memory_space<vmem>>, vector<2x512xf32>
    tpu.vector_store %arg13[%c18, %c0_41], %54 {strides = array<i32>} : memref<104x512xf32, #tpu.memory_space<vmem>>, vector<2x512xf32>,
    %c0_42 = arith.constant 0 : index
    %c96 = arith.constant 96 : index
    %56 = vector.load %arg12[%c0_42, %c96] : memref<2x768xf32, #tpu.memory_space<vmem>>, vector<2x512xf32>
    %c10_43 = arith.constant 10 : index
    %c0_44 = arith.constant 0 : index
    %57 = vector.load %arg8[%c10_43, %c0_44] : memref<49x512xf32, #tpu.memory_space<vmem>>, vector<1x512xf32>
    %58 = vector.broadcast %57 : vector<1x512xf32> to vector<2x512xf32>
    %59 = arith.mulf %56, %58 : vector<2x512xf32>
    %c20 = arith.constant 20 : index
    %c0_45 = arith.constant 0 : index
    %60 = vector.load %arg13[%c20, %c0_45] : memref<104x512xf32, #tpu.memory_space<vmem>>, vector<2x512xf32>
    tpu.vector_store %arg13[%c20, %c0_45], %59 {strides = array<i32>} : memref<104x512xf32, #tpu.memory_space<vmem>>, vector<2x512xf32>,
    %c0_46 = arith.constant 0 : index
    %c97 = arith.constant 97 : index
    %61 = vector.load %arg12[%c0_46, %c97] : memref<2x768xf32, #tpu.memory_space<vmem>>, vector<2x512xf32>
    %c11 = arith.constant 11 : index
    %c0_47 = arith.constant 0 : index
    %62 = vector.load %arg8[%c11, %c0_47] : memref<49x512xf32, #tpu.memory_space<vmem>>, vector<1x512xf32>
    %63 = vector.broadcast %62 : vector<1x512xf32> to vector<2x512xf32>
    %64 = arith.mulf %61, %63 : vector<2x512xf32>
    %c22 = arith.constant 22 : index
    %c0_48 = arith.constant 0 : index
    %65 = vector.load %arg13[%c22, %c0_48] : memref<104x512xf32, #tpu.memory_space<vmem>>, vector<2x512xf32>
    tpu.vector_store %arg13[%c22, %c0_48], %64 {strides = array<i32>} : memref<104x512xf32, #tpu.memory_space<vmem>>, vector<2x512xf32>,
    %c0_49 = arith.constant 0 : index
    %c98_50 = arith.constant 98 : index
    %66 = vector.load %arg12[%c0_49, %c98_50] : memref<2x768xf32, #tpu.memory_space<vmem>>, vector<2x512xf32>
    %c12_51 = arith.constant 12 : index
    %c0_52 = arith.constant 0 : index
    %67 = vector.load %arg8[%c12_51, %c0_52] : memref<49x512xf32, #tpu.memory_space<vmem>>, vector<1x512xf32>
    %68 = vector.broadcast %67 : vector<1x512xf32> to vector<2x512xf32>
    %69 = arith.mulf %66, %68 : vector<2x512xf32>
    %c24 = arith.constant 24 : index
    %c0_53 = arith.constant 0 : index
    %70 = vector.load %arg13[%c24, %c0_53] : memref<104x512xf32, #tpu.memory_space<vmem>>, vector<2x512xf32>
    tpu.vector_store %arg13[%c24, %c0_53], %69 {strides = array<i32>} : memref<104x512xf32, #tpu.memory_space<vmem>>, vector<2x512xf32>,
    %c0_54 = arith.constant 0 : index
    %c99 = arith.constant 99 : index
    %71 = vector.load %arg12[%c0_54, %c99] : memref<2x768xf32, #tpu.memory_space<vmem>>, vector<2x512xf32>
    %c13 = arith.constant 13 : index
    %c0_55 = arith.constant 0 : index
    %72 = vector.load %arg8[%c13, %c0_55] : memref<49x512xf32, #tpu.memory_space<vmem>>, vector<1x512xf32>
    %73 = vector.broadcast %72 : vector<1x512xf32> to vector<2x512xf32>
    %74 = arith.mulf %71, %73 : vector<2x512xf32>
    %c26 = arith.constant 26 : index
    %c0_56 = arith.constant 0 : index
    %75 = vector.load %arg13[%c26, %c0_56] : memref<104x512xf32, #tpu.memory_space<vmem>>, vector<2x512xf32>
    tpu.vector_store %arg13[%c26, %c0_56], %74 {strides = array<i32>} : memref<104x512xf32, #tpu.memory_space<vmem>>, vector<2x512xf32>,
    %c0_57 = arith.constant 0 : index
    %c109 = arith.constant 109 : index
    %76 = vector.load %arg12[%c0_57, %c109] : memref<2x768xf32, #tpu.memory_space<vmem>>, vector<2x512xf32>
    %c14_58 = arith.constant 14 : index
    %c0_59 = arith.constant 0 : index
    %77 = vector.load %arg8[%c14_58, %c0_59] : memref<49x512xf32, #tpu.memory_space<vmem>>, vector<1x512xf32>
    %78 = vector.broadcast %77 : vector<1x512xf32> to vector<2x512xf32>
    %79 = arith.mulf %76, %78 : vector<2x512xf32>
    %c28 = arith.constant 28 : index
    %c0_60 = arith.constant 0 : index
    %80 = vector.load %arg13[%c28, %c0_60] : memref<104x512xf32, #tpu.memory_space<vmem>>, vector<2x512xf32>
    tpu.vector_store %arg13[%c28, %c0_60], %79 {strides = array<i32>} : memref<104x512xf32, #tpu.memory_space<vmem>>, vector<2x512xf32>,
    %c0_61 = arith.constant 0 : index
    %c110 = arith.constant 110 : index
    %81 = vector.load %arg12[%c0_61, %c110] : memref<2x768xf32, #tpu.memory_space<vmem>>, vector<2x512xf32>
    %c15 = arith.constant 15 : index
    %c0_62 = arith.constant 0 : index
    %82 = vector.load %arg8[%c15, %c0_62] : memref<49x512xf32, #tpu.memory_space<vmem>>, vector<1x512xf32>
    %83 = vector.broadcast %82 : vector<1x512xf32> to vector<2x512xf32>
    %84 = arith.mulf %81, %83 : vector<2x512xf32>
    %c30 = arith.constant 30 : index
    %c0_63 = arith.constant 0 : index
    %85 = vector.load %arg13[%c30, %c0_63] : memref<104x512xf32, #tpu.memory_space<vmem>>, vector<2x512xf32>
    tpu.vector_store %arg13[%c30, %c0_63], %84 {strides = array<i32>} : memref<104x512xf32, #tpu.memory_space<vmem>>, vector<2x512xf32>,
    %c0_64 = arith.constant 0 : index
    %c111 = arith.constant 111 : index
    %86 = vector.load %arg12[%c0_64, %c111] : memref<2x768xf32, #tpu.memory_space<vmem>>, vector<2x512xf32>
    %c16_65 = arith.constant 16 : index
    %c0_66 = arith.constant 0 : index
    %87 = vector.load %arg8[%c16_65, %c0_66] : memref<49x512xf32, #tpu.memory_space<vmem>>, vector<1x512xf32>
    %88 = vector.broadcast %87 : vector<1x512xf32> to vector<2x512xf32>
    %89 = arith.mulf %86, %88 : vector<2x512xf32>
    %c32 = arith.constant 32 : index
    %c0_67 = arith.constant 0 : index
    %90 = vector.load %arg13[%c32, %c0_67] : memref<104x512xf32, #tpu.memory_space<vmem>>, vector<2x512xf32>
    tpu.vector_store %arg13[%c32, %c0_67], %89 {strides = array<i32>} : memref<104x512xf32, #tpu.memory_space<vmem>>, vector<2x512xf32>,
    %c0_68 = arith.constant 0 : index
    %c112 = arith.constant 112 : index
    %91 = vector.load %arg12[%c0_68, %c112] : memref<2x768xf32, #tpu.memory_space<vmem>>, vector<2x512xf32>
    %c17 = arith.constant 17 : index
    %c0_69 = arith.constant 0 : index
    %92 = vector.load %arg8[%c17, %c0_69] : memref<49x512xf32, #tpu.memory_space<vmem>>, vector<1x512xf32>
    %93 = vector.broadcast %92 : vector<1x512xf32> to vector<2x512xf32>
    %94 = arith.mulf %91, %93 : vector<2x512xf32>
    %c34 = arith.constant 34 : index
    %c0_70 = arith.constant 0 : index
    %95 = vector.load %arg13[%c34, %c0_70] : memref<104x512xf32, #tpu.memory_space<vmem>>, vector<2x512xf32>
    tpu.vector_store %arg13[%c34, %c0_70], %94 {strides = array<i32>} : memref<104x512xf32, #tpu.memory_space<vmem>>, vector<2x512xf32>,
    %c0_71 = arith.constant 0 : index
    %c113 = arith.constant 113 : index
    %96 = vector.load %arg12[%c0_71, %c113] : memref<2x768xf32, #tpu.memory_space<vmem>>, vector<2x512xf32>
    %c18_72 = arith.constant 18 : index
    %c0_73 = arith.constant 0 : index
    %97 = vector.load %arg8[%c18_72, %c0_73] : memref<49x512xf32, #tpu.memory_space<vmem>>, vector<1x512xf32>
    %98 = vector.broadcast %97 : vector<1x512xf32> to vector<2x512xf32>
    %99 = arith.mulf %96, %98 : vector<2x512xf32>
    %c36 = arith.constant 36 : index
    %c0_74 = arith.constant 0 : index
    %100 = vector.load %arg13[%c36, %c0_74] : memref<104x512xf32, #tpu.memory_space<vmem>>, vector<2x512xf32>
    tpu.vector_store %arg13[%c36, %c0_74], %99 {strides = array<i32>} : memref<104x512xf32, #tpu.memory_space<vmem>>, vector<2x512xf32>,
    %c0_75 = arith.constant 0 : index
    %c114 = arith.constant 114 : index
    %101 = vector.load %arg12[%c0_75, %c114] : memref<2x768xf32, #tpu.memory_space<vmem>>, vector<2x512xf32>
    %c19 = arith.constant 19 : index
    %c0_76 = arith.constant 0 : index
    %102 = vector.load %arg8[%c19, %c0_76] : memref<49x512xf32, #tpu.memory_space<vmem>>, vector<1x512xf32>
    %103 = vector.broadcast %102 : vector<1x512xf32> to vector<2x512xf32>
    %104 = arith.mulf %101, %103 : vector<2x512xf32>
    %c38 = arith.constant 38 : index
    %c0_77 = arith.constant 0 : index
    %105 = vector.load %arg13[%c38, %c0_77] : memref<104x512xf32, #tpu.memory_space<vmem>>, vector<2x512xf32>
    tpu.vector_store %arg13[%c38, %c0_77], %104 {strides = array<i32>} : memref<104x512xf32, #tpu.memory_space<vmem>>, vector<2x512xf32>,
    %c0_78 = arith.constant 0 : index
    %c115 = arith.constant 115 : index
    %106 = vector.load %arg12[%c0_78, %c115] : memref<2x768xf32, #tpu.memory_space<vmem>>, vector<2x512xf32>
    %c20_79 = arith.constant 20 : index
    %c0_80 = arith.constant 0 : index
    %107 = vector.load %arg8[%c20_79, %c0_80] : memref<49x512xf32, #tpu.memory_space<vmem>>, vector<1x512xf32>
    %108 = vector.broadcast %107 : vector<1x512xf32> to vector<2x512xf32>
    %109 = arith.mulf %106, %108 : vector<2x512xf32>
    %c40 = arith.constant 40 : index
    %c0_81 = arith.constant 0 : index
    %110 = vector.load %arg13[%c40, %c0_81] : memref<104x512xf32, #tpu.memory_space<vmem>>, vector<2x512xf32>
    tpu.vector_store %arg13[%c40, %c0_81], %109 {strides = array<i32>} : memref<104x512xf32, #tpu.memory_space<vmem>>, vector<2x512xf32>,
    %c0_82 = arith.constant 0 : index
    %c125 = arith.constant 125 : index
    %111 = vector.load %arg12[%c0_82, %c125] : memref<2x768xf32, #tpu.memory_space<vmem>>, vector<2x512xf32>
    %c21 = arith.constant 21 : index
    %c0_83 = arith.constant 0 : index
    %112 = vector.load %arg8[%c21, %c0_83] : memref<49x512xf32, #tpu.memory_space<vmem>>, vector<1x512xf32>
    %113 = vector.broadcast %112 : vector<1x512xf32> to vector<2x512xf32>
    %114 = arith.mulf %111, %113 : vector<2x512xf32>
    %c42 = arith.constant 42 : index
    %c0_84 = arith.constant 0 : index
    %115 = vector.load %arg13[%c42, %c0_84] : memref<104x512xf32, #tpu.memory_space<vmem>>, vector<2x512xf32>
    tpu.vector_store %arg13[%c42, %c0_84], %114 {strides = array<i32>} : memref<104x512xf32, #tpu.memory_space<vmem>>, vector<2x512xf32>,
    %c0_85 = arith.constant 0 : index
    %c126 = arith.constant 126 : index
    %116 = vector.load %arg12[%c0_85, %c126] : memref<2x768xf32, #tpu.memory_space<vmem>>, vector<2x512xf32>
    %c22_86 = arith.constant 22 : index
    %c0_87 = arith.constant 0 : index
    %117 = vector.load %arg8[%c22_86, %c0_87] : memref<49x512xf32, #tpu.memory_space<vmem>>, vector<1x512xf32>
    %118 = vector.broadcast %117 : vector<1x512xf32> to vector<2x512xf32>
    %119 = arith.mulf %116, %118 : vector<2x512xf32>
    %c44 = arith.constant 44 : index
    %c0_88 = arith.constant 0 : index
    %120 = vector.load %arg13[%c44, %c0_88] : memref<104x512xf32, #tpu.memory_space<vmem>>, vector<2x512xf32>
    tpu.vector_store %arg13[%c44, %c0_88], %119 {strides = array<i32>} : memref<104x512xf32, #tpu.memory_space<vmem>>, vector<2x512xf32>,
    %c0_89 = arith.constant 0 : index
    %c127 = arith.constant 127 : index
    %121 = vector.load %arg12[%c0_89, %c127] : memref<2x768xf32, #tpu.memory_space<vmem>>, vector<2x512xf32>
    %c23 = arith.constant 23 : index
    %c0_90 = arith.constant 0 : index
    %122 = vector.load %arg8[%c23, %c0_90] : memref<49x512xf32, #tpu.memory_space<vmem>>, vector<1x512xf32>
    %123 = vector.broadcast %122 : vector<1x512xf32> to vector<2x512xf32>
    %124 = arith.mulf %121, %123 : vector<2x512xf32>
    %c46 = arith.constant 46 : index
    %c0_91 = arith.constant 0 : index
    %125 = vector.load %arg13[%c46, %c0_91] : memref<104x512xf32, #tpu.memory_space<vmem>>, vector<2x512xf32>
    tpu.vector_store %arg13[%c46, %c0_91], %124 {strides = array<i32>} : memref<104x512xf32, #tpu.memory_space<vmem>>, vector<2x512xf32>,
    %c0_92 = arith.constant 0 : index
    %c128_93 = arith.constant 128 : index
    %126 = vector.load %arg12[%c0_92, %c128_93] : memref<2x768xf32, #tpu.memory_space<vmem>>, vector<2x512xf32>
    %c24_94 = arith.constant 24 : index
    %c0_95 = arith.constant 0 : index
    %127 = vector.load %arg8[%c24_94, %c0_95] : memref<49x512xf32, #tpu.memory_space<vmem>>, vector<1x512xf32>
    %128 = vector.broadcast %127 : vector<1x512xf32> to vector<2x512xf32>
    %129 = arith.mulf %126, %128 : vector<2x512xf32>
    %c48 = arith.constant 48 : index
    %c0_96 = arith.constant 0 : index
    %130 = vector.load %arg13[%c48, %c0_96] : memref<104x512xf32, #tpu.memory_space<vmem>>, vector<2x512xf32>
    tpu.vector_store %arg13[%c48, %c0_96], %129 {strides = array<i32>} : memref<104x512xf32, #tpu.memory_space<vmem>>, vector<2x512xf32>,
    %c0_97 = arith.constant 0 : index
    %c129 = arith.constant 129 : index
    %131 = vector.load %arg12[%c0_97, %c129] : memref<2x768xf32, #tpu.memory_space<vmem>>, vector<2x512xf32>
    %c25 = arith.constant 25 : index
    %c0_98 = arith.constant 0 : index
    %132 = vector.load %arg8[%c25, %c0_98] : memref<49x512xf32, #tpu.memory_space<vmem>>, vector<1x512xf32>
    %133 = vector.broadcast %132 : vector<1x512xf32> to vector<2x512xf32>
    %134 = arith.mulf %131, %133 : vector<2x512xf32>
    %c50 = arith.constant 50 : index
    %c0_99 = arith.constant 0 : index
    %135 = vector.load %arg13[%c50, %c0_99] : memref<104x512xf32, #tpu.memory_space<vmem>>, vector<2x512xf32>
    tpu.vector_store %arg13[%c50, %c0_99], %134 {strides = array<i32>} : memref<104x512xf32, #tpu.memory_space<vmem>>, vector<2x512xf32>,
    %c0_100 = arith.constant 0 : index
    %c130 = arith.constant 130 : index
    %136 = vector.load %arg12[%c0_100, %c130] : memref<2x768xf32, #tpu.memory_space<vmem>>, vector<2x512xf32>
    %c26_101 = arith.constant 26 : index
    %c0_102 = arith.constant 0 : index
    %137 = vector.load %arg8[%c26_101, %c0_102] : memref<49x512xf32, #tpu.memory_space<vmem>>, vector<1x512xf32>
    %138 = vector.broadcast %137 : vector<1x512xf32> to vector<2x512xf32>
    %139 = arith.mulf %136, %138 : vector<2x512xf32>
    %c52 = arith.constant 52 : index
    %c0_103 = arith.constant 0 : index
    %140 = vector.load %arg13[%c52, %c0_103] : memref<104x512xf32, #tpu.memory_space<vmem>>, vector<2x512xf32>
    tpu.vector_store %arg13[%c52, %c0_103], %139 {strides = array<i32>} : memref<104x512xf32, #tpu.memory_space<vmem>>, vector<2x512xf32>,
    %c0_104 = arith.constant 0 : index
    %c131 = arith.constant 131 : index
    %141 = vector.load %arg12[%c0_104, %c131] : memref<2x768xf32, #tpu.memory_space<vmem>>, vector<2x512xf32>
    %c27 = arith.constant 27 : index
    %c0_105 = arith.constant 0 : index
    %142 = vector.load %arg8[%c27, %c0_105] : memref<49x512xf32, #tpu.memory_space<vmem>>, vector<1x512xf32>
    %143 = vector.broadcast %142 : vector<1x512xf32> to vector<2x512xf32>
    %144 = arith.mulf %141, %143 : vector<2x512xf32>
    %c54 = arith.constant 54 : index
    %c0_106 = arith.constant 0 : index
    %145 = vector.load %arg13[%c54, %c0_106] : memref<104x512xf32, #tpu.memory_space<vmem>>, vector<2x512xf32>
    tpu.vector_store %arg13[%c54, %c0_106], %144 {strides = array<i32>} : memref<104x512xf32, #tpu.memory_space<vmem>>, vector<2x512xf32>,
    %c0_107 = arith.constant 0 : index
    %c141 = arith.constant 141 : index
    %146 = vector.load %arg12[%c0_107, %c141] : memref<2x768xf32, #tpu.memory_space<vmem>>, vector<2x512xf32>
    %c28_108 = arith.constant 28 : index
    %c0_109 = arith.constant 0 : index
    %147 = vector.load %arg8[%c28_108, %c0_109] : memref<49x512xf32, #tpu.memory_space<vmem>>, vector<1x512xf32>
    %148 = vector.broadcast %147 : vector<1x512xf32> to vector<2x512xf32>
    %149 = arith.mulf %146, %148 : vector<2x512xf32>
    %c56 = arith.constant 56 : index
    %c0_110 = arith.constant 0 : index
    %150 = vector.load %arg13[%c56, %c0_110] : memref<104x512xf32, #tpu.memory_space<vmem>>, vector<2x512xf32>
    tpu.vector_store %arg13[%c56, %c0_110], %149 {strides = array<i32>} : memref<104x512xf32, #tpu.memory_space<vmem>>, vector<2x512xf32>,
    %c0_111 = arith.constant 0 : index
    %c142 = arith.constant 142 : index
    %151 = vector.load %arg12[%c0_111, %c142] : memref<2x768xf32, #tpu.memory_space<vmem>>, vector<2x512xf32>
    %c29 = arith.constant 29 : index
    %c0_112 = arith.constant 0 : index
    %152 = vector.load %arg8[%c29, %c0_112] : memref<49x512xf32, #tpu.memory_space<vmem>>, vector<1x512xf32>
    %153 = vector.broadcast %152 : vector<1x512xf32> to vector<2x512xf32>
    %154 = arith.mulf %151, %153 : vector<2x512xf32>
    %c58 = arith.constant 58 : index
    %c0_113 = arith.constant 0 : index
    %155 = vector.load %arg13[%c58, %c0_113] : memref<104x512xf32, #tpu.memory_space<vmem>>, vector<2x512xf32>
    tpu.vector_store %arg13[%c58, %c0_113], %154 {strides = array<i32>} : memref<104x512xf32, #tpu.memory_space<vmem>>, vector<2x512xf32>,
    %c0_114 = arith.constant 0 : index
    %c143 = arith.constant 143 : index
    %156 = vector.load %arg12[%c0_114, %c143] : memref<2x768xf32, #tpu.memory_space<vmem>>, vector<2x512xf32>
    %c30_115 = arith.constant 30 : index
    %c0_116 = arith.constant 0 : index
    %157 = vector.load %arg8[%c30_115, %c0_116] : memref<49x512xf32, #tpu.memory_space<vmem>>, vector<1x512xf32>
    %158 = vector.broadcast %157 : vector<1x512xf32> to vector<2x512xf32>
    %159 = arith.mulf %156, %158 : vector<2x512xf32>
    %c60 = arith.constant 60 : index
    %c0_117 = arith.constant 0 : index
    %160 = vector.load %arg13[%c60, %c0_117] : memref<104x512xf32, #tpu.memory_space<vmem>>, vector<2x512xf32>
    tpu.vector_store %arg13[%c60, %c0_117], %159 {strides = array<i32>} : memref<104x512xf32, #tpu.memory_space<vmem>>, vector<2x512xf32>,
    %c0_118 = arith.constant 0 : index
    %c144 = arith.constant 144 : index
    %161 = vector.load %arg12[%c0_118, %c144] : memref<2x768xf32, #tpu.memory_space<vmem>>, vector<2x512xf32>
    %c31 = arith.constant 31 : index
    %c0_119 = arith.constant 0 : index
    %162 = vector.load %arg8[%c31, %c0_119] : memref<49x512xf32, #tpu.memory_space<vmem>>, vector<1x512xf32>
    %163 = vector.broadcast %162 : vector<1x512xf32> to vector<2x512xf32>
    %164 = arith.mulf %161, %163 : vector<2x512xf32>
    %c62 = arith.constant 62 : index
    %c0_120 = arith.constant 0 : index
    %165 = vector.load %arg13[%c62, %c0_120] : memref<104x512xf32, #tpu.memory_space<vmem>>, vector<2x512xf32>
    tpu.vector_store %arg13[%c62, %c0_120], %164 {strides = array<i32>} : memref<104x512xf32, #tpu.memory_space<vmem>>, vector<2x512xf32>,
    %c0_121 = arith.constant 0 : index
    %c145 = arith.constant 145 : index
    %166 = vector.load %arg12[%c0_121, %c145] : memref<2x768xf32, #tpu.memory_space<vmem>>, vector<2x512xf32>
    %c32_122 = arith.constant 32 : index
    %c0_123 = arith.constant 0 : index
    %167 = vector.load %arg8[%c32_122, %c0_123] : memref<49x512xf32, #tpu.memory_space<vmem>>, vector<1x512xf32>
    %168 = vector.broadcast %167 : vector<1x512xf32> to vector<2x512xf32>
    %169 = arith.mulf %166, %168 : vector<2x512xf32>
    %c64 = arith.constant 64 : index
    %c0_124 = arith.constant 0 : index
    %170 = vector.load %arg13[%c64, %c0_124] : memref<104x512xf32, #tpu.memory_space<vmem>>, vector<2x512xf32>
    tpu.vector_store %arg13[%c64, %c0_124], %169 {strides = array<i32>} : memref<104x512xf32, #tpu.memory_space<vmem>>, vector<2x512xf32>,
    %c0_125 = arith.constant 0 : index
    %c146 = arith.constant 146 : index
    %171 = vector.load %arg12[%c0_125, %c146] : memref<2x768xf32, #tpu.memory_space<vmem>>, vector<2x512xf32>
    %c33 = arith.constant 33 : index
    %c0_126 = arith.constant 0 : index
    %172 = vector.load %arg8[%c33, %c0_126] : memref<49x512xf32, #tpu.memory_space<vmem>>, vector<1x512xf32>
    %173 = vector.broadcast %172 : vector<1x512xf32> to vector<2x512xf32>
    %174 = arith.mulf %171, %173 : vector<2x512xf32>
    %c66 = arith.constant 66 : index
    %c0_127 = arith.constant 0 : index
    %175 = vector.load %arg13[%c66, %c0_127] : memref<104x512xf32, #tpu.memory_space<vmem>>, vector<2x512xf32>
    tpu.vector_store %arg13[%c66, %c0_127], %174 {strides = array<i32>} : memref<104x512xf32, #tpu.memory_space<vmem>>, vector<2x512xf32>,
    %c0_128 = arith.constant 0 : index
    %c147 = arith.constant 147 : index
    %176 = vector.load %arg12[%c0_128, %c147] : memref<2x768xf32, #tpu.memory_space<vmem>>, vector<2x512xf32>
    %c34_129 = arith.constant 34 : index
    %c0_130 = arith.constant 0 : index
    %177 = vector.load %arg8[%c34_129, %c0_130] : memref<49x512xf32, #tpu.memory_space<vmem>>, vector<1x512xf32>
    %178 = vector.broadcast %177 : vector<1x512xf32> to vector<2x512xf32>
    %179 = arith.mulf %176, %178 : vector<2x512xf32>
    %c68 = arith.constant 68 : index
    %c0_131 = arith.constant 0 : index
    %180 = vector.load %arg13[%c68, %c0_131] : memref<104x512xf32, #tpu.memory_space<vmem>>, vector<2x512xf32>
    tpu.vector_store %arg13[%c68, %c0_131], %179 {strides = array<i32>} : memref<104x512xf32, #tpu.memory_space<vmem>>, vector<2x512xf32>,
    %c0_132 = arith.constant 0 : index
    %c157 = arith.constant 157 : index
    %181 = vector.load %arg12[%c0_132, %c157] : memref<2x768xf32, #tpu.memory_space<vmem>>, vector<2x512xf32>
    %c35 = arith.constant 35 : index
    %c0_133 = arith.constant 0 : index
    %182 = vector.load %arg8[%c35, %c0_133] : memref<49x512xf32, #tpu.memory_space<vmem>>, vector<1x512xf32>
    %183 = vector.broadcast %182 : vector<1x512xf32> to vector<2x512xf32>
    %184 = arith.mulf %181, %183 : vector<2x512xf32>
    %c70 = arith.constant 70 : index
    %c0_134 = arith.constant 0 : index
    %185 = vector.load %arg13[%c70, %c0_134] : memref<104x512xf32, #tpu.memory_space<vmem>>, vector<2x512xf32>
    tpu.vector_store %arg13[%c70, %c0_134], %184 {strides = array<i32>} : memref<104x512xf32, #tpu.memory_space<vmem>>, vector<2x512xf32>,
    %c0_135 = arith.constant 0 : index
    %c158 = arith.constant 158 : index
    %186 = vector.load %arg12[%c0_135, %c158] : memref<2x768xf32, #tpu.memory_space<vmem>>, vector<2x512xf32>
    %c36_136 = arith.constant 36 : index
    %c0_137 = arith.constant 0 : index
    %187 = vector.load %arg8[%c36_136, %c0_137] : memref<49x512xf32, #tpu.memory_space<vmem>>, vector<1x512xf32>
    %188 = vector.broadcast %187 : vector<1x512xf32> to vector<2x512xf32>
    %189 = arith.mulf %186, %188 : vector<2x512xf32>
    %c72 = arith.constant 72 : index
    %c0_138 = arith.constant 0 : index
    %190 = vector.load %arg13[%c72, %c0_138] : memref<104x512xf32, #tpu.memory_space<vmem>>, vector<2x512xf32>
    tpu.vector_store %arg13[%c72, %c0_138], %189 {strides = array<i32>} : memref<104x512xf32, #tpu.memory_space<vmem>>, vector<2x512xf32>,
    %c0_139 = arith.constant 0 : index
    %c159 = arith.constant 159 : index
    %191 = vector.load %arg12[%c0_139, %c159] : memref<2x768xf32, #tpu.memory_space<vmem>>, vector<2x512xf32>
    %c37 = arith.constant 37 : index
    %c0_140 = arith.constant 0 : index
    %192 = vector.load %arg8[%c37, %c0_140] : memref<49x512xf32, #tpu.memory_space<vmem>>, vector<1x512xf32>
    %193 = vector.broadcast %192 : vector<1x512xf32> to vector<2x512xf32>
    %194 = arith.mulf %191, %193 : vector<2x512xf32>
    %c74 = arith.constant 74 : index
    %c0_141 = arith.constant 0 : index
    %195 = vector.load %arg13[%c74, %c0_141] : memref<104x512xf32, #tpu.memory_space<vmem>>, vector<2x512xf32>
    tpu.vector_store %arg13[%c74, %c0_141], %194 {strides = array<i32>} : memref<104x512xf32, #tpu.memory_space<vmem>>, vector<2x512xf32>,
    %c0_142 = arith.constant 0 : index
    %c160 = arith.constant 160 : index
    %196 = vector.load %arg12[%c0_142, %c160] : memref<2x768xf32, #tpu.memory_space<vmem>>, vector<2x512xf32>
    %c38_143 = arith.constant 38 : index
    %c0_144 = arith.constant 0 : index
    %197 = vector.load %arg8[%c38_143, %c0_144] : memref<49x512xf32, #tpu.memory_space<vmem>>, vector<1x512xf32>
    %198 = vector.broadcast %197 : vector<1x512xf32> to vector<2x512xf32>
    %199 = arith.mulf %196, %198 : vector<2x512xf32>
    %c76 = arith.constant 76 : index
    %c0_145 = arith.constant 0 : index
    %200 = vector.load %arg13[%c76, %c0_145] : memref<104x512xf32, #tpu.memory_space<vmem>>, vector<2x512xf32>
    tpu.vector_store %arg13[%c76, %c0_145], %199 {strides = array<i32>} : memref<104x512xf32, #tpu.memory_space<vmem>>, vector<2x512xf32>,
    %c0_146 = arith.constant 0 : index
    %c161 = arith.constant 161 : index
    %201 = vector.load %arg12[%c0_146, %c161] : memref<2x768xf32, #tpu.memory_space<vmem>>, vector<2x512xf32>
    %c39 = arith.constant 39 : index
    %c0_147 = arith.constant 0 : index
    %202 = vector.load %arg8[%c39, %c0_147] : memref<49x512xf32, #tpu.memory_space<vmem>>, vector<1x512xf32>
    %203 = vector.broadcast %202 : vector<1x512xf32> to vector<2x512xf32>
    %204 = arith.mulf %201, %203 : vector<2x512xf32>
    %c78_148 = arith.constant 78 : index
    %c0_149 = arith.constant 0 : index
    %205 = vector.load %arg13[%c78_148, %c0_149] : memref<104x512xf32, #tpu.memory_space<vmem>>, vector<2x512xf32>
    tpu.vector_store %arg13[%c78_148, %c0_149], %204 {strides = array<i32>} : memref<104x512xf32, #tpu.memory_space<vmem>>, vector<2x512xf32>,
    %c0_150 = arith.constant 0 : index
    %c162 = arith.constant 162 : index
    %206 = vector.load %arg12[%c0_150, %c162] : memref<2x768xf32, #tpu.memory_space<vmem>>, vector<2x512xf32>
    %c40_151 = arith.constant 40 : index
    %c0_152 = arith.constant 0 : index
    %207 = vector.load %arg8[%c40_151, %c0_152] : memref<49x512xf32, #tpu.memory_space<vmem>>, vector<1x512xf32>
    %208 = vector.broadcast %207 : vector<1x512xf32> to vector<2x512xf32>
    %209 = arith.mulf %206, %208 : vector<2x512xf32>
    %c80_153 = arith.constant 80 : index
    %c0_154 = arith.constant 0 : index
    %210 = vector.load %arg13[%c80_153, %c0_154] : memref<104x512xf32, #tpu.memory_space<vmem>>, vector<2x512xf32>
    tpu.vector_store %arg13[%c80_153, %c0_154], %209 {strides = array<i32>} : memref<104x512xf32, #tpu.memory_space<vmem>>, vector<2x512xf32>,
    %c0_155 = arith.constant 0 : index
    %c163 = arith.constant 163 : index
    %211 = vector.load %arg12[%c0_155, %c163] : memref<2x768xf32, #tpu.memory_space<vmem>>, vector<2x512xf32>
    %c41 = arith.constant 41 : index
    %c0_156 = arith.constant 0 : index
    %212 = vector.load %arg8[%c41, %c0_156] : memref<49x512xf32, #tpu.memory_space<vmem>>, vector<1x512xf32>
    %213 = vector.broadcast %212 : vector<1x512xf32> to vector<2x512xf32>
    %214 = arith.mulf %211, %213 : vector<2x512xf32>
    %c82_157 = arith.constant 82 : index
    %c0_158 = arith.constant 0 : index
    %215 = vector.load %arg13[%c82_157, %c0_158] : memref<104x512xf32, #tpu.memory_space<vmem>>, vector<2x512xf32>
    tpu.vector_store %arg13[%c82_157, %c0_158], %214 {strides = array<i32>} : memref<104x512xf32, #tpu.memory_space<vmem>>, vector<2x512xf32>,
    %c0_159 = arith.constant 0 : index
    %c173 = arith.constant 173 : index
    %216 = vector.load %arg12[%c0_159, %c173] : memref<2x768xf32, #tpu.memory_space<vmem>>, vector<2x512xf32>
    %c42_160 = arith.constant 42 : index
    %c0_161 = arith.constant 0 : index
    %217 = vector.load %arg8[%c42_160, %c0_161] : memref<49x512xf32, #tpu.memory_space<vmem>>, vector<1x512xf32>
    %218 = vector.broadcast %217 : vector<1x512xf32> to vector<2x512xf32>
    %219 = arith.mulf %216, %218 : vector<2x512xf32>
    %c84 = arith.constant 84 : index
    %c0_162 = arith.constant 0 : index
    %220 = vector.load %arg13[%c84, %c0_162] : memref<104x512xf32, #tpu.memory_space<vmem>>, vector<2x512xf32>
    tpu.vector_store %arg13[%c84, %c0_162], %219 {strides = array<i32>} : memref<104x512xf32, #tpu.memory_space<vmem>>, vector<2x512xf32>,
    %c0_163 = arith.constant 0 : index
    %c174 = arith.constant 174 : index
    %221 = vector.load %arg12[%c0_163, %c174] : memref<2x768xf32, #tpu.memory_space<vmem>>, vector<2x512xf32>
    %c43 = arith.constant 43 : index
    %c0_164 = arith.constant 0 : index
    %222 = vector.load %arg8[%c43, %c0_164] : memref<49x512xf32, #tpu.memory_space<vmem>>, vector<1x512xf32>
    %223 = vector.broadcast %222 : vector<1x512xf32> to vector<2x512xf32>
    %224 = arith.mulf %221, %223 : vector<2x512xf32>
    %c86 = arith.constant 86 : index
    %c0_165 = arith.constant 0 : index
    %225 = vector.load %arg13[%c86, %c0_165] : memref<104x512xf32, #tpu.memory_space<vmem>>, vector<2x512xf32>
    tpu.vector_store %arg13[%c86, %c0_165], %224 {strides = array<i32>} : memref<104x512xf32, #tpu.memory_space<vmem>>, vector<2x512xf32>,
    %c0_166 = arith.constant 0 : index
    %c175 = arith.constant 175 : index
    %226 = vector.load %arg12[%c0_166, %c175] : memref<2x768xf32, #tpu.memory_space<vmem>>, vector<2x512xf32>
    %c44_167 = arith.constant 44 : index
    %c0_168 = arith.constant 0 : index
    %227 = vector.load %arg8[%c44_167, %c0_168] : memref<49x512xf32, #tpu.memory_space<vmem>>, vector<1x512xf32>
    %228 = vector.broadcast %227 : vector<1x512xf32> to vector<2x512xf32>
    %229 = arith.mulf %226, %228 : vector<2x512xf32>
    %c88 = arith.constant 88 : index
    %c0_169 = arith.constant 0 : index
    %230 = vector.load %arg13[%c88, %c0_169] : memref<104x512xf32, #tpu.memory_space<vmem>>, vector<2x512xf32>
    tpu.vector_store %arg13[%c88, %c0_169], %229 {strides = array<i32>} : memref<104x512xf32, #tpu.memory_space<vmem>>, vector<2x512xf32>,
    %c0_170 = arith.constant 0 : index
    %c176 = arith.constant 176 : index
    %231 = vector.load %arg12[%c0_170, %c176] : memref<2x768xf32, #tpu.memory_space<vmem>>, vector<2x512xf32>
    %c45 = arith.constant 45 : index
    %c0_171 = arith.constant 0 : index
    %232 = vector.load %arg8[%c45, %c0_171] : memref<49x512xf32, #tpu.memory_space<vmem>>, vector<1x512xf32>
    %233 = vector.broadcast %232 : vector<1x512xf32> to vector<2x512xf32>
    %234 = arith.mulf %231, %233 : vector<2x512xf32>
    %c90 = arith.constant 90 : index
    %c0_172 = arith.constant 0 : index
    %235 = vector.load %arg13[%c90, %c0_172] : memref<104x512xf32, #tpu.memory_space<vmem>>, vector<2x512xf32>
    tpu.vector_store %arg13[%c90, %c0_172], %234 {strides = array<i32>} : memref<104x512xf32, #tpu.memory_space<vmem>>, vector<2x512xf32>,
    %c0_173 = arith.constant 0 : index
    %c177 = arith.constant 177 : index
    %236 = vector.load %arg12[%c0_173, %c177] : memref<2x768xf32, #tpu.memory_space<vmem>>, vector<2x512xf32>
    %c46_174 = arith.constant 46 : index
    %c0_175 = arith.constant 0 : index
    %237 = vector.load %arg8[%c46_174, %c0_175] : memref<49x512xf32, #tpu.memory_space<vmem>>, vector<1x512xf32>
    %238 = vector.broadcast %237 : vector<1x512xf32> to vector<2x512xf32>
    %239 = arith.mulf %236, %238 : vector<2x512xf32>
    %c92 = arith.constant 92 : index
    %c0_176 = arith.constant 0 : index
    %240 = vector.load %arg13[%c92, %c0_176] : memref<104x512xf32, #tpu.memory_space<vmem>>, vector<2x512xf32>
    tpu.vector_store %arg13[%c92, %c0_176], %239 {strides = array<i32>} : memref<104x512xf32, #tpu.memory_space<vmem>>, vector<2x512xf32>,
    %c0_177 = arith.constant 0 : index
    %c178 = arith.constant 178 : index
    %241 = vector.load %arg12[%c0_177, %c178] : memref<2x768xf32, #tpu.memory_space<vmem>>, vector<2x512xf32>
    %c47 = arith.constant 47 : index
    %c0_178 = arith.constant 0 : index
    %242 = vector.load %arg8[%c47, %c0_178] : memref<49x512xf32, #tpu.memory_space<vmem>>, vector<1x512xf32>
    %243 = vector.broadcast %242 : vector<1x512xf32> to vector<2x512xf32>
    %244 = arith.mulf %241, %243 : vector<2x512xf32>
    %c94_179 = arith.constant 94 : index
    %c0_180 = arith.constant 0 : index
    %245 = vector.load %arg13[%c94_179, %c0_180] : memref<104x512xf32, #tpu.memory_space<vmem>>, vector<2x512xf32>
    tpu.vector_store %arg13[%c94_179, %c0_180], %244 {strides = array<i32>} : memref<104x512xf32, #tpu.memory_space<vmem>>, vector<2x512xf32>,
    %c0_181 = arith.constant 0 : index
    %c179 = arith.constant 179 : index
    %246 = vector.load %arg12[%c0_181, %c179] : memref<2x768xf32, #tpu.memory_space<vmem>>, vector<2x512xf32>
    %c48_182 = arith.constant 48 : index
    %c0_183 = arith.constant 0 : index
    %247 = vector.load %arg8[%c48_182, %c0_183] : memref<49x512xf32, #tpu.memory_space<vmem>>, vector<1x512xf32>
    %248 = vector.broadcast %247 : vector<1x512xf32> to vector<2x512xf32>
    %249 = arith.mulf %246, %248 : vector<2x512xf32>
    %c96_184 = arith.constant 96 : index
    %c0_185 = arith.constant 0 : index
    %250 = vector.load %arg13[%c96_184, %c0_185] : memref<104x512xf32, #tpu.memory_space<vmem>>, vector<2x512xf32>
    tpu.vector_store %arg13[%c96_184, %c0_185], %249 {strides = array<i32>} : memref<104x512xf32, #tpu.memory_space<vmem>>, vector<2x512xf32>,
    %c0_186 = arith.constant 0 : index
    %c0_187 = arith.constant 0 : index
    %251 = vector.load %arg2[%c0_186, %c0_187] : memref<8x104xf32, #tpu.memory_space<vmem>>, vector<8x104xf32>
    %c0_188 = arith.constant 0 : index
    %c0_189 = arith.constant 0 : index
    %252 = vector.load %arg13[%c0_188, %c0_189] : memref<104x512xf32, #tpu.memory_space<vmem>>, vector<104x512xf32>
    %cst_190 = arith.constant dense<0.000000e+00> : vector<8x512xf32>
    %253 = tpu.matmul %251, %252, %cst_190 {dimension_numbers = #tpu.dot_dimension_numbers<[1], [0], [0], [1], [0, 0, 1, 1], [], []>} : vector<8x104xf32>, vector<104x512xf32>, vector<8x512xf32> -> vector<8x512xf32>
    %c0_191 = arith.constant 0 : index
    %c0_192 = arith.constant 0 : index
    %254 = vector.load %arg5[%c0_191, %c0_192] : memref<8x1xf32, #tpu.memory_space<vmem>>, vector<8x1xf32>
    %255 = vector.broadcast %254 : vector<8x1xf32> to vector<8x512xf32>
    %256 = arith.addf %253, %255 : vector<8x512xf32>
    %cst_193 = arith.constant 0.000000e+00 : f32
    %257 = vector.broadcast %cst_193 : f32 to vector<8x512xf32>
    %258 = arith.cmpf ogt, %256, %257 : vector<8x512xf32>
    %cst_194 = arith.constant 3.000000e-01 : f32
    %259 = vector.broadcast %cst_194 : f32 to vector<8x512xf32>
    %260 = arith.mulf %259, %256 : vector<8x512xf32>
    %261 = arith.select %258, %256, %260 : vector<8x512xi1>, vector<8x512xf32>
    %cst_195 = arith.constant 0.000000e+00 : f32
    %262 = vector.broadcast %cst_195 : f32 to vector<8x768xf32>
    %c0_196 = arith.constant 0 : index
    %c0_197 = arith.constant 0 : index
    %263 = vector.load %arg14[%c0_196, %c0_197] : memref<8x768xf32, #tpu.memory_space<vmem>>, vector<8x768xf32>
    tpu.vector_store %arg14[%c0_196, %c0_197], %262 {strides = array<i32>} : memref<8x768xf32, #tpu.memory_space<vmem>>, vector<8x768xf32>,
    %c0_198 = arith.constant 0 : index
    %c128_199 = arith.constant 128 : index
    %264 = vector.load %arg14[%c0_198, %c128_199] : memref<8x768xf32, #tpu.memory_space<vmem>>, vector<8x512xf32>
    tpu.vector_store %arg14[%c0_198, %c128_199], %261 {strides = array<i32>} : memref<8x768xf32, #tpu.memory_space<vmem>>, vector<8x512xf32>,
    %c0_200 = arith.constant 0 : index
    %c94_201 = arith.constant 94 : index
    %265 = vector.load %arg14[%c0_200, %c94_201] : memref<8x768xf32, #tpu.memory_space<vmem>>, vector<8x512xf32>
    %c0_202 = arith.constant 0 : index
    %c0_203 = arith.constant 0 : index
    %266 = vector.load %arg9[%c0_202, %c0_203] : memref<25x512xf32, #tpu.memory_space<vmem>>, vector<1x512xf32>
    %267 = vector.broadcast %266 : vector<1x512xf32> to vector<8x512xf32>
    %268 = arith.mulf %265, %267 : vector<8x512xf32>
    %c0_204 = arith.constant 0 : index
    %c0_205 = arith.constant 0 : index
    %269 = vector.load %arg15[%c0_204, %c0_205] : memref<200x512xf32, #tpu.memory_space<vmem>>, vector<8x512xf32>
    tpu.vector_store %arg15[%c0_204, %c0_205], %268 {strides = array<i32>} : memref<200x512xf32, #tpu.memory_space<vmem>>, vector<8x512xf32>,
    %c0_206 = arith.constant 0 : index
    %c95_207 = arith.constant 95 : index
    %270 = vector.load %arg14[%c0_206, %c95_207] : memref<8x768xf32, #tpu.memory_space<vmem>>, vector<8x512xf32>
    %c1_208 = arith.constant 1 : index
    %c0_209 = arith.constant 0 : index
    %271 = vector.load %arg9[%c1_208, %c0_209] : memref<25x512xf32, #tpu.memory_space<vmem>>, vector<1x512xf32>
    %272 = vector.broadcast %271 : vector<1x512xf32> to vector<8x512xf32>
    %273 = arith.mulf %270, %272 : vector<8x512xf32>
    %c8_210 = arith.constant 8 : index
    %c0_211 = arith.constant 0 : index
    %274 = vector.load %arg15[%c8_210, %c0_211] : memref<200x512xf32, #tpu.memory_space<vmem>>, vector<8x512xf32>
    tpu.vector_store %arg15[%c8_210, %c0_211], %273 {strides = array<i32>} : memref<200x512xf32, #tpu.memory_space<vmem>>, vector<8x512xf32>,
    %c0_212 = arith.constant 0 : index
    %c96_213 = arith.constant 96 : index
    %275 = vector.load %arg14[%c0_212, %c96_213] : memref<8x768xf32, #tpu.memory_space<vmem>>, vector<8x512xf32>
    %c2_214 = arith.constant 2 : index
    %c0_215 = arith.constant 0 : index
    %276 = vector.load %arg9[%c2_214, %c0_215] : memref<25x512xf32, #tpu.memory_space<vmem>>, vector<1x512xf32>
    %277 = vector.broadcast %276 : vector<1x512xf32> to vector<8x512xf32>
    %278 = arith.mulf %275, %277 : vector<8x512xf32>
    %c16_216 = arith.constant 16 : index
    %c0_217 = arith.constant 0 : index
    %279 = vector.load %arg15[%c16_216, %c0_217] : memref<200x512xf32, #tpu.memory_space<vmem>>, vector<8x512xf32>
    tpu.vector_store %arg15[%c16_216, %c0_217], %278 {strides = array<i32>} : memref<200x512xf32, #tpu.memory_space<vmem>>, vector<8x512xf32>,
    %c0_218 = arith.constant 0 : index
    %c97_219 = arith.constant 97 : index
    %280 = vector.load %arg14[%c0_218, %c97_219] : memref<8x768xf32, #tpu.memory_space<vmem>>, vector<8x512xf32>
    %c3_220 = arith.constant 3 : index
    %c0_221 = arith.constant 0 : index
    %281 = vector.load %arg9[%c3_220, %c0_221] : memref<25x512xf32, #tpu.memory_space<vmem>>, vector<1x512xf32>
    %282 = vector.broadcast %281 : vector<1x512xf32> to vector<8x512xf32>
    %283 = arith.mulf %280, %282 : vector<8x512xf32>
    %c24_222 = arith.constant 24 : index
    %c0_223 = arith.constant 0 : index
    %284 = vector.load %arg15[%c24_222, %c0_223] : memref<200x512xf32, #tpu.memory_space<vmem>>, vector<8x512xf32>
    tpu.vector_store %arg15[%c24_222, %c0_223], %283 {strides = array<i32>} : memref<200x512xf32, #tpu.memory_space<vmem>>, vector<8x512xf32>,
    %c0_224 = arith.constant 0 : index
    %c98_225 = arith.constant 98 : index
    %285 = vector.load %arg14[%c0_224, %c98_225] : memref<8x768xf32, #tpu.memory_space<vmem>>, vector<8x512xf32>
    %c4_226 = arith.constant 4 : index
    %c0_227 = arith.constant 0 : index
    %286 = vector.load %arg9[%c4_226, %c0_227] : memref<25x512xf32, #tpu.memory_space<vmem>>, vector<1x512xf32>
    %287 = vector.broadcast %286 : vector<1x512xf32> to vector<8x512xf32>
    %288 = arith.mulf %285, %287 : vector<8x512xf32>
    %c32_228 = arith.constant 32 : index
    %c0_229 = arith.constant 0 : index
    %289 = vector.load %arg15[%c32_228, %c0_229] : memref<200x512xf32, #tpu.memory_space<vmem>>, vector<8x512xf32>
    tpu.vector_store %arg15[%c32_228, %c0_229], %288 {strides = array<i32>} : memref<200x512xf32, #tpu.memory_space<vmem>>, vector<8x512xf32>,
    %c0_230 = arith.constant 0 : index
    %c110_231 = arith.constant 110 : index
    %290 = vector.load %arg14[%c0_230, %c110_231] : memref<8x768xf32, #tpu.memory_space<vmem>>, vector<8x512xf32>
    %c5_232 = arith.constant 5 : index
    %c0_233 = arith.constant 0 : index
    %291 = vector.load %arg9[%c5_232, %c0_233] : memref<25x512xf32, #tpu.memory_space<vmem>>, vector<1x512xf32>
    %292 = vector.broadcast %291 : vector<1x512xf32> to vector<8x512xf32>
    %293 = arith.mulf %290, %292 : vector<8x512xf32>
    %c40_234 = arith.constant 40 : index
    %c0_235 = arith.constant 0 : index
    %294 = vector.load %arg15[%c40_234, %c0_235] : memref<200x512xf32, #tpu.memory_space<vmem>>, vector<8x512xf32>
    tpu.vector_store %arg15[%c40_234, %c0_235], %293 {strides = array<i32>} : memref<200x512xf32, #tpu.memory_space<vmem>>, vector<8x512xf32>,
    %c0_236 = arith.constant 0 : index
    %c111_237 = arith.constant 111 : index
    %295 = vector.load %arg14[%c0_236, %c111_237] : memref<8x768xf32, #tpu.memory_space<vmem>>, vector<8x512xf32>
    %c6_238 = arith.constant 6 : index
    %c0_239 = arith.constant 0 : index
    %296 = vector.load %arg9[%c6_238, %c0_239] : memref<25x512xf32, #tpu.memory_space<vmem>>, vector<1x512xf32>
    %297 = vector.broadcast %296 : vector<1x512xf32> to vector<8x512xf32>
    %298 = arith.mulf %295, %297 : vector<8x512xf32>
    %c48_240 = arith.constant 48 : index
    %c0_241 = arith.constant 0 : index
    %299 = vector.load %arg15[%c48_240, %c0_241] : memref<200x512xf32, #tpu.memory_space<vmem>>, vector<8x512xf32>
    tpu.vector_store %arg15[%c48_240, %c0_241], %298 {strides = array<i32>} : memref<200x512xf32, #tpu.memory_space<vmem>>, vector<8x512xf32>,
    %c0_242 = arith.constant 0 : index
    %c112_243 = arith.constant 112 : index
    %300 = vector.load %arg14[%c0_242, %c112_243] : memref<8x768xf32, #tpu.memory_space<vmem>>, vector<8x512xf32>
    %c7_244 = arith.constant 7 : index
    %c0_245 = arith.constant 0 : index
    %301 = vector.load %arg9[%c7_244, %c0_245] : memref<25x512xf32, #tpu.memory_space<vmem>>, vector<1x512xf32>
    %302 = vector.broadcast %301 : vector<1x512xf32> to vector<8x512xf32>
    %303 = arith.mulf %300, %302 : vector<8x512xf32>
    %c56_246 = arith.constant 56 : index
    %c0_247 = arith.constant 0 : index
    %304 = vector.load %arg15[%c56_246, %c0_247] : memref<200x512xf32, #tpu.memory_space<vmem>>, vector<8x512xf32>
    tpu.vector_store %arg15[%c56_246, %c0_247], %303 {strides = array<i32>} : memref<200x512xf32, #tpu.memory_space<vmem>>, vector<8x512xf32>,
    %c0_248 = arith.constant 0 : index
    %c113_249 = arith.constant 113 : index
    %305 = vector.load %arg14[%c0_248, %c113_249] : memref<8x768xf32, #tpu.memory_space<vmem>>, vector<8x512xf32>
    %c8_250 = arith.constant 8 : index
    %c0_251 = arith.constant 0 : index
    %306 = vector.load %arg9[%c8_250, %c0_251] : memref<25x512xf32, #tpu.memory_space<vmem>>, vector<1x512xf32>
    %307 = vector.broadcast %306 : vector<1x512xf32> to vector<8x512xf32>
    %308 = arith.mulf %305, %307 : vector<8x512xf32>
    %c64_252 = arith.constant 64 : index
    %c0_253 = arith.constant 0 : index
    %309 = vector.load %arg15[%c64_252, %c0_253] : memref<200x512xf32, #tpu.memory_space<vmem>>, vector<8x512xf32>
    tpu.vector_store %arg15[%c64_252, %c0_253], %308 {strides = array<i32>} : memref<200x512xf32, #tpu.memory_space<vmem>>, vector<8x512xf32>,
    %c0_254 = arith.constant 0 : index
    %c114_255 = arith.constant 114 : index
    %310 = vector.load %arg14[%c0_254, %c114_255] : memref<8x768xf32, #tpu.memory_space<vmem>>, vector<8x512xf32>
    %c9_256 = arith.constant 9 : index
    %c0_257 = arith.constant 0 : index
    %311 = vector.load %arg9[%c9_256, %c0_257] : memref<25x512xf32, #tpu.memory_space<vmem>>, vector<1x512xf32>
    %312 = vector.broadcast %311 : vector<1x512xf32> to vector<8x512xf32>
    %313 = arith.mulf %310, %312 : vector<8x512xf32>
    %c72_258 = arith.constant 72 : index
    %c0_259 = arith.constant 0 : index
    %314 = vector.load %arg15[%c72_258, %c0_259] : memref<200x512xf32, #tpu.memory_space<vmem>>, vector<8x512xf32>
    tpu.vector_store %arg15[%c72_258, %c0_259], %313 {strides = array<i32>} : memref<200x512xf32, #tpu.memory_space<vmem>>, vector<8x512xf32>,
    %c0_260 = arith.constant 0 : index
    %c126_261 = arith.constant 126 : index
    %315 = vector.load %arg14[%c0_260, %c126_261] : memref<8x768xf32, #tpu.memory_space<vmem>>, vector<8x512xf32>
    %c10_262 = arith.constant 10 : index
    %c0_263 = arith.constant 0 : index
    %316 = vector.load %arg9[%c10_262, %c0_263] : memref<25x512xf32, #tpu.memory_space<vmem>>, vector<1x512xf32>
    %317 = vector.broadcast %316 : vector<1x512xf32> to vector<8x512xf32>
    %318 = arith.mulf %315, %317 : vector<8x512xf32>
    %c80_264 = arith.constant 80 : index
    %c0_265 = arith.constant 0 : index
    %319 = vector.load %arg15[%c80_264, %c0_265] : memref<200x512xf32, #tpu.memory_space<vmem>>, vector<8x512xf32>
    tpu.vector_store %arg15[%c80_264, %c0_265], %318 {strides = array<i32>} : memref<200x512xf32, #tpu.memory_space<vmem>>, vector<8x512xf32>,
    %c0_266 = arith.constant 0 : index
    %c127_267 = arith.constant 127 : index
    %320 = vector.load %arg14[%c0_266, %c127_267] : memref<8x768xf32, #tpu.memory_space<vmem>>, vector<8x512xf32>
    %c11_268 = arith.constant 11 : index
    %c0_269 = arith.constant 0 : index
    %321 = vector.load %arg9[%c11_268, %c0_269] : memref<25x512xf32, #tpu.memory_space<vmem>>, vector<1x512xf32>
    %322 = vector.broadcast %321 : vector<1x512xf32> to vector<8x512xf32>
    %323 = arith.mulf %320, %322 : vector<8x512xf32>
    %c88_270 = arith.constant 88 : index
    %c0_271 = arith.constant 0 : index
    %324 = vector.load %arg15[%c88_270, %c0_271] : memref<200x512xf32, #tpu.memory_space<vmem>>, vector<8x512xf32>
    tpu.vector_store %arg15[%c88_270, %c0_271], %323 {strides = array<i32>} : memref<200x512xf32, #tpu.memory_space<vmem>>, vector<8x512xf32>,
    %c0_272 = arith.constant 0 : index
    %c128_273 = arith.constant 128 : index
    %325 = vector.load %arg14[%c0_272, %c128_273] : memref<8x768xf32, #tpu.memory_space<vmem>>, vector<8x512xf32>
    %c12_274 = arith.constant 12 : index
    %c0_275 = arith.constant 0 : index
    %326 = vector.load %arg9[%c12_274, %c0_275] : memref<25x512xf32, #tpu.memory_space<vmem>>, vector<1x512xf32>
    %327 = vector.broadcast %326 : vector<1x512xf32> to vector<8x512xf32>
    %328 = arith.mulf %325, %327 : vector<8x512xf32>
    %c96_276 = arith.constant 96 : index
    %c0_277 = arith.constant 0 : index
    %329 = vector.load %arg15[%c96_276, %c0_277] : memref<200x512xf32, #tpu.memory_space<vmem>>, vector<8x512xf32>
    tpu.vector_store %arg15[%c96_276, %c0_277], %328 {strides = array<i32>} : memref<200x512xf32, #tpu.memory_space<vmem>>, vector<8x512xf32>,
    %c0_278 = arith.constant 0 : index
    %c129_279 = arith.constant 129 : index
    %330 = vector.load %arg14[%c0_278, %c129_279] : memref<8x768xf32, #tpu.memory_space<vmem>>, vector<8x512xf32>
    %c13_280 = arith.constant 13 : index
    %c0_281 = arith.constant 0 : index
    %331 = vector.load %arg9[%c13_280, %c0_281] : memref<25x512xf32, #tpu.memory_space<vmem>>, vector<1x512xf32>
    %332 = vector.broadcast %331 : vector<1x512xf32> to vector<8x512xf32>
    %333 = arith.mulf %330, %332 : vector<8x512xf32>
    %c104 = arith.constant 104 : index
    %c0_282 = arith.constant 0 : index
    %334 = vector.load %arg15[%c104, %c0_282] : memref<200x512xf32, #tpu.memory_space<vmem>>, vector<8x512xf32>
    tpu.vector_store %arg15[%c104, %c0_282], %333 {strides = array<i32>} : memref<200x512xf32, #tpu.memory_space<vmem>>, vector<8x512xf32>,
    %c0_283 = arith.constant 0 : index
    %c130_284 = arith.constant 130 : index
    %335 = vector.load %arg14[%c0_283, %c130_284] : memref<8x768xf32, #tpu.memory_space<vmem>>, vector<8x512xf32>
    %c14_285 = arith.constant 14 : index
    %c0_286 = arith.constant 0 : index
    %336 = vector.load %arg9[%c14_285, %c0_286] : memref<25x512xf32, #tpu.memory_space<vmem>>, vector<1x512xf32>
    %337 = vector.broadcast %336 : vector<1x512xf32> to vector<8x512xf32>
    %338 = arith.mulf %335, %337 : vector<8x512xf32>
    %c112_287 = arith.constant 112 : index
    %c0_288 = arith.constant 0 : index
    %339 = vector.load %arg15[%c112_287, %c0_288] : memref<200x512xf32, #tpu.memory_space<vmem>>, vector<8x512xf32>
    tpu.vector_store %arg15[%c112_287, %c0_288], %338 {strides = array<i32>} : memref<200x512xf32, #tpu.memory_space<vmem>>, vector<8x512xf32>,
    %c0_289 = arith.constant 0 : index
    %c142_290 = arith.constant 142 : index
    %340 = vector.load %arg14[%c0_289, %c142_290] : memref<8x768xf32, #tpu.memory_space<vmem>>, vector<8x512xf32>
    %c15_291 = arith.constant 15 : index
    %c0_292 = arith.constant 0 : index
    %341 = vector.load %arg9[%c15_291, %c0_292] : memref<25x512xf32, #tpu.memory_space<vmem>>, vector<1x512xf32>
    %342 = vector.broadcast %341 : vector<1x512xf32> to vector<8x512xf32>
    %343 = arith.mulf %340, %342 : vector<8x512xf32>
    %c120 = arith.constant 120 : index
    %c0_293 = arith.constant 0 : index
    %344 = vector.load %arg15[%c120, %c0_293] : memref<200x512xf32, #tpu.memory_space<vmem>>, vector<8x512xf32>
    tpu.vector_store %arg15[%c120, %c0_293], %343 {strides = array<i32>} : memref<200x512xf32, #tpu.memory_space<vmem>>, vector<8x512xf32>,
    %c0_294 = arith.constant 0 : index
    %c143_295 = arith.constant 143 : index
    %345 = vector.load %arg14[%c0_294, %c143_295] : memref<8x768xf32, #tpu.memory_space<vmem>>, vector<8x512xf32>
    %c16_296 = arith.constant 16 : index
    %c0_297 = arith.constant 0 : index
    %346 = vector.load %arg9[%c16_296, %c0_297] : memref<25x512xf32, #tpu.memory_space<vmem>>, vector<1x512xf32>
    %347 = vector.broadcast %346 : vector<1x512xf32> to vector<8x512xf32>
    %348 = arith.mulf %345, %347 : vector<8x512xf32>
    %c128_298 = arith.constant 128 : index
    %c0_299 = arith.constant 0 : index
    %349 = vector.load %arg15[%c128_298, %c0_299] : memref<200x512xf32, #tpu.memory_space<vmem>>, vector<8x512xf32>
    tpu.vector_store %arg15[%c128_298, %c0_299], %348 {strides = array<i32>} : memref<200x512xf32, #tpu.memory_space<vmem>>, vector<8x512xf32>,
    %c0_300 = arith.constant 0 : index
    %c144_301 = arith.constant 144 : index
    %350 = vector.load %arg14[%c0_300, %c144_301] : memref<8x768xf32, #tpu.memory_space<vmem>>, vector<8x512xf32>
    %c17_302 = arith.constant 17 : index
    %c0_303 = arith.constant 0 : index
    %351 = vector.load %arg9[%c17_302, %c0_303] : memref<25x512xf32, #tpu.memory_space<vmem>>, vector<1x512xf32>
    %352 = vector.broadcast %351 : vector<1x512xf32> to vector<8x512xf32>
    %353 = arith.mulf %350, %352 : vector<8x512xf32>
    %c136 = arith.constant 136 : index
    %c0_304 = arith.constant 0 : index
    %354 = vector.load %arg15[%c136, %c0_304] : memref<200x512xf32, #tpu.memory_space<vmem>>, vector<8x512xf32>
    tpu.vector_store %arg15[%c136, %c0_304], %353 {strides = array<i32>} : memref<200x512xf32, #tpu.memory_space<vmem>>, vector<8x512xf32>,
    %c0_305 = arith.constant 0 : index
    %c145_306 = arith.constant 145 : index
    %355 = vector.load %arg14[%c0_305, %c145_306] : memref<8x768xf32, #tpu.memory_space<vmem>>, vector<8x512xf32>
    %c18_307 = arith.constant 18 : index
    %c0_308 = arith.constant 0 : index
    %356 = vector.load %arg9[%c18_307, %c0_308] : memref<25x512xf32, #tpu.memory_space<vmem>>, vector<1x512xf32>
    %357 = vector.broadcast %356 : vector<1x512xf32> to vector<8x512xf32>
    %358 = arith.mulf %355, %357 : vector<8x512xf32>
    %c144_309 = arith.constant 144 : index
    %c0_310 = arith.constant 0 : index
    %359 = vector.load %arg15[%c144_309, %c0_310] : memref<200x512xf32, #tpu.memory_space<vmem>>, vector<8x512xf32>
    tpu.vector_store %arg15[%c144_309, %c0_310], %358 {strides = array<i32>} : memref<200x512xf32, #tpu.memory_space<vmem>>, vector<8x512xf32>,
    %c0_311 = arith.constant 0 : index
    %c146_312 = arith.constant 146 : index
    %360 = vector.load %arg14[%c0_311, %c146_312] : memref<8x768xf32, #tpu.memory_space<vmem>>, vector<8x512xf32>
    %c19_313 = arith.constant 19 : index
    %c0_314 = arith.constant 0 : index
    %361 = vector.load %arg9[%c19_313, %c0_314] : memref<25x512xf32, #tpu.memory_space<vmem>>, vector<1x512xf32>
    %362 = vector.broadcast %361 : vector<1x512xf32> to vector<8x512xf32>
    %363 = arith.mulf %360, %362 : vector<8x512xf32>
    %c152 = arith.constant 152 : index
    %c0_315 = arith.constant 0 : index
    %364 = vector.load %arg15[%c152, %c0_315] : memref<200x512xf32, #tpu.memory_space<vmem>>, vector<8x512xf32>
    tpu.vector_store %arg15[%c152, %c0_315], %363 {strides = array<i32>} : memref<200x512xf32, #tpu.memory_space<vmem>>, vector<8x512xf32>,
    %c0_316 = arith.constant 0 : index
    %c158_317 = arith.constant 158 : index
    %365 = vector.load %arg14[%c0_316, %c158_317] : memref<8x768xf32, #tpu.memory_space<vmem>>, vector<8x512xf32>
    %c20_318 = arith.constant 20 : index
    %c0_319 = arith.constant 0 : index
    %366 = vector.load %arg9[%c20_318, %c0_319] : memref<25x512xf32, #tpu.memory_space<vmem>>, vector<1x512xf32>
    %367 = vector.broadcast %366 : vector<1x512xf32> to vector<8x512xf32>
    %368 = arith.mulf %365, %367 : vector<8x512xf32>
    %c160_320 = arith.constant 160 : index
    %c0_321 = arith.constant 0 : index
    %369 = vector.load %arg15[%c160_320, %c0_321] : memref<200x512xf32, #tpu.memory_space<vmem>>, vector<8x512xf32>
    tpu.vector_store %arg15[%c160_320, %c0_321], %368 {strides = array<i32>} : memref<200x512xf32, #tpu.memory_space<vmem>>, vector<8x512xf32>,
    %c0_322 = arith.constant 0 : index
    %c159_323 = arith.constant 159 : index
    %370 = vector.load %arg14[%c0_322, %c159_323] : memref<8x768xf32, #tpu.memory_space<vmem>>, vector<8x512xf32>
    %c21_324 = arith.constant 21 : index
    %c0_325 = arith.constant 0 : index
    %371 = vector.load %arg9[%c21_324, %c0_325] : memref<25x512xf32, #tpu.memory_space<vmem>>, vector<1x512xf32>
    %372 = vector.broadcast %371 : vector<1x512xf32> to vector<8x512xf32>
    %373 = arith.mulf %370, %372 : vector<8x512xf32>
    %c168 = arith.constant 168 : index
    %c0_326 = arith.constant 0 : index
    %374 = vector.load %arg15[%c168, %c0_326] : memref<200x512xf32, #tpu.memory_space<vmem>>, vector<8x512xf32>
    tpu.vector_store %arg15[%c168, %c0_326], %373 {strides = array<i32>} : memref<200x512xf32, #tpu.memory_space<vmem>>, vector<8x512xf32>,
    %c0_327 = arith.constant 0 : index
    %c160_328 = arith.constant 160 : index
    %375 = vector.load %arg14[%c0_327, %c160_328] : memref<8x768xf32, #tpu.memory_space<vmem>>, vector<8x512xf32>
    %c22_329 = arith.constant 22 : index
    %c0_330 = arith.constant 0 : index
    %376 = vector.load %arg9[%c22_329, %c0_330] : memref<25x512xf32, #tpu.memory_space<vmem>>, vector<1x512xf32>
    %377 = vector.broadcast %376 : vector<1x512xf32> to vector<8x512xf32>
    %378 = arith.mulf %375, %377 : vector<8x512xf32>
    %c176_331 = arith.constant 176 : index
    %c0_332 = arith.constant 0 : index
    %379 = vector.load %arg15[%c176_331, %c0_332] : memref<200x512xf32, #tpu.memory_space<vmem>>, vector<8x512xf32>
    tpu.vector_store %arg15[%c176_331, %c0_332], %378 {strides = array<i32>} : memref<200x512xf32, #tpu.memory_space<vmem>>, vector<8x512xf32>,
    %c0_333 = arith.constant 0 : index
    %c161_334 = arith.constant 161 : index
    %380 = vector.load %arg14[%c0_333, %c161_334] : memref<8x768xf32, #tpu.memory_space<vmem>>, vector<8x512xf32>
    %c23_335 = arith.constant 23 : index
    %c0_336 = arith.constant 0 : index
    %381 = vector.load %arg9[%c23_335, %c0_336] : memref<25x512xf32, #tpu.memory_space<vmem>>, vector<1x512xf32>
    %382 = vector.broadcast %381 : vector<1x512xf32> to vector<8x512xf32>
    %383 = arith.mulf %380, %382 : vector<8x512xf32>
    %c184 = arith.constant 184 : index
    %c0_337 = arith.constant 0 : index
    %384 = vector.load %arg15[%c184, %c0_337] : memref<200x512xf32, #tpu.memory_space<vmem>>, vector<8x512xf32>
    tpu.vector_store %arg15[%c184, %c0_337], %383 {strides = array<i32>} : memref<200x512xf32, #tpu.memory_space<vmem>>, vector<8x512xf32>,
    %c0_338 = arith.constant 0 : index
    %c162_339 = arith.constant 162 : index
    %385 = vector.load %arg14[%c0_338, %c162_339] : memref<8x768xf32, #tpu.memory_space<vmem>>, vector<8x512xf32>
    %c24_340 = arith.constant 24 : index
    %c0_341 = arith.constant 0 : index
    %386 = vector.load %arg9[%c24_340, %c0_341] : memref<25x512xf32, #tpu.memory_space<vmem>>, vector<1x512xf32>
    %387 = vector.broadcast %386 : vector<1x512xf32> to vector<8x512xf32>
    %388 = arith.mulf %385, %387 : vector<8x512xf32>
    %c192 = arith.constant 192 : index
    %c0_342 = arith.constant 0 : index
    %389 = vector.load %arg15[%c192, %c0_342] : memref<200x512xf32, #tpu.memory_space<vmem>>, vector<8x512xf32>
    tpu.vector_store %arg15[%c192, %c0_342], %388 {strides = array<i32>} : memref<200x512xf32, #tpu.memory_space<vmem>>, vector<8x512xf32>,
    %c0_343 = arith.constant 0 : index
    %c0_344 = arith.constant 0 : index
    %390 = vector.load %arg3[%c0_343, %c0_344] : memref<16x200xf32, #tpu.memory_space<vmem>>, vector<16x200xf32>
    %c0_345 = arith.constant 0 : index
    %c0_346 = arith.constant 0 : index
    %391 = vector.load %arg15[%c0_345, %c0_346] : memref<200x512xf32, #tpu.memory_space<vmem>>, vector<200x512xf32>
    %cst_347 = arith.constant dense<0.000000e+00> : vector<16x512xf32>
    %392 = tpu.matmul %390, %391, %cst_347 {dimension_numbers = #tpu.dot_dimension_numbers<[1], [0], [0], [1], [0, 0, 1, 1], [], []>} : vector<16x200xf32>, vector<200x512xf32>, vector<16x512xf32> -> vector<16x512xf32>
    %c0_348 = arith.constant 0 : index
    %c0_349 = arith.constant 0 : index
    %393 = vector.load %arg6[%c0_348, %c0_349] : memref<16x1xf32, #tpu.memory_space<vmem>>, vector<16x1xf32>
    %394 = vector.broadcast %393 : vector<16x1xf32> to vector<16x512xf32>
    %395 = arith.addf %392, %394 : vector<16x512xf32>
    %cst_350 = arith.constant 0.000000e+00 : f32
    %396 = vector.broadcast %cst_350 : f32 to vector<16x512xf32>
    %397 = arith.cmpf ogt, %395, %396 : vector<16x512xf32>
    %cst_351 = arith.constant 3.000000e-01 : f32
    %398 = vector.broadcast %cst_351 : f32 to vector<16x512xf32>
    %399 = arith.mulf %398, %395 : vector<16x512xf32>
    %400 = arith.select %397, %395, %399 : vector<16x512xi1>, vector<16x512xf32>
    %cst_352 = arith.constant 0.000000e+00 : f32
    %401 = vector.broadcast %cst_352 : f32 to vector<16x768xf32>
    %c0_353 = arith.constant 0 : index
    %c0_354 = arith.constant 0 : index
    %402 = vector.load %arg16[%c0_353, %c0_354] : memref<16x768xf32, #tpu.memory_space<vmem>>, vector<16x768xf32>
    tpu.vector_store %arg16[%c0_353, %c0_354], %401 {strides = array<i32>} : memref<16x768xf32, #tpu.memory_space<vmem>>, vector<16x768xf32>,
    %c0_355 = arith.constant 0 : index
    %c128_356 = arith.constant 128 : index
    %403 = vector.load %arg16[%c0_355, %c128_356] : memref<16x768xf32, #tpu.memory_space<vmem>>, vector<16x512xf32>
    tpu.vector_store %arg16[%c0_355, %c128_356], %400 {strides = array<i32>} : memref<16x768xf32, #tpu.memory_space<vmem>>, vector<16x512xf32>,
    %c0_357 = arith.constant 0 : index
    %c111_358 = arith.constant 111 : index
    %404 = vector.load %arg16[%c0_357, %c111_358] : memref<16x768xf32, #tpu.memory_space<vmem>>, vector<16x512xf32>
    %c0_359 = arith.constant 0 : index
    %c0_360 = arith.constant 0 : index
    %405 = vector.load %arg10[%c0_359, %c0_360] : memref<9x512xf32, #tpu.memory_space<vmem>>, vector<1x512xf32>
    %406 = vector.broadcast %405 : vector<1x512xf32> to vector<16x512xf32>
    %407 = arith.mulf %404, %406 : vector<16x512xf32>
    %c0_361 = arith.constant 0 : index
    %c0_362 = arith.constant 0 : index
    %408 = vector.load %arg17[%c0_361, %c0_362] : memref<144x512xf32, #tpu.memory_space<vmem>>, vector<16x512xf32>
    tpu.vector_store %arg17[%c0_361, %c0_362], %407 {strides = array<i32>} : memref<144x512xf32, #tpu.memory_space<vmem>>, vector<16x512xf32>,
    %c0_363 = arith.constant 0 : index
    %c112_364 = arith.constant 112 : index
    %409 = vector.load %arg16[%c0_363, %c112_364] : memref<16x768xf32, #tpu.memory_space<vmem>>, vector<16x512xf32>
    %c1_365 = arith.constant 1 : index
    %c0_366 = arith.constant 0 : index
    %410 = vector.load %arg10[%c1_365, %c0_366] : memref<9x512xf32, #tpu.memory_space<vmem>>, vector<1x512xf32>
    %411 = vector.broadcast %410 : vector<1x512xf32> to vector<16x512xf32>
    %412 = arith.mulf %409, %411 : vector<16x512xf32>
    %c16_367 = arith.constant 16 : index
    %c0_368 = arith.constant 0 : index
    %413 = vector.load %arg17[%c16_367, %c0_368] : memref<144x512xf32, #tpu.memory_space<vmem>>, vector<16x512xf32>
    tpu.vector_store %arg17[%c16_367, %c0_368], %412 {strides = array<i32>} : memref<144x512xf32, #tpu.memory_space<vmem>>, vector<16x512xf32>,
    %c0_369 = arith.constant 0 : index
    %c113_370 = arith.constant 113 : index
    %414 = vector.load %arg16[%c0_369, %c113_370] : memref<16x768xf32, #tpu.memory_space<vmem>>, vector<16x512xf32>
    %c2_371 = arith.constant 2 : index
    %c0_372 = arith.constant 0 : index
    %415 = vector.load %arg10[%c2_371, %c0_372] : memref<9x512xf32, #tpu.memory_space<vmem>>, vector<1x512xf32>
    %416 = vector.broadcast %415 : vector<1x512xf32> to vector<16x512xf32>
    %417 = arith.mulf %414, %416 : vector<16x512xf32>
    %c32_373 = arith.constant 32 : index
    %c0_374 = arith.constant 0 : index
    %418 = vector.load %arg17[%c32_373, %c0_374] : memref<144x512xf32, #tpu.memory_space<vmem>>, vector<16x512xf32>
    tpu.vector_store %arg17[%c32_373, %c0_374], %417 {strides = array<i32>} : memref<144x512xf32, #tpu.memory_space<vmem>>, vector<16x512xf32>,
    %c0_375 = arith.constant 0 : index
    %c127_376 = arith.constant 127 : index
    %419 = vector.load %arg16[%c0_375, %c127_376] : memref<16x768xf32, #tpu.memory_space<vmem>>, vector<16x512xf32>
    %c3_377 = arith.constant 3 : index
    %c0_378 = arith.constant 0 : index
    %420 = vector.load %arg10[%c3_377, %c0_378] : memref<9x512xf32, #tpu.memory_space<vmem>>, vector<1x512xf32>
    %421 = vector.broadcast %420 : vector<1x512xf32> to vector<16x512xf32>
    %422 = arith.mulf %419, %421 : vector<16x512xf32>
    %c48_379 = arith.constant 48 : index
    %c0_380 = arith.constant 0 : index
    %423 = vector.load %arg17[%c48_379, %c0_380] : memref<144x512xf32, #tpu.memory_space<vmem>>, vector<16x512xf32>
    tpu.vector_store %arg17[%c48_379, %c0_380], %422 {strides = array<i32>} : memref<144x512xf32, #tpu.memory_space<vmem>>, vector<16x512xf32>,
    %c0_381 = arith.constant 0 : index
    %c128_382 = arith.constant 128 : index
    %424 = vector.load %arg16[%c0_381, %c128_382] : memref<16x768xf32, #tpu.memory_space<vmem>>, vector<16x512xf32>
    %c4_383 = arith.constant 4 : index
    %c0_384 = arith.constant 0 : index
    %425 = vector.load %arg10[%c4_383, %c0_384] : memref<9x512xf32, #tpu.memory_space<vmem>>, vector<1x512xf32>
    %426 = vector.broadcast %425 : vector<1x512xf32> to vector<16x512xf32>
    %427 = arith.mulf %424, %426 : vector<16x512xf32>
    %c64_385 = arith.constant 64 : index
    %c0_386 = arith.constant 0 : index
    %428 = vector.load %arg17[%c64_385, %c0_386] : memref<144x512xf32, #tpu.memory_space<vmem>>, vector<16x512xf32>
    tpu.vector_store %arg17[%c64_385, %c0_386], %427 {strides = array<i32>} : memref<144x512xf32, #tpu.memory_space<vmem>>, vector<16x512xf32>,
    %c0_387 = arith.constant 0 : index
    %c129_388 = arith.constant 129 : index
    %429 = vector.load %arg16[%c0_387, %c129_388] : memref<16x768xf32, #tpu.memory_space<vmem>>, vector<16x512xf32>
    %c5_389 = arith.constant 5 : index
    %c0_390 = arith.constant 0 : index
    %430 = vector.load %arg10[%c5_389, %c0_390] : memref<9x512xf32, #tpu.memory_space<vmem>>, vector<1x512xf32>
    %431 = vector.broadcast %430 : vector<1x512xf32> to vector<16x512xf32>
    %432 = arith.mulf %429, %431 : vector<16x512xf32>
    %c80_391 = arith.constant 80 : index
    %c0_392 = arith.constant 0 : index
    %433 = vector.load %arg17[%c80_391, %c0_392] : memref<144x512xf32, #tpu.memory_space<vmem>>, vector<16x512xf32>
    tpu.vector_store %arg17[%c80_391, %c0_392], %432 {strides = array<i32>} : memref<144x512xf32, #tpu.memory_space<vmem>>, vector<16x512xf32>,
    %c0_393 = arith.constant 0 : index
    %c143_394 = arith.constant 143 : index
    %434 = vector.load %arg16[%c0_393, %c143_394] : memref<16x768xf32, #tpu.memory_space<vmem>>, vector<16x512xf32>
    %c6_395 = arith.constant 6 : index
    %c0_396 = arith.constant 0 : index
    %435 = vector.load %arg10[%c6_395, %c0_396] : memref<9x512xf32, #tpu.memory_space<vmem>>, vector<1x512xf32>
    %436 = vector.broadcast %435 : vector<1x512xf32> to vector<16x512xf32>
    %437 = arith.mulf %434, %436 : vector<16x512xf32>
    %c96_397 = arith.constant 96 : index
    %c0_398 = arith.constant 0 : index
    %438 = vector.load %arg17[%c96_397, %c0_398] : memref<144x512xf32, #tpu.memory_space<vmem>>, vector<16x512xf32>
    tpu.vector_store %arg17[%c96_397, %c0_398], %437 {strides = array<i32>} : memref<144x512xf32, #tpu.memory_space<vmem>>, vector<16x512xf32>,
    %c0_399 = arith.constant 0 : index
    %c144_400 = arith.constant 144 : index
    %439 = vector.load %arg16[%c0_399, %c144_400] : memref<16x768xf32, #tpu.memory_space<vmem>>, vector<16x512xf32>
    %c7_401 = arith.constant 7 : index
    %c0_402 = arith.constant 0 : index
    %440 = vector.load %arg10[%c7_401, %c0_402] : memref<9x512xf32, #tpu.memory_space<vmem>>, vector<1x512xf32>
    %441 = vector.broadcast %440 : vector<1x512xf32> to vector<16x512xf32>
    %442 = arith.mulf %439, %441 : vector<16x512xf32>
    %c112_403 = arith.constant 112 : index
    %c0_404 = arith.constant 0 : index
    %443 = vector.load %arg17[%c112_403, %c0_404] : memref<144x512xf32, #tpu.memory_space<vmem>>, vector<16x512xf32>
    tpu.vector_store %arg17[%c112_403, %c0_404], %442 {strides = array<i32>} : memref<144x512xf32, #tpu.memory_space<vmem>>, vector<16x512xf32>,
    %c0_405 = arith.constant 0 : index
    %c145_406 = arith.constant 145 : index
    %444 = vector.load %arg16[%c0_405, %c145_406] : memref<16x768xf32, #tpu.memory_space<vmem>>, vector<16x512xf32>
    %c8_407 = arith.constant 8 : index
    %c0_408 = arith.constant 0 : index
    %445 = vector.load %arg10[%c8_407, %c0_408] : memref<9x512xf32, #tpu.memory_space<vmem>>, vector<1x512xf32>
    %446 = vector.broadcast %445 : vector<1x512xf32> to vector<16x512xf32>
    %447 = arith.mulf %444, %446 : vector<16x512xf32>
    %c128_409 = arith.constant 128 : index
    %c0_410 = arith.constant 0 : index
    %448 = vector.load %arg17[%c128_409, %c0_410] : memref<144x512xf32, #tpu.memory_space<vmem>>, vector<16x512xf32>
    tpu.vector_store %arg17[%c128_409, %c0_410], %447 {strides = array<i32>} : memref<144x512xf32, #tpu.memory_space<vmem>>, vector<16x512xf32>,
    %c0_411 = arith.constant 0 : index
    %c0_412 = arith.constant 0 : index
    %449 = vector.load %arg4[%c0_411, %c0_412] : memref<2x144xf32, #tpu.memory_space<vmem>>, vector<2x144xf32>
    %c0_413 = arith.constant 0 : index
    %c0_414 = arith.constant 0 : index
    %450 = vector.load %arg17[%c0_413, %c0_414] : memref<144x512xf32, #tpu.memory_space<vmem>>, vector<144x512xf32>
    %cst_415 = arith.constant dense<0.000000e+00> : vector<2x512xf32>
    %451 = tpu.matmul %449, %450, %cst_415 {dimension_numbers = #tpu.dot_dimension_numbers<[1], [0], [0], [1], [0, 0, 1, 1], [], []>} : vector<2x144xf32>, vector<144x512xf32>, vector<2x512xf32> -> vector<2x512xf32>
    %c0_416 = arith.constant 0 : index
    %c0_417 = arith.constant 0 : index
    %452 = vector.load %arg7[%c0_416, %c0_417] : memref<2x1xf32, #tpu.memory_space<vmem>>, vector<2x1xf32>
    %453 = vector.broadcast %452 : vector<2x1xf32> to vector<2x512xf32>
    %454 = arith.addf %451, %453 : vector<2x512xf32>
    %455 = math.tanh %454 : vector<2x512xf32>
    %c0_418 = arith.constant 0 : index
    %c0_419 = arith.constant 0 : index
    %456 = vector.load %arg1[%c0_418, %c0_419] : memref<2x512xf32, #tpu.memory_space<vmem>>, vector<2x512xf32>
    %457 = arith.addf %455, %456 : vector<2x512xf32>
    %cst_420 = arith.constant 0.000000e+00 : f32
    %458 = vector.broadcast %cst_420 : f32 to vector<2x512xf32>
    %459 = arith.maximumf %457, %458 : vector<2x512xf32>
    %c0_421 = arith.constant 0 : index
    %c0_422 = arith.constant 0 : index
    %460 = vector.load %arg11[%c0_421, %c0_422] : memref<2x512xf32, #tpu.memory_space<vmem>>, vector<2x512xf32>
    tpu.vector_store %arg11[%c0_421, %c0_422], %459 {strides = array<i32>} : memref<2x512xf32, #tpu.memory_space<vmem>>, vector<2x512xf32>,
    return
  }
  func.func @transform_0(%arg0: i32) -> (i32, i32) {
    %c0_i32 = arith.constant 0 : i32
    %c0_i32_0 = arith.constant 0 : i32
    %c0_i32_1 = arith.constant 0 : i32
    return %c0_i32, %c0_i32_0 : i32, i32
  }
  func.func @transform_1(%arg0: i32) -> (i32, i32) {
    %c0_i32 = arith.constant 0 : i32
    %c0_i32_0 = arith.constant 0 : i32
    %c0_i32_1 = arith.constant 0 : i32
    return %c0_i32, %c0_i32_0 : i32, i32
  }
  func.func @transform_2(%arg0: i32) -> (i32, i32) {
    %c0_i32 = arith.constant 0 : i32
    %c0_i32_0 = arith.constant 0 : i32
    %c0_i32_1 = arith.constant 0 : i32
    return %c0_i32, %c0_i32_0 : i32, i32
  }
  func.func @transform_3(%arg0: i32) -> (i32, i32) {
    %c0_i32 = arith.constant 0 : i32
    %c0_i32_0 = arith.constant 0 : i32
    %c0_i32_1 = arith.constant 0 : i32
    return %c0_i32, %c0_i32_0 : i32, i32
  }
  func.func @transform_4(%arg0: i32) -> (i32, i32) {
    %c0_i32 = arith.constant 0 : i32
    %c0_i32_0 = arith.constant 0 : i32
    %c0_i32_1 = arith.constant 0 : i32
    return %c0_i32, %c0_i32_0 : i32, i32
  }
  func.func @transform_5(%arg0: i32) -> (i32, i32) {
    %c0_i32 = arith.constant 0 : i32
    %c0_i32_0 = arith.constant 0 : i32
    %c0_i32_1 = arith.constant 0 : i32
    return %c0_i32, %c0_i32_0 : i32, i32
  }
  func.func @transform_6(%arg0: i32) -> (i32, i32) {
    %c0_i32 = arith.constant 0 : i32
    %c0_i32_0 = arith.constant 0 : i32
    %c0_i32_1 = arith.constant 0 : i32
    return %c0_i32, %c0_i32_0 : i32, i32
  }
  func.func @transform_7(%arg0: i32) -> (i32, i32) {
    %c0_i32 = arith.constant 0 : i32
    %c0_i32_0 = arith.constant 0 : i32
    %c0_i32_1 = arith.constant 0 : i32
    return %c0_i32, %c0_i32_0 : i32, i32
  }
  func.func @transform_8(%arg0: i32) -> (i32, i32) {
    %c0_i32 = arith.constant 0 : i32
    %c0_i32_0 = arith.constant 0 : i32
    %c0_i32_1 = arith.constant 0 : i32
    return %c0_i32, %c0_i32_0 : i32, i32
  }
  func.func @transform_9(%arg0: i32) -> (i32, i32) {
    %c0_i32 = arith.constant 0 : i32
    %c0_i32_0 = arith.constant 0 : i32
    %c0_i32_1 = arith.constant 0 : i32
    return %c0_i32, %c0_i32_0 : i32, i32
  }
  func.func @transform_10(%arg0: i32) -> (i32, i32) {
    %c0_i32 = arith.constant 0 : i32
    %c0_i32_0 = arith.constant 0 : i32
    %c0_i32_1 = arith.constant 0 : i32
    return %c0_i32, %c0_i32_0 : i32, i32
  }
}

</mosaic_0001>

<bundles_post_ra>
// kernel: refinenet_block.1
= control target key start
LH: loop header
LB: loop body
LE: loop exit
PB: predicated region body
PF: predicated region fallthrough
CT: control target
= control target key end

     0   :  { %v47_v0 = vlaneseq  ;;  %v8393_v1 = vmov 1983009808   ;;  %v8394_v3 = vmov 0.0   ;;  %s11751_s27 = smov 77   ;;  %s11727_s28 = smov 78   ;;  %vm11754_vm0 = vcmask 629760   ;;  %s11686_s7 = inlined_call_operand.vmem [shape: f32[49,512], index: 7, kind: input, shape index: {}]   ;;  %s11687_s0 = inlined_call_operand.vmem [shape: f32[2,512], index: 0, kind: input, shape index: {}]   ;;  %s11688_s8 = inlined_call_operand.vmem [shape: f32[25,512], index: 8, kind: input, shape index: {}]   ;;  %s11689_s4 = inlined_call_operand.vmem [shape: f32[8,1], index: 4, kind: input, shape index: {}]   ;;  %s11690_s1 = inlined_call_operand.vmem [shape: f32[8,104], index: 1, kind: input, shape index: {}]   ;;  %s11691_s2 = inlined_call_operand.vmem [shape: f32[16,200], index: 2, kind: input, shape index: {}]   ;;  %s11692_s5 = inlined_call_operand.vmem [shape: f32[16,1], index: 5, kind: input, shape index: {}]   ;;  %s11693_s9 = inlined_call_operand.vmem [shape: f32[9,512], index: 9, kind: input, shape index: {}]   ;;  %s11694_s3 = inlined_call_operand.vmem [shape: f32[2,144], index: 3, kind: input, shape index: {}]   ;;  %s11695_s6 = inlined_call_operand.vmem [shape: f32[2,1], index: 6, kind: input, shape index: {}]   ;;  %s11696_s10 = inlined_call_operand.vmem [shape: f32[2,512], index: 10, kind: output, shape index: {}]  }
   0x1   :  { %11820 = sst [smem:[#allocation23_spill]] %s11696_s10  ;;  %v66_v2 = vunpack.c.l.s4 %v8393_v1  ;;  %36 = vst [vmem:[#allocation2] sm:$0xff] %v8394_v3  ;;  %37 = vst [vmem:[#allocation2 + $0x8] sm:$0xf] %v8394_v3  ;;  %4842 = vmatprep.mubr.f32.mxu0 %v8394_v3  ;;  %4913 = vmatprep.mubr.f32.mxu1 %v8394_v3  ;;  %v35_v18 = vld [vmem:[%s11687_s0] sm:$0xff]  ;;  %s11729_s13 = smov 79  }
   0x2   :  { %39 = vst [vmem:[#allocation3 + $0x180] sm:$0xfc] %v8394_v3  ;;  %40 = vst [vmem:[#allocation3 + $0x188] sm:$0xfc] %v8394_v3  ;;  %v48_v4 = vshrl.u32 %v47_v0, 7  ;;  %s11735_s14 = smov 80  }
   0x3   :  { %41 = vst [vmem:[#allocation3 + $0x190] sm:$0xfc] %v8394_v3  ;;  %42 = vst [vmem:[#allocation3 + $0x198] sm:$0xfc] %v8394_v3  ;;  %v67_v6 = vunpack.c.0.s8 %v66_v2  ;;  %s11741_s19 = smov 81   ;;  %s11703_s20 = smov 82  }
   0x4   :  { %v45_v5 = vld [vmem:[%s11686_s7] ss:$8 sm:$0xf]  ;;  %v8238_v7 = vld [vmem:[%s11686_s7 + $0x1] ss:$8 sm:$0xf] }
   0x5   :  { %v8505_v8 = vsub.s32 0, %v48_v4  ;;  %v8507_v9 = vsub.s32 1, %v48_v4  ;;  %v8509_v10 = vsub.s32 2, %v48_v4  ;;  %v8511_v11 = vsub.s32 3, %v48_v4  ;;  %38 = vst [vmem:[#allocation2 + $0x2] sm:$0xff] %v35_v18  ;;  %s11705_s23 = smov 83  }
   0x6   :  { %v8513_v12 = vsub.s32 %v67_v6, %v48_v4  ;;  %v8239_v13 = vld [vmem:[%s11686_s7 + $0x2] ss:$8 sm:$0xf]  ;;  %v8240_v23 = vld [vmem:[%s11686_s7 + $0x3] ss:$8 sm:$0xf] }
   0x7   :  { %11821 = vst [vmem:[#allocation8_spill] sm:$0xff] %v8505_v8  ;;  %11822 = vst [vmem:[#allocation9_spill] sm:$0xff] %v8507_v9  ;;  %v50_v14 = vrot.slane %v45_v5, %v8505_v8  ;;  %v54_v15 = vrot.slane %v45_v5, %v8507_v9  ;;  %v58_v16 = vrot.slane %v45_v5, %v8509_v10  ;;  %v8241_v36 = vld [vmem:[%s11686_s7 + $0x4] ss:$8 sm:$0xf]  ;;  %s11707_s26 = smov 93  }
   0x8   :  { %11823 = vst [vmem:[#allocation10_spill] sm:$0xff] %v8509_v10  ;;  %11824 = vst [vmem:[#allocation11_spill] sm:$0xff] %v8511_v11  ;;  %v62_v17 = vrot.slane %v45_v5, %v8511_v11  ;;  %v146_v19 = vrot.slane %v8238_v7, %v8505_v8  ;;  %v150_v20 = vrot.slane %v8238_v7, %v8507_v9  ;;  %v8242_v49 = vld [vmem:[%s11686_s7 + $0x5] ss:$8 sm:$0xf]  ;;  %s11724_s29 = smov 94  }
   0x9   :  { %11825 = vst [vmem:[#allocation12_spill] sm:$0xff] %v8513_v12  ;;  %v154_v21 = vrot.slane %v8238_v7, %v8509_v10  ;;  %v158_v22 = vrot.slane %v8238_v7, %v8511_v11  ;;  %v63_v24 = vcombine.low %v50_v14, %v54_v15  ;;  %v243_v26 = vrot.slane %v8239_v13, %v8505_v8  ;;  %v8243_v63 = vld [vmem:[%s11686_s7 + $0x6] ss:$8 sm:$0xf]  ;;  %s11697_s30 = smov 95   ;;  %s11699_s11 = smov 96  }
   0xa   :  { %v64_v25 = vcombine.low %v58_v16, %v62_v17  ;;  %v247_v27 = vrot.slane %v8239_v13, %v8507_v9  ;;  %v159_v28 = vcombine.low %v146_v19, %v150_v20  ;;  %v251_v30 = vrot.slane %v8239_v13, %v8509_v10  ;;  %v8244_v5 = vld [vmem:[%s11686_s7 + $0x7] ss:$8 sm:$0xf]  ;;  %s11701_s12 = smov 97   ;;  %s8407_s15 = smov 51  }
   0xb   :  { %v160_v29 = vcombine.low %v154_v21, %v158_v22  ;;  %v255_v31 = vrot.slane %v8239_v13, %v8511_v11  ;;  %v71_v32 = vrot.slane %v63_v24, %v8513_v12  ;;  %v340_v35 = vrot.slane %v8240_v23, %v8505_v8  ;;  %v8245_v24 = vld [vmem:[%s11686_s7 + $0x20] ss:$8 sm:$0xf]  ;;  %s8408_s16 = smov 49   ;;  %s8409_s17 = smov 48  }
   0xc   :  { %v78_v33 = vrot.slane %v64_v25, %v8513_v12  ;;  %v256_v34 = vcombine.low %v243_v26, %v247_v27  ;;  %v167_v37 = vrot.slane %v159_v28, %v8513_v12  ;;  %v344_v40 = vrot.slane %v8240_v23, %v8507_v9  ;;  %s8410_s18 = smov 47   ;;  %s8411_s21 = smov 45  }
   0xd   :  { %v174_v38 = vrot.slane %v160_v29, %v8513_v12  ;;  %v257_v39 = vcombine.low %v251_v30, %v255_v31  ;;  %v348_v43 = vrot.slane %v8240_v23, %v8509_v10  ;;  %v352_v44 = vrot.slane %v8240_v23, %v8511_v11  ;;  %v8246_v30 = vld [vmem:[%s11686_s7 + $0x21] ss:$8 sm:$0xf]  ;;  %s8412_s22 = smov 35   ;;  %s11790_s24 = smov 34  }
   0xe   :  { %v79_v41 = vcombine.low %v71_v32, %v78_v33  ;;  %v264_v42 = vrot.slane %v256_v34, %v8513_v12  ;;  %v353_v47 = vcombine.low %v340_v35, %v344_v40  ;;  %v438_v48 = vrot.slane %v8241_v36, %v8505_v8  ;;  %s8414_s25 = smov 50   ;;  %s11956_s10 = smov 17  }
   0xf   :  { %v175_v45 = vcombine.low %v167_v37, %v174_v38  ;;  %v271_v46 = vrot.slane %v257_v39, %v8513_v12  ;;  %v354_v50 = vcombine.low %v348_v43, %v352_v44  ;;  %v442_v51 = vrot.slane %v8241_v36, %v8507_v9  ;;  %v8247_v44 = vld [vmem:[%s11686_s7 + $0x22] ss:$8 sm:$0xf] }
  0x10   :  { %80 = vrot.lane.b32.xlu0 %v79_v41, %s11751_s27  ;;  %v446_v52 = vrot.slane %v8241_v36, %v8509_v10  ;;  %v450_v53 = vrot.slane %v8241_v36, %v8511_v11  ;;  %v534_v54 = vrot.slane %v8242_v49, %v8505_v8  ;;  %v538_v55 = vrot.slane %v8242_v49, %v8507_v9  ;;  %s11763_s27 = smov 15  }
  0x11   :  { %v272_v56 = vcombine.low %v264_v42, %v271_v46  ;;  %v451_v57 = vcombine.low %v438_v48, %v442_v51  ;;  %v361_v59 = vrot.slane %v353_v47, %v8513_v12  ;;  %v368_v60 = vrot.slane %v354_v50, %v8513_v12 }
  0x12   :  { %v452_v58 = vcombine.low %v446_v52, %v450_v53  ;;  %v542_v61 = vrot.slane %v8242_v49, %v8509_v10  ;;  %v546_v62 = vrot.slane %v8242_v49, %v8511_v11  ;;  %v547_v0 = vcombine.low %v534_v54, %v538_v55  ;;  %v8248_v54 = vld [vmem:[%s11686_s7 + $0x23] ss:$8 sm:$0xf] }
  0x13   :  { %v459_v1 = vrot.slane %v451_v57, %v8513_v12  ;;  %v631_v3 = vrot.slane %v8243_v63, %v8505_v8  ;;  %v635_v4 = vrot.slane %v8243_v63, %v8507_v9  ;;  %v369_v6 = vcombine.low %v361_v59, %v368_v60 }
  0x14   :  { %176 = vrot.lane.b32.xlu0 %v175_v45, %s11727_s28  ;;  %v466_v2 = vrot.slane %v452_v58, %v8513_v12  ;;  %v548_v7 = vcombine.low %v542_v61, %v546_v62  ;;  %v639_v13 = vrot.slane %v8243_v63, %v8509_v10  ;;  %v643_v14 = vrot.slane %v8243_v63, %v8511_v11  ;;  %s11765_s28 = smov 19  }
  0x15   :  { %v728_v15 = vrot.slane %v8244_v5, %v8505_v8  ;;  %v732_v16 = vrot.slane %v8244_v5, %v8507_v9  ;;  %v555_v18 = vrot.slane %v547_v0, %v8513_v12  ;;  %v644_v19 = vcombine.low %v631_v3, %v635_v4 }
  0x16   :  { %v467_v17 = vcombine.low %v459_v1, %v466_v2  ;;  %v562_v20 = vrot.slane %v548_v7, %v8513_v12  ;;  %v645_v21 = vcombine.low %v639_v13, %v643_v14  ;;  %v736_v22 = vrot.slane %v8244_v5, %v8509_v10 }
  0x17   :  { %v740_v23 = vrot.slane %v8244_v5, %v8511_v11  ;;  %v741_v25 = vcombine.low %v728_v15, %v732_v16  ;;  %v826_v26 = vrot.slane %v8245_v24, %v8505_v8  ;;  %v830_v27 = vrot.slane %v8245_v24, %v8507_v9  ;;  %v44_v15 = vld [vmem:[#allocation2 + $0x8] sm:$0x3]  ;;  %v8632_v16 = vld [vmem:[#allocation2] sm:$0xff] }
  0x18   :  { %273 = vrot.lane.b32.xlu0 %v272_v56, %s11729_s13  ;;  %v834_v28 = vrot.slane %v8245_v24, %v8509_v10  ;;  %v838_v29 = vrot.slane %v8245_v24, %v8511_v11  ;;  %v563_v31 = vcombine.low %v555_v18, %v562_v20  ;;  %v652_v32 = vrot.slane %v644_v19, %v8513_v12  ;;  %s11739_s13 = smov 110  }
  0x19   :  { %v659_v33 = vrot.slane %v645_v21, %v8513_v12  ;;  %v742_v34 = vcombine.low %v736_v22, %v740_v23  ;;  %v922_v35 = vrot.slane %v8246_v30, %v8505_v8  ;;  %v926_v36 = vrot.slane %v8246_v30, %v8507_v9 }
  0x1a   :  { %v749_v37 = vrot.slane %v741_v25, %v8513_v12  ;;  %v839_v38 = vcombine.low %v826_v26, %v830_v27  ;;  %v840_v39 = vcombine.low %v834_v28, %v838_v29  ;;  %v930_v42 = vrot.slane %v8246_v30, %v8509_v10 }
  0x1b   :  { %v660_v40 = vcombine.low %v652_v32, %v659_v33  ;;  %v756_v41 = vrot.slane %v742_v34, %v8513_v12  ;;  %v934_v43 = vrot.slane %v8246_v30, %v8511_v11  ;;  %v935_v45 = vcombine.low %v922_v35, %v926_v36  ;;  %v431_v34 = vld [vmem:[#allocation2 + $0x8] sm:$0x3] }
  0x1c   :  { %370 = vrot.lane.b32.xlu0 %v369_v6, %s11735_s14  ;;  %v847_v46 = vrot.slane %v839_v38, %v8513_v12  ;;  %v854_v47 = vrot.slane %v840_v39, %v8513_v12  ;;  %v1019_v48 = vrot.slane %v8247_v44, %v8505_v8  ;;  %v1023_v49 = vrot.slane %v8247_v44, %v8507_v9  ;;  %s11766_s14 = smov 18  }
  0x1d   :  { %v757_v50 = vcombine.low %v749_v37, %v756_v41  ;;  %v936_v51 = vcombine.low %v930_v42, %v934_v43  ;;  %v1027_v52 = vrot.slane %v8247_v44, %v8509_v10  ;;  %v1031_v53 = vrot.slane %v8247_v44, %v8511_v11 }
  0x1e   :  { %v943_v55 = vrot.slane %v935_v45, %v8513_v12  ;;  %v855_v56 = vcombine.low %v847_v46, %v854_v47  ;;  %v1032_v57 = vcombine.low %v1019_v48, %v1023_v49  ;;  %v1116_v58 = vrot.slane %v8248_v54, %v8505_v8 }
  0x1f   :  { %v1120_v59 = vrot.slane %v8248_v54, %v8507_v9  ;;  %v950_v60 = vrot.slane %v936_v51, %v8513_v12  ;;  %v1033_v61 = vcombine.low %v1027_v52, %v1031_v53  ;;  %v1124_v62 = vrot.slane %v8248_v54, %v8509_v10  ;;  %v819_v51 = vld [vmem:[#allocation2 + $0x8] sm:$0x3] }
  0x20   :  { %468 = vrot.lane.b32.xlu0 %v467_v17, %s11741_s19  ;;  %v1128_v63 = vrot.slane %v8248_v54, %v8511_v11  ;;  %v1040_v0 = vrot.slane %v1032_v57, %v8513_v12  ;;  %vm11720_vm1 = vcmask 646144   ;;  %vm11721_vm2 = vcmask 654336   ;;  %s11780_s19 = smov 17  }
  0x21   :  { %v951_v1 = vcombine.low %v943_v55, %v950_v60  ;;  %v1047_v2 = vrot.slane %v1033_v61, %v8513_v12  ;;  %v1129_v3 = vcombine.low %v1116_v58, %v1120_v59  ;;  %vm11713_vm3 = vcmask 678912  }
  0x22   :  { %v1130_v4 = vcombine.low %v1124_v62, %v1128_v63  ;;  %vm11714_vm4 = vcmask 760832   ;;  %vm11718_vm5 = vcmask 637952   ;;  %vm11731_vm6 = vcmask 662528  }
  0x23   :  { %v1048_v5 = vcombine.low %v1040_v0, %v1047_v2  ;;  %v1137_v6 = vrot.slane %v1129_v3, %v8513_v12  ;;  %vm11712_vm7 = vcmask 670720   ;;  %vm11710_vm8 = vcmask 785408  }
  0x24   :  { %564 = vrot.lane.b32.xlu0 %v563_v31, %s11703_s20  ;;  %v1144_v7 = vrot.slane %v1130_v4, %v8513_v12  ;;  %vm11715_vm9 = vcmask 769024   ;;  %vm11711_vm10 = vcmask 793600   ;;  %vm11709_vm11 = vcmask 777216   ;;  %s11788_s20 = smov 33  }
  0x25   :  { %vm222_vm12 = vcmask 408576   ;;  %vm319_vm13 = vcmask 400384   ;;  %vm513_vm14 = vcmask 384000   ;;  %vm610_vm15 = vcmask 375808  }
  0x26   :  { %v1145_v13 = vcombine.low %v1137_v6, %v1144_v7 }
  0x28   :  { %661 = vrot.lane.b32.xlu0 %v660_v40, %s11705_s23  ;;  %s11716_s23 = smov 98  }
  0x2c   :  { %758 = vrot.lane.b32.xlu0 %v757_v50, %s11707_s26  ;;  %s11722_s26 = smov 99  }
  0x30   :  { %856 = vrot.lane.b32.xlu0 %v855_v56, %s11724_s29  ;;  %s11753_s29 = smov 29  }
  0x34   :  { %952 = vrot.lane.b32.xlu0 %v951_v1, %s11697_s30  ;;  %s11786_s30 = smov 32  }
  0x38   :  { %1049 = vrot.lane.b32.xlu0 %v1048_v5, %s11699_s11  ;;  %s8416_s11 = smov 46  }
  0x3c   :  { %1146 = vrot.lane.b32.xlu0 %v1145_v13, %s11701_s12  ;;  %s11784_s12 = smov 31  }
  0x82   :  { %v81_v14 = vpop.permute.xlu0 %80 }
  0x83   :  { %v82_v17 = vrot.slane %v81_v14, 6 }
  0x85   :  { %v84_v18 = vsel %vm11754_vm0, %v82_v17, %v81_v14  ;;  %v88_v19 = vmul.f32 %v82_v17, %v44_v15  ;;  %vm11755_vm0 = vcmask 924672  }
  0x86   :  { %v8636_v20 = vmul.f32 %v84_v18, %v8632_v16  ;;  %v8638_v21 = vpop.permute.xlu0 %176 }
  0x87   :  { %v114_v22 = vrot.slane %v88_v19, %v8513_v12  ;;  %v178_v46 = vrot.slane %v8638_v21, 6 }
  0x88   :  { %v8643_v23 = vrot.slane %v8636_v20, %v8513_v12 }
  0x89   :  { %123 = vrot.lane.b32.xlu1 %v114_v22, %s8407_s15  ;;  %v180_v53 = vsel %vm11718_vm5, %v178_v46, %v8638_v21  ;;  %v139_v22 = vld [vmem:[#allocation2 + $0x8] sm:$0x3]  ;;  %vm11719_vm5 = vcmask 801792  }
  0x8a   :  { %v8646_v24 = vpop.permute.xlu0 %273  ;;  %115 = vrot.lane.b32.xlu0 %v8643_v23, %s8407_s15  ;;  %v8722_v57 = vmul.f32 %v180_v53, %v8632_v16  ;;  %v624_v53 = vld [vmem:[#allocation2 + $0x8] sm:$0x3] }
  0x8b   :  { %v275_v25 = vrot.slane %v8646_v24, 6 }
  0x8c   :  { %v201_v0 = vrot.slane %v8722_v57, %v8513_v12 }
  0x8d   :  { %v277_v26 = vsel %vm11720_vm1, %v275_v25, %v8646_v24  ;;  %vm1289_vm1 = vcmask 244736  }
  0x8e   :  { %v8656_v27 = vmul.f32 %v277_v26, %v8632_v16  ;;  %v8658_v28 = vpop.permute.xlu0 %370 }
  0x8f   :  { %v372_v29 = vrot.slane %v8658_v28, 6 }
  0x90   :  { %v8663_v30 = vrot.slane %v8656_v27, %v8513_v12 }
  0x91   :  { %v374_v31 = vsel %vm11721_vm2, %v372_v29, %v8658_v28  ;;  %vm11726_vm2 = vcmask 809984  }
  0x92   :  { %v8670_v32 = vmul.f32 %v374_v31, %v8632_v16  ;;  %v469_v33 = vpop.permute.xlu0 %468  ;;  %311 = vrot.lane.b32.xlu0 %v8663_v30, %s8408_s16 }
  0x93   :  { %v470_v35 = vrot.slane %v469_v33, 6 }
  0x94   :  { %v8676_v36 = vrot.slane %v8670_v32, %v8513_v12 }
  0x95   :  { %v476_v37 = vmul.f32 %v470_v35, %v431_v34  ;;  %v472_v59 = vsel %vm11731_vm6, %v470_v35, %v469_v33  ;;  %v184_v33 = vmul.f32 %v178_v46, %v139_v22  ;;  %vm11732_vm6 = vcmask 891904  }
  0x96   :  { %v8678_v38 = vpop.permute.xlu0 %564  ;;  %413 = vrot.lane.b32.xlu0 %v8676_v36, %s8409_s17  ;;  %v8731_v62 = vmul.f32 %v472_v59, %v8632_v16  ;;  %v915_v59 = vld [vmem:[#allocation2 + $0x8] sm:$0x3] }
  0x97   :  { %v502_v39 = vrot.slane %v476_v37, %v8513_v12  ;;  %v566_v60 = vrot.slane %v8678_v38, 6  ;;  %v236_v37 = vld [vmem:[#allocation2 + $0x8] sm:$0x3] }
  0x98   :  { %v486_v7 = vrot.slane %v8731_v62, %v8513_v12 }
  0x99   :  { %511 = vrot.lane.b32.xlu1 %v502_v39, %s8410_s18  ;;  %v568_v1 = vsel %vm11712_vm7, %v566_v60, %v8678_v38  ;;  %v203_v38 = vcombine.high %v201_v0, %v201_v0  ;;  %v284_v39 = vcombine.high %v8656_v27, %v8656_v27  ;;  %vm998_vm7 = vcmask 269312  }
  0x9a   :  { %v8684_v40 = vpop.permute.xlu0 %661  ;;  %v8749_v5 = vmul.f32 %v568_v1, %v8632_v16 }
  0x9b   :  { %v663_v41 = vrot.slane %v8684_v40, 6 }
  0x9c   :  { %v589_v21 = vrot.slane %v8749_v5, %v8513_v12 }
  0x9d   :  { %v665_v42 = vsel %vm11713_vm3, %v663_v41, %v8684_v40  ;;  %vm1095_vm3 = vcmask 261120  }
  0x9e   :  { %v8692_v43 = vmul.f32 %v665_v42, %v8632_v16  ;;  %v8694_v44 = vpop.permute.xlu0 %758  ;;  %v281_v42 = vmul.f32 %v275_v25, %v236_v37  ;;  %v91_v37 = vcombine.high %v8636_v20, %v8636_v20 }
  0x9f   :  { %v760_v45 = vrot.slane %v8694_v44, 6 }
  0xa0   :  { %v8700_v47 = vrot.slane %v8692_v43, %v8513_v12  ;;  %v307_v25 = vrot.slane %v281_v42, %v8513_v12  ;;  %v672_v22 = vcombine.high %v8692_v43, %v8692_v43  ;;  %v187_v42 = vcombine.low %v8722_v57, %v8722_v57 }
  0xa1   :  { %v762_v48 = vsel %vm11714_vm4, %v760_v45, %v8694_v44  ;;  %v299_v57 = vcombine.low %v8663_v30, %v8663_v30  ;;  %v8249_v30 = vld [vmem:[%s11686_s7 + $0x24] ss:$8 sm:$0xf]  ;;  %vm417_vm4 = vcmask 392192  }
  0xa2   :  { %v8707_v49 = vmul.f32 %v762_v48, %v8632_v16  ;;  %v857_v50 = vpop.permute.xlu0 %856  ;;  %699 = vrot.lane.b32.xlu0 %v8700_v47, %s8411_s21  ;;  %v204_v48 = vcombine.low %v184_v33, %v184_v33  ;;  %v194_v20 = vrot.slane %v187_v42, %v8513_v12 }
  0xa3   :  { %v858_v52 = vrot.slane %v857_v50, 6 }
  0xa4   :  { %v8715_v54 = vrot.slane %v8707_v49, %v8513_v12  ;;  %v211_v24 = vrot.slane %v204_v48, %v8513_v12 }
  0xa5   :  { %v864_v55 = vmul.f32 %v858_v52, %v819_v51  ;;  %v860_v13 = vsel %vm11715_vm9, %v858_v52, %v857_v50  ;;  %v527_v50 = vld [vmem:[#allocation2 + $0x8] sm:$0x3]  ;;  %v8798_v51 = vrot.slane %v284_v39, %v8513_v12  ;;  %v381_v52 = vcombine.low %v8670_v32, %v8670_v32 }
  0xa6   :  { %v8717_v56 = vpop.permute.xlu0 %952  ;;  %801 = vrot.lane.b32.xlu0 %v8715_v54, %s8412_s22  ;;  %v8771_v19 = vmul.f32 %v860_v13, %v8632_v16  ;;  %v572_v27 = vmul.f32 %v566_v60, %v527_v50  ;;  %v669_v32 = vmul.f32 %v663_v41, %v624_v53  ;;  %v494_v60 = vcombine.high %v486_v7, %v486_v7  ;;  %v1012_v13 = vld [vmem:[#allocation2 + $0x8] sm:$0x3] }
  0xa7   :  { %v890_v58 = vrot.slane %v864_v55, %v8513_v12  ;;  %v954_v14 = vrot.slane %v8717_v56, 6  ;;  %v8808_v55 = vrot.slane %v381_v52, %v8513_v12  ;;  %v397_v50 = vcombine.low %v8676_v36, %v8676_v36 }
  0xa8   :  { %v874_v35 = vrot.slane %v8771_v19, %v8513_v12  ;;  %v202_v52 = vcombine.high %v194_v20, %v194_v20  ;;  %v1218_v53 = vrot.slane %v8249_v30, %v8507_v9  ;;  %vm805_vm9 = vcmask 285696  }
  0xa9   :  { %899 = vrot.lane.b32.xlu1 %v890_v58, %s11790_s24  ;;  %v956_v26 = vsel %vm11709_vm11, %v954_v14, %v8717_v56  ;;  %v308_v56 = vcombine.low %v307_v25, %v307_v25  ;;  %v592_v58 = vcombine.low %v572_v27, %v572_v27  ;;  %vm707_vm11 = vcmask 367616  }
  0xaa   :  { %v8728_v61 = vpop.permute.xlu0 %1049  ;;  %v8785_v34 = vmul.f32 %v956_v26, %v8632_v16  ;;  %v769_v26 = vcombine.low %v8707_v49, %v8707_v49  ;;  %v882_v33 = vcombine.high %v874_v35, %v874_v35  ;;  %v106_v49 = vcombine.high %v8643_v23, %v8643_v23 }
  0xab   :  { %v1051_v63 = vrot.slane %v8728_v61, 6  ;;  %v599_v1 = vrot.slane %v592_v58, %v8513_v12 }
  0xac   :  { %v977_v46 = vrot.slane %v8785_v34, %v8513_v12  ;;  %v963_v58 = vcombine.low %v8785_v34, %v8785_v34 }
  0xad   :  { %v1053_v2 = vsel %vm11710_vm8, %v1051_v63, %v8728_v61  ;;  %216 = vrot.lane.b32.xlu1 %v201_v0, %s8414_s25  ;;  %v960_v0 = vmul.f32 %v954_v14, %v915_v59  ;;  %v1057_v40 = vmul.f32 %v1051_v63, %v1012_v13  ;;  %v8826_v14 = vrot.slane %v672_v22, %v8513_v12 }
  0xae   :  { %v8744_v3 = vmul.f32 %v1053_v2, %v8632_v16  ;;  %v8746_v4 = vpop.permute.xlu0 %1146  ;;  %v695_v2 = vrot.slane %v669_v32, %v8513_v12  ;;  %v8836_v61 = vrot.slane %v769_v26, %v8513_v12  ;;  %v1222_v32 = vrot.slane %v8249_v30, %v8509_v10  ;;  %v721_v26 = vld [vmem:[#allocation2 + $0x8] sm:$0x3] }
  0xaf   :  { %v1148_v6 = vrot.slane %v8746_v4, 6  ;;  %v970_v13 = vrot.slane %v963_v58, %v8513_v12  ;;  %v785_v22 = vcombine.low %v8715_v54, %v8715_v54  ;;  %v766_v54 = vmul.f32 %v760_v45, %v721_v26 }
  0xb0   :  { %v8758_v15 = vrot.slane %v8744_v3, %v8513_v12  ;;  %v696_v41 = vcombine.low %v695_v2, %v695_v2  ;;  %v1060_v39 = vcombine.high %v8744_v3, %v8744_v3  ;;  %vm901_vm8 = vcmask 277504  }
  0xb1   :  { %v1150_v17 = vsel %vm11711_vm10, %v1148_v6, %v8746_v4  ;;  %503 = vrot.lane.b32.xlu1 %v486_v7, %s8410_s18  ;;  %v980_v7 = vcombine.low %v960_v0, %v960_v0  ;;  %vm125_vm10 = vcmask 416768  }
  0xb2   :  { %v8766_v18 = vmul.f32 %v1150_v17, %v8632_v16  ;;  %1087 = vrot.lane.b32.xlu0 %v8758_v15, %s11786_s30  ;;  %v591_v17 = vcombine.high %v589_v21, %v589_v21  ;;  %v8855_v48 = vrot.slane %v1060_v39, %v8513_v12 }
  0xb3   :  { %v987_v43 = vrot.slane %v980_v7, %v8513_v12 }
  0xb4   :  { %v8779_v31 = vrot.slane %v8766_v18, %v8513_v12  ;;  %v1157_v23 = vcombine.low %v8766_v18, %v8766_v18  ;;  %v479_v18 = vcombine.high %v8731_v62, %v8731_v62  ;;  %v867_v62 = vcombine.high %v8771_v19, %v8771_v19 }
  0xb5   :  { %604 = vrot.lane.b32.xlu1 %v589_v21, %s8416_s11  ;;  %v1083_v21 = vrot.slane %v1057_v40, %v8513_v12  ;;  %v978_v40 = vcombine.high %v970_v13, %v970_v13 }
  0xb6   :  { %1189 = vrot.lane.b32.xlu0 %v8779_v31, %s11784_s12  ;;  %v8864_v3 = vrot.slane %v1157_v23, %v8513_v12  ;;  %v493_v27 = vrot.slane %v479_v18, %v8513_v12  ;;  %v881_v19 = vrot.slane %v867_v62, %v8513_v12  ;;  %v1173_v28 = vcombine.low %v8779_v31, %v8779_v31 }
  0xb7   :  { %v1084_v63 = vcombine.low %v1083_v21, %v1083_v21  ;;  %v1075_v21 = vcombine.low %v8758_v15, %v8758_v15  ;;  %v300_v23 = vcombine.low %v8798_v51, %v8798_v51 }
  0xb8   :  { %v495_v25 = vcombine.high %v493_v27, %v493_v27  ;;  %v883_v2 = vcombine.high %v881_v19, %v881_v19 }
  0xb9   :  { %891 = vrot.lane.b32.xlu1 %v874_v35, %s11790_s24  ;;  %v105_v35 = vrot.slane %v91_v37, %v8513_v12 }
  0xba   :  { %218 = vrot.lane.b32.xlu0 %v203_v38, %s8414_s25  ;;  %v979_v38 = vcombine.high %v977_v46, %v977_v46 }
  0xbd   :  { %992 = vrot.lane.b32.xlu1 %v977_v46, %s11788_s20  ;;  %v107_v46 = vcombine.high %v105_v35, %v105_v35 }
  0xbe   :  { %315 = vrot.lane.b32.xlu0 %v8798_v51, %s8408_s16 }
  0xc1   :  { %220 = vrot.lane.b32.xlu1 %v211_v24, %s8414_s25  ;;  %v575_v24 = vcombine.low %v8749_v5, %v8749_v5  ;;  %v1214_v5 = vrot.slane %v8249_v30, %v8505_v8 }
  0xc2   :  { %409 = vrot.lane.b32.xlu0 %v8808_v55, %s8409_s17 }
  0xc3   :  { %v582_v36 = vrot.slane %v575_v24, %v8513_v12 }
  0xc5   :  { %317 = vrot.lane.b32.xlu1 %v308_v56, %s8408_s16  ;;  %v1226_v56 = vrot.slane %v8249_v30, %v8511_v11  ;;  %v590_v59 = vcombine.high %v582_v36, %v582_v36  ;;  %v1076_v30 = vcombine.low %v8855_v48, %v8855_v48 }
  0xc6   :  { %505 = vrot.lane.b32.xlu0 %v494_v60, %s8410_s18  ;;  %v1227_v60 = vcombine.low %v1214_v5, %v1218_v53 }
  0xc7   :  { %v1228_v0 = vcombine.low %v1222_v32, %v1226_v56 }
  0xc8   :  { %v1235_v34 = vrot.slane %v1227_v60, %v8513_v12 }
  0xc9   :  { %608 = vrot.lane.b32.xlu1 %v599_v1, %s8416_s11  ;;  %v687_v1 = vcombine.low %v8700_v47, %v8700_v47 }
  0xca   :  { %606 = vrot.lane.b32.xlu0 %v591_v17, %s8416_s11  ;;  %v1242_v17 = vrot.slane %v1228_v0, %v8513_v12 }
  0xcc   :  { %v1243_v47 = vcombine.low %v1235_v34, %v1242_v17 }
  0xcd   :  { %705 = vrot.lane.b32.xlu1 %v696_v41, %s8411_s21  ;;  %v333_v41 = vld [vmem:[#allocation2 + $0x8] sm:$0x3] }
  0xce   :  { %703 = vrot.lane.b32.xlu0 %v8826_v14, %s8411_s21  ;;  %v378_v7 = vmul.f32 %v372_v29, %v333_v41 }
  0xd1   :  { %996 = vrot.lane.b32.xlu1 %v987_v43, %s11788_s20  ;;  %v398_v43 = vcombine.low %v378_v7, %v378_v7 }
  0xd2   :  { %797 = vrot.lane.b32.xlu0 %v8836_v61, %s8412_s22 }
  0xd3   :  { %v405_v29 = vrot.slane %v398_v43, %v8513_v12 }
  0xd5   :  { %1093 = vrot.lane.b32.xlu1 %v1084_v63, %s11786_s30  ;;  %v1109_v63 = vld [vmem:[#allocation2 + $0x8] sm:$0x3]  ;;  %v406_v44 = vcombine.low %v405_v29, %v405_v29 }
  0xd6   :  { %893 = vrot.lane.b32.xlu0 %v882_v33, %s11790_s24  ;;  %v786_v33 = vcombine.low %v766_v54, %v766_v54 }
  0xd8   :  { %v793_v45 = vrot.slane %v786_v33, %v8513_v12 }
  0xd9   :  { %117 = vrot.lane.b32.xlu1 %v106_v49, %s8407_s15  ;;  %v1154_v49 = vmul.f32 %v1148_v6, %v1109_v63 }
  0xda   :  { %994 = vrot.lane.b32.xlu0 %v979_v38, %s11788_s20  ;;  %v794_v15 = vcombine.low %v793_v45, %v793_v45 }
  0xdb   :  { %v1174_v37 = vcombine.low %v1154_v49, %v1154_v49 }
  0xdd   :  { %119 = vrot.lane.b32.xlu1 %v105_v35, %s8407_s15  ;;  %v1181_v39 = vrot.slane %v1174_v37, %v8513_v12 }
  0xde   :  { %1091 = vrot.lane.b32.xlu0 %v8855_v48, %s11786_s30 }
  0xdf   :  { %v1182_v31 = vcombine.low %v1181_v39, %v1181_v39 }
  0xe1   :  { %212 = vrot.lane.b32.xlu1 %v194_v20, %s8414_s25 }
  0xe2   :  { %1185 = vrot.lane.b32.xlu0 %v8864_v3, %s11784_s12 }
  0xe5   :  { %309 = vrot.lane.b32.xlu1 %v299_v57, %s8408_s16 }
  0xe6   :  { %121 = vrot.lane.b32.xlu0 %v107_v46, %s8407_s15  ;;  %v396_v46 = vcombine.low %v8808_v55, %v8808_v55 }
  0xe9   :  { %411 = vrot.lane.b32.xlu1 %v397_v50, %s8409_s17  ;;  %v688_v50 = vcombine.low %v8826_v14, %v8826_v14 }
  0xea   :  { %214 = vrot.lane.b32.xlu0 %v202_v52, %s8414_s25 }
  0xed   :  { %507 = vrot.lane.b32.xlu1 %v493_v27, %s8410_s18  ;;  %v784_v27 = vcombine.low %v8836_v61, %v8836_v61 }
  0xee   :  { %509 = vrot.lane.b32.xlu0 %v495_v25, %s8410_s18  ;;  %v1172_v25 = vcombine.low %v8864_v3, %v8864_v3 }
  0xf1   :  { %600 = vrot.lane.b32.xlu1 %v582_v36, %s8416_s11 }
  0xf2   :  { %602 = vrot.lane.b32.xlu0 %v590_v59, %s8416_s11 }
  0xf5   :  { %697 = vrot.lane.b32.xlu1 %v687_v1, %s8411_s21 }
  0xf6   :  { %897 = vrot.lane.b32.xlu0 %v883_v2, %s11790_s24 }
  0xf9   :  { %799 = vrot.lane.b32.xlu1 %v785_v22, %s8412_s22 }
  0xfa   :  { %990 = vrot.lane.b32.xlu0 %v978_v40, %s11788_s20 }
  0xfb   :  { %v8934_v6 = vpop.permute.xlu1 %123 }
  0xfc   :  { %v8927_v38 = vpop.permute.xlu0 %115 }
  0xfd   :  { %895 = vrot.lane.b32.xlu1 %v881_v19, %s11790_s24 }
  0xfe   :  { %1244 = vrot.lane.b32.xlu0 %v1243_v47, %s11716_s23  ;;  %s11782_s23 = smov 30  }
 0x101   :  { %988 = vrot.lane.b32.xlu1 %v970_v13, %s11788_s20 }
 0x104   :  { %v8931_v4 = vpop.permute.xlu0 %311 }
 0x105   :  { %1085 = vrot.lane.b32.xlu1 %v1075_v21, %s11786_s30 }
 0x108   :  { %v8937_v35 = vpop.permute.xlu0 %413 }
 0x109   :  { %1187 = vrot.lane.b32.xlu1 %v1173_v28, %s11784_s12 }
 0x10b   :  { %v8939_v42 = vpop.permute.xlu1 %511 }
 0x10d   :  { %415 = vrot.lane.b32.xlu1 %v406_v44, %s8409_s17 }
 0x111   :  { %803 = vrot.lane.b32.xlu1 %v794_v15, %s8412_s22 }
 0x114   :  { %v8944_v20 = vpop.permute.xlu0 %699 }
 0x115   :  { %1191 = vrot.lane.b32.xlu1 %v1182_v31, %s11784_s12 }
 0x118   :  { %v8955_v52 = vpop.permute.xlu0 %801 }
 0x119   :  { %313 = vrot.lane.b32.xlu1 %v300_v23, %s8408_s16 }
 0x11b   :  { %v8946_v57 = vpop.permute.xlu1 %899 }
 0x11d   :  { %407 = vrot.lane.b32.xlu1 %v396_v46, %s8409_s17 }
 0x11f   :  { %v8951_v18 = vpop.permute.xlu1 %216 }
 0x121   :  { %701 = vrot.lane.b32.xlu1 %v688_v50, %s8411_s21 }
 0x123   :  { %v504_v51 = vpop.permute.xlu1 %503 }
 0x124   :  { %v8960_v24 = vpop.permute.xlu0 %1087 }
 0x125   :  { %795 = vrot.lane.b32.xlu1 %v784_v27, %s8412_s22 }
 0x127   :  { %v8963_v55 = vpop.permute.xlu1 %604 }
 0x128   :  { %v8967_v62 = vpop.permute.xlu0 %1189 }
 0x129   :  { %1089 = vrot.lane.b32.xlu1 %v1076_v30, %s11786_s30 }
 0x12b   :  { %v892_v14 = vpop.permute.xlu1 %891 }
 0x12c   :  { %v219_v36 = vpop.permute.xlu0 %218 }
 0x12d   :  { %v225_v61 = vsel %vm222_vm12, %v8951_v18, %v219_v36  ;;  %1183 = vrot.lane.b32.xlu1 %v1172_v25, %s11784_s12 }
 0x12e   :  { %233 = vst [vmem:[#allocation3 + $0x10] sm:$0xc] %v225_v61 }
 0x12f   :  { %v8975_v5 = vpop.permute.xlu1 %992 }
 0x130   :  { %v8977_v53 = vpop.permute.xlu0 %315 }
 0x133   :  { %v221_v48 = vpop.permute.xlu1 %220 }
 0x134   :  { %v226_v32 = vsel %vm222_vm12, %v219_v36, %v221_v48  ;;  %v8980_v56 = vpop.permute.xlu0 %409 }
 0x135   :  { %234 = vst [vmem:[#allocation3 + $0x18] sm:$0xc] %v226_v32 }
 0x137   :  { %v318_v3 = vpop.permute.xlu1 %317 }
 0x138   :  { %v323_v58 = vsel %vm319_vm13, %v8977_v53, %v318_v3  ;;  %v8984_v59 = vpop.permute.xlu0 %505 }
 0x139   :  { %331 = vst [vmem:[#allocation3 + $0x18] sm:$0x30] %v323_v58  ;;  %v514_v19 = vsel %vm513_vm14, %v504_v51, %v8984_v59 }
 0x13a   :  { %522 = vst [vmem:[#allocation3 + $0x20] sm:$0x3] %v514_v19 }
 0x13b   :  { %v609_v60 = vpop.permute.xlu1 %608 }
 0x13c   :  { %v607_v0 = vpop.permute.xlu0 %606 }
 0x13d   :  { %v613_v1 = vsel %vm610_vm15, %v8963_v55, %v607_v0  ;;  %v614_v2 = vsel %vm610_vm15, %v607_v0, %v609_v60 }
 0x13e   :  { %621 = vst [vmem:[#allocation3 + $0x30] sm:$0xc] %v613_v1  ;;  %622 = vst [vmem:[#allocation3 + $0x38] sm:$0xc] %v614_v2 }
 0x13f   :  { %v706_v13 = vpop.permute.xlu1 %705 }
 0x140   :  { %v8991_v34 = vpop.permute.xlu0 %703 }
 0x141   :  { %v711_v17 = vsel %vm707_vm11, %v8991_v34, %v706_v13 }
 0x142   :  { %719 = vst [vmem:[#allocation3 + $0x38] sm:$0x30] %v711_v17 }
 0x143   :  { %v997_v22 = vpop.permute.xlu1 %996 }
 0x144   :  { %v8995_v40 = vpop.permute.xlu0 %797 }
 0x147   :  { %v1094_v47 = vpop.permute.xlu1 %1093 }
 0x148   :  { %v8997_v41 = vpop.permute.xlu0 %893 }
 0x149   :  { %v902_v7 = vsel %vm901_vm8, %v892_v14, %v8997_v41 }
 0x14a   :  { %910 = vst [vmem:[#allocation3 + $0x40] sm:$0x3] %v902_v7 }
 0x14b   :  { %v118_v26 = vpop.permute.xlu1 %117 }
 0x14c   :  { %v126_v43 = vsel %vm125_vm10, %v8927_v38, %v118_v26  ;;  %v995_v54 = vpop.permute.xlu0 %994 }
 0x14d   :  { %134 = vst [vmem:[#allocation3] sm:$0x3] %v126_v43  ;;  %v1001_v21 = vsel %vm998_vm7, %v8975_v5, %v995_v54  ;;  %v1002_v63 = vsel %vm998_vm7, %v995_v54, %v997_v22 }
 0x14e   :  { %1009 = vst [vmem:[#allocation3 + $0x50] sm:$0xc] %v1001_v21  ;;  %1010 = vst [vmem:[#allocation3 + $0x58] sm:$0xc] %v1002_v63 }
 0x14f   :  { %v120_v33 = vpop.permute.xlu1 %119 }
 0x150   :  { %v127_v49 = vsel %vm125_vm10, %v118_v26, %v120_v33  ;;  %v9007_v28 = vpop.permute.xlu0 %1091 }
 0x151   :  { %135 = vst [vmem:[#allocation3 + $0x8] sm:$0x3] %v127_v49  ;;  %v1099_v29 = vsel %vm1095_vm3, %v9007_v28, %v1094_v47 }
 0x152   :  { %1107 = vst [vmem:[#allocation3 + $0x58] sm:$0x30] %v1099_v29 }
 0x153   :  { %v213_v37 = vpop.permute.xlu1 %212 }
 0x154   :  { %v9011_v44 = vpop.permute.xlu0 %1185 }
 0x157   :  { %v310_v45 = vpop.permute.xlu1 %309 }
 0x158   :  { %v320_v38 = vsel %vm319_vm13, %v310_v45, %v8931_v4  ;;  %v122_v15 = vpop.permute.xlu0 %121 }
 0x159   :  { %328 = vst [vmem:[#allocation3] sm:$0x30] %v320_v38  ;;  %v128_v39 = vsel %vm125_vm10, %v120_v33, %v122_v15  ;;  %v129_v31 = vsel %vm125_vm10, %v122_v15, %v8934_v6  ;;  %v1207_v38 = vld [vmem:[#allocation2 + $0x8] sm:$0x3] }
 0x15a   :  { %136 = vst [vmem:[#allocation3 + $0x10] sm:$0x3] %v128_v39  ;;  %137 = vst [vmem:[#allocation3 + $0x18] sm:$0x3] %v129_v31 }
 0x15b   :  { %v412_v23 = vpop.permute.xlu1 %411 }
 0x15c   :  { %v419_v46 = vsel %vm417_vm4, %v8980_v56, %v412_v23  ;;  %v420_v50 = vsel %vm417_vm4, %v412_v23, %v8937_v35  ;;  %v215_v51 = vpop.permute.xlu0 %214 }
 0x15d   :  { %427 = vst [vmem:[#allocation3 + $0x8] sm:$0xc0] %v419_v46  ;;  %428 = vst [vmem:[#allocation3 + $0x10] sm:$0xc0] %v420_v50  ;;  %v223_v27 = vsel %vm222_vm12, %v213_v37, %v215_v51  ;;  %v224_v30 = vsel %vm222_vm12, %v215_v51, %v8951_v18 }
 0x15e   :  { %231 = vst [vmem:[#allocation3] sm:$0xc] %v223_v27  ;;  %232 = vst [vmem:[#allocation3 + $0x8] sm:$0xc] %v224_v30 }
 0x15f   :  { %v508_v6 = vpop.permute.xlu1 %507 }
 0x160   :  { %v515_v14 = vsel %vm513_vm14, %v8984_v59, %v508_v6  ;;  %v510_v25 = vpop.permute.xlu0 %509 }
 0x161   :  { %523 = vst [vmem:[#allocation3 + $0x28] sm:$0x3] %v515_v14  ;;  %v516_v36 = vsel %vm513_vm14, %v508_v6, %v510_v25  ;;  %v517_v61 = vsel %vm513_vm14, %v510_v25, %v8939_v42 }
 0x162   :  { %524 = vst [vmem:[#allocation3 + $0x30] sm:$0x3] %v516_v36  ;;  %525 = vst [vmem:[#allocation3 + $0x38] sm:$0x3] %v517_v61 }
 0x163   :  { %v601_v48 = vpop.permute.xlu1 %600 }
 0x164   :  { %v603_v32 = vpop.permute.xlu0 %602 }
 0x165   :  { %v611_v3 = vsel %vm610_vm15, %v601_v48, %v603_v32  ;;  %v612_v18 = vsel %vm610_vm15, %v603_v32, %v8963_v55 }
 0x166   :  { %619 = vst [vmem:[#allocation3 + $0x20] sm:$0xc] %v611_v3  ;;  %620 = vst [vmem:[#allocation3 + $0x28] sm:$0xc] %v612_v18 }
 0x167   :  { %v698_v58 = vpop.permute.xlu1 %697 }
 0x168   :  { %v708_v59 = vsel %vm707_vm11, %v698_v58, %v8944_v20  ;;  %v898_v19 = vpop.permute.xlu0 %897 }
 0x169   :  { %716 = vst [vmem:[#allocation3 + $0x20] sm:$0x30] %v708_v59  ;;  %v905_v42 = vsel %vm901_vm8, %v898_v19, %v8946_v57  ;;  %v8250_v57 = vld [vmem:[%s11686_s7 + $0x25] ss:$8 sm:$0xf] }
 0x16a   :  { %913 = vst [vmem:[#allocation3 + $0x58] sm:$0x3] %v905_v42  ;;  %v1310_v26 = vrot.slane %v8250_v57, %v8505_v8  ;;  %v1318_v43 = vrot.slane %v8250_v57, %v8509_v10  ;;  %v1322_v54 = vrot.slane %v8250_v57, %v8511_v11 }
 0x16b   :  { %v800_v60 = vpop.permute.xlu1 %799 }
 0x16c   :  { %v807_v0 = vsel %vm805_vm9, %v8995_v40, %v800_v60  ;;  %v808_v55 = vsel %vm805_vm9, %v800_v60, %v8955_v52  ;;  %v991_v1 = vpop.permute.xlu0 %990  ;;  %v1324_v45 = vcombine.low %v1318_v43, %v1322_v54 }
 0x16d   :  { %815 = vst [vmem:[#allocation3 + $0x28] sm:$0xc0] %v807_v0  ;;  %816 = vst [vmem:[#allocation3 + $0x30] sm:$0xc0] %v808_v55  ;;  %v1000_v2 = vsel %vm998_vm7, %v991_v1, %v8975_v5  ;;  %v1314_v5 = vrot.slane %v8250_v57, %v8507_v9 }
 0x16e   :  { %1008 = vst [vmem:[#allocation3 + $0x48] sm:$0xc] %v1000_v2  ;;  %v1338_v51 = vrot.slane %v1324_v45, %v8513_v12 }
 0x16f   :  { %v896_v13 = vpop.permute.xlu1 %895  ;;  %v1323_v37 = vcombine.low %v1310_v26, %v1314_v5 }
 0x170   :  { %v903_v17 = vsel %vm901_vm8, %v8997_v41, %v896_v13  ;;  %v904_v22 = vsel %vm901_vm8, %v896_v13, %v898_v19  ;;  %v1245_v47 = vpop.permute.xlu0 %1244 }
 0x171   :  { %911 = vst [vmem:[#allocation3 + $0x48] sm:$0x3] %v903_v17  ;;  %912 = vst [vmem:[#allocation3 + $0x50] sm:$0x3] %v904_v22  ;;  %v1246_v7 = vrot.slane %v1245_v47, 6  ;;  %v1331_v50 = vrot.slane %v1323_v37, %v8513_v12 }
 0x173   :  { %v1248_v21 = vsel %vm11719_vm5, %v1246_v7, %v1245_v47  ;;  %v989_v63 = vpop.permute.xlu1 %988  ;;  %vm1193_vm5 = vcmask 252928   ;;  %v1252_v46 = vmul.f32 %v1246_v7, %v1207_v38  ;;  %v1339_v36 = vcombine.low %v1331_v50, %v1338_v51  ;;  %v8251_v7 = vld [vmem:[%s11686_s7 + $0x26] ss:$8 sm:$0xf] }
 0x174   :  { %v1251_v41 = vmul.f32 %v1248_v21, %v8632_v16  ;;  %v999_v33 = vsel %vm998_vm7, %v989_v63, %v991_v1  ;;  %v1407_v43 = vrot.slane %v8251_v7, %v8505_v8  ;;  %v1411_v21 = vrot.slane %v8251_v7, %v8507_v9 }
 0x175   :  { %1007 = vst [vmem:[#allocation3 + $0x40] sm:$0xc] %v999_v33  ;;  %v1278_v25 = vrot.slane %v1252_v46, %v8513_v12  ;;  %v1415_v63 = vrot.slane %v8251_v7, %v8509_v10  ;;  %v1303_v33 = vld [vmem:[#allocation2 + $0x8] sm:$0x3] }
 0x176   :  { %v1262_v49 = vrot.slane %v1251_v41, %v8513_v12  ;;  %v1255_v29 = vcombine.high %v1251_v41, %v1251_v41  ;;  %v1419_v41 = vrot.slane %v8251_v7, %v8511_v11  ;;  %v1420_v45 = vcombine.low %v1407_v43, %v1411_v21 }
 0x177   :  { %v1086_v15 = vpop.permute.xlu1 %1085 }
 0x178   :  { %v1096_v39 = vsel %vm1095_vm3, %v1086_v15, %v8960_v24  ;;  %1279 = vrot.lane.b32.xlu1 %v1262_v49, %s11782_s23  ;;  %v1270_v31 = vcombine.high %v1262_v49, %v1262_v49  ;;  %v1269_v23 = vrot.slane %v1255_v29, %v8513_v12  ;;  %v1421_v38 = vcombine.low %v1415_v63, %v1419_v41 }
 0x179   :  { %1104 = vst [vmem:[#allocation3 + $0x40] sm:$0x30] %v1096_v39 }
 0x17a   :  { %1281 = vrot.lane.b32.xlu0 %v1270_v31, %s11782_s23  ;;  %v1271_v14 = vcombine.high %v1269_v23, %v1269_v23  ;;  %v1428_v31 = vrot.slane %v1420_v45, %v8513_v12 }
 0x17b   :  { %v1188_v27 = vpop.permute.xlu1 %1187 }
 0x17c   :  { %v1195_v30 = vsel %vm1193_vm5, %v9011_v44, %v1188_v27  ;;  %v1196_v6 = vsel %vm1193_vm5, %v1188_v27, %v8967_v62  ;;  %1283 = vrot.lane.b32.xlu1 %v1269_v23, %s11782_s23  ;;  %v1435_v23 = vrot.slane %v1421_v38, %v8513_v12 }
 0x17d   :  { %1203 = vst [vmem:[#allocation3 + $0x48] sm:$0xc0] %v1195_v30  ;;  %1204 = vst [vmem:[#allocation3 + $0x50] sm:$0xc0] %v1196_v6 }
 0x17e   :  { %1285 = vrot.lane.b32.xlu0 %v1271_v14, %s11782_s23  ;;  %v1436_v51 = vcombine.low %v1428_v31, %v1435_v23 }
 0x17f   :  { %v416_v61 = vpop.permute.xlu1 %415 }
 0x180   :  { %v421_v48 = vsel %vm417_vm4, %v8937_v35, %v416_v61  ;;  %1287 = vrot.lane.b32.xlu1 %v1278_v25, %s11782_s23  ;;  %v8252_v61 = vld [vmem:[%s11686_s7 + $0x27] ss:$8 sm:$0xf] }
 0x181   :  { %429 = vst [vmem:[#allocation3 + $0x18] sm:$0xc0] %v421_v48 }
 0x182   :  { %1340 = vrot.lane.b32.xlu0 %v1339_v36, %s11722_s26  ;;  %s11733_s26 = smov 109  }
 0x183   :  { %v804_v32 = vpop.permute.xlu1 %803 }
 0x184   :  { %v809_v3 = vsel %vm805_vm9, %v8955_v52, %v804_v32 }
 0x185   :  { %817 = vst [vmem:[#allocation3 + $0x38] sm:$0xc0] %v809_v3 }
 0x187   :  { %v1192_v18 = vpop.permute.xlu1 %1191 }
 0x188   :  { %v1197_v58 = vsel %vm1193_vm5, %v8967_v62, %v1192_v18  ;;  %v1504_v18 = vrot.slane %v8252_v61, %v8505_v8 }
 0x189   :  { %1205 = vst [vmem:[#allocation3 + $0x58] sm:$0xc0] %v1197_v58  ;;  %v1508_v58 = vrot.slane %v8252_v61, %v8507_v9 }
 0x18b   :  { %v314_v59 = vpop.permute.xlu1 %313 }
 0x18c   :  { %v321_v35 = vsel %vm319_vm13, %v8931_v4, %v314_v59  ;;  %v322_v19 = vsel %vm319_vm13, %v314_v59, %v8977_v53 }
 0x18d   :  { %329 = vst [vmem:[#allocation3 + $0x8] sm:$0x30] %v321_v35  ;;  %330 = vst [vmem:[#allocation3 + $0x10] sm:$0x30] %v322_v19  ;;  %v1512_v35 = vrot.slane %v8252_v61, %v8509_v10  ;;  %v1516_v19 = vrot.slane %v8252_v61, %v8511_v11 }
 0x18f   :  { %v408_v42 = vpop.permute.xlu1 %407 }
 0x190   :  { %v418_v60 = vsel %vm417_vm4, %v408_v42, %v8980_v56  ;;  %v9132_v42 = vld [vmem:[#allocation2] sm:$0xff] }
 0x191   :  { %426 = vst [vmem:[#allocation3] sm:$0xc0] %v418_v60 }
 0x193   :  { %v702_v52 = vpop.permute.xlu1 %701 }
 0x194   :  { %v709_v0 = vsel %vm707_vm11, %v8944_v20, %v702_v52  ;;  %v710_v62 = vsel %vm707_vm11, %v702_v52, %v8991_v34 }
 0x195   :  { %717 = vst [vmem:[#allocation3 + $0x28] sm:$0x30] %v709_v0  ;;  %718 = vst [vmem:[#allocation3 + $0x30] sm:$0x30] %v710_v62  ;;  %v1517_v0 = vcombine.low %v1504_v18, %v1508_v58 }
 0x197   :  { %v796_v4 = vpop.permute.xlu1 %795 }
 0x198   :  { %v806_v53 = vsel %vm805_vm9, %v796_v4, %v8995_v40  ;;  %v1518_v4 = vcombine.low %v1512_v35, %v1516_v19  ;;  %v8254_v19 = vld [vmem:[%s11686_s7 + $0x41] ss:$8 sm:$0xf] }
 0x199   :  { %814 = vst [vmem:[#allocation3 + $0x20] sm:$0xc0] %v806_v53  ;;  %v1400_v53 = vld [vmem:[#allocation2 + $0x8] sm:$0x3] }
 0x19b   :  { %v1090_v55 = vpop.permute.xlu1 %1089 }
 0x19c   :  { %v1097_v1 = vsel %vm1095_vm3, %v8960_v24, %v1090_v55  ;;  %v1098_v56 = vsel %vm1095_vm3, %v1090_v55, %v9007_v28 }
 0x19d   :  { %1105 = vst [vmem:[#allocation3 + $0x48] sm:$0x30] %v1097_v1  ;;  %1106 = vst [vmem:[#allocation3 + $0x50] sm:$0x30] %v1098_v56  ;;  %v1525_v56 = vrot.slane %v1517_v0, %v8513_v12 }
 0x19f   :  { %v1184_v20 = vpop.permute.xlu1 %1183 }
 0x1a0   :  { %v1194_v34 = vsel %vm1193_vm5, %v1184_v20, %v9011_v44 }
 0x1a1   :  { %1202 = vst [vmem:[#allocation3 + $0x40] sm:$0xc0] %v1194_v34 }
 0x1ea   :  { %v1280_v2 = vpop.permute.xlu1 %1279 }
 0x1ec   :  { %v1282_v13 = vpop.permute.xlu0 %1281 }
 0x1ed   :  { %v1290_v40 = vsel %vm1289_vm1, %v1280_v2, %v1282_v13 }
 0x1ee   :  { %1298 = vst [vmem:[#allocation3 + $0x60] sm:$0x3] %v1290_v40  ;;  %v1284_v57 = vpop.permute.xlu1 %1283 }
 0x1ef   :  { %v1291_v17 = vsel %vm1289_vm1, %v1282_v13, %v1284_v57  ;;  %v1532_v13 = vrot.slane %v1518_v4, %v8513_v12  ;;  %v1702_v4 = vrot.slane %v8254_v19, %v8507_v9 }
 0x1f0   :  { %1299 = vst [vmem:[#allocation3 + $0x68] sm:$0x3] %v1291_v17  ;;  %v1286_v24 = vpop.permute.xlu0 %1285 }
 0x1f1   :  { %v1292_v28 = vsel %vm1289_vm1, %v1284_v57, %v1286_v24  ;;  %v1533_v57 = vcombine.low %v1525_v56, %v1532_v13 }
 0x1f2   :  { %1300 = vst [vmem:[#allocation3 + $0x70] sm:$0x3] %v1292_v28  ;;  %v1288_v22 = vpop.permute.xlu1 %1287 }
 0x1f3   :  { %v1293_v47 = vsel %vm1289_vm1, %v1286_v24, %v1288_v22 }
 0x1f4   :  { %1301 = vst [vmem:[#allocation3 + $0x78] sm:$0x3] %v1293_v47  ;;  %v1341_v44 = vpop.permute.xlu0 %1340 }
 0x1f5   :  { %v1342_v26 = vrot.slane %v1341_v44, 6 }
 0x1f7   :  { %v1344_v5 = vsel %vm11726_vm2, %v1342_v26, %v1341_v44  ;;  %v1348_v29 = vmul.f32 %v1342_v26, %v1303_v33  ;;  %vm11737_vm2 = vcmask 236544   ;;  %v8253_v26 = vld [vmem:[%s11686_s7 + $0x40] ss:$8 sm:$0xf] }
 0x1f8   :  { %v1347_v54 = vmul.f32 %v1344_v5, %v8632_v16  ;;  %v1602_v63 = vrot.slane %v8253_v26, %v8505_v8  ;;  %v1606_v41 = vrot.slane %v8253_v26, %v8507_v9 }
 0x1f9   :  { %v1368_v16 = vcombine.low %v1348_v29, %v1348_v29  ;;  %v1614_v29 = vrot.slane %v8253_v26, %v8511_v11 }
 0x1fa   :  { %v1351_v49 = vcombine.low %v1347_v54, %v1347_v54  ;;  %v1365_v39 = vrot.slane %v1347_v54, %v8513_v12 }
 0x1fb   :  { %v1375_v50 = vrot.slane %v1368_v16, %v8513_v12 }
 0x1fc   :  { %v1358_v37 = vrot.slane %v1351_v49, %v8513_v12  ;;  %v1367_v46 = vcombine.high %v1365_v39, %v1365_v39  ;;  %v1610_v49 = vrot.slane %v8253_v26, %v8509_v10 }
 0x1fe   :  { %1376 = vrot.lane.b32.xlu1 %v1358_v37, %s11753_s29  ;;  %v1366_v15 = vcombine.high %v1358_v37, %v1358_v37  ;;  %v1497_v37 = vld [vmem:[#allocation2 + $0x8] sm:$0x3]  ;;  %v1616_v23 = vcombine.low %v1610_v49, %v1614_v29 }
 0x200   :  { %1378 = vrot.lane.b32.xlu0 %v1366_v15, %s11753_s29 }
 0x202   :  { %1380 = vrot.lane.b32.xlu1 %v1365_v39, %s11753_s29  ;;  %v1615_v39 = vcombine.low %v1602_v63, %v1606_v41 }
 0x204   :  { %1382 = vrot.lane.b32.xlu0 %v1367_v46, %s11753_s29 }
 0x206   :  { %1384 = vrot.lane.b32.xlu1 %v1375_v50, %s11753_s29  ;;  %v1623_v50 = vrot.slane %v1615_v39, %v8513_v12  ;;  %s11761_s29 = smov 114  }
 0x208   :  { %1437 = vrot.lane.b32.xlu0 %v1436_v51, %s11733_s26  ;;  %s11748_s26 = smov 111  }
 0x270   :  { %v1377_v27 = vpop.permute.xlu1 %1376 }
 0x272   :  { %v1379_v30 = vpop.permute.xlu0 %1378 }
 0x273   :  { %v1387_v6 = vsel %vm11737_vm2, %v1377_v27, %v1379_v30 }
 0x274   :  { %1395 = vst [vmem:[#allocation3 + $0x60] sm:$0xc] %v1387_v6  ;;  %v1381_v14 = vpop.permute.xlu1 %1380  ;;  %v1630_v6 = vrot.slane %v1616_v23, %v8513_v12 }
 0x275   :  { %v1388_v25 = vsel %vm11737_vm2, %v1379_v30, %v1381_v14 }
 0x276   :  { %1396 = vst [vmem:[#allocation3 + $0x68] sm:$0xc] %v1388_v25  ;;  %v1383_v36 = vpop.permute.xlu0 %1382  ;;  %v1631_v25 = vcombine.low %v1623_v50, %v1630_v6  ;;  %v1691_v50 = vld [vmem:[#allocation2 + $0x8] sm:$0x3] }
 0x277   :  { %v1389_v48 = vsel %vm11737_vm2, %v1381_v14, %v1383_v36 }
 0x278   :  { %1397 = vst [vmem:[#allocation3 + $0x70] sm:$0xc] %v1389_v48  ;;  %v1385_v32 = vpop.permute.xlu1 %1384 }
 0x279   :  { %v1390_v3 = vsel %vm11737_vm2, %v1383_v36, %v1385_v32  ;;  %vm11738_vm2 = vcmask 900096  }
 0x27a   :  { %1398 = vst [vmem:[#allocation3 + $0x78] sm:$0xc] %v1390_v3  ;;  %v1438_v59 = vpop.permute.xlu0 %1437 }
 0x27b   :  { %v1439_v60 = vrot.slane %v1438_v59, 6 }
 0x27d   :  { %v1441_v52 = vsel %vm11732_vm6, %v1439_v60, %v1438_v59  ;;  %v1445_v20 = vmul.f32 %v1439_v60, %v1400_v53  ;;  %vm11743_vm6 = vcmask 154624   ;;  %v1706_v53 = vrot.slane %v8254_v19, %v8509_v10 }
 0x27e   :  { %v1444_v62 = vmul.f32 %v1441_v52, %v9132_v42 }
 0x27f   :  { %v1471_v17 = vrot.slane %v1445_v20, %v8513_v12 }
 0x280   :  { %v1455_v55 = vrot.slane %v1444_v62, %v8513_v12  ;;  %v1448_v1 = vcombine.high %v1444_v62, %v1444_v62  ;;  %v1698_v62 = vrot.slane %v8254_v19, %v8505_v8 }
 0x281   :  { %v1472_v24 = vcombine.low %v1471_v17, %v1471_v17 }
 0x282   :  { %1475 = vrot.lane.b32.xlu0 %v1455_v55, %s11765_s28  ;;  %v1463_v34 = vcombine.low %v1455_v55, %v1455_v55  ;;  %v1462_v2 = vrot.slane %v1448_v1, %v8513_v12  ;;  %v1710_v55 = vrot.slane %v8254_v19, %v8511_v11  ;;  %v1711_v13 = vcombine.low %v1698_v62, %v1702_v4  ;;  %v8256_v62 = vld [vmem:[%s11686_s7 + $0x43] ss:$8 sm:$0xf] }
 0x284   :  { %1473 = vrot.lane.b32.xlu1 %v1463_v34, %s11765_s28  ;;  %v1464_v40 = vcombine.low %v1462_v2, %v1462_v2 }
 0x286   :  { %1479 = vrot.lane.b32.xlu0 %v1462_v2, %s11765_s28 }
 0x288   :  { %1477 = vrot.lane.b32.xlu1 %v1464_v40, %s11765_s28  ;;  %v1712_v40 = vcombine.low %v1706_v53, %v1710_v55 }
 0x28a   :  { %1534 = vrot.lane.b32.xlu0 %v1533_v57, %s11739_s13  ;;  %v1595_v57 = vld [vmem:[#allocation2 + $0x8] sm:$0x3]  ;;  %s11746_s13 = smov 112  }
 0x28c   :  { %1481 = vrot.lane.b32.xlu1 %v1472_v24, %s11765_s28  ;;  %s11776_s28 = smov 13  }
 0x2f4   :  { %v1476_v28 = vpop.permute.xlu0 %1475 }
 0x2f6   :  { %v1474_v22 = vpop.permute.xlu1 %1473 }
 0x2f7   :  { %v1484_v47 = vsel %vm11743_vm6, %v1474_v22, %v1476_v28  ;;  %v1719_v22 = vrot.slane %v1711_v13, %v8513_v12 }
 0x2f8   :  { %1492 = vst [vmem:[#allocation3 + $0x60] sm:$0x30] %v1484_v47  ;;  %v1480_v44 = vpop.permute.xlu0 %1479  ;;  %v1726_v47 = vrot.slane %v1712_v40, %v8513_v12 }
 0x2fa   :  { %v1478_v7 = vpop.permute.xlu1 %1477  ;;  %v1727_v26 = vcombine.low %v1719_v22, %v1726_v47 }
 0x2fb   :  { %v1485_v5 = vsel %vm11743_vm6, %v1476_v28, %v1478_v7  ;;  %v1486_v43 = vsel %vm11743_vm6, %v1478_v7, %v1480_v44 }
 0x2fc   :  { %1493 = vst [vmem:[#allocation3 + $0x68] sm:$0x30] %v1485_v5  ;;  %1494 = vst [vmem:[#allocation3 + $0x70] sm:$0x30] %v1486_v43  ;;  %v1535_v54 = vpop.permute.xlu0 %1534 }
 0x2fd   :  { %v1536_v21 = vrot.slane %v1535_v54, 6 }
 0x2fe   :  { %v1482_v33 = vpop.permute.xlu1 %1481 }
 0x2ff   :  { %v1538_v45 = vsel %vm11738_vm2, %v1536_v21, %v1535_v54  ;;  %v1487_v38 = vsel %vm11743_vm6, %v1480_v44, %v1482_v33  ;;  %v1542_v16 = vmul.f32 %v1536_v21, %v1497_v37  ;;  %vm11745_vm2 = vcmask 146432  }
 0x300   :  { %v1541_v15 = vmul.f32 %v1538_v45, %v9132_v42  ;;  %1495 = vst [vmem:[#allocation3 + $0x78] sm:$0x30] %v1487_v38  ;;  %vm11744_vm6 = vcmask 908288   ;;  %v8255_v45 = vld [vmem:[%s11686_s7 + $0x42] ss:$8 sm:$0xf] }
 0x301   :  { %v1562_v51 = vcombine.low %v1542_v16, %v1542_v16  ;;  %v1795_v39 = vrot.slane %v8255_v45, %v8505_v8  ;;  %v1803_v23 = vrot.slane %v8255_v45, %v8509_v10 }
 0x302   :  { %v1545_v31 = vcombine.low %v1541_v15, %v1541_v15  ;;  %v1559_v30 = vrot.slane %v1541_v15, %v8513_v12 }
 0x303   :  { %v1569_v36 = vrot.slane %v1562_v51, %v8513_v12 }
 0x304   :  { %v1552_v46 = vrot.slane %v1545_v31, %v8513_v12  ;;  %v1561_v14 = vcombine.low %v1559_v30, %v1559_v30  ;;  %v1799_v31 = vrot.slane %v8255_v45, %v8507_v9 }
 0x305   :  { %v1570_v61 = vcombine.low %v1569_v36, %v1569_v36 }
 0x306   :  { %1573 = vrot.lane.b32.xlu0 %v1552_v46, %s11766_s14  ;;  %v1560_v27 = vcombine.low %v1552_v46, %v1552_v46  ;;  %v1807_v46 = vrot.slane %v8255_v45, %v8511_v11  ;;  %v1808_v6 = vcombine.low %v1795_v39, %v1799_v31 }
 0x308   :  { %1571 = vrot.lane.b32.xlu1 %v1560_v27, %s11766_s14 }
 0x30a   :  { %1577 = vrot.lane.b32.xlu0 %v1559_v30, %s11766_s14 }
 0x30c   :  { %1575 = vrot.lane.b32.xlu1 %v1561_v14, %s11766_s14  ;;  %v1809_v14 = vcombine.low %v1803_v23, %v1807_v46 }
 0x30e   :  { %1632 = vrot.lane.b32.xlu0 %v1631_v25, %s11748_s26  ;;  %s11758_s26 = smov 16  }
 0x310   :  { %1579 = vrot.lane.b32.xlu1 %v1570_v61, %s11766_s14  ;;  %s11828_s14 = smov 29  }
 0x378   :  { %v1574_v48 = vpop.permute.xlu0 %1573 }
 0x37a   :  { %v1572_v32 = vpop.permute.xlu1 %1571 }
 0x37b   :  { %v1582_v3 = vsel %vm11745_vm2, %v1572_v32, %v1574_v48  ;;  %v1823_v32 = vrot.slane %v1809_v14, %v8513_v12 }
 0x37c   :  { %1590 = vst [vmem:[#allocation3 + $0x60] sm:$0xc0] %v1582_v3  ;;  %v1578_v18 = vpop.permute.xlu0 %1577 }
 0x37e   :  { %v1576_v58 = vpop.permute.xlu1 %1575 }
 0x37f   :  { %v1583_v59 = vsel %vm11745_vm2, %v1574_v48, %v1576_v58  ;;  %v1584_v35 = vsel %vm11745_vm2, %v1576_v58, %v1578_v18  ;;  %v1816_v48 = vrot.slane %v1808_v6, %v8513_v12 }
 0x380   :  { %1591 = vst [vmem:[#allocation3 + $0x68] sm:$0xc0] %v1583_v59  ;;  %1592 = vst [vmem:[#allocation3 + $0x70] sm:$0xc0] %v1584_v35  ;;  %v1633_v60 = vpop.permute.xlu0 %1632 }
 0x381   :  { %v1634_v52 = vrot.slane %v1633_v60, 6  ;;  %v1824_v58 = vcombine.low %v1816_v48, %v1823_v32 }
 0x382   :  { %v1580_v0 = vpop.permute.xlu1 %1579 }
 0x383   :  { %v1636_v1 = vsel %vm11744_vm6, %v1634_v52, %v1633_v60  ;;  %v1585_v56 = vsel %vm11745_vm2, %v1578_v18, %v1580_v0  ;;  %v1640_v28 = vmul.f32 %v1634_v52, %v1595_v57  ;;  %vm1677_vm6 = vcmask 138240  }
 0x384   :  { %v1639_v20 = vmul.f32 %v1636_v1, %v9132_v42  ;;  %1593 = vst [vmem:[#allocation3 + $0x78] sm:$0xc0] %v1585_v56  ;;  %vm11750_vm2 = vcmask 916480   ;;  %v1892_v1 = vrot.slane %v8256_v62, %v8505_v8  ;;  %v1896_v56 = vrot.slane %v8256_v62, %v8507_v9 }
 0x385   :  { %v1666_v7 = vrot.slane %v1640_v28, %v8513_v12  ;;  %v1788_v28 = vld [vmem:[#allocation2 + $0x8] sm:$0x3] }
 0x386   :  { %v1643_v34 = vcombine.high %v1639_v20, %v1639_v20  ;;  %v1650_v2 = vrot.slane %v1639_v20, %v8513_v12  ;;  %v1905_v57 = vcombine.low %v1892_v1, %v1896_v56 }
 0x388   :  { %v1658_v17 = vcombine.high %v1650_v2, %v1650_v2  ;;  %1667 = vrot.lane.b32.xlu1 %v1650_v2, %s11780_s19  ;;  %v1657_v24 = vrot.slane %v1643_v34, %v8513_v12  ;;  %v1900_v34 = vrot.slane %v8256_v62, %v8509_v10  ;;  %v1904_v2 = vrot.slane %v8256_v62, %v8511_v11 }
 0x38a   :  { %1669 = vrot.lane.b32.xlu0 %v1658_v17, %s11780_s19  ;;  %v1659_v44 = vcombine.high %v1657_v24, %v1657_v24 }
 0x38c   :  { %1671 = vrot.lane.b32.xlu1 %v1657_v24, %s11780_s19  ;;  %v1906_v24 = vcombine.low %v1900_v34, %v1904_v2 }
 0x38e   :  { %1673 = vrot.lane.b32.xlu0 %v1659_v44, %s11780_s19  ;;  %v1913_v44 = vrot.slane %v1905_v57, %v8513_v12 }
 0x390   :  { %1675 = vrot.lane.b32.xlu1 %v1666_v7, %s11780_s19 }
 0x392   :  { %1728 = vrot.lane.b32.xlu0 %v1727_v26, %s11746_s13  ;;  %s11756_s13 = smov 113  }
 0x3fa   :  { %v1668_v5 = vpop.permute.xlu1 %1667 }
 0x3fc   :  { %v1670_v43 = vpop.permute.xlu0 %1669 }
 0x3fd   :  { %v1678_v54 = vsel %vm1677_vm6, %v1668_v5, %v1670_v43 }
 0x3fe   :  { %1686 = vst [vmem:[#allocation3 + $0x80] sm:$0x3] %v1678_v54  ;;  %v1672_v21 = vpop.permute.xlu1 %1671 }
 0x3ff   :  { %v1679_v63 = vsel %vm1677_vm6, %v1670_v43, %v1672_v21  ;;  %v1920_v43 = vrot.slane %v1906_v24, %v8513_v12 }
 0x400   :  { %1687 = vst [vmem:[#allocation3 + $0x88] sm:$0x3] %v1679_v63  ;;  %v1674_v41 = vpop.permute.xlu0 %1673 }
 0x401   :  { %v1680_v33 = vsel %vm1677_vm6, %v1672_v21, %v1674_v41  ;;  %v1921_v63 = vcombine.low %v1913_v44, %v1920_v43  ;;  %v8286_v44 = vld [vmem:[%s11686_s7 + $0xa7] ss:$8 sm:$0xf] }
 0x402   :  { %1688 = vst [vmem:[#allocation3 + $0x90] sm:$0x3] %v1680_v33  ;;  %v1676_v49 = vpop.permute.xlu1 %1675 }
 0x403   :  { %v1681_v29 = vsel %vm1677_vm6, %v1674_v41, %v1676_v49 }
 0x404   :  { %1689 = vst [vmem:[#allocation3 + $0x98] sm:$0x3] %v1681_v29  ;;  %v1729_v37 = vpop.permute.xlu0 %1728 }
 0x405   :  { %v1730_v38 = vrot.slane %v1729_v37, 6 }
 0x407   :  { %v1732_v15 = vsel %vm11750_vm2, %v1730_v38, %v1729_v37  ;;  %v1736_v27 = vmul.f32 %v1730_v38, %v1691_v50  ;;  %vm11760_vm2 = vcmask 130048   ;;  %v8257_v38 = vld [vmem:[%s11686_s7 + $0x44] ss:$8 sm:$0xf] }
 0x408   :  { %v1735_v16 = vmul.f32 %v1732_v15, %v9132_v42  ;;  %v1990_v23 = vrot.slane %v8257_v38, %v8505_v8  ;;  %v1994_v46 = vrot.slane %v8257_v38, %v8507_v9 }
 0x409   :  { %v1756_v61 = vcombine.low %v1736_v27, %v1736_v27  ;;  %v2002_v27 = vrot.slane %v8257_v38, %v8511_v11 }
 0x40a   :  { %v1739_v51 = vcombine.low %v1735_v16, %v1735_v16  ;;  %v1753_v25 = vrot.slane %v1735_v16, %v8513_v12 }
 0x40b   :  { %v1763_v18 = vrot.slane %v1756_v61, %v8513_v12 }
 0x40c   :  { %v1746_v30 = vrot.slane %v1739_v51, %v8513_v12  ;;  %v1755_v3 = vcombine.high %v1753_v25, %v1753_v25  ;;  %v1998_v51 = vrot.slane %v8257_v38, %v8509_v10 }
 0x40e   :  { %1764 = vrot.lane.b32.xlu1 %v1746_v30, %s11758_s26  ;;  %v1754_v36 = vcombine.high %v1746_v30, %v1746_v30  ;;  %v1885_v30 = vld [vmem:[#allocation2 + $0x8] sm:$0x3]  ;;  %v2004_v32 = vcombine.low %v1998_v51, %v2002_v27 }
 0x410   :  { %1766 = vrot.lane.b32.xlu0 %v1754_v36, %s11758_s26  ;;  %v2003_v36 = vcombine.low %v1990_v23, %v1994_v46  ;;  %v8282_v46 = vld [vmem:[%s11686_s7 + $0xa3] ss:$8 sm:$0xf] }
 0x412   :  { %1768 = vrot.lane.b32.xlu1 %v1753_v25, %s11758_s26 }
 0x414   :  { %1770 = vrot.lane.b32.xlu0 %v1755_v3, %s11758_s26 }
 0x416   :  { %1772 = vrot.lane.b32.xlu1 %v1763_v18, %s11758_s26  ;;  %v2011_v18 = vrot.slane %v2003_v36, %v8513_v12  ;;  %s11774_s26 = smov 14  }
 0x418   :  { %1825 = vrot.lane.b32.xlu0 %v1824_v58, %s11756_s13  ;;  %s11770_s13 = smov 115  }
 0x480   :  { %v1765_v59 = vpop.permute.xlu1 %1764 }
 0x482   :  { %v1767_v35 = vpop.permute.xlu0 %1766 }
 0x483   :  { %v1775_v19 = vsel %vm11760_vm2, %v1765_v59, %v1767_v35 }
 0x484   :  { %1783 = vst [vmem:[#allocation3 + $0x80] sm:$0xc] %v1775_v19  ;;  %v1769_v60 = vpop.permute.xlu1 %1768  ;;  %v2018_v19 = vrot.slane %v2004_v32, %v8513_v12 }
 0x485   :  { %v1776_v52 = vsel %vm11760_vm2, %v1767_v35, %v1769_v60 }
 0x486   :  { %1784 = vst [vmem:[#allocation3 + $0x88] sm:$0xc] %v1776_v52  ;;  %v1771_v0 = vpop.permute.xlu0 %1770  ;;  %v2019_v52 = vcombine.low %v2011_v18, %v2018_v19  ;;  %v4157_v19 = vrot.slane %v8282_v46, %v8507_v9 }
 0x487   :  { %v1777_v4 = vsel %vm11760_vm2, %v1769_v60, %v1771_v0 }
 0x488   :  { %1785 = vst [vmem:[#allocation3 + $0x90] sm:$0xc] %v1777_v4  ;;  %v1773_v53 = vpop.permute.xlu1 %1772  ;;  %v8287_v4 = vld [vmem:[%s11686_s7 + $0xc0] ss:$8 sm:$0xf] }
 0x489   :  { %v1778_v55 = vsel %vm11760_vm2, %v1771_v0, %v1773_v53  ;;  %vm11768_vm2 = vcmask 932864   ;;  %v8284_v53 = vld [vmem:[%s11686_s7 + $0xa5] ss:$8 sm:$0xf]  ;;  %v4633_v1 = vrot.slane %v8287_v4, %v8507_v9  ;;  %v4637_v56 = vrot.slane %v8287_v4, %v8509_v10 }
 0x48a   :  { %1786 = vst [vmem:[#allocation3 + $0x98] sm:$0xc] %v1778_v55  ;;  %v1826_v20 = vpop.permute.xlu0 %1825  ;;  %v4629_v55 = vrot.slane %v8287_v4, %v8505_v8  ;;  %v4343_v34 = vrot.slane %v8284_v53, %v8505_v8  ;;  %v4347_v2 = vrot.slane %v8284_v53, %v8507_v9 }
 0x48b   :  { %v1827_v13 = vrot.slane %v1826_v20, 6 }
 0x48d   :  { %v1829_v40 = vsel %vm11755_vm0, %v1827_v13, %v1826_v20  ;;  %v1833_v7 = vmul.f32 %v1827_v13, %v1788_v28  ;;  %vm11769_vm0 = vcmask 121856   ;;  %v4641_v20 = vrot.slane %v8287_v4, %v8511_v11 }
 0x48e   :  { %v1832_v17 = vmul.f32 %v1829_v40, %v9132_v42  ;;  %v4351_v13 = vrot.slane %v8284_v53, %v8509_v10  ;;  %v4355_v40 = vrot.slane %v8284_v53, %v8511_v11  ;;  %v4356_v28 = vcombine.low %v4343_v34, %v4347_v2 }
 0x48f   :  { %v1859_v54 = vrot.slane %v1833_v7, %v8513_v12  ;;  %v4643_v24 = vcombine.low %v4637_v56, %v4641_v20  ;;  %v1983_v56 = vld [vmem:[#allocation2 + $0x8] sm:$0x3]  ;;  %v4161_v20 = vrot.slane %v8282_v46, %v8509_v10  ;;  %v4165_v34 = vrot.slane %v8282_v46, %v8511_v11 }
 0x490   :  { %v1836_v22 = vcombine.high %v1832_v17, %v1832_v17  ;;  %v1843_v47 = vrot.slane %v1832_v17, %v8513_v12  ;;  %v4642_v17 = vcombine.low %v4629_v55, %v4633_v1 }
 0x491   :  { %v1860_v41 = vcombine.low %v1859_v54, %v1859_v54  ;;  %v4657_v43 = vrot.slane %v4643_v24, %v8513_v12  ;;  %v4364_v54 = vrot.slane %v4356_v28, %v8513_v12  ;;  %v8279_v28 = vld [vmem:[%s11686_s7 + $0xa0] ss:$8 sm:$0xf] }
 0x492   :  { %1863 = vrot.lane.b32.xlu0 %v1843_v47, %s11763_s27  ;;  %v1851_v26 = vcombine.low %v1843_v47, %v1843_v47  ;;  %v1850_v5 = vrot.slane %v1836_v22, %v8513_v12  ;;  %v4357_v47 = vcombine.low %v4351_v13, %v4355_v40 }
 0x494   :  { %1861 = vrot.lane.b32.xlu1 %v1851_v26, %s11763_s27  ;;  %v1852_v21 = vcombine.low %v1850_v5, %v1850_v5 }
 0x496   :  { %1867 = vrot.lane.b32.xlu0 %v1850_v5, %s11763_s27  ;;  %v4650_v5 = vrot.slane %v4642_v17, %v8513_v12 }
 0x498   :  { %1865 = vrot.lane.b32.xlu1 %v1852_v21, %s11763_s27  ;;  %v4533_v21 = vrot.slane %v8286_v44, %v8505_v8 }
 0x49a   :  { %1922 = vrot.lane.b32.xlu0 %v1921_v63, %s11761_s29  ;;  %v8258_v63 = vld [vmem:[%s11686_s7 + $0x45] ss:$8 sm:$0xf]  ;;  %s11835_s29 = smov 80  }
 0x49b   :  { %v2094_v51 = vrot.slane %v8258_v63, %v8509_v10  ;;  %v2098_v27 = vrot.slane %v8258_v63, %v8511_v11 }
 0x49c   :  { %1869 = vrot.lane.b32.xlu1 %v1860_v41, %s11763_s27  ;;  %s11827_s27 = smov 19  }
 0x504   :  { %v1864_v33 = vpop.permute.xlu0 %1863 }
 0x506   :  { %v1862_v49 = vpop.permute.xlu1 %1861 }
 0x507   :  { %v1872_v29 = vsel %vm11769_vm0, %v1862_v49, %v1864_v33  ;;  %v4537_v49 = vrot.slane %v8286_v44, %v8507_v9 }
 0x508   :  { %1880 = vst [vmem:[#allocation3 + $0x80] sm:$0x30] %v1872_v29  ;;  %v1868_v37 = vpop.permute.xlu0 %1867  ;;  %v4541_v29 = vrot.slane %v8286_v44, %v8509_v10 }
 0x50a   :  { %v1866_v45 = vpop.permute.xlu1 %1865 }
 0x50b   :  { %v1873_v15 = vsel %vm11769_vm0, %v1864_v33, %v1866_v45  ;;  %v1874_v39 = vsel %vm11769_vm0, %v1866_v45, %v1868_v37  ;;  %v4371_v33 = vrot.slane %v4357_v47, %v8513_v12 }
 0x50c   :  { %1881 = vst [vmem:[#allocation3 + $0x88] sm:$0x30] %v1873_v15  ;;  %1882 = vst [vmem:[#allocation3 + $0x90] sm:$0x30] %v1874_v39  ;;  %v1923_v16 = vpop.permute.xlu0 %1922 }
 0x50d   :  { %v1924_v31 = vrot.slane %v1923_v16, 6  ;;  %v8280_v15 = vld [vmem:[%s11686_s7 + $0xa1] ss:$8 sm:$0xf] }
 0x50e   :  { %v1870_v50 = vpop.permute.xlu1 %1869  ;;  %v3963_v36 = vrot.slane %v8280_v15, %v8505_v8  ;;  %v3971_v18 = vrot.slane %v8280_v15, %v8509_v10 }
 0x50f   :  { %v1926_v6 = vsel %vm11768_vm2, %v1924_v31, %v1923_v16  ;;  %v1875_v14 = vsel %vm11769_vm0, %v1868_v37, %v1870_v50  ;;  %v1930_v61 = vmul.f32 %v1924_v31, %v1885_v30  ;;  %vm11778_vm2 = vcmask 113664  }
 0x510   :  { %v1929_v25 = vmul.f32 %v1926_v6, %v9132_v42  ;;  %1883 = vst [vmem:[#allocation3 + $0x98] sm:$0x30] %v1875_v14  ;;  %v4545_v37 = vrot.slane %v8286_v44, %v8511_v11  ;;  %vm11777_vm0 = vcmask 941056   ;;  %v9301_v16 = vcombine.low %v4650_v5, %v4657_v43 }
 0x511   :  { %v1950_v59 = vcombine.low %v1930_v61, %v1930_v61  ;;  %v2086_v31 = vrot.slane %v8258_v63, %v8505_v8  ;;  %v2090_v50 = vrot.slane %v8258_v63, %v8507_v9  ;;  %v9310_v6 = vcombine.low %v4364_v54, %v4371_v33  ;;  %v8283_v61 = vld [vmem:[%s11686_s7 + $0xa4] ss:$8 sm:$0xf] }
 0x512   :  { %v1933_v48 = vcombine.low %v1929_v25, %v1929_v25  ;;  %v1947_v58 = vrot.slane %v1929_v25, %v8513_v12  ;;  %v9312_v14 = vcombine.low %v4533_v21, %v4537_v49  ;;  %v9314_v25 = vcombine.low %v4541_v29, %v4545_v37  ;;  %v8276_v29 = vld [vmem:[%s11686_s7 + $0x85] ss:$8 sm:$0xf] }
 0x513   :  { %v1957_v0 = vrot.slane %v1950_v59, %v8513_v12  ;;  %v3975_v59 = vrot.slane %v8280_v15, %v8511_v11  ;;  %v4253_v4 = vrot.slane %v8283_v61, %v8507_v9  ;;  %v4257_v55 = vrot.slane %v8283_v61, %v8509_v10 }
 0x514   :  { %v1940_v3 = vrot.slane %v1933_v48, %v8513_v12  ;;  %v1949_v60 = vcombine.low %v1947_v58, %v1947_v58  ;;  %v4261_v1 = vrot.slane %v8283_v61, %v8511_v11  ;;  %v4167_v21 = vcombine.low %v4161_v20, %v4165_v34 }
 0x515   :  { %v1958_v62 = vcombine.low %v1957_v0, %v1957_v0  ;;  %v2100_v0 = vcombine.low %v2094_v51, %v2098_v27  ;;  %v3977_v47 = vcombine.low %v3971_v18, %v3975_v59  ;;  %v3873_v33 = vrot.slane %v8279_v28, %v8507_v9 }
 0x516   :  { %1961 = vrot.lane.b32.xlu0 %v1940_v3, %s11774_s26  ;;  %v1948_v35 = vcombine.low %v1940_v3, %v1940_v3  ;;  %v3967_v3 = vrot.slane %v8280_v15, %v8507_v9  ;;  %v4263_v54 = vcombine.low %v4257_v55, %v4261_v1  ;;  %v4554_v15 = vrot.slane %v9312_v14, %v8513_v12 }
 0x517   :  { %v2114_v5 = vrot.slane %v2100_v0, %v8513_v12 }
 0x518   :  { %1959 = vrot.lane.b32.xlu1 %v1948_v35, %s11774_s26  ;;  %v4153_v35 = vrot.slane %v8282_v46, %v8505_v8  ;;  %v4277_v27 = vrot.slane %v4263_v54, %v8513_v12 }
 0x51a   :  { %1965 = vrot.lane.b32.xlu0 %v1947_v58, %s11774_s26  ;;  %v4166_v44 = vcombine.low %v4153_v35, %v4157_v19 }
 0x51c   :  { %1963 = vrot.lane.b32.xlu1 %v1949_v60, %s11774_s26  ;;  %v8285_v60 = vld [vmem:[%s11686_s7 + $0xa6] ss:$8 sm:$0xf]  ;;  %v4174_v14 = vrot.slane %v4166_v44, %v8513_v12 }
 0x51d   :  { %v4438_v2 = vrot.slane %v8285_v60, %v8505_v8  ;;  %v4442_v13 = vrot.slane %v8285_v60, %v8507_v9  ;;  %v4446_v17 = vrot.slane %v8285_v60, %v8509_v10  ;;  %v4450_v24 = vrot.slane %v8285_v60, %v8511_v11 }
 0x51e   :  { %2020 = vrot.lane.b32.xlu0 %v2019_v52, %s11770_s13  ;;  %v2099_v52 = vcombine.low %v2086_v31, %v2090_v50  ;;  %s11772_s13 = smov 125  }
 0x51f   :  { %v4451_v63 = vcombine.low %v4438_v2, %v4442_v13  ;;  %v4452_v37 = vcombine.low %v4446_v17, %v4450_v24 }
 0x520   :  { %1967 = vrot.lane.b32.xlu1 %v1958_v62, %s11774_s26  ;;  %v4249_v62 = vrot.slane %v8283_v61, %v8505_v8  ;;  %v3587_v61 = vrot.slane %v8276_v29, %v8507_v9  ;;  %s11832_s26 = smov 16  }
 0x522   :  { %v4262_v43 = vcombine.low %v4249_v62, %v4253_v4  ;;  %v3591_v62 = vrot.slane %v8276_v29, %v8509_v10 }
 0x524   :  { %v4270_v51 = vrot.slane %v4262_v43, %v8513_v12 }
 0x526   :  { %v4278_v4 = vcombine.low %v4270_v51, %v4277_v27 }
 0x588   :  { %v1962_v57 = vpop.permute.xlu0 %1961 }
 0x58a   :  { %v1960_v22 = vpop.permute.xlu1 %1959 }
 0x58b   :  { %v1970_v7 = vsel %vm11778_vm2, %v1960_v22, %v1962_v57  ;;  %v3976_v22 = vcombine.low %v3963_v36, %v3967_v3  ;;  %v3583_v36 = vrot.slane %v8276_v29, %v8505_v8  ;;  %v4466_v3 = vrot.slane %v4452_v37, %v8513_v12 }
 0x58c   :  { %1978 = vst [vmem:[#allocation3 + $0x80] sm:$0xc0] %v1970_v7  ;;  %v1966_v26 = vpop.permute.xlu0 %1965  ;;  %v2107_v7 = vrot.slane %v2099_v52, %v8513_v12 }
 0x58d   :  { %v3984_v31 = vrot.slane %v3976_v22, %v8513_v12  ;;  %v9392_v55 = vcombine.low %v3583_v36, %v3587_v61 }
 0x58e   :  { %v1964_v41 = vpop.permute.xlu1 %1963  ;;  %v2115_v50 = vcombine.low %v2107_v7, %v2114_v5 }
 0x58f   :  { %v1971_v45 = vsel %vm11778_vm2, %v1962_v57, %v1964_v41  ;;  %v1972_v38 = vsel %vm11778_vm2, %v1964_v41, %v1966_v26  ;;  %v3869_v41 = vrot.slane %v8279_v28, %v8505_v8  ;;  %v3604_v61 = vrot.slane %v9392_v55, %v8513_v12 }
 0x590   :  { %1979 = vst [vmem:[#allocation3 + $0x88] sm:$0xc0] %v1971_v45  ;;  %1980 = vst [vmem:[#allocation3 + $0x90] sm:$0xc0] %v1972_v38  ;;  %v2021_v39 = vpop.permute.xlu0 %2020  ;;  %v3877_v45 = vrot.slane %v8279_v28, %v8509_v10  ;;  %v3881_v38 = vrot.slane %v8279_v28, %v8511_v11 }
 0x591   :  { %v2022_v23 = vrot.slane %v2021_v39, 6  ;;  %v3882_v18 = vcombine.low %v3869_v41, %v3873_v33 }
 0x592   :  { %v1968_v30 = vpop.permute.xlu1 %1967 }
 0x593   :  { %v2024_v48 = vsel %vm11777_vm0, %v2022_v23, %v2021_v39  ;;  %v1973_v32 = vsel %vm11778_vm2, %v1966_v26, %v1968_v30  ;;  %v2028_v26 = vmul.f32 %v2022_v23, %v1983_v56  ;;  %v4561_v39 = vrot.slane %v9314_v25, %v8513_v12  ;;  %v8281_v30 = vld [vmem:[%s11686_s7 + $0xa2] ss:$8 sm:$0xf]  ;;  %v8275_v56 = vld [vmem:[%s11686_s7 + $0x84] ss:$8 sm:$0xf] }
 0x594   :  { %v2027_v58 = vmul.f32 %v2024_v48, %v9132_v42  ;;  %1981 = vst [vmem:[#allocation3 + $0x98] sm:$0xc0] %v1973_v32  ;;  %v3991_v23 = vrot.slane %v3977_v47, %v8513_v12  ;;  %v4181_v25 = vrot.slane %v4167_v21, %v8513_v12  ;;  %v8278_v48 = vld [vmem:[%s11686_s7 + $0x87] ss:$8 sm:$0xf]  ;;  %v4459_v32 = vrot.slane %v4451_v63, %v8513_v12 }
 0x595   :  { %v2054_v46 = vrot.slane %v2028_v26, %v8513_v12  ;;  %v4058_v59 = vrot.slane %v8281_v30, %v8505_v8  ;;  %v4062_v35 = vrot.slane %v8281_v30, %v8507_v9  ;;  %v4066_v19 = vrot.slane %v8281_v30, %v8509_v10 }
 0x596   :  { %v2031_v53 = vcombine.high %v2027_v58, %v2027_v58  ;;  %v2038_v42 = vrot.slane %v2027_v58, %v8513_v12  ;;  %v3883_v58 = vcombine.low %v3877_v45, %v3881_v38  ;;  %v4070_v60 = vrot.slane %v8281_v30, %v8511_v11 }
 0x597   :  { %v4562_v52 = vcombine.low %v4554_v15, %v4561_v39  ;;  %v9385_v0 = vcombine.low %v3984_v31, %v3991_v23  ;;  %v3773_v1 = vrot.slane %v8278_v48, %v8505_v8  ;;  %v3777_v20 = vrot.slane %v8278_v48, %v8507_v9 }
 0x598   :  { %2055 = vrot.lane.b32.xlu1 %v2038_v42, %s11776_s28  ;;  %v2046_v40 = vcombine.high %v2038_v42, %v2038_v42  ;;  %v2045_v57 = vrot.slane %v2031_v53, %v8513_v12  ;;  %v9389_v53 = vcombine.low %v4174_v14, %v4181_v25  ;;  %v3595_v42 = vrot.slane %v8276_v29, %v8511_v11 }
 0x599   :  { %v3781_v34 = vrot.slane %v8278_v48, %v8509_v10  ;;  %v3785_v2 = vrot.slane %v8278_v48, %v8511_v11  ;;  %v3890_v13 = vrot.slane %v3882_v18, %v8513_v12  ;;  %v4467_v17 = vcombine.low %v4459_v32, %v4466_v3 }
 0x59a   :  { %2057 = vrot.lane.b32.xlu0 %v2046_v40, %s11776_s28  ;;  %v2047_v49 = vcombine.high %v2045_v57, %v2045_v57  ;;  %v8277_v40 = vld [vmem:[%s11686_s7 + $0x86] ss:$8 sm:$0xf]  ;;  %v3897_v24 = vrot.slane %v3883_v58, %v8513_v12  ;;  %v4072_v28 = vcombine.low %v4066_v19, %v4070_v60  ;;  %v3489_v22 = vrot.slane %v8275_v56, %v8505_v8  ;;  %v8273_v19 = vld [vmem:[%s11686_s7 + $0x82] ss:$8 sm:$0xf] }
 0x59b   :  { %v3493_v47 = vrot.slane %v8275_v56, %v8507_v9  ;;  %v3497_v44 = vrot.slane %v8275_v56, %v8509_v10  ;;  %v3501_v7 = vrot.slane %v8275_v56, %v8511_v11  ;;  %v3678_v26 = vrot.slane %v8277_v40, %v8505_v8 }
 0x59c   :  { %2059 = vrot.lane.b32.xlu1 %v2045_v57, %s11776_s28  ;;  %v8272_v57 = vld [vmem:[%s11686_s7 + $0x81] ss:$8 sm:$0xf]  ;;  %v3682_v5 = vrot.slane %v8277_v40, %v8507_v9  ;;  %v3686_v43 = vrot.slane %v8277_v40, %v8509_v10  ;;  %v3690_v54 = vrot.slane %v8277_v40, %v8511_v11  ;;  %v3597_v21 = vcombine.low %v3591_v62, %v3595_v42  ;;  %v8268_v42 = vld [vmem:[%s11686_s7 + $0x65] ss:$8 sm:$0xf] }
 0x59d   :  { %v3786_v63 = vcombine.low %v3773_v1, %v3777_v20  ;;  %v3787_v41 = vcombine.low %v3781_v34, %v3785_v2  ;;  %v3203_v33 = vrot.slane %v8272_v57, %v8505_v8  ;;  %v3207_v29 = vrot.slane %v8272_v57, %v8507_v9 }
 0x59e   :  { %2061 = vrot.lane.b32.xlu0 %v2047_v49, %s11776_s28  ;;  %v8274_v49 = vld [vmem:[%s11686_s7 + $0x83] ss:$8 sm:$0xf]  ;;  %v3211_v37 = vrot.slane %v8272_v57, %v8509_v10  ;;  %v3215_v45 = vrot.slane %v8272_v57, %v8511_v11  ;;  %v3898_v38 = vcombine.low %v3890_v13, %v3897_v24  ;;  %v4086_v39 = vrot.slane %v4072_v28, %v8513_v12 }
 0x59f   :  { %v3502_v31 = vcombine.low %v3489_v22, %v3493_v47  ;;  %v3503_v23 = vcombine.low %v3497_v44, %v3501_v7  ;;  %v3691_v51 = vcombine.low %v3678_v26, %v3682_v5  ;;  %v3692_v27 = vcombine.low %v3686_v43, %v3690_v54  ;;  %v8267_v44 = vld [vmem:[%s11686_s7 + $0x64] ss:$8 sm:$0xf]  ;;  %v8269_v54 = vld [vmem:[%s11686_s7 + $0x66] ss:$8 sm:$0xf] }
 0x5a0   :  { %2063 = vrot.lane.b32.xlu1 %v2054_v46, %s11776_s28  ;;  %v3393_v46 = vrot.slane %v8274_v49, %v8505_v8  ;;  %v3611_v48 = vrot.slane %v3597_v21, %v8513_v12  ;;  %v3794_v32 = vrot.slane %v3786_v63, %v8513_v12  ;;  %v3801_v3 = vrot.slane %v3787_v41, %v8513_v12  ;;  %v8270_v21 = vld [vmem:[%s11686_s7 + $0x67] ss:$8 sm:$0xf]  ;;  %s11792_s28 = smov 1  }
 0x5a1   :  { %v9447_v18 = vcombine.low %v3203_v33, %v3207_v29  ;;  %v3217_v60 = vcombine.low %v3211_v37, %v3215_v45  ;;  %v3405_v62 = vrot.slane %v8274_v49, %v8511_v11  ;;  %v3699_v55 = vrot.slane %v3691_v51, %v8513_v12 }
 0x5a2   :  { %2116 = vrot.lane.b32.xlu0 %v2115_v50, %s11772_s13  ;;  %v3397_v50 = vrot.slane %v8274_v49, %v8507_v9  ;;  %v3706_v1 = vrot.slane %v3692_v27, %v8513_v12  ;;  %v3298_v34 = vrot.slane %v8273_v19, %v8505_v8  ;;  %v3302_v2 = vrot.slane %v8273_v19, %v8507_v9  ;;  %s11794_s13 = smov 126  }
 0x5a3   :  { %v3306_v13 = vrot.slane %v8273_v19, %v8509_v10  ;;  %v3310_v40 = vrot.slane %v8273_v19, %v8511_v11  ;;  %v3612_v57 = vcombine.low %v3604_v61, %v3611_v48  ;;  %v2823_v47 = vrot.slane %v8268_v42, %v8505_v8 }
 0x5a4   :  { %4659 = vrot.lane.b32.xlu1 %v9301_v16, %s8407_s15  ;;  %v4071_v16 = vcombine.low %v4058_v59, %v4062_v35  ;;  %v3510_v59 = vrot.slane %v3502_v31, %v8513_v12  ;;  %v3517_v35 = vrot.slane %v3503_v23, %v8513_v12  ;;  %v2827_v7 = vrot.slane %v8268_v42, %v8507_v9  ;;  %s11829_s15 = smov 13  }
 0x5a5   :  { %v2831_v26 = vrot.slane %v8268_v42, %v8509_v10  ;;  %v2835_v5 = vrot.slane %v8268_v42, %v8511_v11  ;;  %v3707_v43 = vcombine.low %v3699_v55, %v3706_v1  ;;  %v3312_v33 = vcombine.low %v3306_v13, %v3310_v40 }
 0x5a6   :  { %4279 = vrot.lane.b32.xlu0 %v4278_v4, %s8410_s18  ;;  %v4079_v15 = vrot.slane %v4071_v16, %v8513_v12  ;;  %v9457_v4 = vcombine.low %v3393_v46, %v3397_v50  ;;  %v3518_v24 = vcombine.low %v3510_v59, %v3517_v35  ;;  %v3231_v16 = vrot.slane %v3217_v60, %v8513_v12  ;;  %v8265_v59 = vld [vmem:[%s11686_s7 + $0x62] ss:$8 sm:$0xf]  ;;  %s11831_s18 = smov 15  }
 0x5a7   :  { %v2733_v29 = vrot.slane %v8267_v44, %v8507_v9  ;;  %v2737_v37 = vrot.slane %v8267_v44, %v8509_v10  ;;  %v2741_v45 = vrot.slane %v8267_v44, %v8511_v11  ;;  %v2836_v23 = vcombine.low %v2823_v47, %v2827_v7 }
 0x5a8   :  { %4373 = vrot.lane.b32.xlu1 %v9310_v6, %s8409_s17  ;;  %v8271_v6 = vld [vmem:[%s11686_s7 + $0x80] ss:$8 sm:$0xf]  ;;  %v4087_v58 = vcombine.low %v4079_v15, %v4086_v39  ;;  %v3414_v22 = vrot.slane %v9457_v4, %v8513_v12  ;;  %v2926_v15 = vrot.slane %v8269_v54, %v8509_v10  ;;  %v2930_v39 = vrot.slane %v8269_v54, %v8511_v11  ;;  %s8440_s17 = smov 3  }
 0x5a9   :  { %v3109_v30 = vrot.slane %v8271_v6, %v8505_v8  ;;  %v3113_v14 = vrot.slane %v8271_v6, %v8507_v9  ;;  %v3117_v25 = vrot.slane %v8271_v6, %v8509_v10  ;;  %v3121_v36 = vrot.slane %v8271_v6, %v8511_v11 }
 0x5aa   :  { %4468 = vrot.lane.b32.xlu0 %v4467_v17, %s8408_s16  ;;  %v3224_v17 = vrot.slane %v9447_v18, %v8513_v12  ;;  %v2922_v6 = vrot.slane %v8269_v54, %v8507_v9  ;;  %v2837_v46 = vcombine.low %v2831_v26, %v2835_v5  ;;  %v3013_v50 = vrot.slane %v8270_v21, %v8505_v8  ;;  %s11796_s16 = smov 2  }
 0x5ab   :  { %v3122_v56 = vcombine.low %v3109_v30, %v3113_v14  ;;  %v3123_v20 = vcombine.low %v3117_v25, %v3121_v36  ;;  %v3017_v51 = vrot.slane %v8270_v21, %v8507_v9  ;;  %v3021_v27 = vrot.slane %v8270_v21, %v8509_v10  ;;  %v8264_v25 = vld [vmem:[%s11686_s7 + $0x61] ss:$8 sm:$0xf] }
 0x5ac   :  { %4563 = vrot.lane.b32.xlu1 %v4562_v52, %s8414_s25  ;;  %v3401_v52 = vrot.slane %v8274_v49, %v8509_v10  ;;  %v2729_v49 = vrot.slane %v8267_v44, %v8505_v8  ;;  %v3025_v30 = vrot.slane %v8270_v21, %v8511_v11  ;;  %v3326_v61 = vrot.slane %v3312_v33, %v8513_v12  ;;  %s11826_s25 = smov 18   ;;  %v8260_v33 = vld [vmem:[%s11686_s7 + $0x47] ss:$8 sm:$0xf] }
 0x5ad   :  { %v3130_v63 = vrot.slane %v3122_v56, %v8513_v12  ;;  %v3137_v41 = vrot.slane %v3123_v20, %v8513_v12  ;;  %v2443_v35 = vrot.slane %v8264_v25, %v8505_v8  ;;  %v2447_v19 = vrot.slane %v8264_v25, %v8507_v9 }
 0x5ae   :  { %3899 = vrot.lane.b32.xlu0 %v3898_v38, %s11790_s24  ;;  %v3407_v28 = vcombine.low %v3401_v52, %v3405_v62  ;;  %v2918_v38 = vrot.slane %v8269_v54, %v8505_v8  ;;  %v2742_v48 = vcombine.low %v2729_v49, %v2733_v29  ;;  %v2451_v60 = vrot.slane %v8264_v25, %v8509_v10  ;;  %s11953_s24 = smov 32  }
 0x5af   :  { %v3138_v14 = vcombine.low %v3130_v63, %v3137_v41  ;;  %v2455_v52 = vrot.slane %v8264_v25, %v8511_v11  ;;  %v2844_v4 = vrot.slane %v2836_v23, %v8513_v12  ;;  %v2851_v42 = vrot.slane %v2837_v46, %v8513_v12 }
 0x5b0   :  { %3993 = vrot.lane.b32.xlu1 %v9385_v0, %s8412_s22  ;;  %v3802_v0 = vcombine.low %v3794_v32, %v3801_v3  ;;  %v3421_v31 = vrot.slane %v3407_v28, %v8513_v12  ;;  %v2743_v32 = vcombine.low %v2737_v37, %v2741_v45  ;;  %v3232_v3 = vcombine.low %v3224_v17, %v3231_v16  ;;  %v8259_v17 = vld [vmem:[%s11686_s7 + $0x46] ss:$8 sm:$0xf]  ;;  %s11798_s22 = smov 127  }
 0x5b1   :  { %v2931_v18 = vcombine.low %v2918_v38, %v2922_v6  ;;  %v3026_v55 = vcombine.low %v3013_v50, %v3017_v51  ;;  %v3027_v1 = vcombine.low %v3021_v27, %v3025_v30  ;;  %v2750_v20 = vrot.slane %v2742_v48, %v8513_v12 }
 0x5b2   :  { %4088 = vrot.lane.b32.xlu0 %v4087_v58, %s8411_s21  ;;  %v2932_v58 = vcombine.low %v2926_v15, %v2930_v39  ;;  %v3422_v62 = vcombine.low %v3414_v22, %v3421_v31  ;;  %v2538_v13 = vrot.slane %v8265_v59, %v8505_v8  ;;  %v2542_v40 = vrot.slane %v8265_v59, %v8507_v9  ;;  %s11834_s21 = smov 81  }
 0x5b3   :  { %v2456_v28 = vcombine.low %v2443_v35, %v2447_v19  ;;  %v2457_v22 = vcombine.low %v2451_v60, %v2455_v52  ;;  %v2852_v5 = vcombine.low %v2844_v4, %v2851_v42  ;;  %v3041_v21 = vrot.slane %v3027_v1, %v8513_v12 }
 0x5b4   :  { %4183 = vrot.lane.b32.xlu1 %v9389_v53, %s8416_s11  ;;  %v3311_v53 = vcombine.low %v3298_v34, %v3302_v2  ;;  %v2757_v34 = vrot.slane %v2743_v32, %v8513_v12  ;;  %v8266_v2 = vld [vmem:[%s11686_s7 + $0x63] ss:$8 sm:$0xf]  ;;  %v2946_v16 = vrot.slane %v2932_v58, %v8513_v12  ;;  %v2551_v63 = vcombine.low %v2538_v13, %v2542_v40  ;;  %s11830_s11 = smov 14  }
 0x5b5   :  { %v2633_v47 = vrot.slane %v8266_v2, %v8505_v8  ;;  %v2637_v44 = vrot.slane %v8266_v2, %v8507_v9  ;;  %v2641_v7 = vrot.slane %v8266_v2, %v8509_v10  ;;  %v2645_v26 = vrot.slane %v8266_v2, %v8511_v11 }
 0x5b6   :  { %3519 = vrot.lane.b32.xlu0 %v3518_v24, %s11782_s23  ;;  %v3319_v36 = vrot.slane %v3311_v53, %v8513_v12  ;;  %v2939_v24 = vrot.slane %v2931_v18, %v8513_v12  ;;  %v2758_v54 = vcombine.low %v2750_v20, %v2757_v34  ;;  %v2183_v53 = vrot.slane %v8259_v17, %v8505_v8  ;;  %s11862_s23 = smov 109  }
 0x5b7   :  { %v2187_v49 = vrot.slane %v8259_v17, %v8507_v9  ;;  %v2191_v29 = vrot.slane %v8259_v17, %v8509_v10  ;;  %v2195_v37 = vrot.slane %v8259_v17, %v8511_v11  ;;  %v2464_v38 = vrot.slane %v2456_v28, %v8513_v12 }
 0x5b8   :  { %3613 = vrot.lane.b32.xlu1 %v3612_v57, %s11784_s12  ;;  %v3327_v56 = vcombine.low %v3319_v36, %v3326_v61  ;;  %v2546_v57 = vrot.slane %v8265_v59, %v8509_v10  ;;  %v2947_v45 = vcombine.low %v2939_v24, %v2946_v16  ;;  %v2471_v6 = vrot.slane %v2457_v22, %v8513_v12  ;;  %v2079_v24 = vld [vmem:[#allocation2 + $0x8] sm:$0x3]  ;;  %s11866_s12 = smov 99  }
 0x5b9   :  { %v2646_v15 = vcombine.low %v2633_v47, %v2637_v44  ;;  %v2647_v39 = vcombine.low %v2641_v7, %v2645_v26  ;;  %v2280_v31 = vrot.slane %v8260_v33, %v8505_v8  ;;  %v2284_v23 = vrot.slane %v8260_v33, %v8507_v9 }
 0x5ba   :  { %3708 = vrot.lane.b32.xlu0 %v3707_v43, %s11786_s30  ;;  %v3034_v43 = vrot.slane %v3026_v55, %v8513_v12  ;;  %v2288_v46 = vrot.slane %v8260_v33, %v8509_v10  ;;  %v2292_v50 = vrot.slane %v8260_v33, %v8511_v11  ;;  %v2559_v27 = vrot.slane %v2551_v63, %v8513_v12  ;;  %s11885_s30 = smov 113  }
 0x5bb   :  { %v2197_v25 = vcombine.low %v2191_v29, %v2195_v37  ;;  %v2472_v36 = vcombine.low %v2464_v38, %v2471_v6  ;;  %v2654_v61 = vrot.slane %v2646_v15, %v8513_v12  ;;  %v2661_v48 = vrot.slane %v2647_v39, %v8513_v12 }
 0x5bc   :  { %3803 = vrot.lane.b32.xlu1 %v3802_v0, %s11788_s20  ;;  %v2550_v0 = vrot.slane %v8265_v59, %v8511_v11  ;;  %v3042_v51 = vcombine.low %v3034_v43, %v3041_v21  ;;  %v2293_v32 = vcombine.low %v2280_v31, %v2284_v23  ;;  %vm2065_vm0 = vcmask 105472   ;;  %s11889_s20 = smov 112  }
 0x5bd   :  { %v2211_v59 = vrot.slane %v2197_v25, %v8513_v12  ;;  %v2662_v35 = vcombine.low %v2654_v61, %v2661_v48  ;;  %vm11779_vm2 = vcmask 1022976   ;;  %v9633_v25 = vld [vmem:[#allocation2 + $0x2] sm:$0xff] }
 0x5be   :  { %3139 = vrot.lane.b32.xlu0 %v3138_v14, %s11780_s19  ;;  %v2552_v41 = vcombine.low %v2546_v57, %v2550_v0  ;;  %v2196_v14 = vcombine.low %v2183_v53, %v2187_v49  ;;  %v2301_v19 = vrot.slane %v2293_v32, %v8513_v12  ;;  %v2078_v57 = vld [vmem:[#allocation2] sm:$0xff]  ;;  %s11857_s19 = smov 110  }
 0x5c0   :  { %3233 = vrot.lane.b32.xlu1 %v3232_v3, %s11826_s25  ;;  %v2566_v30 = vrot.slane %v2552_v41, %v8513_v12  ;;  %v2294_v3 = vcombine.low %v2288_v46, %v2292_v50  ;;  %v2204_v58 = vrot.slane %v2196_v14, %v8513_v12 }
 0x5c2   :  { %3328 = vrot.lane.b32.xlu0 %v3327_v56, %s11827_s27  ;;  %v2567_v18 = vcombine.low %v2559_v27, %v2566_v30  ;;  %v2308_v60 = vrot.slane %v2294_v3, %v8513_v12  ;;  %v2212_v52 = vcombine.low %v2204_v58, %v2211_v59  ;;  %s11833_s27 = smov 77  }
 0x5c4   :  { %3423 = vrot.lane.b32.xlu1 %v3422_v62, %s11828_s14  ;;  %v2309_v62 = vcombine.low %v2301_v19, %v2308_v60  ;;  %s11836_s14 = smov 79  }
 0x5c6   :  { %2759 = vrot.lane.b32.xlu0 %v2758_v54, %s11829_s15  ;;  %s11837_s15 = smov 78  }
 0x5c8   :  { %2853 = vrot.lane.b32.xlu1 %v2852_v5, %s11830_s11 }
 0x5ca   :  { %2948 = vrot.lane.b32.xlu0 %v2947_v45, %s11831_s18 }
 0x5cc   :  { %3043 = vrot.lane.b32.xlu1 %v3042_v51, %s11832_s26 }
 0x5ce   :  { %2473 = vrot.lane.b32.xlu0 %v2472_v36, %s11792_s28  ;;  %s11903_s28 = smov 125  }
 0x5d0   :  { %2568 = vrot.lane.b32.xlu1 %v2567_v18, %s11796_s16 }
 0x5d2   :  { %2663 = vrot.lane.b32.xlu0 %v2662_v35, %s8440_s17 }
 0x5d4   :  { %2213 = vrot.lane.b32.xlu1 %v2212_v52, %s11794_s13 }
 0x5d6   :  { %2310 = vrot.lane.b32.xlu0 %v2309_v62, %s11798_s22 }
 0x60a   :  { %v2056_v4 = vpop.permute.xlu1 %2055 }
 0x60c   :  { %v2058_v42 = vpop.permute.xlu0 %2057 }
 0x60d   :  { %v2066_v55 = vsel %vm2065_vm0, %v2056_v4, %v2058_v42 }
 0x60e   :  { %2074 = vst [vmem:[#allocation3 + $0xa0] sm:$0x3] %v2066_v55  ;;  %v2060_v1 = vpop.permute.xlu1 %2059 }
 0x60f   :  { %v2067_v56 = vsel %vm2065_vm0, %v2058_v42, %v2060_v1 }
 0x610   :  { %2075 = vst [vmem:[#allocation3 + $0xa8] sm:$0x3] %v2067_v56  ;;  %v2062_v20 = vpop.permute.xlu0 %2061 }
 0x611   :  { %v2068_v34 = vsel %vm2065_vm0, %v2060_v1, %v2062_v20 }
 0x612   :  { %2076 = vst [vmem:[#allocation3 + $0xb0] sm:$0x3] %v2068_v34  ;;  %v2064_v2 = vpop.permute.xlu1 %2063 }
 0x613   :  { %v2069_v13 = vsel %vm2065_vm0, %v2062_v20, %v2064_v2 }
 0x614   :  { %2077 = vst [vmem:[#allocation3 + $0xb8] sm:$0x3] %v2069_v13  ;;  %v2117_v40 = vpop.permute.xlu0 %2116  ;;  %v4622_v13 = vld [vmem:[#allocation2 + $0xa] sm:$0x3] }
 0x615   :  { %v2118_v0 = vrot.slane %v2117_v40, 6 }
 0x616   :  { %v9582_v17 = vpop.permute.xlu1 %4659 }
 0x617   :  { %v2120_v16 = vsel %vm11779_vm2, %v2118_v0, %v2117_v40  ;;  %v2124_v44 = vmul.f32 %v2118_v0, %v2079_v24  ;;  %v4661_v14 = vrot.slane %v9582_v17, 6  ;;  %vm2216_vm2 = vcmask 1031168  }
 0x618   :  { %v2123_v28 = vmul.f32 %v2120_v16, %v2078_v57  ;;  %v9585_v22 = vpop.permute.xlu0 %4279 }
 0x619   :  { %v2144_v21 = vcombine.low %v2124_v44, %v2124_v44  ;;  %v4662_v32 = vsel %vm125_vm10, %v4661_v14, %v9582_v17  ;;  %v4281_v19 = vrot.slane %v9585_v22, 6  ;;  %v4666_v0 = vmul.f32 %v4661_v14, %v4622_v13 }
 0x61a   :  { %v9587_v47 = vpop.permute.xlu1 %4373  ;;  %v2127_v7 = vcombine.low %v2123_v28, %v2123_v28  ;;  %v2141_v26 = vrot.slane %v2123_v28, %v8513_v12  ;;  %v4665_v58 = vmul.f32 %v4662_v32, %v9633_v25  ;;  %v4242_v28 = vld [vmem:[#allocation2 + $0xa] sm:$0x3] }
 0x61b   :  { %v2151_v49 = vrot.slane %v2144_v21, %v8513_v12  ;;  %v4282_v1 = vsel %vm513_vm14, %v4281_v19, %v9585_v22  ;;  %v4375_v40 = vrot.slane %v9587_v47, 6  ;;  %v4336_v21 = vld [vmem:[#allocation2 + $0xa] sm:$0x3]  ;;  %vm11851_vm14 = vcmask 662528  }
 0x61c   :  { %v2134_v5 = vrot.slane %v2127_v7, %v8513_v12  ;;  %v9591_v43 = vpop.permute.xlu0 %4468  ;;  %v2143_v41 = vcombine.high %v2141_v26, %v2141_v26  ;;  %v4669_v60 = vcombine.high %v4665_v58, %v4665_v58  ;;  %v4676_v52 = vrot.slane %v4665_v58, %v8513_v12 }
 0x61d   :  { %v4285_v34 = vmul.f32 %v9633_v25, %v4282_v1  ;;  %v4376_v24 = vsel %vm417_vm4, %v4375_v40, %v9587_v47  ;;  %v4470_v16 = vrot.slane %v9591_v43, 6  ;;  %v4692_v7 = vrot.slane %v4666_v0, %v8513_v12  ;;  %v4526_v1 = vld [vmem:[#allocation2 + $0xa] sm:$0x3] }
 0x61e   :  { %v9593_v54 = vpop.permute.xlu1 %4563  ;;  %2152 = vrot.lane.b32.xlu1 %v2134_v5, %s8440_s17  ;;  %v2142_v63 = vcombine.high %v2134_v5, %v2134_v5  ;;  %v4683_v56 = vrot.slane %v4669_v60, %v8513_v12  ;;  %v4684_v20 = vcombine.high %v4676_v52, %v4676_v52  ;;  %v4379_v22 = vmul.f32 %v9633_v25, %v4376_v24  ;;  %v4431_v60 = vld [vmem:[#allocation2 + $0xa] sm:$0x3] }
 0x61f   :  { %v4289_v17 = vcombine.high %v4285_v34, %v4285_v34  ;;  %v9678_v44 = vrot.slane %v4285_v34, %v8513_v12  ;;  %v4471_v5 = vsel %vm319_vm13, %v4470_v16, %v9591_v43  ;;  %v4286_v47 = vmul.f32 %v4281_v19, %v4242_v28 }
 0x620   :  { %2154 = vrot.lane.b32.xlu0 %v2142_v63, %s8440_s17  ;;  %v9597_v53 = vpop.permute.xlu0 %3899  ;;  %v4383_v63 = vcombine.low %v4379_v22, %v4379_v22  ;;  %v4380_v14 = vmul.f32 %v4375_v40, %v4336_v21  ;;  %v4565_v19 = vrot.slane %v9593_v54, 6  ;;  %vm2259_vm4 = vcmask 15360  }
 0x622   :  { %v9599_v33 = vpop.permute.xlu1 %3993  ;;  %2156 = vrot.lane.b32.xlu1 %v2141_v26, %s8440_s17  ;;  %v4303_v26 = vrot.slane %v4289_v17, %v8513_v12  ;;  %v4390_v32 = vrot.slane %v4383_v63, %v8513_v12  ;;  %v4570_v13 = vmul.f32 %v4565_v19, %v4526_v1 }
 0x623   :  { %v3995_v63 = vrot.slane %v9599_v33, 6 }
 0x624   :  { %2158 = vrot.lane.b32.xlu0 %v2143_v41, %s8440_s17  ;;  %v9604_v29 = vpop.permute.xlu0 %4088  ;;  %v4304_v41 = vcombine.high %v9678_v44, %v9678_v44  ;;  %v4305_v58 = vcombine.high %v4303_v26, %v4303_v26  ;;  %v4590_v17 = vcombine.low %v4570_v13, %v4570_v13 }
 0x626   :  { %v9606_v37 = vpop.permute.xlu1 %4183  ;;  %2160 = vrot.lane.b32.xlu1 %v2151_v49, %s8440_s17  ;;  %v4474_v49 = vmul.f32 %v9633_v25, %v4471_v5  ;;  %s11838_s17 = smov 94  }
 0x628   :  { %v9609_v45 = vpop.permute.xlu0 %3519  ;;  %v4478_v43 = vcombine.high %v4474_v49, %v4474_v49 }
 0x62a   :  { %v9611_v38 = vpop.permute.xlu1 %3613 }
 0x62c   :  { %v9613_v6 = vpop.permute.xlu0 %3708 }
 0x62e   :  { %v9615_v15 = vpop.permute.xlu1 %3803 }
 0x630   :  { %v9619_v31 = vpop.permute.xlu0 %3139 }
 0x632   :  { %v9617_v39 = vpop.permute.xlu1 %3233 }
 0x634   :  { %v9623_v46 = vpop.permute.xlu0 %3328 }
 0x636   :  { %v9621_v23 = vpop.permute.xlu1 %3423 }
 0x638   :  { %v9629_v27 = vpop.permute.xlu0 %2759 }
 0x639   :  { %v2761_v30 = vrot.slane %v9629_v27, 6 }
 0x63a   :  { %v9625_v50 = vpop.permute.xlu1 %2853 }
 0x63b   :  { %v2762_v61 = vsel %vm2065_vm0, %v2761_v30, %v9629_v27  ;;  %vm2162_vm0 = vcmask 23552  }
 0x63c   :  { %v9642_v48 = vmul.f32 %v9633_v25, %v2762_v61  ;;  %v4312_v61 = vrot.slane %v4286_v47, %v8513_v12  ;;  %v9722_v21 = vpop.permute.xlu0 %2948 }
 0x63e   :  { %v9627_v51 = vpop.permute.xlu1 %3043 }
 0x642   :  { %v9635_v36 = vpop.permute.xlu1 %2568 }
 0x646   :  { %v9646_v3 = vpop.permute.xlu1 %2213 }
 0x647   :  { %v2215_v18 = vrot.slane %v9646_v3, 6 }
 0x649   :  { %v2217_v59 = vsel %vm2216_vm2, %v2215_v18, %v9646_v3 }
 0x64a   :  { %v2220_v35 = vmul.f32 %v2217_v59, %v2078_v57  ;;  %v4685_v57 = vcombine.high %v4683_v56, %v4683_v56  ;;  %v4397_v59 = vrot.slane %v4379_v22, %v8513_v12  ;;  %v4597_v22 = vrot.slane %v4590_v17, %v8513_v12 }
 0x64c   :  { %v2224_v62 = vcombine.high %v2220_v35, %v2220_v35  ;;  %v2231_v4 = vrot.slane %v2220_v35, %v8513_v12  ;;  %v4400_v35 = vcombine.low %v4380_v14, %v4380_v14  ;;  %v4598_v5 = vcombine.low %v4597_v22, %v4597_v22 }
 0x64e   :  { %v9658_v42 = vrot.slane %v2224_v62, %v8513_v12  ;;  %2251 = vrot.lane.b32.xlu1 %v2231_v4, %s11796_s16  ;;  %v2239_v55 = vcombine.low %v2231_v4, %v2231_v4  ;;  %v4398_v62 = vcombine.high %v4390_v32, %v4390_v32  ;;  %v4475_v4 = vmul.f32 %v4470_v16, %v4431_v60 }
 0x64f   :  { %v3901_v16 = vrot.slane %v9597_v53, 6 }
 0x650   :  { %2249 = vrot.lane.b32.xlu0 %v2239_v55, %s11796_s16  ;;  %v2240_v2 = vcombine.low %v9658_v42, %v9658_v42  ;;  %v4407_v55 = vrot.slane %v4400_v35, %v8513_v12  ;;  %v4501_v40 = vrot.slane %v4475_v4, %v8513_v12 }
 0x652   :  { %4695 = vrot.lane.b32.xlu1 %v4684_v20, %s11833_s27  ;;  %v4399_v20 = vcombine.high %v4397_v59, %v4397_v59 }
 0x654   :  { %2253 = vrot.lane.b32.xlu0 %v2240_v2, %s11796_s16 }
 0x656   :  { %4699 = vrot.lane.b32.xlu1 %v4685_v57, %s11833_s27  ;;  %v4485_v57 = vrot.slane %v4474_v49, %v8513_v12  ;;  %v3996_v49 = vsel %vm805_vm9, %v3995_v63, %v9599_v33  ;;  %vm11846_vm9 = vcmask 629760  }
 0x657   :  { %vm11847_vm10 = vmmov %vm11846_vm9 }
 0x658   :  { %4697 = vrot.lane.b32.xlu0 %v4683_v56, %s11833_s27  ;;  %v4566_v56 = vsel %vm222_vm12, %v4565_v19, %v9593_v54  ;;  %v4502_v54 = vcombine.low %v4501_v40, %v4501_v40  ;;  %v4185_v40 = vrot.slane %v9606_v37, 6  ;;  %vm11849_vm12 = vcmask 146432   ;;  %vm11850_vm13 = vmmov %vm11846_vm9 }
 0x659   :  { %v4569_v2 = vmul.f32 %v9633_v25, %v4566_v56 }
 0x65a   :  { %4693 = vrot.lane.b32.xlu1 %v4676_v52, %s11833_s27  ;;  %v4492_v52 = vrot.slane %v4478_v43, %v8513_v12  ;;  %v3862_v43 = vld [vmem:[#allocation2 + $0xa] sm:$0x3]  ;;  %v4186_v22 = vsel %vm610_vm15, %v4185_v40, %v9606_v37  ;;  %vm11852_vm15 = vcmask 154624  }
 0x65b   :  { %v4587_v0 = vrot.slane %v4569_v2, %v8513_v12  ;;  %v4573_v24 = vcombine.low %v4569_v2, %v4569_v2  ;;  %v3906_v19 = vmul.f32 %v3901_v16, %v3862_v43 }
 0x65c   :  { %4701 = vrot.lane.b32.xlu0 %v4692_v7, %s11833_s27  ;;  %v4494_v34 = vcombine.low %v4492_v52, %v4492_v52  ;;  %s11839_s27 = smov 93  }
 0x65d   :  { %v4589_v28 = vcombine.low %v4587_v0, %v4587_v0  ;;  %v4580_v7 = vrot.slane %v4573_v24, %v8513_v12  ;;  %v3932_v1 = vrot.slane %v3906_v19, %v8513_v12 }
 0x65e   :  { %4317 = vrot.lane.b32.xlu1 %v4303_v26, %s11834_s21  ;;  %v3902_v26 = vsel %vm901_vm8, %v3901_v16, %v9597_v53  ;;  %v4090_v53 = vrot.slane %v9604_v29, 6 }
 0x65f   :  { %v3905_v47 = vmul.f32 %v9633_v25, %v3902_v26  ;;  %v4588_v14 = vcombine.low %v4580_v7, %v4580_v7 }
 0x660   :  { %4315 = vrot.lane.b32.xlu0 %v4304_v41, %s11834_s21  ;;  %v4091_v33 = vsel %vm707_vm11, %v4090_v53, %v9604_v29  ;;  %vm11848_vm11 = vmmov %vm11846_vm9 }
 0x661   :  { %v3909_v41 = vcombine.high %v3905_v47, %v3905_v47 }
 0x662   :  { %4321 = vrot.lane.b32.xlu1 %v4312_v61, %s11834_s21  ;;  %v9732_v61 = vpop.permute.xlu0 %2473 }
 0x663   :  { %v3923_v35 = vrot.slane %v3909_v41, %v8513_v12 }
 0x664   :  { %4319 = vrot.lane.b32.xlu0 %v4305_v58, %s11834_s21  ;;  %v3999_v58 = vmul.f32 %v9633_v25, %v3996_v49 }
 0x666   :  { %4412 = vrot.lane.b32.xlu1 %v4397_v59, %s11835_s29  ;;  %v9736_v59 = vrot.slane %v3905_v47, %v8513_v12  ;;  %v4003_v60 = vcombine.low %v3999_v58, %v3999_v58  ;;  %v9747_v4 = vpop.permute.xlu0 %2663 }
 0x668   :  { %4410 = vrot.lane.b32.xlu0 %v4398_v62, %s11835_s29  ;;  %v3924_v62 = vcombine.high %v9736_v59, %v9736_v59  ;;  %v4010_v29 = vrot.slane %v4003_v60, %v8513_v12 }
 0x66a   :  { %4416 = vrot.lane.b32.xlu1 %v4407_v55, %s11835_s29  ;;  %v9755_v13 = vpop.permute.xlu0 %2310  ;;  %v4018_v17 = vcombine.high %v4010_v29, %v4010_v29 }
 0x66c   :  { %4414 = vrot.lane.b32.xlu0 %v4399_v20, %s11835_s29  ;;  %v3925_v20 = vcombine.high %v3923_v35, %v3923_v35 }
 0x66e   :  { %4507 = vrot.lane.b32.xlu1 %v4494_v34, %s11836_s14  ;;  %v4017_v34 = vrot.slane %v3999_v58, %v8513_v12 }
 0x670   :  { %4505 = vrot.lane.b32.xlu0 %v4485_v57, %s11836_s14 }
 0x672   :  { %4511 = vrot.lane.b32.xlu1 %v4502_v54, %s11836_s14 }
 0x674   :  { %4509 = vrot.lane.b32.xlu0 %v4492_v52, %s11836_s14  ;;  %v4094_v52 = vmul.f32 %v9633_v25, %v4091_v33 }
 0x676   :  { %4603 = vrot.lane.b32.xlu1 %v4589_v28, %s11837_s15  ;;  %v4098_v56 = vcombine.high %v4094_v52, %v4094_v52  ;;  %v4146_v28 = vld [vmem:[#allocation2 + $0xa] sm:$0x3]  ;;  %v4105_v37 = vrot.slane %v4094_v52, %v8513_v12 }
 0x677   :  { %v4190_v41 = vmul.f32 %v4185_v40, %v4146_v28  ;;  %v3576_v28 = vld [vmem:[#allocation2 + $0xa] sm:$0x3] }
 0x678   :  { %4601 = vrot.lane.b32.xlu0 %v4580_v7, %s11837_s15  ;;  %v4019_v7 = vcombine.high %v4017_v34, %v4017_v34 }
 0x67a   :  { %4607 = vrot.lane.b32.xlu1 %v4598_v5, %s11837_s15 }
 0x67c   :  { %4605 = vrot.lane.b32.xlu0 %v4587_v0, %s11837_s15  ;;  %v4112_v0 = vrot.slane %v4098_v56, %v8513_v12 }
 0x67e   :  { %4408 = vrot.lane.b32.xlu1 %v4390_v32, %s11835_s29  ;;  %v4493_v32 = vcombine.low %v4485_v57, %v4485_v57  ;;  %v4051_v57 = vld [vmem:[#allocation2 + $0xa] sm:$0x3]  ;;  %v4114_v26 = vcombine.low %v4112_v0, %v4112_v0  ;;  %s11841_s29 = smov 82  }
 0x67f   :  { %v4095_v54 = vmul.f32 %v4090_v53, %v4051_v57 }
 0x680   :  { %4313 = vrot.lane.b32.xlu0 %v9678_v44, %s11834_s21  ;;  %v3956_v44 = vld [vmem:[#allocation2 + $0xa] sm:$0x3]  ;;  %s11840_s21 = smov 83  }
 0x681   :  { %v4000_v55 = vmul.f32 %v3995_v63, %v3956_v44  ;;  %v4189_v63 = vmul.f32 %v9633_v25, %v4186_v22  ;;  %v4121_v49 = vrot.slane %v4095_v54, %v8513_v12 }
 0x682   :  { %4599 = vrot.lane.b32.xlu1 %v4588_v14, %s11837_s15  ;;  %s11843_s15 = smov 97  }
 0x683   :  { %v4020_v2 = vcombine.low %v4000_v55, %v4000_v55  ;;  %v4122_v33 = vcombine.low %v4121_v49, %v4121_v49  ;;  %v4193_v60 = vcombine.low %v4189_v63, %v4189_v63  ;;  %v3521_v55 = vrot.slane %v9609_v45, 6 }
 0x684   :  { %4503 = vrot.lane.b32.xlu0 %v4493_v32, %s11836_s14  ;;  %v4207_v32 = vrot.slane %v4189_v63, %v8513_v12  ;;  %s11842_s14 = smov 98  }
 0x685   :  { %v4027_v24 = vrot.slane %v4020_v2, %v8513_v12 }
 0x686   :  { %3937 = vrot.lane.b32.xlu1 %v3923_v35, %s11838_s17  ;;  %v4210_v35 = vcombine.low %v4190_v41, %v4190_v41  ;;  %v4209_v52 = vcombine.low %v4207_v32, %v4207_v32 }
 0x688   :  { %3935 = vrot.lane.b32.xlu0 %v3924_v62, %s11838_s17  ;;  %v4217_v62 = vrot.slane %v4210_v35, %v8513_v12 }
 0x68a   :  { %3941 = vrot.lane.b32.xlu1 %v3932_v1, %s11838_s17  ;;  %v4200_v1 = vrot.slane %v4193_v60, %v8513_v12  ;;  %v4218_v56 = vcombine.low %v4217_v62, %v4217_v62 }
 0x68c   :  { %3939 = vrot.lane.b32.xlu0 %v3925_v20, %s11838_s17  ;;  %v3522_v20 = vsel %vm1289_vm1, %v3521_v55, %v9609_v45  ;;  %v3710_v45 = vrot.slane %v9613_v6, 6 }
 0x68d   :  { %v3525_v2 = vmul.f32 %v9633_v25, %v3522_v20 }
 0x68e   :  { %4032 = vrot.lane.b32.xlu1 %v4017_v34, %s11839_s27  ;;  %v3615_v34 = vrot.slane %v9611_v38, 6 }
 0x68f   :  { %v3529_v57 = vcombine.high %v3525_v2, %v3525_v2 }
 0x690   :  { %4030 = vrot.lane.b32.xlu0 %v4018_v17, %s11839_s27  ;;  %v2153_v16 = vpop.permute.xlu1 %2152  ;;  %v3616_v40 = vsel %vm1193_vm5, %v3615_v34, %v9611_v38  ;;  %v3482_v17 = vld [vmem:[#allocation2 + $0xa] sm:$0x3] }
 0x691   :  { %v3619_v54 = vmul.f32 %v9633_v25, %v3616_v40  ;;  %v3543_v38 = vrot.slane %v3529_v57, %v8513_v12 }
 0x692   :  { %4036 = vrot.lane.b32.xlu1 %v4027_v24, %s11839_s27  ;;  %v2155_v5 = vpop.permute.xlu0 %2154  ;;  %v9797_v24 = vrot.slane %v3525_v2, %v8513_v12 }
 0x693   :  { %v2163_v47 = vsel %vm2162_vm0, %v2153_v16, %v2155_v5  ;;  %v4113_v16 = vcombine.low %v4105_v37, %v4105_v37  ;;  %v3623_v22 = vcombine.low %v3619_v54, %v3619_v54  ;;  %v3545_v41 = vcombine.high %v3543_v38, %v3543_v38 }
 0x694   :  { %4034 = vrot.lane.b32.xlu0 %v4019_v7, %s11839_s27  ;;  %2171 = vst [vmem:[#allocation3 + $0xa0] sm:$0xc] %v2163_v47  ;;  %v2157_v53 = vpop.permute.xlu1 %2156  ;;  %v3544_v7 = vcombine.high %v9797_v24, %v9797_v24 }
 0x695   :  { %v2164_v14 = vsel %vm2162_vm0, %v2155_v5, %v2157_v53  ;;  %v9811_v63 = vrot.slane %v3623_v22, %v8513_v12 }
 0x696   :  { %4127 = vrot.lane.b32.xlu1 %v4114_v26, %s11840_s21  ;;  %2172 = vst [vmem:[#allocation3 + $0xa8] sm:$0xc] %v2164_v14  ;;  %v2159_v43 = vpop.permute.xlu0 %2158  ;;  %v3620_v26 = vmul.f32 %v3615_v34, %v3576_v28  ;;  %v3805_v14 = vrot.slane %v9615_v15, 6 }
 0x697   :  { %v2165_v58 = vsel %vm2162_vm0, %v2157_v53, %v2159_v43 }
 0x698   :  { %4125 = vrot.lane.b32.xlu0 %v4105_v37, %s11840_s21  ;;  %2173 = vst [vmem:[#allocation3 + $0xb0] sm:$0xc] %v2165_v58  ;;  %v2161_v19 = vpop.permute.xlu1 %2160  ;;  %v3640_v49 = vcombine.low %v3620_v26, %v3620_v26  ;;  %v3671_v37 = vld [vmem:[#allocation2 + $0xa] sm:$0x3]  ;;  %v3235_v26 = vrot.slane %v9617_v39, 6 }
 0x699   :  { %v2166_v44 = vsel %vm2162_vm0, %v2159_v43, %v2161_v19  ;;  %v3638_v43 = vcombine.high %v9811_v63, %v9811_v63  ;;  %v3715_v58 = vmul.f32 %v3710_v45, %v3671_v37  ;;  %v3806_v19 = vsel %vm998_vm7, %v3805_v14, %v9615_v15 }
 0x69a   :  { %4131 = vrot.lane.b32.xlu1 %v4122_v33, %s11840_s21  ;;  %2174 = vst [vmem:[#allocation3 + $0xb8] sm:$0xc] %v2166_v44  ;;  %v3647_v35 = vrot.slane %v3640_v49, %v8513_v12  ;;  %v3766_v33 = vld [vmem:[#allocation2 + $0xa] sm:$0x3]  ;;  %v3809_v60 = vmul.f32 %v9633_v25, %v3806_v19 }
 0x69b   :  { %v3741_v62 = vrot.slane %v3715_v58, %v8513_v12 }
 0x69c   :  { %4129 = vrot.lane.b32.xlu0 %v4112_v0, %s11840_s21  ;;  %v4208_v0 = vcombine.low %v4200_v1, %v4200_v1  ;;  %v3813_v2 = vcombine.low %v3809_v60, %v3809_v60 }
 0x69d   :  { %v3742_v34 = vcombine.low %v3741_v62, %v3741_v62 }
 0x69e   :  { %4223 = vrot.lane.b32.xlu1 %v4209_v52, %s11841_s29  ;;  %v3810_v52 = vmul.f32 %v3805_v14, %v3766_v33 }
 0x6a0   :  { %4221 = vrot.lane.b32.xlu0 %v4200_v1, %s11841_s29  ;;  %v3830_v20 = vcombine.low %v3810_v52, %v3810_v52 }
 0x6a2   :  { %4227 = vrot.lane.b32.xlu1 %v4218_v56, %s11841_s29  ;;  %v3827_v56 = vrot.slane %v3809_v60, %v8513_v12 }
 0x6a4   :  { %4225 = vrot.lane.b32.xlu0 %v4207_v32, %s11841_s29 }
 0x6a6   :  { %4028 = vrot.lane.b32.xlu1 %v4010_v29, %s11839_s27  ;;  %v3526_v29 = vmul.f32 %v3521_v55, %v3482_v17  ;;  %s11844_s27 = smov 96   ;;  %v3829_v17 = vcombine.low %v3827_v56, %v3827_v56 }
 0x6a8   :  { %3933 = vrot.lane.b32.xlu0 %v9736_v59, %s11838_s17  ;;  %v3711_v59 = vsel %vm1095_vm3, %v3710_v45, %v9613_v6  ;;  %v3552_v47 = vrot.slane %v3526_v29, %v8513_v12  ;;  %v3637_v6 = vrot.slane %v3619_v54, %v8513_v12  ;;  %v3837_v45 = vrot.slane %v3830_v20, %v8513_v12 }
 0x6a9   :  { %v3714_v5 = vmul.f32 %v9633_v25, %v3711_v59  ;;  %v3141_v54 = vrot.slane %v9619_v31, 6  ;;  %v3820_v29 = vrot.slane %v3813_v2, %v8513_v12 }
 0x6aa   :  { %4219 = vrot.lane.b32.xlu1 %v4208_v0, %s11841_s29  ;;  %v3639_v44 = vcombine.high %v3637_v6, %v3637_v6  ;;  %v3838_v59 = vcombine.low %v3837_v45, %v3837_v45  ;;  %s11853_s29 = smov 111  }
 0x6ab   :  { %v3718_v53 = vcombine.high %v3714_v5, %v3714_v5  ;;  %v3725_v1 = vrot.slane %v3714_v5, %v8513_v12  ;;  %v3142_v22 = vsel %vm1677_vm6, %v3141_v54, %v9619_v31  ;;  %v3828_v58 = vcombine.low %v3820_v29, %v3820_v29 }
 0x6ac   :  { %4123 = vrot.lane.b32.xlu0 %v4113_v16, %s11840_s21  ;;  %s11845_s21 = smov 95  }
 0x6ad   :  { %v3732_v32 = vrot.slane %v3718_v53, %v8513_v12  ;;  %v3236_v53 = vsel %vm11849_vm12, %v3235_v26, %v9617_v39  ;;  %v3733_v19 = vcombine.low %v3725_v1, %v3725_v1 }
 0x6ae   :  { %3557 = vrot.lane.b32.xlu1 %v3543_v38, %s11842_s14  ;;  %v3239_v33 = vmul.f32 %v9633_v25, %v3236_v53 }
 0x6af   :  { %v3734_v55 = vcombine.low %v3732_v32, %v3732_v32 }
 0x6b0   :  { %3555 = vrot.lane.b32.xlu0 %v3544_v7, %s11842_s14 }
 0x6b2   :  { %3561 = vrot.lane.b32.xlu1 %v3552_v47, %s11842_s14 }
 0x6b4   :  { %3559 = vrot.lane.b32.xlu0 %v3545_v41, %s11842_s14  ;;  %v3145_v41 = vmul.f32 %v9633_v25, %v3142_v22  ;;  %v3257_v22 = vrot.slane %v3239_v33, %v8513_v12 }
 0x6b6   :  { %3652 = vrot.lane.b32.xlu1 %v3637_v6, %s11843_s15  ;;  %v3149_v37 = vcombine.high %v3145_v41, %v3145_v41 }
 0x6b8   :  { %3650 = vrot.lane.b32.xlu0 %v3638_v43, %s11843_s15  ;;  %v3163_v62 = vrot.slane %v3149_v37, %v8513_v12 }
 0x6ba   :  { %3656 = vrot.lane.b32.xlu1 %v3647_v35, %s11843_s15  ;;  %v3330_v35 = vrot.slane %v9623_v46, 6 }
 0x6bc   :  { %3654 = vrot.lane.b32.xlu0 %v3639_v44, %s11843_s15 }
 0x6be   :  { %3747 = vrot.lane.b32.xlu1 %v3734_v55, %s11844_s27  ;;  %v3196_v55 = vld [vmem:[#allocation2 + $0xa] sm:$0x3] }
 0x6c0   :  { %3745 = vrot.lane.b32.xlu0 %v3725_v1, %s11844_s27  ;;  %v2252_v15 = vpop.permute.xlu1 %2251 }
 0x6c2   :  { %3751 = vrot.lane.b32.xlu1 %v3742_v34, %s11844_s27  ;;  %v2250_v40 = vpop.permute.xlu0 %2249 }
 0x6c3   :  { %v2260_v57 = vsel %vm2259_vm4, %v2250_v40, %v2252_v15 }
 0x6c4   :  { %2268 = vst [vmem:[#allocation3 + $0xa0] sm:$0x30] %v2260_v57  ;;  %3749 = vrot.lane.b32.xlu0 %v3732_v32, %s11844_s27  ;;  %v4696_v0 = vpop.permute.xlu1 %4695  ;;  %v3102_v32 = vld [vmem:[#allocation2 + $0xa] sm:$0x3] }
 0x6c6   :  { %3843 = vrot.lane.b32.xlu1 %v3829_v17, %s11845_s21  ;;  %v9839_v16 = vpop.permute.xlu0 %2253 }
 0x6c7   :  { %v2261_v38 = vsel %vm2259_vm4, %v2252_v15, %v9839_v16  ;;  %v3243_v15 = vcombine.low %v3239_v33, %v3239_v33 }
 0x6c8   :  { %2269 = vst [vmem:[#allocation3 + $0xa8] sm:$0x30] %v2261_v38  ;;  %3841 = vrot.lane.b32.xlu0 %v3820_v29, %s11845_s21  ;;  %v4700_v28 = vpop.permute.xlu1 %4699 }
 0x6c9   :  { %v9884_v29 = vrot.slane %v3243_v15, %v8513_v12 }
 0x6ca   :  { %3847 = vrot.lane.b32.xlu1 %v3838_v59, %s11845_s21  ;;  %v4698_v7 = vpop.permute.xlu0 %4697 }
 0x6cb   :  { %v4704_v5 = vsel %vm11846_vm9, %v4696_v0, %v4698_v7  ;;  %v4705_v47 = vsel %vm11847_vm10, %v4698_v7, %v4700_v28  ;;  %vm11854_vm9 = vmmov %vm11851_vm14 }
 0x6cc   :  { %4712 = vst [vmem:[#allocation3 + $0x188] sm:$0x3] %v4704_v5  ;;  %4713 = vst [vmem:[#allocation3 + $0x190] sm:$0x3] %v4705_v47  ;;  %3845 = vrot.lane.b32.xlu0 %v3827_v56, %s11845_s21  ;;  %v4694_v6 = vpop.permute.xlu1 %4693  ;;  %v3331_v56 = vsel %vm11852_vm15, %v3330_v35, %v9623_v46  ;;  %v3425_v47 = vrot.slane %v9621_v23, 6  ;;  %vm11861_vm15 = vcmask 646144  }
 0x6cd   :  { %v4703_v49 = vsel %vm11848_vm11, %v4694_v6, %v4696_v0  ;;  %vm11855_vm10 = vmmov %vm11854_vm9  ;;  %v3240_v0 = vmul.f32 %v3235_v26, %v3196_v55  ;;  %v3334_v17 = vmul.f32 %v9633_v25, %v3331_v56  ;;  %vm11856_vm11 = vcmask 654336  }
 0x6ce   :  { %4711 = vst [vmem:[#allocation3 + $0x180] sm:$0x3] %v4703_v49  ;;  %3648 = vrot.lane.b32.xlu1 %v9811_v63, %s11843_s15  ;;  %v4702_v31 = vpop.permute.xlu0 %4701  ;;  %v9864_v63 = vrot.slane %v3145_v41, %v8513_v12  ;;  %v3291_v41 = vld [vmem:[#allocation2 + $0xa] sm:$0x3]  ;;  %v3258_v49 = vcombine.high %v9884_v29, %v9884_v29  ;;  %vm11858_vm12 = vmmov %vm11856_vm11  ;;  %v8443_v56 = vmov 0  }
 0x6cf   :  { %v4706_v14 = vsel %vm11850_vm13, %v4700_v28, %v4702_v31  ;;  %v3165_v28 = vcombine.high %v3163_v62, %v3163_v62  ;;  %v3260_v7 = vcombine.low %v3240_v0, %v3240_v0  ;;  %v3338_v26 = vcombine.high %v3334_v17, %v3334_v17  ;;  %vm11859_vm13 = vmmov %vm11856_vm11  ;;  %8380 = vset.pattern.permute.xlu0 %v8443_v56 }
 0x6d0   :  { %4714 = vst [vmem:[#allocation3 + $0x198] sm:$0x3] %v4706_v14  ;;  %3553 = vrot.lane.b32.xlu0 %v9797_v24, %s11842_s14  ;;  %v4318_v43 = vpop.permute.xlu1 %4317  ;;  %v3146_v24 = vmul.f32 %v3141_v54, %v3102_v32  ;;  %v3164_v34 = vcombine.high %v9864_v63, %v9864_v63  ;;  %v3386_v14 = vld [vmem:[#allocation2 + $0xa] sm:$0x3]  ;;  %v3335_v37 = vmul.f32 %v3330_v35, %v3291_v41 }
 0x6d1   :  { %v3267_v32 = vrot.slane %v3260_v7, %v8513_v12  ;;  %8381 = vset.pattern.permute.xlu1 %v8443_v56  ;;  %v2816_v56 = vld [vmem:[#allocation2 + $0xa] sm:$0x3] }
 0x6d2   :  { %3839 = vrot.lane.b32.xlu1 %v3828_v58, %s11845_s21  ;;  %v9867_v39 = vpop.permute.xlu0 %4315  ;;  %v3172_v54 = vrot.slane %v3146_v24, %v8513_v12 }
 0x6d3   :  { %v4324_v44 = vsel %vm11851_vm14, %v9867_v39, %v4318_v43  ;;  %v4765_v60 = vld [vmem:[#allocation3 + $0x188] sm:$0xff]  ;;  %v4766_v45 = vld [vmem:[#allocation3 + $0x190] sm:$0xff]  ;;  %vm11860_vm14 = vcmask 236544  }
 0x6d4   :  { %4332 = vst [vmem:[#allocation3 + $0x168] sm:$0x3] %v4324_v44  ;;  %3743 = vrot.lane.b32.xlu0 %v3733_v19, %s11844_s27  ;;  %4784 = vmatprep.subr.mxu0 %v4765_v60  ;;  %v4322_v52 = vpop.permute.xlu1 %4321  ;;  %v3426_v33 = vsel %vm11860_vm14, %v3425_v47, %v9621_v23  ;;  %v3259_v44 = vcombine.high %v3257_v22, %v3257_v22  ;;  %vm11869_vm14 = vcmask 654336  }
 0x6d5   :  { %v4764_v20 = vld [vmem:[#allocation3 + $0x180] sm:$0xff]  ;;  %v3430_v60 = vmul.f32 %v3425_v47, %v3386_v14  ;;  %v3429_v35 = vmul.f32 %v9633_v25, %v3426_v33  ;;  %v9910_v23 = vrot.slane %v3334_v17, %v8513_v12  ;;  %v2769_v33 = vcombine.high %v9642_v48, %v9642_v48 }
 0x6d6   :  { %3177 = vrot.lane.b32.xlu1 %v3163_v62, %s11853_s29  ;;  %v4320_v1 = vpop.permute.xlu0 %4319  ;;  %4785 = vmatpush1.msra.mxu0 %v4764_v20 }
 0x6d7   :  { %v4325_v2 = vsel %vm11854_vm9, %v4318_v43, %v4320_v1  ;;  %v4326_v40 = vsel %vm11855_vm10, %v4320_v1, %v4322_v52  ;;  %v4767_v57 = vld [vmem:[#allocation3 + $0x198] sm:$0xff]  ;;  %v3352_v43 = vrot.slane %v3338_v26, %v8513_v12  ;;  %v3361_v52 = vrot.slane %v3335_v37, %v8513_v12  ;;  %vm11863_vm9 = vmmov %vm11861_vm15 }
 0x6d8   :  { %4333 = vst [vmem:[#allocation3 + $0x170] sm:$0x3] %v4325_v2  ;;  %4334 = vst [vmem:[#allocation3 + $0x178] sm:$0x3] %v4326_v40  ;;  %3175 = vrot.lane.b32.xlu0 %v3164_v34, %s11853_s29  ;;  %4855 = vmatprep.subr.mxu1 %v4767_v57  ;;  %v4413_v46 = vpop.permute.xlu1 %4412  ;;  %v3447_v34 = vrot.slane %v3429_v35, %v8513_v12  ;;  %v3450_v2 = vcombine.low %v3430_v60, %v3430_v60 }
 0x6d9   :  { %4856 = vmatpush1.msra.mxu1 %v4766_v45  ;;  %v3354_v55 = vcombine.low %v3352_v43, %v3352_v43  ;;  %vm11864_vm10 = vmmov %vm11863_vm9  ;;  %v3362_v57 = vcombine.low %v3361_v52, %v3361_v52  ;;  %v3433_v0 = vcombine.low %v3429_v35, %v3429_v35 }
 0x6da   :  { %3181 = vrot.lane.b32.xlu1 %v3172_v54, %s11853_s29  ;;  %v9887_v38 = vpop.permute.xlu0 %4410  ;;  %v3449_v54 = vcombine.low %v3447_v34, %v3447_v34 }
 0x6db   :  { %v4419_v59 = vsel %vm11856_vm11, %v9887_v38, %v4413_v46  ;;  %vm11865_vm11 = vcmask 637952  }
 0x6dc   :  { %4427 = vst [vmem:[#allocation3 + $0x168] sm:$0xc] %v4419_v59  ;;  %3179 = vrot.lane.b32.xlu0 %v3165_v28, %s11853_s29  ;;  %v4417_v5 = vpop.permute.xlu1 %4416  ;;  %v3457_v28 = vrot.slane %v3450_v2, %v8513_v12 }
 0x6de   :  { %3272 = vrot.lane.b32.xlu1 %v3257_v22, %s11857_s19  ;;  %v4415_v6 = vpop.permute.xlu0 %4414  ;;  %v3440_v22 = vrot.slane %v3433_v0, %v8513_v12  ;;  %v3458_v47 = vcombine.low %v3457_v28, %v3457_v28 }
 0x6df   :  { %v4420_v31 = vsel %vm11858_vm12, %v4413_v46, %v4415_v6  ;;  %v4421_v53 = vsel %vm11859_vm13, %v4415_v6, %v4417_v5  ;;  %vm11867_vm12 = vmmov %vm11865_vm11 }
 0x6e0   :  { %4428 = vst [vmem:[#allocation3 + $0x170] sm:$0xc] %v4420_v31  ;;  %4429 = vst [vmem:[#allocation3 + $0x178] sm:$0xc] %v4421_v53  ;;  %3270 = vrot.lane.b32.xlu0 %v3258_v49, %s11857_s19  ;;  %v4508_v58 = vpop.permute.xlu1 %4507  ;;  %v2855_v49 = vrot.slane %v9625_v50, 6  ;;  %v3448_v60 = vcombine.low %v3440_v22, %v3440_v22 }
 0x6e1   :  { %vm11868_vm13 = vmmov %vm11865_vm11 }
 0x6e2   :  { %3276 = vrot.lane.b32.xlu1 %v3267_v32, %s11857_s19  ;;  %v4506_v19 = vpop.permute.xlu0 %4505  ;;  %v2860_v2 = vmul.f32 %v2855_v49, %v2816_v56 }
 0x6e3   :  { %v4514_v24 = vsel %vm11861_vm15, %v4506_v19, %v4508_v58  ;;  %vm11870_vm15 = vcmask 662528  }
 0x6e4   :  { %4522 = vst [vmem:[#allocation3 + $0x168] sm:$0x30] %v4514_v24  ;;  %3274 = vrot.lane.b32.xlu0 %v3259_v44, %s11857_s19  ;;  %v4512_v62 = vpop.permute.xlu1 %4511  ;;  %v2722_v24 = vld [vmem:[#allocation2 + $0xa] sm:$0x3]  ;;  %v2880_v28 = vcombine.low %v2860_v2, %v2860_v2 }
 0x6e6   :  { %3367 = vrot.lane.b32.xlu1 %v3354_v55, %s11862_s23  ;;  %v4510_v20 = vpop.permute.xlu0 %4509 }
 0x6e7   :  { %v4515_v15 = vsel %vm11863_vm9, %v4508_v58, %v4510_v20  ;;  %v4516_v1 = vsel %vm11864_vm10, %v4510_v20, %v4512_v62  ;;  %vm11871_vm9 = vmmov %vm11865_vm11  ;;  %vm11872_vm10 = vcmask 113664   ;;  %v2766_v62 = vmul.f32 %v2761_v30, %v2722_v24 }
 0x6e8   :  { %4523 = vst [vmem:[#allocation3 + $0x170] sm:$0x30] %v4515_v15  ;;  %4524 = vst [vmem:[#allocation3 + $0x178] sm:$0x30] %v4516_v1  ;;  %3365 = vrot.lane.b32.xlu0 %v9910_v23, %s11862_s23  ;;  %v4604_v40 = vpop.permute.xlu1 %4603 }
 0x6ea   :  { %3371 = vrot.lane.b32.xlu1 %v3362_v57, %s11862_s23  ;;  %v4602_v17 = vpop.permute.xlu0 %4601  ;;  %v2792_v57 = vrot.slane %v2766_v62, %v8513_v12 }
 0x6eb   :  { %v4610_v46 = vsel %vm11865_vm11, %v4602_v17, %v4604_v40  ;;  %vm11873_vm11 = vcmask 646144  }
 0x6ec   :  { %4618 = vst [vmem:[#allocation3 + $0x168] sm:$0xc0] %v4610_v46  ;;  %3369 = vrot.lane.b32.xlu0 %v3352_v43, %s11862_s23  ;;  %v4608_v45 = vpop.permute.xlu1 %4607  ;;  %v2856_v43 = vsel %vm11872_vm10, %v2855_v49, %v9625_v50 }
 0x6ed   :  { %v2859_v50 = vmul.f32 %v9633_v25, %v2856_v43 }
 0x6ee   :  { %3463 = vrot.lane.b32.xlu1 %v3449_v54, %s11866_s12  ;;  %v4606_v59 = vpop.permute.xlu0 %4605 }
 0x6ef   :  { %v4611_v7 = vsel %vm11867_vm12, %v4604_v40, %v4606_v59  ;;  %v4612_v26 = vsel %vm11868_vm13, %v4606_v59, %v4608_v45  ;;  %vm11874_vm12 = vcmask 769024   ;;  %vm11875_vm13 = vcmask 121856  }
 0x6f0   :  { %4619 = vst [vmem:[#allocation3 + $0x170] sm:$0xc0] %v4611_v7  ;;  %4620 = vst [vmem:[#allocation3 + $0x178] sm:$0xc0] %v4612_v26  ;;  %3461 = vrot.lane.b32.xlu0 %v3440_v22, %s11866_s12  ;;  %v4409_v5 = vpop.permute.xlu1 %4408  ;;  %v2863_v15 = vcombine.low %v2859_v50, %v2859_v50  ;;  %v2877_v54 = vrot.slane %v2859_v50, %v8513_v12  ;;  %v3045_v7 = vrot.slane %v9627_v51, 6 }
 0x6f1   :  { %v4418_v41 = vsel %vm11869_vm14, %v4409_v5, %v9887_v38  ;;  %vm11877_vm14 = vmmov %vm11874_vm12  ;;  %v2911_v26 = vld [vmem:[#allocation2 + $0xa] sm:$0x3] }
 0x6f2   :  { %4426 = vst [vmem:[#allocation3 + $0x160] sm:$0xc] %v4418_v41  ;;  %3467 = vrot.lane.b32.xlu1 %v3458_v47, %s11866_s12  ;;  %v4314_v6 = vpop.permute.xlu0 %4313  ;;  %v9972_v0 = vrot.slane %v2863_v15, %v8513_v12 }
 0x6f3   :  { %v4323_v31 = vsel %vm11870_vm15, %v4314_v6, %v9867_v39  ;;  %v4761_v53 = vld [vmem:[#allocation3 + $0x168] sm:$0xff]  ;;  %vm11878_vm15 = vmmov %vm11874_vm12 }
 0x6f4   :  { %4331 = vst [vmem:[#allocation3 + $0x160] sm:$0x3] %v4323_v31  ;;  %3465 = vrot.lane.b32.xlu0 %v3447_v34, %s11866_s12  ;;  %4786 = vmatprep.subr.mxu0 %v4761_v53  ;;  %v4600_v14 = vpop.permute.xlu1 %4599  ;;  %v2878_v47 = vcombine.high %v9972_v0, %v9972_v0 }
 0x6f5   :  { %v4609_v37 = vsel %vm11871_vm9, %v4600_v14, %v4602_v17  ;;  %vm11879_vm9 = vcmask 760832   ;;  %v2887_v14 = vrot.slane %v2880_v28, %v8513_v12  ;;  %v10024_v28 = vld [vmem:[#allocation2 + $0x2] sm:$0xff] }
 0x6f6   :  { %4617 = vst [vmem:[#allocation3 + $0x160] sm:$0xc0] %v4609_v37  ;;  %3268 = vrot.lane.b32.xlu1 %v9884_v29, %s11857_s19  ;;  %v4504_v38 = vpop.permute.xlu0 %4503  ;;  %v2950_v29 = vrot.slane %v9722_v21, 6  ;;  %vm11881_vm10 = vmmov %vm11879_vm9  ;;  %v3006_v37 = vld [vmem:[#allocation2 + $0xa] sm:$0x3] }
 0x6f7   :  { %v4513_v58 = vsel %vm11873_vm11, %v4504_v38, %v4506_v19  ;;  %v4763_v32 = vld [vmem:[#allocation3 + $0x178] sm:$0xff]  ;;  %v4762_v39 = vld [vmem:[#allocation3 + $0x170] sm:$0xff]  ;;  %v9948_v19 = vrot.slane %v9642_v48, %v8513_v12  ;;  %v2783_v48 = vrot.slane %v2769_v33, %v8513_v12  ;;  %vm11882_vm11 = vmmov %vm11879_vm9  ;;  %v3050_v33 = vmul.f32 %v3045_v7, %v3006_v37 }
 0x6f8   :  { %4521 = vst [vmem:[#allocation3 + $0x160] sm:$0x30] %v4513_v58  ;;  %3173 = vrot.lane.b32.xlu0 %v9864_v63, %s11853_s29  ;;  %4857 = vmatprep.subr.mxu1 %v4763_v32  ;;  %v3938_v44 = vpop.permute.xlu1 %3937  ;;  %v3353_v63 = vcombine.low %v9910_v23, %v9910_v23  ;;  %v2951_v20 = vsel %vm11875_vm13, %v2950_v29, %v9722_v21  ;;  %vm11884_vm13 = vcmask 678912  }
 0x6f9   :  { %4858 = vmatpush1.msra.mxu1 %v4762_v39  ;;  %v2784_v1 = vcombine.high %v9948_v19, %v9948_v19  ;;  %v2954_v40 = vmul.f32 %v9633_v25, %v2951_v20  ;;  %v2785_v46 = vcombine.high %v2783_v48, %v2783_v48  ;;  %v2955_v49 = vmul.f32 %v2950_v29, %v2911_v26 }
 0x6fa   :  { %3459 = vrot.lane.b32.xlu1 %v3448_v60, %s11866_s12  ;;  %v9951_v35 = vpop.permute.xlu0 %3935  ;;  %s11876_s12 = smov 115   ;;  %v2879_v58 = vcombine.high %v2877_v54, %v2877_v54  ;;  %v2475_v20 = vrot.slane %v9732_v61, 6 }
 0x6fb   :  { %v3944_v52 = vsel %vm11874_vm12, %v9951_v35, %v3938_v44  ;;  %v2958_v59 = vcombine.high %v2954_v40, %v2954_v40  ;;  %vm11883_vm12 = vcmask 130048  }
 0x6fc   :  { %3952 = vst [vmem:[#allocation3 + $0x148] sm:$0x3] %v3944_v52  ;;  %3363 = vrot.lane.b32.xlu0 %v3353_v63, %s11862_s23  ;;  %v3942_v55 = vpop.permute.xlu1 %3941  ;;  %s11880_s23 = smov 114   ;;  %v3046_v38 = vsel %vm11883_vm12, %v3045_v7, %v9627_v51  ;;  %v10001_v51 = vrot.slane %v2954_v40, %v8513_v12  ;;  %v3070_v52 = vcombine.low %v3050_v33, %v3050_v33 }
 0x6fd   :  { %v2972_v31 = vrot.slane %v2958_v59, %v8513_v12  ;;  %v3049_v39 = vmul.f32 %v9633_v25, %v3046_v38 }
 0x6fe   :  { %2797 = vrot.lane.b32.xlu1 %v2783_v48, %s11876_s12  ;;  %v3940_v23 = vpop.permute.xlu0 %3939 }
 0x6ff   :  { %v3945_v27 = vsel %vm11877_vm14, %v3938_v44, %v3940_v23  ;;  %v3946_v30 = vsel %vm11878_vm15, %v3940_v23, %v3942_v55  ;;  %v4760_v34 = vld [vmem:[#allocation3 + $0x160] sm:$0xff]  ;;  %v2981_v44 = vrot.slane %v2955_v49, %v8513_v12  ;;  %v2974_v24 = vcombine.low %v2972_v31, %v2972_v31  ;;  %vm11886_vm14 = vmmov %vm11884_vm13 }
 0x700   :  { %3953 = vst [vmem:[#allocation3 + $0x150] sm:$0x3] %v3945_v27  ;;  %3954 = vst [vmem:[#allocation3 + $0x158] sm:$0x3] %v3946_v30  ;;  %2795 = vrot.lane.b32.xlu0 %v2784_v1, %s11876_s12  ;;  %4787 = vmatpush1.msra.mxu0 %v4760_v34  ;;  %v4033_v21 = vpop.permute.xlu1 %4032  ;;  %v3067_v25 = vrot.slane %v3049_v39, %v8513_v12  ;;  %v3053_v48 = vcombine.low %v3049_v39, %v3049_v39 }
 0x701   :  { %vm11887_vm15 = vmmov %vm11884_vm13  ;;  %v2982_v55 = vcombine.low %v2981_v44, %v2981_v44  ;;  %v3077_v27 = vrot.slane %v3070_v52, %v8513_v12  ;;  %v2531_v44 = vld [vmem:[#allocation2 + $0xa] sm:$0x3] }
 0x702   :  { %2801 = vrot.lane.b32.xlu1 %v2792_v57, %s11876_s12  ;;  %v9975_v17 = vpop.permute.xlu0 %4030  ;;  %v3069_v1 = vcombine.low %v3067_v25, %v3067_v25  ;;  %v3060_v34 = vrot.slane %v3053_v48, %v8513_v12  ;;  %v2626_v48 = vld [vmem:[#allocation2 + $0xa] sm:$0x3] }
 0x703   :  { %v4039_v45 = vsel %vm11879_vm9, %v9975_v17, %v4033_v21  ;;  %vm11888_vm9 = vcmask 670720  }
 0x704   :  { %4047 = vst [vmem:[#allocation3 + $0x148] sm:$0xc] %v4039_v45  ;;  %2799 = vrot.lane.b32.xlu0 %v2785_v46, %s11876_s12  ;;  %v4037_v22 = vpop.permute.xlu1 %4036  ;;  %vm11891_vm12 = vmmov %vm11888_vm9  ;;  %v3078_v46 = vcombine.low %v3077_v27, %v3077_v27  ;;  %v2570_v45 = vrot.slane %v9635_v36, 6  ;;  %v3068_v37 = vcombine.low %v3060_v34, %v3060_v34 }
 0x706   :  { %v4035_v5 = vpop.permute.xlu0 %4034  ;;  %2892 = vrot.lane.b32.xlu1 %v2877_v54, %s11880_s23 }
 0x707   :  { %v4040_v41 = vsel %vm11881_vm10, %v4033_v21, %v4035_v5  ;;  %v4041_v6 = vsel %vm11882_vm11, %v4035_v5, %v4037_v22  ;;  %vm2357_vm10 = vcmask 7168   ;;  %vm11890_vm11 = vmmov %vm11888_vm9  ;;  %v2436_v5 = vld [vmem:[#allocation2 + $0xa] sm:$0x3] }
 0x708   :  { %4048 = vst [vmem:[#allocation3 + $0x150] sm:$0xc] %v4040_v41  ;;  %4049 = vst [vmem:[#allocation3 + $0x158] sm:$0xc] %v4041_v6  ;;  %2890 = vrot.lane.b32.xlu0 %v2878_v47, %s11880_s23  ;;  %v4128_v53 = vpop.permute.xlu1 %4127  ;;  %v2476_v2 = vsel %vm2357_vm10, %v2475_v20, %v9732_v61 }
 0x709   :  { %v2479_v59 = vmul.f32 %v10024_v28, %v2476_v2 }
 0x70a   :  { %v9992_v43 = vpop.permute.xlu0 %4125  ;;  %2896 = vrot.lane.b32.xlu1 %v2887_v14, %s11880_s23  ;;  %v2480_v14 = vmul.f32 %v2475_v20, %v2436_v5 }
 0x70b   :  { %v4134_v32 = vsel %vm11884_vm13, %v9992_v43, %v4128_v53  ;;  %vm11892_vm13 = vcmask 760832   ;;  %v2483_v41 = vcombine.low %v2479_v59, %v2479_v59 }
 0x70c   :  { %4142 = vst [vmem:[#allocation3 + $0x148] sm:$0x30] %v4134_v32  ;;  %2894 = vrot.lane.b32.xlu0 %v2879_v58, %s11880_s23  ;;  %v4132_v60 = vpop.permute.xlu1 %4131  ;;  %v2500_v39 = vcombine.low %v2480_v14, %v2480_v14 }
 0x70d   :  { %v10042_v38 = vrot.slane %v2483_v41, %v8513_v12 }
 0x70e   :  { %v4130_v29 = vpop.permute.xlu0 %4129  ;;  %2987 = vrot.lane.b32.xlu1 %v2974_v24, %s11885_s30 }
 0x70f   :  { %v4135_v50 = vsel %vm11886_vm14, %v4128_v53, %v4130_v29  ;;  %v4136_v63 = vsel %vm11887_vm15, %v4130_v29, %v4132_v60  ;;  %vm11893_vm14 = vcmask 769024   ;;  %vm11894_vm15 = vmmov %vm11888_vm9  ;;  %v2665_v60 = vrot.slane %v9747_v4, 6 }
 0x710   :  { %4143 = vst [vmem:[#allocation3 + $0x150] sm:$0x30] %v4135_v50  ;;  %4144 = vst [vmem:[#allocation3 + $0x158] sm:$0x30] %v4136_v63  ;;  %2985 = vrot.lane.b32.xlu0 %v10001_v51, %s11885_s30  ;;  %v4224_v62 = vpop.permute.xlu1 %4223 }
 0x712   :  { %v4222_v56 = vpop.permute.xlu0 %4221  ;;  %2991 = vrot.lane.b32.xlu1 %v2982_v55, %s11885_s30  ;;  %v2507_v55 = vrot.slane %v2500_v39, %v8513_v12 }
 0x713   :  { %v4230_v15 = vsel %vm11888_vm9, %v4222_v56, %v4224_v62  ;;  %vm11895_vm9 = vcmask 678912  }
 0x714   :  { %4238 = vst [vmem:[#allocation3 + $0x148] sm:$0xc0] %v4230_v15  ;;  %2989 = vrot.lane.b32.xlu0 %v2972_v31, %s11885_s30  ;;  %v4228_v23 = vpop.permute.xlu1 %4227 }
 0x716   :  { %v4226_v30 = vpop.permute.xlu0 %4225  ;;  %3083 = vrot.lane.b32.xlu1 %v3069_v1, %s11889_s20 }
 0x717   :  { %v4231_v40 = vsel %vm11890_vm11, %v4224_v62, %v4226_v30  ;;  %v4232_v21 = vsel %vm11891_vm12, %v4226_v30, %v4228_v23  ;;  %vm11896_vm11 = vcmask 801792   ;;  %v2670_v30 = vmul.f32 %v2665_v60, %v2626_v48  ;;  %v2273_v48 = vld [vmem:[#allocation2 + $0x8] sm:$0x3] }
 0x718   :  { %4239 = vst [vmem:[#allocation3 + $0x150] sm:$0xc0] %v4231_v40  ;;  %4240 = vst [vmem:[#allocation3 + $0x158] sm:$0xc0] %v4232_v21  ;;  %3081 = vrot.lane.b32.xlu0 %v3060_v34, %s11889_s20  ;;  %v4029_v57 = vpop.permute.xlu1 %4028 }
 0x719   :  { %v4038_v54 = vsel %vm11892_vm13, %v4029_v57, %v9975_v17  ;;  %v2571_v17 = vsel %vm2259_vm4, %v2570_v45, %v9635_v36  ;;  %vm11897_vm12 = vmmov %vm11896_vm11 }
 0x71a   :  { %4046 = vst [vmem:[#allocation3 + $0x140] sm:$0xc] %v4038_v54  ;;  %v3934_v61 = vpop.permute.xlu0 %3933  ;;  %3087 = vrot.lane.b32.xlu1 %v3078_v46, %s11889_s20  ;;  %v2574_v53 = vmul.f32 %v10024_v28, %v2571_v17  ;;  %vm11898_vm13 = vmmov %vm11896_vm11 }
 0x71b   :  { %v3943_v22 = vsel %vm11893_vm14, %v3934_v61, %v9951_v35  ;;  %v4757_v7 = vld [vmem:[#allocation3 + $0x148] sm:$0xff]  ;;  %vm11899_vm14 = vcmask 793600  }
 0x71c   :  { %3951 = vst [vmem:[#allocation3 + $0x140] sm:$0x3] %v3943_v22  ;;  %3085 = vrot.lane.b32.xlu0 %v3067_v25, %s11889_s20  ;;  %4788 = vmatprep.subr.mxu0 %v4757_v7  ;;  %v4220_v26 = vpop.permute.xlu1 %4219  ;;  %v2578_v32 = vcombine.high %v2574_v53, %v2574_v53  ;;  %v2575_v25 = vmul.f32 %v2570_v45, %v2531_v44  ;;  %v2312_v7 = vrot.slane %v9755_v13, 6 }
 0x71d   :  { %v4229_v47 = vsel %vm11894_vm15, %v4220_v26, %v4222_v56  ;;  %v2666_v56 = vsel %vm2162_vm0, %v2665_v60, %v9747_v4  ;;  %v2585_v4 = vrot.slane %v2574_v53, %v8513_v12  ;;  %vm11900_vm0 = vmmov %vm11899_vm14  ;;  %v2690_v45 = vcombine.low %v2670_v30, %v2670_v30  ;;  %v2370_v60 = vld [vmem:[#allocation2 + $0x2] sm:$0xff] }
 0x71e   :  { %4237 = vst [vmem:[#allocation3 + $0x140] sm:$0xc0] %v4229_v47  ;;  %v4124_v6 = vpop.permute.xlu0 %4123  ;;  %2888 = vrot.lane.b32.xlu1 %v9972_v0, %s11880_s23  ;;  %v2592_v52 = vrot.slane %v2578_v32, %v8513_v12  ;;  %v2601_v1 = vrot.slane %v2575_v25, %v8513_v12  ;;  %v2669_v27 = vmul.f32 %v10024_v28, %v2666_v56  ;;  %vm11901_vm15 = vmmov %vm11900_vm0  ;;  %v8261_v47 = vld [vmem:[%s11686_s7 + $0x60] ss:$8 sm:$0xf]  ;;  %s11912_s7 = smov 1  }
 0x71f   :  { %v4133_v35 = vsel %vm11895_vm9, %v4124_v6, %v9992_v43  ;;  %v4759_v49 = vld [vmem:[#allocation3 + $0x158] sm:$0xff]  ;;  %v4758_v31 = vld [vmem:[#allocation3 + $0x150] sm:$0xff]  ;;  %v2973_v43 = vcombine.low %v10001_v51, %v10001_v51  ;;  %v2498_v51 = vcombine.high %v10042_v38, %v10042_v38  ;;  %vm11902_vm9 = vcmask 785408  }
 0x720   :  { %4141 = vst [vmem:[#allocation3 + $0x140] sm:$0x30] %v4133_v35  ;;  %2793 = vrot.lane.b32.xlu0 %v9948_v19, %s11876_s12  ;;  %4859 = vmatprep.subr.mxu1 %v4759_v49  ;;  %v3558_v36 = vpop.permute.xlu1 %3557  ;;  %v2497_v19 = vrot.slane %v2479_v59, %v8513_v12  ;;  %v2594_v2 = vcombine.low %v2592_v52, %v2592_v52  ;;  %s11951_s12 = smov 34  }
 0x721   :  { %4860 = vmatpush1.msra.mxu1 %v4758_v31  ;;  %v2687_v46 = vrot.slane %v2669_v27, %v8513_v12  ;;  %v2602_v28 = vcombine.low %v2601_v1, %v2601_v1  ;;  %v2673_v59 = vcombine.low %v2669_v27, %v2669_v27  ;;  %v2697_v5 = vrot.slane %v2690_v45, %v8513_v12 }
 0x722   :  { %v10044_v0 = vpop.permute.xlu0 %3555  ;;  %3079 = vrot.lane.b32.xlu1 %v3068_v37, %s11889_s20  ;;  %v2499_v15 = vcombine.high %v2497_v19, %v2497_v19  ;;  %v2377_v41 = vrot.slane %v8261_v47, %v8505_v8  ;;  %v2381_v6 = vrot.slane %v8261_v47, %v8507_v9  ;;  %v2385_v35 = vrot.slane %v8261_v47, %v8509_v10 }
 0x723   :  { %v3564_v58 = vsel %vm11896_vm11, %v10044_v0, %v3558_v36  ;;  %v2689_v17 = vcombine.low %v2687_v46, %v2687_v46  ;;  %v2389_v49 = vrot.slane %v8261_v47, %v8511_v11  ;;  %vm2313_vm11 = vcmask 1039360  }
 0x724   :  { %3572 = vst [vmem:[#allocation3 + $0x128] sm:$0x3] %v3564_v58  ;;  %2983 = vrot.lane.b32.xlu0 %v2973_v43, %s11885_s30  ;;  %v3562_v33 = vpop.permute.xlu1 %3561  ;;  %v2680_v53 = vrot.slane %v2673_v59, %v8513_v12  ;;  %v2390_v37 = vcombine.low %v2377_v41, %v2381_v6  ;;  %v2698_v32 = vcombine.low %v2697_v5, %v2697_v5 }
 0x725   :  { %v2391_v43 = vcombine.low %v2385_v35, %v2389_v49 }
 0x726   :  { %v3560_v24 = vpop.permute.xlu0 %3559  ;;  %2512 = vrot.lane.b32.xlu1 %v2497_v19, %s11798_s22  ;;  %v2314_v19 = vsel %vm2313_vm11, %v2312_v7, %v9755_v13  ;;  %v2398_v39 = vrot.slane %v2390_v37, %v8513_v12 }
 0x727   :  { %v3565_v29 = vsel %vm11897_vm12, %v3558_v36, %v3560_v24  ;;  %v3566_v50 = vsel %vm11898_vm13, %v3560_v24, %v3562_v33  ;;  %v4756_v63 = vld [vmem:[#allocation3 + $0x140] sm:$0xff]  ;;  %vm11904_vm12 = vmmov %vm11902_vm9  ;;  %v2405_v33 = vrot.slane %v2391_v43, %v8513_v12  ;;  %v2176_v24 = vld [vmem:[#allocation2 + $0x8] sm:$0x3] }
 0x728   :  { %3573 = vst [vmem:[#allocation3 + $0x130] sm:$0x3] %v3565_v29  ;;  %3574 = vst [vmem:[#allocation3 + $0x138] sm:$0x3] %v3566_v50  ;;  %2510 = vrot.lane.b32.xlu0 %v2498_v51, %s11798_s22  ;;  %4789 = vmatpush1.msra.mxu0 %v4756_v63  ;;  %v3653_v62 = vpop.permute.xlu1 %3652  ;;  %v8392_v50 = vld [vmem:[#allocation2] sm:$0xff] }
 0x729   :  { %vm11905_vm13 = vmmov %vm11902_vm9  ;;  %v2406_v29 = vcombine.low %v2398_v39, %v2405_v33  ;;  %v2317_v63 = vmul.f32 %v8392_v50, %v2314_v19 }
 0x72a   :  { %v10064_v20 = vpop.permute.xlu0 %3650  ;;  %2516 = vrot.lane.b32.xlu1 %v2507_v55, %s11798_s22 }
 0x72b   :  { %v3659_v23 = vsel %vm11899_vm14, %v10064_v20, %v3653_v62  ;;  %vm11906_vm14 = vcmask 777216   ;;  %v2408_v13 = vmul.f32 %v2406_v29, %v2370_v60  ;;  %v2321_v27 = vcombine.low %v2317_v63, %v2317_v63 }
 0x72c   :  { %3667 = vst [vmem:[#allocation3 + $0x128] sm:$0xc] %v3659_v23  ;;  %2514 = vrot.lane.b32.xlu0 %v2499_v15, %s11798_s22  ;;  %v3657_v34 = vpop.permute.xlu1 %3656 }
 0x72d   :  { %v2417_v23 = vrot.slane %v2408_v13, %v8513_v12  ;;  %8262 = vst.sshfl [vmem:[#allocation3 + $0xc0] sm:$0x3 pattern:$0x76325410] %v2408_v13  ;;  %v2410_v1 = vcombine.high %v2408_v13, %v2408_v13  ;;  %v2328_v45 = vrot.slane %v2321_v27, %v8513_v12 }
 0x72e   :  { %v3655_v40 = vpop.permute.xlu0 %3654  ;;  %2607 = vrot.lane.b32.xlu1 %v2594_v2, %s11794_s13 }
 0x72f   :  { %v3660_v21 = vsel %vm11900_vm0, %v3653_v62, %v3655_v40  ;;  %v3661_v57 = vsel %vm11901_vm15, %v3655_v40, %v3657_v34  ;;  %v2221_v62 = vmul.f32 %v2215_v18, %v2176_v24  ;;  %vm11907_vm0 = vmmov %vm11906_vm14  ;;  %v2425_v30 = vcombine.high %v2417_v23, %v2417_v23  ;;  %8263 = vst.sshfl [vmem:[#allocation3 + $0xd0] sm:$0x3 pattern:$0x76325410] %v2410_v1 }
 0x730   :  { %3668 = vst [vmem:[#allocation3 + $0x130] sm:$0xc] %v3660_v21  ;;  %3669 = vst [vmem:[#allocation3 + $0x138] sm:$0xc] %v3661_v57  ;;  %2605 = vrot.lane.b32.xlu0 %v2585_v4, %s11794_s13  ;;  %v3748_v54 = vpop.permute.xlu1 %3747  ;;  %v2424_v34 = vrot.slane %v2410_v1, %v8513_v12  ;;  %v2688_v21 = vcombine.low %v2680_v53, %v2680_v53  ;;  %v2336_v49 = vcombine.low %v2328_v45, %v2328_v45 }
 0x731   :  { %vm11908_vm15 = vmmov %vm11907_vm0  ;;  %v2247_v2 = vrot.slane %v2221_v62, %v8513_v12  ;;  %2432 = vst [vmem:[#allocation3 + $0xc8] sm:$0x3] %v2425_v30  ;;  %v8303_v24 = vld [vmem:[%s11688_s8 + $0x26] ss:$8 sm:$0xf] }
 0x732   :  { %v10078_v61 = vpop.permute.xlu0 %3745  ;;  %2611 = vrot.lane.b32.xlu1 %v2602_v28, %s11794_s13  ;;  %v2335_v28 = vrot.slane %v2317_v63, %v8513_v12  ;;  %v5927_v62 = vrot.slane %v8303_v24, %v8507_v9  ;;  %v5935_v1 = vrot.slane %v8303_v24, %v8511_v11 }
 0x733   :  { %v3754_v22 = vsel %vm11902_vm9, %v10078_v61, %v3748_v54  ;;  %vm11909_vm9 = vcmask 793600  }
 0x734   :  { %3762 = vst [vmem:[#allocation3 + $0x128] sm:$0x30] %v3754_v22  ;;  %2609 = vrot.lane.b32.xlu0 %v2592_v52, %s11794_s13  ;;  %v3752_v26 = vpop.permute.xlu1 %3751  ;;  %v2593_v52 = vcombine.low %v2585_v4, %v2585_v4  ;;  %v2318_v4 = vmul.f32 %v2312_v7, %v2273_v48  ;;  %v2337_v47 = vcombine.low %v2335_v28, %v2335_v28 }
 0x736   :  { %v3750_v31 = vpop.permute.xlu0 %3749  ;;  %2703 = vrot.lane.b32.xlu1 %v2689_v17, %s11903_s28 }
 0x737   :  { %v3755_v14 = vsel %vm11904_vm12, %v3748_v54, %v3750_v31  ;;  %v3756_v36 = vsel %vm11905_vm13, %v3750_v31, %v3752_v26  ;;  %vm11910_vm12 = vcmask 801792   ;;  %vm11911_vm13 = vmmov %vm11907_vm0 }
 0x738   :  { %3763 = vst [vmem:[#allocation3 + $0x130] sm:$0x30] %v3755_v14  ;;  %3764 = vst [vmem:[#allocation3 + $0x138] sm:$0x30] %v3756_v36  ;;  %2701 = vrot.lane.b32.xlu0 %v2680_v53, %s11903_s28  ;;  %v3844_v58 = vpop.permute.xlu1 %3843 }
 0x73a   :  { %v3842_v44 = vpop.permute.xlu0 %3841  ;;  %2707 = vrot.lane.b32.xlu1 %v2698_v32, %s11903_s28  ;;  %v4768_v32 = vld [vmem:[%s11689_s4] sm:$0xff]  ;;  %s11954_s4 = smov 31  }
 0x73b   :  { %v3850_v51 = vsel %vm11906_vm14, %v3842_v44, %v3844_v58  ;;  %vm11913_vm14 = vcmask 785408  }
 0x73c   :  { %3858 = vst [vmem:[#allocation3 + $0x128] sm:$0xc0] %v3850_v51  ;;  %2705 = vrot.lane.b32.xlu0 %v2687_v46, %s11903_s28  ;;  %v3848_v25 = vpop.permute.xlu1 %3847  ;;  %v2426_v46 = vcombine.high %v2424_v34, %v2424_v34 }
 0x73e   :  { %v3846_v55 = vpop.permute.xlu0 %3845  ;;  %2603 = vrot.lane.b32.xlu1 %v2593_v52, %s11794_s13  ;;  %2434 = vst [vmem:[#allocation3 + $0xd8] sm:$0x3] %v2426_v46  ;;  %v5923_v52 = vrot.slane %v8303_v24, %v8505_v8  ;;  %s11931_s13 = smov 126  }
 0x73f   :  { %v3851_v56 = vsel %vm11907_vm0, %v3844_v58, %v3846_v55  ;;  %v3852_v15 = vsel %vm11908_vm15, %v3846_v55, %v3848_v25  ;;  %vm11914_vm0 = vcmask 908288  }
 0x740   :  { %3859 = vst [vmem:[#allocation3 + $0x130] sm:$0xc0] %v3851_v56  ;;  %3860 = vst [vmem:[#allocation3 + $0x138] sm:$0xc0] %v3852_v15  ;;  %2508 = vrot.lane.b32.xlu0 %v10042_v38, %s11798_s22  ;;  %v3649_v3 = vpop.permute.xlu1 %3648  ;;  %v5931_v56 = vrot.slane %v8303_v24, %v8509_v10 }
 0x741   :  { %v3658_v18 = vsel %vm11909_vm9, %v3649_v3, %v10064_v20  ;;  %vm11915_vm15 = vmmov %vm11914_vm0  ;;  %v8302_v15 = vld [vmem:[%s11688_s8 + $0x25] ss:$8 sm:$0xf] }
 0x742   :  { %3666 = vst [vmem:[#allocation3 + $0x120] sm:$0xc] %v3658_v18  ;;  %v3554_v40 = vpop.permute.xlu0 %3553  ;;  %2255 = vrot.lane.b32.xlu1 %v9658_v42, %s11796_s16  ;;  %v2338_v42 = vcombine.low %v2318_v4, %v2318_v4  ;;  %vm11916_vm9 = vmmov %vm11914_vm0  ;;  %v5851_v30 = vrot.slane %v8302_v15, %v8505_v8  ;;  %v5863_v46 = vrot.slane %v8302_v15, %v8511_v11 }
 0x743   :  { %v3563_v38 = vsel %vm11910_vm12, %v3554_v40, %v10044_v0  ;;  %v4753_v57 = vld [vmem:[#allocation3 + $0x128] sm:$0xff]  ;;  %v2248_v0 = vcombine.low %v2247_v2, %v2247_v2  ;;  %vm11917_vm12 = vcmask 900096   ;;  %v5855_v2 = vrot.slane %v8302_v15, %v8507_v9 }
 0x744   :  { %3571 = vst [vmem:[#allocation3 + $0x120] sm:$0x3] %v3563_v38  ;;  %2699 = vrot.lane.b32.xlu0 %v2688_v21, %s11903_s28  ;;  %4790 = vmatprep.subr.mxu0 %v4753_v57  ;;  %v3840_v20 = vpop.permute.xlu1 %3839  ;;  %v2345_v41 = vrot.slane %v2338_v42, %v8513_v12  ;;  %v5859_v21 = vrot.slane %v8302_v15, %v8509_v10  ;;  %v8300_v38 = vld [vmem:[%s11688_s8 + $0x23] ss:$8 sm:$0xf]  ;;  %s11952_s28 = smov 33  }
 0x745   :  { %v3849_v54 = vsel %vm11911_vm13, %v3840_v20, %v3842_v44  ;;  %vm11918_vm13 = vmmov %vm11917_vm12 }
 0x746   :  { %3857 = vst [vmem:[#allocation3 + $0x120] sm:$0xc0] %v3849_v54  ;;  %v3744_v59 = vpop.permute.xlu0 %3743  ;;  %2349 = vrot.lane.b32.xlu1 %v2328_v45, %s11912_s7  ;;  %v2346_v53 = vcombine.low %v2345_v41, %v2345_v41  ;;  %v8299_v41 = vld [vmem:[%s11688_s8 + $0x22] ss:$8 sm:$0xf] }
 0x747   :  { %v3753_v22 = vsel %vm11913_vm14, %v3744_v59, %v10078_v61  ;;  %v4755_v7 = vld [vmem:[#allocation3 + $0x138] sm:$0xff]  ;;  %v4754_v26 = vld [vmem:[#allocation3 + $0x130] sm:$0xff]  ;;  %vm11919_vm14 = vmmov %vm11917_vm12 }
 0x748   :  { %3761 = vst [vmem:[#allocation3 + $0x120] sm:$0x30] %v3753_v22  ;;  %2257 = vrot.lane.b32.xlu0 %v2248_v0, %s11796_s16  ;;  %4861 = vmatprep.subr.mxu1 %v4755_v7  ;;  %v3178_v17 = vpop.permute.xlu1 %3177  ;;  %v8304_v61 = vld [vmem:[%s11688_s8 + $0x27] ss:$8 sm:$0xf]  ;;  %v5748_v0 = vrot.slane %v8300_v38, %v8507_v9 }
 0x749   :  { %4862 = vmatpush1.msra.mxu1 %v4754_v26  ;;  %v5995_v14 = vrot.slane %v8304_v61, %v8505_v8  ;;  %v5999_v39 = vrot.slane %v8304_v61, %v8507_v9  ;;  %v6003_v60 = vrot.slane %v8304_v61, %v8509_v10  ;;  %v6007_v29 = vrot.slane %v8304_v61, %v8511_v11 }
 0x74a   :  { %v10129_v5 = vpop.permute.xlu0 %3175  ;;  %2353 = vrot.lane.b32.xlu1 %v2335_v28, %s11912_s7  ;;  %v5744_v28 = vrot.slane %v8300_v38, %v8505_v8 }
 0x74b   :  { %v3184_v6 = vsel %vm11914_vm0, %v10129_v5, %v3178_v17  ;;  %vm11920_vm0 = vcmask 891904  }
 0x74c   :  { %3192 = vst [vmem:[#allocation3 + $0x108] sm:$0x3] %v3184_v6  ;;  %2351 = vrot.lane.b32.xlu0 %v2337_v47, %s11912_s7  ;;  %v3182_v35 = vpop.permute.xlu1 %3181 }
 0x74e   :  { %v3180_v31 = vpop.permute.xlu0 %3179  ;;  %2347 = vrot.lane.b32.xlu1 %v2336_v49, %s11912_s7 }
 0x74f   :  { %v3185_v36 = vsel %vm11915_vm15, %v3178_v17, %v3180_v31  ;;  %v3186_v37 = vsel %vm11916_vm9, %v3180_v31, %v3182_v35  ;;  %v4752_v43 = vld [vmem:[#allocation3 + $0x120] sm:$0xff]  ;;  %vm11921_vm15 = vmmov %vm11920_vm0  ;;  %v5752_v17 = vrot.slane %v8300_v38, %v8509_v10 }
 0x750   :  { %3193 = vst [vmem:[#allocation3 + $0x110] sm:$0x3] %v3185_v36  ;;  %3194 = vst [vmem:[#allocation3 + $0x118] sm:$0x3] %v3186_v37  ;;  %2355 = vrot.lane.b32.xlu0 %v2346_v53, %s11912_s7  ;;  %4791 = vmatpush1.msra.mxu0 %v4752_v43  ;;  %v3273_v58 = vpop.permute.xlu1 %3272  ;;  %v5672_v53 = vrot.slane %v8299_v41, %v8505_v8  ;;  %v5676_v36 = vrot.slane %v8299_v41, %v8507_v9 }
 0x751   :  { %vm11922_vm9 = vmmov %vm11920_vm0 }
 0x752   :  { %v3271_v19 = vpop.permute.xlu0 %3270  ;;  %6008 = vrot.lane.b32.xlu1 %v5995_v14, %s11830_s11 }
 0x753   :  { %v3279_v33 = vsel %vm11917_vm12, %v3271_v19, %v3273_v58  ;;  %vm11923_vm12 = vcmask 809984  }
 0x754   :  { %3287 = vst [vmem:[#allocation3 + $0x108] sm:$0xc] %v3279_v33  ;;  %v3277_v44 = vpop.permute.xlu1 %3276  ;;  %4771 = vperm.xlu0 %8380, %v4768_v32   ;;  %v8298_v32 = vld [vmem:[%s11688_s8 + $0x21] ss:$8 sm:$0xf] }
 0x756   :  { %v3275_v51 = vpop.permute.xlu0 %3274  ;;  %6010 = vrot.lane.b32.xlu1 %v5999_v39, %s11830_s11  ;;  %v5684_v39 = vrot.slane %v8299_v41, %v8511_v11 }
 0x757   :  { %v3280_v50 = vsel %vm11918_vm13, %v3273_v58, %v3275_v51  ;;  %v3281_v63 = vsel %vm11919_vm14, %v3275_v51, %v3277_v44  ;;  %vm11924_vm13 = vmmov %vm11923_vm12  ;;  %v5680_v58 = vrot.slane %v8299_v41, %v8509_v10  ;;  %v5600_v51 = vrot.slane %v8298_v32, %v8505_v8 }
 0x758   :  { %3288 = vst [vmem:[#allocation3 + $0x110] sm:$0xc] %v3280_v50  ;;  %3289 = vst [vmem:[#allocation3 + $0x118] sm:$0xc] %v3281_v63  ;;  %v3368_v25 = vpop.permute.xlu1 %3367  ;;  %6012 = vrot.lane.b32.xlu0 %v6003_v60, %s11830_s11  ;;  %v5604_v50 = vrot.slane %v8298_v32, %v8507_v9 }
 0x759   :  { %vm11925_vm14 = vmmov %vm11923_vm12 }
 0x75a   :  { %v3366_v13 = vpop.permute.xlu0 %3365  ;;  %6014 = vrot.lane.b32.xlu1 %v6007_v29, %s11830_s11 }
 0x75b   :  { %v3374_v55 = vsel %vm11920_vm0, %v3366_v13, %v3368_v25  ;;  %vm11926_vm0 = vcmask 900096  }
 0x75c   :  { %3382 = vst [vmem:[#allocation3 + $0x108] sm:$0x30] %v3374_v55  ;;  %v3372_v48 = vpop.permute.xlu1 %3371  ;;  %5936 = vrot.lane.b32.xlu0 %v5923_v52, %s11796_s16  ;;  %v5608_v52 = vrot.slane %v8298_v32, %v8509_v10  ;;  %v5612_v55 = vrot.slane %v8298_v32, %v8511_v11 }
 0x75e   :  { %v3370_v23 = vpop.permute.xlu0 %3369  ;;  %5938 = vrot.lane.b32.xlu1 %v5927_v62, %s11796_s16 }
 0x75f   :  { %v3375_v27 = vsel %vm11921_vm15, %v3368_v25, %v3370_v23  ;;  %v3376_v3 = vsel %vm11922_vm9, %v3370_v23, %v3372_v48  ;;  %vm11927_vm15 = vcmask 908288   ;;  %vm11928_vm9 = vmmov %vm11923_vm12 }
 0x760   :  { %3383 = vst [vmem:[#allocation3 + $0x110] sm:$0x30] %v3375_v27  ;;  %3384 = vst [vmem:[#allocation3 + $0x118] sm:$0x30] %v3376_v3  ;;  %v3464_v18 = vpop.permute.xlu1 %3463  ;;  %5940 = vrot.lane.b32.xlu0 %v5931_v56, %s11796_s16 }
 0x762   :  { %v3462_v34 = vpop.permute.xlu0 %3461  ;;  %5942 = vrot.lane.b32.xlu1 %v5935_v1, %s11796_s16 }
 0x763   :  { %v3470_v4 = vsel %vm11923_vm12, %v3462_v34, %v3464_v18  ;;  %vm11929_vm12 = vcmask 891904  }
 0x764   :  { %3478 = vst [vmem:[#allocation3 + $0x108] sm:$0xc0] %v3470_v4  ;;  %v3468_v40 = vpop.permute.xlu1 %3467  ;;  %5864 = vrot.lane.b32.xlu0 %v5851_v30, %s11912_s7 }
 0x766   :  { %v3466_v57 = vpop.permute.xlu0 %3465  ;;  %5866 = vrot.lane.b32.xlu1 %v5855_v2, %s11912_s7 }
 0x767   :  { %v3471_v20 = vsel %vm11924_vm13, %v3464_v18, %v3466_v57  ;;  %v3472_v45 = vsel %vm11925_vm14, %v3466_v57, %v3468_v40  ;;  %vm11930_vm13 = vcmask 941056  }
 0x768   :  { %3479 = vst [vmem:[#allocation3 + $0x110] sm:$0xc0] %v3471_v20  ;;  %3480 = vst [vmem:[#allocation3 + $0x118] sm:$0xc0] %v3472_v45  ;;  %v3269_v54 = vpop.permute.xlu1 %3268  ;;  %5868 = vrot.lane.b32.xlu0 %v5859_v21, %s11912_s7 }
 0x769   :  { %v3278_v42 = vsel %vm11926_vm0, %v3269_v54, %v3271_v19  ;;  %vm11932_vm14 = vmmov %vm11930_vm13 }
 0x76a   :  { %3286 = vst [vmem:[#allocation3 + $0x100] sm:$0xc] %v3278_v42  ;;  %v3174_v59 = vpop.permute.xlu0 %3173  ;;  %5870 = vrot.lane.b32.xlu1 %v5863_v46, %s11912_s7  ;;  %vm11933_vm0 = vmmov %vm11930_vm13  ;;  %v8295_v42 = vld [vmem:[%s11688_s8 + $0x6] ss:$8 sm:$0xf] }
 0x76b   :  { %v3183_v22 = vsel %vm11927_vm15, %v3174_v59, %v10129_v5  ;;  %v4749_v7 = vld [vmem:[#allocation3 + $0x108] sm:$0xff]  ;;  %v5756_v5 = vrot.slane %v8300_v38, %v8511_v11  ;;  %vm11934_vm15 = vcmask 932864  }
 0x76c   :  { %3191 = vst [vmem:[#allocation3 + $0x100] sm:$0x3] %v3183_v22  ;;  %4792 = vmatprep.subr.mxu0 %v4749_v7  ;;  %v3460_v26 = vpop.permute.xlu1 %3459  ;;  %5757 = vrot.lane.b32.xlu0 %v5744_v28, %s11798_s22 }
 0x76d   :  { %v3469_v47 = vsel %vm11928_vm9, %v3460_v26, %v3462_v34  ;;  %vm11935_vm9 = vmmov %vm11934_vm15  ;;  %v8296_v34 = vld [vmem:[%s11688_s8 + $0x7] ss:$8 sm:$0xf] }
 0x76e   :  { %3477 = vst [vmem:[#allocation3 + $0x100] sm:$0xc0] %v3469_v47  ;;  %v3364_v6 = vpop.permute.xlu0 %3363  ;;  %5759 = vrot.lane.b32.xlu1 %v5748_v0, %s11798_s22  ;;  %v5456_v57 = vrot.slane %v8296_v34, %v8505_v8  ;;  %v5460_v20 = vrot.slane %v8296_v34, %v8507_v9  ;;  %v5464_v28 = vrot.slane %v8296_v34, %v8509_v10 }
 0x76f   :  { %v3373_v61 = vsel %vm11929_vm12, %v3364_v6, %v3366_v13  ;;  %v4751_v35 = vld [vmem:[#allocation3 + $0x118] sm:$0xff]  ;;  %v4750_v49 = vld [vmem:[#allocation3 + $0x110] sm:$0xff]  ;;  %vm11936_vm12 = vmmov %vm11935_vm9  ;;  %v5468_v0 = vrot.slane %v8296_v34, %v8511_v11  ;;  %v5388_v6 = vrot.slane %v8295_v42, %v8507_v9 }
 0x770   :  { %3381 = vst [vmem:[#allocation3 + $0x100] sm:$0x30] %v3373_v61  ;;  %4863 = vmatprep.subr.mxu1 %v4751_v35  ;;  %v2798_v31 = vpop.permute.xlu1 %2797  ;;  %5761 = vrot.lane.b32.xlu0 %v5752_v17, %s11798_s22  ;;  %v8297_v13 = vld [vmem:[%s11688_s8 + $0x20] ss:$8 sm:$0xf]  ;;  %v5384_v17 = vrot.slane %v8295_v42, %v8505_v8 }
 0x771   :  { %4864 = vmatpush1.msra.mxu1 %v4750_v49  ;;  %v5528_v23 = vrot.slane %v8297_v13, %v8505_v8  ;;  %v5532_v27 = vrot.slane %v8297_v13, %v8507_v9  ;;  %v5536_v30 = vrot.slane %v8297_v13, %v8509_v10  ;;  %v5540_v4 = vrot.slane %v8297_v13, %v8511_v11 }
 0x772   :  { %v10204_v14 = vpop.permute.xlu0 %2795  ;;  %5763 = vrot.lane.b32.xlu1 %v5756_v5, %s11798_s22  ;;  %v5392_v49 = vrot.slane %v8295_v42, %v8509_v10 }
 0x773   :  { %v2804_v37 = vsel %vm11930_vm13, %v10204_v14, %v2798_v31  ;;  %vm11937_vm13 = vcmask 924672  }
 0x774   :  { %2812 = vst [vmem:[#allocation3 + $0xe8] sm:$0x3] %v2804_v37  ;;  %v2802_v43 = vpop.permute.xlu1 %2801  ;;  %5685 = vrot.lane.b32.xlu0 %v5672_v53, %s11931_s13  ;;  %v8294_v53 = vld [vmem:[%s11688_s8 + $0x5] ss:$8 sm:$0xf] }
 0x776   :  { %v2800_v19 = vpop.permute.xlu0 %2799  ;;  %5687 = vrot.lane.b32.xlu1 %v5676_v36, %s11931_s13 }
 0x777   :  { %v2805_v33 = vsel %vm11932_vm14, %v2798_v31, %v2800_v19  ;;  %v2806_v44 = vsel %vm11933_vm0, %v2800_v19, %v2802_v43  ;;  %v4748_v60 = vld [vmem:[#allocation3 + $0x100] sm:$0xff]  ;;  %vm11938_vm14 = vmmov %vm11937_vm13  ;;  %v5312_v19 = vrot.slane %v8294_v53, %v8505_v8 }
 0x778   :  { %2813 = vst [vmem:[#allocation3 + $0xf0] sm:$0x3] %v2805_v33  ;;  %2814 = vst [vmem:[#allocation3 + $0xf8] sm:$0x3] %v2806_v44  ;;  %4793 = vmatpush1.msra.mxu0 %v4748_v60  ;;  %v2893_v24 = vpop.permute.xlu1 %2892  ;;  %5689 = vrot.lane.b32.xlu0 %v5680_v58, %s11931_s13  ;;  %v5316_v33 = vrot.slane %v8294_v53, %v8507_v9 }
 0x779   :  { %vm11939_vm0 = vmmov %vm11937_vm13 }
 0x77a   :  { %v2891_v29 = vpop.permute.xlu0 %2890  ;;  %5691 = vrot.lane.b32.xlu1 %v5684_v39, %s11931_s13 }
 0x77b   :  { %v2899_v63 = vsel %vm11934_vm15, %v2891_v29, %v2893_v24  ;;  %vm11940_vm15 = vcmask 916480  }
 0x77c   :  { %2907 = vst [vmem:[#allocation3 + $0xe8] sm:$0xc] %v2899_v63  ;;  %v2897_v25 = vpop.permute.xlu1 %2896  ;;  %5613 = vrot.lane.b32.xlu0 %v5600_v51, %s11880_s23  ;;  %v8293_v51 = vld [vmem:[%s11688_s8 + $0x4] ss:$8 sm:$0xf] }
 0x77e   :  { %v2895_v62 = vpop.permute.xlu0 %2894  ;;  %5615 = vrot.lane.b32.xlu1 %v5604_v50, %s11880_s23  ;;  %v5324_v50 = vrot.slane %v8294_v53, %v8511_v11 }
 0x77f   :  { %v2900_v48 = vsel %vm11935_vm9, %v2893_v24, %v2895_v62  ;;  %v2901_v56 = vsel %vm11936_vm12, %v2895_v62, %v2897_v25  ;;  %vm11941_vm9 = vmmov %vm11940_vm15  ;;  %v5320_v24 = vrot.slane %v8294_v53, %v8509_v10  ;;  %v5240_v62 = vrot.slane %v8293_v51, %v8505_v8 }
 0x780   :  { %2908 = vst [vmem:[#allocation3 + $0xf0] sm:$0xc] %v2900_v48  ;;  %2909 = vst [vmem:[#allocation3 + $0xf8] sm:$0xc] %v2901_v56  ;;  %v2988_v15 = vpop.permute.xlu1 %2987  ;;  %5617 = vrot.lane.b32.xlu0 %v5608_v52, %s11880_s23  ;;  %v5244_v48 = vrot.slane %v8293_v51, %v8507_v9 }
 0x781   :  { %vm11942_vm12 = vmmov %vm11941_vm9 }
 0x782   :  { %v2986_v1 = vpop.permute.xlu0 %2985  ;;  %5619 = vrot.lane.b32.xlu1 %v5612_v55, %s11880_s23 }
 0x783   :  { %v2994_v3 = vsel %vm11937_vm13, %v2986_v1, %v2988_v15  ;;  %vm11943_vm13 = vcmask 932864  }
 0x784   :  { %3002 = vst [vmem:[#allocation3 + $0xe8] sm:$0x30] %v2994_v3  ;;  %v2992_v18 = vpop.permute.xlu1 %2991  ;;  %5541 = vrot.lane.b32.xlu0 %v5528_v23, %s11885_s30  ;;  %v5248_v23 = vrot.slane %v8293_v51, %v8509_v10  ;;  %v5252_v3 = vrot.slane %v8293_v51, %v8511_v11 }
 0x786   :  { %v2990_v2 = vpop.permute.xlu0 %2989  ;;  %5543 = vrot.lane.b32.xlu1 %v5532_v27, %s11885_s30 }
 0x787   :  { %v2995_v40 = vsel %vm11938_vm14, %v2988_v15, %v2990_v2  ;;  %v2996_v21 = vsel %vm11939_vm0, %v2990_v2, %v2992_v18  ;;  %vm11944_vm14 = vcmask 941056   ;;  %vm11945_vm0 = vmmov %vm11941_vm9 }
 0x788   :  { %3003 = vst [vmem:[#allocation3 + $0xf0] sm:$0x30] %v2995_v40  ;;  %3004 = vst [vmem:[#allocation3 + $0xf8] sm:$0x30] %v2996_v21  ;;  %v3084_v38 = vpop.permute.xlu1 %3083  ;;  %5545 = vrot.lane.b32.xlu0 %v5536_v30, %s11885_s30 }
 0x78a   :  { %v3082_v46 = vpop.permute.xlu0 %3081  ;;  %5547 = vrot.lane.b32.xlu1 %v5540_v4, %s11885_s30 }
 0x78b   :  { %v3090_v45 = vsel %vm11940_vm15, %v3082_v46, %v3084_v38  ;;  %vm11946_vm15 = vcmask 924672  }
 0x78c   :  { %3098 = vst [vmem:[#allocation3 + $0xe8] sm:$0xc0] %v3090_v45  ;;  %v3088_v54 = vpop.permute.xlu1 %3087  ;;  %5469 = vrot.lane.b32.xlu0 %v5456_v57, %s11889_s20 }
 0x78e   :  { %v3086_v59 = vpop.permute.xlu0 %3085  ;;  %5471 = vrot.lane.b32.xlu1 %v5460_v20, %s11889_s20 }
 0x78f   :  { %v3091_v22 = vsel %vm11941_vm9, %v3084_v38, %v3086_v59  ;;  %v3092_v7 = vsel %vm11942_vm12, %v3086_v59, %v3088_v54  ;;  %vm11947_vm9 = vcmask 1022976  }
 0x790   :  { %3099 = vst [vmem:[#allocation3 + $0xf0] sm:$0xc0] %v3091_v22  ;;  %3100 = vst [vmem:[#allocation3 + $0xf8] sm:$0xc0] %v3092_v7  ;;  %v2889_v26 = vpop.permute.xlu1 %2888  ;;  %5473 = vrot.lane.b32.xlu0 %v5464_v28, %s11889_s20 }
 0x791   :  { %v2898_v47 = vsel %vm11943_vm13, %v2889_v26, %v2891_v29  ;;  %vm11948_vm12 = vmmov %vm11947_vm9 }
 0x792   :  { %2906 = vst [vmem:[#allocation3 + $0xe0] sm:$0xc] %v2898_v47  ;;  %v2794_v41 = vpop.permute.xlu0 %2793  ;;  %5475 = vrot.lane.b32.xlu1 %v5468_v0, %s11889_s20  ;;  %vm11949_vm13 = vmmov %vm11947_vm9 }
 0x793   :  { %v2803_v5 = vsel %vm11944_vm14, %v2794_v41, %v10204_v14  ;;  %v4745_v61 = vld [vmem:[#allocation3 + $0xe8] sm:$0xff]  ;;  %v5396_v14 = vrot.slane %v8295_v42, %v8511_v11  ;;  %vm11950_vm14 = vmmov %vm11947_vm9 }
 0x794   :  { %2811 = vst [vmem:[#allocation3 + $0xe0] sm:$0x3] %v2803_v5  ;;  %4794 = vmatprep.subr.mxu0 %v4745_v61  ;;  %v3080_v35 = vpop.permute.xlu1 %3079  ;;  %5397 = vrot.lane.b32.xlu0 %v5384_v17, %s11853_s29  ;;  %v8290_v5 = vld [vmem:[%s11688_s8 + $0x1] ss:$8 sm:$0xf] }
 0x795   :  { %v3089_v31 = vsel %vm11945_vm0, %v3080_v35, %v3082_v46  ;;  %v8291_v46 = vld [vmem:[%s11688_s8 + $0x2] ss:$8 sm:$0xf]  ;;  %vm4774_vm0 = vcmask 850944  }
 0x796   :  { %3097 = vst [vmem:[#allocation3 + $0xe0] sm:$0xc0] %v3089_v31  ;;  %v2984_v36 = vpop.permute.xlu0 %2983  ;;  %5399 = vrot.lane.b32.xlu1 %v5388_v6, %s11853_s29  ;;  %v5096_v59 = vrot.slane %v8291_v46, %v8505_v8  ;;  %v5100_v7 = vrot.slane %v8291_v46, %v8507_v9  ;;  %v5104_v41 = vrot.slane %v8291_v46, %v8509_v10 }
 0x797   :  { %v2993_v37 = vsel %vm11946_vm15, %v2984_v36, %v2986_v1  ;;  %v4747_v43 = vld [vmem:[#allocation3 + $0xf8] sm:$0xff]  ;;  %v4746_v58 = vld [vmem:[#allocation3 + $0xf0] sm:$0xff]  ;;  %v5108_v35 = vrot.slane %v8291_v46, %v8511_v11 }
 0x798   :  { %3001 = vst [vmem:[#allocation3 + $0xe0] sm:$0x30] %v2993_v37  ;;  %4865 = vmatprep.subr.mxu1 %v4747_v43  ;;  %v2513_v32 = vpop.permute.xlu1 %2512  ;;  %5401 = vrot.lane.b32.xlu0 %v5392_v49, %s11853_s29  ;;  %v8292_v1 = vld [vmem:[%s11688_s8 + $0x3] ss:$8 sm:$0xf]  ;;  %v5028_v37 = vrot.slane %v8290_v5, %v8507_v9 }
 0x799   :  { %4866 = vmatpush1.msra.mxu1 %v4746_v58  ;;  %v5168_v2 = vrot.slane %v8292_v1, %v8505_v8  ;;  %v5172_v40 = vrot.slane %v8292_v1, %v8507_v9  ;;  %v5176_v57 = vrot.slane %v8292_v1, %v8509_v10  ;;  %v5180_v45 = vrot.slane %v8292_v1, %v8511_v11  ;;  %v4729_v1 = vld [vmem:[#allocation3 + $0x68] sm:$0xff]  ;;  %v4727_v46 = vld [vmem:[#allocation3 + $0x58] sm:$0xff] }
 0x79a   :  { %v10279_v39 = vpop.permute.xlu0 %2510  ;;  %5403 = vrot.lane.b32.xlu1 %v5396_v14, %s11853_s29 }
 0x79b   :  { %v2519_v44 = vsel %vm2313_vm11, %v10279_v39, %v2513_v32 }
 0x79c   :  { %2527 = vst [vmem:[#allocation3 + $0xc8] sm:$0xc] %v2519_v44  ;;  %v2517_v60 = vpop.permute.xlu1 %2516  ;;  %5325 = vrot.lane.b32.xlu0 %v5312_v19, %s11857_s19  ;;  %v4947_v19 = vld [vmem:[%s11688_s8] ss:$8 sm:$0xf] }
 0x79e   :  { %v2515_v29 = vpop.permute.xlu0 %2514  ;;  %5327 = vrot.lane.b32.xlu1 %v5316_v33, %s11857_s19  ;;  %v5036_v33 = vrot.slane %v8290_v5, %v8511_v11 }
 0x79f   :  { %v2520_v63 = vsel %vm2313_vm11, %v2513_v32, %v2515_v29  ;;  %v2521_v25 = vsel %vm2313_vm11, %v2515_v29, %v2517_v60  ;;  %v4744_v52 = vld [vmem:[#allocation3 + $0xe0] sm:$0xff]  ;;  %v5032_v32 = vrot.slane %v8290_v5, %v8509_v10  ;;  %v4952_v29 = vrot.slane %v4947_v19, %v8505_v8 }
 0x7a0   :  { %2528 = vst [vmem:[#allocation3 + $0xd0] sm:$0xc] %v2520_v63  ;;  %2529 = vst [vmem:[#allocation3 + $0xd8] sm:$0xc] %v2521_v25  ;;  %4795 = vmatpush1.msra.mxu0 %v4744_v52  ;;  %v2608_v13 = vpop.permute.xlu1 %2607  ;;  %5329 = vrot.lane.b32.xlu0 %v5320_v24, %s11857_s19  ;;  %v4956_v25 = vrot.slane %v4947_v19, %v8507_v9 }
 0x7a2   :  { %v2606_v55 = vpop.permute.xlu0 %2605  ;;  %5331 = vrot.lane.b32.xlu1 %v5324_v50, %s11857_s19 }
 0x7a3   :  { %v2614_v56 = vsel %vm2216_vm2, %v2606_v55, %v2608_v13 }
 0x7a4   :  { %2622 = vst [vmem:[#allocation3 + $0xc8] sm:$0x30] %v2614_v56  ;;  %v2612_v15 = vpop.permute.xlu1 %2611  ;;  %5253 = vrot.lane.b32.xlu0 %v5240_v62, %s11842_s14  ;;  %v4964_v62 = vrot.slane %v4947_v19, %v8511_v11  ;;  %v4733_v56 = vld [vmem:[#allocation3 + $0x88] sm:$0xff] }
 0x7a6   :  { %v2610_v27 = vpop.permute.xlu0 %2609  ;;  %5255 = vrot.lane.b32.xlu1 %v5244_v48, %s11842_s14 }
 0x7a7   :  { %v2615_v18 = vsel %vm2216_vm2, %v2608_v13, %v2610_v27  ;;  %v2616_v30 = vsel %vm2216_vm2, %v2610_v27, %v2612_v15  ;;  %v4960_v13 = vrot.slane %v4947_v19, %v8509_v10  ;;  %v4732_v15 = vld [vmem:[#allocation3 + $0x80] sm:$0xff] }
 0x7a8   :  { %2623 = vst [vmem:[#allocation3 + $0xd0] sm:$0x30] %v2615_v18  ;;  %2624 = vst [vmem:[#allocation3 + $0xd8] sm:$0x30] %v2616_v30  ;;  %v2704_v34 = vpop.permute.xlu1 %2703  ;;  %5257 = vrot.lane.b32.xlu0 %v5248_v23, %s11842_s14  ;;  %v4735_v18 = vld [vmem:[#allocation3 + $0x98] sm:$0xff]  ;;  %v4725_v30 = vld [vmem:[#allocation3 + $0x48] sm:$0xff] }
 0x7aa   :  { %v2702_v4 = vpop.permute.xlu0 %2701  ;;  %5259 = vrot.lane.b32.xlu1 %v5252_v3, %s11842_s14  ;;  %v4728_v3 = vld [vmem:[#allocation3 + $0x60] sm:$0xff] }
 0x7ab   :  { %v2710_v21 = vsel %vm11947_vm9, %v2702_v4, %v2704_v34 }
 0x7ac   :  { %2718 = vst [vmem:[#allocation3 + $0xc8] sm:$0xc0] %v2710_v21  ;;  %v2708_v38 = vpop.permute.xlu1 %2707  ;;  %5181 = vrot.lane.b32.xlu0 %v5168_v2, %s11843_s15  ;;  %v4724_v2 = vld [vmem:[#allocation3 + $0x40] sm:$0xff]  ;;  %v4721_v21 = vld [vmem:[#allocation3 + $0x28] sm:$0xff] }
 0x7ae   :  { %v2706_v20 = vpop.permute.xlu0 %2705  ;;  %5183 = vrot.lane.b32.xlu1 %v5172_v40, %s11843_s15  ;;  %v8313_v40 = vld [vmem:[%s11688_s8 + $0x60] ss:$8 sm:$0xf] }
 0x7af   :  { %v2711_v54 = vsel %vm11948_vm12, %v2704_v34, %v2706_v20  ;;  %v2712_v28 = vsel %vm11949_vm13, %v2706_v20, %v2708_v38  ;;  %v4734_v34 = vld [vmem:[#allocation3 + $0x90] sm:$0xff]  ;;  %v4717_v20 = vld [vmem:[#allocation3 + $0x8] sm:$0xff]  ;;  %vm11965_vm12 = vcmask 113664  }
 0x7b0   :  { %2719 = vst [vmem:[#allocation3 + $0xd0] sm:$0xc0] %v2711_v54  ;;  %2720 = vst [vmem:[#allocation3 + $0xd8] sm:$0xc0] %v2712_v28  ;;  %v2604_v42 = vpop.permute.xlu1 %2603  ;;  %5185 = vrot.lane.b32.xlu0 %v5176_v57, %s11843_s15  ;;  %v4730_v38 = vld [vmem:[#allocation3 + $0x70] sm:$0xff]  ;;  %v4720_v57 = vld [vmem:[#allocation3 + $0x20] sm:$0xff]  ;;  %v6643_v28 = vrot.slane %v8313_v40, %v8505_v8 }
 0x7b1   :  { %v2613_v0 = vsel %vm2216_vm2, %v2604_v42, %v2606_v55  ;;  %v4715_v54 = vld [vmem:[%s11690_s1] sm:$0xff]  ;;  %v4716_v42 = vld [vmem:[#allocation3] sm:$0xff]  ;;  %s11955_s1 = smov 30   ;;  %vm11968_vm13 = vmmov %vm11965_vm12 }
 0x7b2   :  { %2621 = vst [vmem:[#allocation3 + $0xc0] sm:$0x30] %v2613_v0  ;;  %v2509_v22 = vpop.permute.xlu0 %2508  ;;  %5187 = vrot.lane.b32.xlu1 %v5180_v45, %s11843_s15  ;;  %v4726_v45 = vld [vmem:[#allocation3 + $0x50] sm:$0xff]  ;;  %v6647_v0 = vrot.slane %v8313_v40, %v8507_v9 }
 0x7b3   :  { %v2518_v26 = vsel %vm2313_vm11, %v2509_v22, %v10279_v39  ;;  %v4741_v17 = vld [vmem:[#allocation3 + $0xc8] sm:$0xff]  ;;  %v4722_v22 = vld [vmem:[#allocation3 + $0x30] sm:$0xff] }
 0x7b4   :  { %2526 = vst [vmem:[#allocation3 + $0xc0] sm:$0xc] %v2518_v26  ;;  %4796 = vmatprep.subr.mxu0 %v4741_v17  ;;  %v2256_v47 = vpop.permute.xlu1 %2255  ;;  %5109 = vrot.lane.b32.xlu0 %v5096_v59, %s11844_s27  ;;  %v4723_v59 = vld [vmem:[#allocation3 + $0x38] sm:$0xff]  ;;  %v4718_v26 = vld [vmem:[#allocation3 + $0x10] sm:$0xff]  ;;  %v6651_v17 = vrot.slane %v8313_v40, %v8509_v10 }
 0x7b5   :  { %v2262_v6 = vsel %vm2259_vm4, %v9839_v16, %v2256_v47  ;;  %v5024_v16 = vrot.slane %v8290_v5, %v8505_v8 }
 0x7b6   :  { %2270 = vst [vmem:[#allocation3 + $0xb0] sm:$0x30] %v2262_v6  ;;  %v2700_v61 = vpop.permute.xlu0 %2699  ;;  %5111 = vrot.lane.b32.xlu1 %v5100_v7, %s11844_s27  ;;  %v4719_v7 = vld [vmem:[#allocation3 + $0x18] sm:$0xff] }
 0x7b7   :  { %v2709_v49 = vsel %vm11950_vm14, %v2700_v61, %v2702_v4  ;;  %v4743_v31 = vld [vmem:[#allocation3 + $0xd8] sm:$0xff]  ;;  %v4742_v53 = vld [vmem:[#allocation3 + $0xd0] sm:$0xff] }
 0x7b8   :  { %2717 = vst [vmem:[#allocation3 + $0xc0] sm:$0xc0] %v2709_v49  ;;  %4867 = vmatprep.subr.mxu1 %v4743_v31  ;;  %v2350_v36 = vpop.permute.xlu1 %2349  ;;  %5113 = vrot.lane.b32.xlu0 %v5104_v41, %s11844_s27  ;;  %v4731_v4 = vld [vmem:[#allocation3 + $0x78] sm:$0xff] }
 0x7b9   :  { %4868 = vmatpush1.msra.mxu1 %v4742_v53  ;;  %v8312_v41 = vld [vmem:[%s11688_s8 + $0x47] ss:$8 sm:$0xf]  ;;  %v8311_v49 = vld [vmem:[%s11688_s8 + $0x46] ss:$8 sm:$0xf] }
 0x7ba   :  { %v2258_v14 = vpop.permute.xlu0 %2257  ;;  %5115 = vrot.lane.b32.xlu1 %v5108_v35, %s11844_s27  ;;  %v6571_v6 = vrot.slane %v8312_v41, %v8505_v8  ;;  %v6575_v5 = vrot.slane %v8312_v41, %v8507_v9  ;;  %v6579_v61 = vrot.slane %v8312_v41, %v8509_v10  ;;  %v6583_v35 = vrot.slane %v8312_v41, %v8511_v11 }
 0x7bb   :  { %v2263_v43 = vsel %vm2259_vm4, %v2256_v47, %v2258_v14  ;;  %v6655_v47 = vrot.slane %v8313_v40, %v8511_v11  ;;  %v6499_v31 = vrot.slane %v8311_v49, %v8505_v8  ;;  %v6503_v53 = vrot.slane %v8311_v49, %v8507_v9  ;;  %v8310_v14 = vld [vmem:[%s11688_s8 + $0x45] ss:$8 sm:$0xf] }
 0x7bc   :  { %2271 = vst [vmem:[#allocation3 + $0xb8] sm:$0x30] %v2263_v43  ;;  %v2354_v58 = vpop.permute.xlu1 %2353  ;;  %5037 = vrot.lane.b32.xlu0 %v5024_v16, %s11845_s21  ;;  %v6511_v16 = vrot.slane %v8311_v49, %v8511_v11  ;;  %v6431_v43 = vrot.slane %v8310_v14, %v8507_v9  ;;  %v6439_v19 = vrot.slane %v8310_v14, %v8511_v11 }
 0x7be   :  { %v2352_v39 = vpop.permute.xlu0 %2351  ;;  %5039 = vrot.lane.b32.xlu1 %v5028_v37, %s11845_s21  ;;  %v6427_v37 = vrot.slane %v8310_v14, %v8505_v8 }
 0x7bf   :  { %v2359_v44 = vsel %vm2357_vm10, %v2350_v36, %v2352_v39  ;;  %v2360_v60 = vsel %vm2357_vm10, %v2352_v39, %v2354_v58  ;;  %v4740_v24 = vld [vmem:[#allocation3 + $0xc0] sm:$0xff] }
 0x7c0   :  { %2367 = vst [vmem:[#allocation3 + $0xa8] sm:$0xc0] %v2359_v44  ;;  %2368 = vst [vmem:[#allocation3 + $0xb0] sm:$0xc0] %v2360_v60  ;;  %4797 = vmatpush1.msra.mxu0 %v4740_v24  ;;  %v2348_v51 = vpop.permute.xlu1 %2347  ;;  %5041 = vrot.lane.b32.xlu0 %v5032_v32, %s11845_s21  ;;  %v6435_v32 = vrot.slane %v8310_v14, %v8509_v10 }
 0x7c1   :  { %v2358_v50 = vsel %vm2357_vm10, %v2348_v51, %v2350_v36  ;;  %v6507_v36 = vrot.slane %v8311_v49, %v8509_v10  ;;  %v8309_v39 = vld [vmem:[%s11688_s8 + $0x44] ss:$8 sm:$0xf] }
 0x7c2   :  { %2366 = vst [vmem:[#allocation3 + $0xa0] sm:$0xc0] %v2358_v50  ;;  %v2356_v63 = vpop.permute.xlu0 %2355  ;;  %5043 = vrot.lane.b32.xlu1 %v5036_v33, %s11845_s21  ;;  %v6355_v33 = vrot.slane %v8309_v39, %v8505_v8  ;;  %v6359_v44 = vrot.slane %v8309_v39, %v8507_v9  ;;  %v6363_v51 = vrot.slane %v8309_v39, %v8509_v10  ;;  %v8308_v50 = vld [vmem:[%s11688_s8 + $0x43] ss:$8 sm:$0xf] }
 0x7c3   :  { %v2361_v52 = vsel %vm2357_vm10, %v2354_v58, %v2356_v63 }
 0x7c4   :  { %2369 = vst [vmem:[#allocation3 + $0xb8] sm:$0xc0] %v2361_v52  ;;  %4965 = vrot.lane.b32.xlu0 %v4952_v29, %s11838_s17  ;;  %v10408_v58 = vpop.permute.xlu1 %6008  ;;  %v6367_v29 = vrot.slane %v8309_v39, %v8511_v11  ;;  %v6283_v52 = vrot.slane %v8308_v50, %v8505_v8 }
 0x7c6   :  { %4967 = vrot.lane.b32.xlu1 %v4956_v25, %s11838_s17 }
 0x7c7   :  { %v4737_v55 = vld [vmem:[#allocation3 + $0xa8] sm:$0xff]  ;;  %v4738_v27 = vld [vmem:[#allocation3 + $0xb0] sm:$0xff] }
 0x7c8   :  { %4798 = vmatprep.subr.mxu0 %v4737_v55  ;;  %4969 = vrot.lane.b32.xlu0 %v4960_v13, %s11838_s17  ;;  %v10423_v24 = vpop.permute.xlu1 %6010  ;;  %v6287_v13 = vrot.slane %v8308_v50, %v8507_v9  ;;  %v6295_v55 = vrot.slane %v8308_v50, %v8511_v11 }
 0x7c9   :  { %v4736_v48 = vld [vmem:[#allocation3 + $0xa0] sm:$0xff] }
 0x7ca   :  { %4799 = vmatpush1.msra.mxu0 %v4736_v48  ;;  %4971 = vrot.lane.b32.xlu1 %v4964_v62, %s11838_s17  ;;  %v6291_v62 = vrot.slane %v8308_v50, %v8509_v10  ;;  %v8307_v48 = vld [vmem:[%s11688_s8 + $0x42] ss:$8 sm:$0xf] }
 0x7cb   :  { %4800 = vmatprep.subr.mxu0 %v4733_v56  ;;  %v4739_v23 = vld [vmem:[#allocation3 + $0xb8] sm:$0xff] }
 0x7cc   :  { %4801 = vmatpush1.msra.mxu0 %v4732_v15  ;;  %4869 = vmatprep.subr.mxu1 %v4739_v23  ;;  %v10434_v25 = vpop.permute.xlu1 %6014  ;;  %v6211_v23 = vrot.slane %v8307_v48, %v8505_v8 }
 0x7cd   :  { %4802 = vmatprep.subr.mxu0 %v4729_v1  ;;  %4870 = vmatpush1.msra.mxu1 %v4738_v27  ;;  %v6215_v1 = vrot.slane %v8307_v48, %v8507_v9 }
 0x7ce   :  { %4803 = vmatpush1.msra.mxu0 %v4728_v3  ;;  %4871 = vmatprep.subr.mxu1 %v4735_v18  ;;  %v6219_v18 = vrot.slane %v8307_v48, %v8509_v10 }
 0x7cf   :  { %4804 = vmatprep.subr.mxu0 %v4725_v30  ;;  %4872 = vmatpush1.msra.mxu1 %v4734_v34  ;;  %v10421_v60 = vpop.permute.xlu0 %4771  ;;  %v6223_v30 = vrot.slane %v8307_v48, %v8511_v11  ;;  %v8306_v34 = vld [vmem:[%s11688_s8 + $0x41] ss:$8 sm:$0xf] }
 0x7d0   :  { %4805 = vmatpush1.msra.mxu0 %v4724_v2  ;;  %4873 = vmatprep.subr.mxu1 %v4731_v4  ;;  %v10449_v15 = vpop.permute.xlu1 %5938  ;;  %v6139_v2 = vrot.slane %v8306_v34, %v8505_v8  ;;  %v6143_v4 = vrot.slane %v8306_v34, %v8507_v9 }
 0x7d1   :  { %4806 = vmatprep.subr.mxu0 %v4721_v21  ;;  %4874 = vmatpush1.msra.mxu1 %v4730_v38  ;;  %v6147_v38 = vrot.slane %v8306_v34, %v8509_v10 }
 0x7d2   :  { %4807 = vmatpush1.msra.mxu0 %v4720_v57  ;;  %4875 = vmatprep.subr.mxu1 %v4727_v46  ;;  %v6151_v57 = vrot.slane %v8306_v34, %v8511_v11  ;;  %v8305_v46 = vld [vmem:[%s11688_s8 + $0x40] ss:$8 sm:$0xf] }
 0x7d3   :  { %4808 = vmatprep.subr.mxu0 %v4717_v20  ;;  %4876 = vmatpush1.msra.mxu1 %v4726_v45  ;;  %v10432_v63 = vpop.permute.xlu0 %6012 }
 0x7d4   :  { %4809 = vmatpush1.msra.mxu0 %v4716_v42  ;;  %4877 = vmatprep.subr.mxu1 %v4723_v59  ;;  %v10457_v3 = vpop.permute.xlu1 %5942  ;;  %v6075_v42 = vrot.slane %v8305_v46, %v8509_v10  ;;  %v6079_v59 = vrot.slane %v8305_v46, %v8511_v11 }
 0x7d5   :  { %8288 = vmatmul.mubr.msk.f32.vlgmr.msra.gmra.mxu0 %vm4774_vm0, %v4715_v54  ;;  %4878 = vmatpush1.msra.mxu1 %v4722_v22 }
 0x7d6   :  { %4879 = vmatprep.subr.mxu1 %v4719_v7  ;;  %6656 = vrot.lane.b32.xlu0 %v6643_v28, %s11951_s12  ;;  %v6071_v28 = vrot.slane %v8305_v46, %v8507_v9 }
 0x7d7   :  { %4880 = vmatpush1.msra.mxu1 %v4718_v26  ;;  %6658 = vrot.lane.b32.xlu1 %v6647_v0, %s11951_s12  ;;  %v10447_v56 = vpop.permute.xlu0 %5936 }
 0x7d8   :  { %8289 = vmatmul.mubr.msk.f32.vlgmr.msra.gmra.mxu1 %vm4774_vm0, %v4715_v54  ;;  %v10472_v21 = vpop.permute.xlu1 %5866  ;;  %v6067_v54 = vrot.slane %v8305_v46, %v8505_v8  ;;  %vm11969_vm0 = vmmov %vm11965_vm12 }
 0x7da   :  { %6660 = vrot.lane.b32.xlu0 %v6651_v17, %s11951_s12 }
 0x7db   :  { %6662 = vrot.lane.b32.xlu1 %v6655_v47, %s11951_s12  ;;  %v10455_v27 = vpop.permute.xlu0 %5940 }
 0x7dc   :  { %v10483_v45 = vpop.permute.xlu1 %5870 }
 0x7de   :  { %6584 = vrot.lane.b32.xlu0 %v6571_v6, %s11952_s28 }
 0x7df   :  { %6586 = vrot.lane.b32.xlu1 %v6575_v5, %s11952_s28  ;;  %v10470_v40 = vpop.permute.xlu0 %5864 }
 0x7e0   :  { %v10495_v22 = vpop.permute.xlu1 %5759 }
 0x7e2   :  { %6588 = vrot.lane.b32.xlu0 %v6579_v61, %s11952_s28 }
 0x7e3   :  { %6590 = vrot.lane.b32.xlu1 %v6583_v35, %s11952_s28  ;;  %v10481_v20 = vpop.permute.xlu0 %5868 }
 0x7e4   :  { %v10501_v26 = vpop.permute.xlu1 %5763 }
 0x7e6   :  { %6512 = vrot.lane.b32.xlu0 %v6499_v31, %s11953_s24 }
 0x7e7   :  { %6514 = vrot.lane.b32.xlu1 %v6503_v53, %s11953_s24  ;;  %v10493_v0 = vpop.permute.xlu0 %5757 }
 0x7e8   :  { %v10505_v47 = vpop.permute.xlu1 %5687 }
 0x7ea   :  { %6516 = vrot.lane.b32.xlu0 %v6507_v36, %s11953_s24 }
 0x7eb   :  { %6518 = vrot.lane.b32.xlu1 %v6511_v16, %s11953_s24  ;;  %v10499_v7 = vpop.permute.xlu0 %5761 }
 0x7ec   :  { %v10509_v6 = vpop.permute.xlu1 %5691 }
 0x7ee   :  { %6440 = vrot.lane.b32.xlu0 %v6427_v37, %s11954_s4 }
 0x7ef   :  { %6442 = vrot.lane.b32.xlu1 %v6431_v43, %s11954_s4  ;;  %v10503_v17 = vpop.permute.xlu0 %5685 }
 0x7f0   :  { %v10513_v61 = vpop.permute.xlu1 %5615 }
 0x7f2   :  { %6444 = vrot.lane.b32.xlu0 %v6435_v32, %s11954_s4 }
 0x7f3   :  { %6446 = vrot.lane.b32.xlu1 %v6439_v19, %s11954_s4  ;;  %v10507_v41 = vpop.permute.xlu0 %5689 }
 0x7f4   :  { %v10517_v49 = vpop.permute.xlu1 %5619 }
 0x7f6   :  { %6368 = vrot.lane.b32.xlu0 %v6355_v33, %s11955_s1 }
 0x7f7   :  { %6370 = vrot.lane.b32.xlu1 %v6359_v44, %s11955_s1  ;;  %v10511_v5 = vpop.permute.xlu0 %5613 }
 0x7f8   :  { %v10521_v53 = vpop.permute.xlu1 %5543 }
 0x7fa   :  { %6372 = vrot.lane.b32.xlu0 %v6363_v51, %s11955_s1 }
 0x7fb   :  { %6374 = vrot.lane.b32.xlu1 %v6367_v29, %s11955_s1  ;;  %v10515_v35 = vpop.permute.xlu0 %5617 }
 0x7fc   :  { %v10525_v16 = vpop.permute.xlu1 %5547 }
 0x7fe   :  { %6296 = vrot.lane.b32.xlu0 %v6283_v52, %s11826_s25 }
 0x7ff   :  { %6298 = vrot.lane.b32.xlu1 %v6287_v13, %s11826_s25  ;;  %v10519_v31 = vpop.permute.xlu0 %5541 }
 0x800   :  { %v10529_v37 = vpop.permute.xlu1 %5471 }
 0x802   :  { %6300 = vrot.lane.b32.xlu0 %v6291_v62, %s11826_s25 }
 0x803   :  { %6302 = vrot.lane.b32.xlu1 %v6295_v55, %s11826_s25  ;;  %v10523_v36 = vpop.permute.xlu0 %5545 }
 0x804   :  { %v10533_v32 = vpop.permute.xlu1 %5475 }
 0x806   :  { %6224 = vrot.lane.b32.xlu0 %v6211_v23, %s11956_s10 }
 0x807   :  { %6226 = vrot.lane.b32.xlu1 %v6215_v1, %s11956_s10  ;;  %v10527_v14 = vpop.permute.xlu0 %5469 }
 0x808   :  { %v10537_v39 = vpop.permute.xlu1 %5399 }
 0x80a   :  { %6228 = vrot.lane.b32.xlu0 %v6219_v18, %s11956_s10 }
 0x80b   :  { %6230 = vrot.lane.b32.xlu1 %v6223_v30, %s11956_s10  ;;  %v10531_v43 = vpop.permute.xlu0 %5473 }
 0x80c   :  { %v10541_v44 = vpop.permute.xlu1 %5403 }
 0x80e   :  { %6152 = vrot.lane.b32.xlu0 %v6139_v2, %s11832_s26 }
 0x80f   :  { %6154 = vrot.lane.b32.xlu1 %v6143_v4, %s11832_s26  ;;  %v10535_v19 = vpop.permute.xlu0 %5397 }
 0x810   :  { %v10545_v29 = vpop.permute.xlu1 %5327 }
 0x812   :  { %6156 = vrot.lane.b32.xlu0 %v6147_v38, %s11832_s26 }
 0x813   :  { %6158 = vrot.lane.b32.xlu1 %v6151_v57, %s11832_s26  ;;  %v10539_v33 = vpop.permute.xlu0 %5401 }
 0x814   :  { %v10549_v52 = vpop.permute.xlu1 %5331 }
 0x816   :  { %6080 = vrot.lane.b32.xlu0 %v6067_v54, %s11831_s18 }
 0x817   :  { %6082 = vrot.lane.b32.xlu1 %v6071_v28, %s11831_s18  ;;  %v10543_v51 = vpop.permute.xlu0 %5325 }
 0x818   :  { %v10553_v62 = vpop.permute.xlu1 %5255 }
 0x81a   :  { %6084 = vrot.lane.b32.xlu0 %v6075_v42, %s11831_s18 }
 0x81b   :  { %6086 = vrot.lane.b32.xlu1 %v6079_v59, %s11831_s18  ;;  %v10547_v50 = vpop.permute.xlu0 %5329 }
 0x81c   :  { %v10557_v48 = vpop.permute.xlu1 %5259 }
 0x81f   :  { %v10551_v13 = vpop.permute.xlu0 %5253 }
 0x820   :  { %v10561_v1 = vpop.permute.xlu1 %5183 }
 0x823   :  { %v10555_v55 = vpop.permute.xlu0 %5257 }
 0x824   :  { %v10565_v30 = vpop.permute.xlu1 %5187 }
 0x827   :  { %v10559_v23 = vpop.permute.xlu0 %5181 }
 0x828   :  { %v10569_v2 = vpop.permute.xlu1 %5111 }
 0x829   :  { %11958 = vst [vmem:[#allocation14_spill] sm:$0xff] %v10569_v2 }
 0x82b   :  { %v10563_v18 = vpop.permute.xlu0 %5185 }
 0x82c   :  { %v10573_v38 = vpop.permute.xlu1 %5115 }
 0x82d   :  { %11960 = vst [vmem:[#allocation16_spill] sm:$0xff] %v10573_v38 }
 0x82f   :  { %v10567_v34 = vpop.permute.xlu0 %5109 }
 0x830   :  { %11957 = vst [vmem:[#allocation13_spill] sm:$0xff] %v10567_v34  ;;  %v10577_v46 = vpop.permute.xlu1 %5039 }
 0x831   :  { %11962 = vst [vmem:[#allocation18_spill] sm:$0xff] %v10577_v46 }
 0x833   :  { %v10571_v4 = vpop.permute.xlu0 %5113 }
 0x834   :  { %11959 = vst [vmem:[#allocation15_spill] sm:$0xff] %v10571_v4  ;;  %v10581_v42 = vpop.permute.xlu1 %5043 }
 0x835   :  { %11964 = vst [vmem:[#allocation20_spill] sm:$0xff] %v10581_v42 }
 0x837   :  { %v10575_v57 = vpop.permute.xlu0 %5037 }
 0x838   :  { %11961 = vst [vmem:[#allocation17_spill] sm:$0xff] %v10575_v57  ;;  %v10592_v4 = vpop.permute.xlu1 %4967 }
 0x839   :  { %11967 = vst [vmem:[#allocation22_spill] sm:$0xff] %v10592_v4 }
 0x83b   :  { %v10579_v28 = vpop.permute.xlu0 %5041 }
 0x83c   :  { %11963 = vst [vmem:[#allocation19_spill] sm:$0xff] %v10579_v28  ;;  %v6016_v28 = vsel %vm11965_vm12, %v10408_v58, %v10423_v24 }
 0x83f   :  { %v10590_v42 = vpop.permute.xlu0 %4965 }
 0x840   :  { %11966 = vst [vmem:[#allocation21_spill] sm:$0xff] %v10590_v42  ;;  %v6018_v42 = vsel %vm11969_vm0, %v10432_v63, %v10434_v25 }
 0x895   :  { %v4844_v54 = vpop.f32.mrf.mxu0 }
 0x896   :  { %v4845_v38 = vadd.f32 %v4844_v54, %v10421_v60 }
 0x897   :  { %v4846_v59 = vpop.f32.mrf.mxu0 }
 0x898   :  { %v4847_v12 = vadd.f32 %v4846_v59, %v10421_v60  ;;  %v4915_v8 = vpop.f32.mrf.mxu1  ;;  %v4924_v2 = vmul.f32 0.3, %v4845_v38 }
 0x899   :  { %v4916_v9 = vadd.f32 %v4915_v8, %v10421_v60  ;;  %v6017_v8 = vsel %vm11968_vm13, %v10423_v24, %v10432_v63  ;;  %v10614_v24 = vpop.permute.xlu1 %4971  ;;  %v5944_v63 = vsel %vm2259_vm4, %v10447_v56, %v10449_v15 }
 0x89a   :  { %vm4921_vm15 = vcmp.gt.f32.partialorder %v4847_v12, 0.0  ;;  %v4925_v10 = vmul.f32 0.3, %v4847_v12  ;;  %v4917_v11 = vpop.f32.mrf.mxu1 }
 0x89b   :  { %vm4922_vm9 = vcmp.gt.f32.partialorder %v4916_v9, 0.0  ;;  %v4926_v57 = vmul.f32 0.3, %v4916_v9  ;;  %v4918_v46 = vadd.f32 %v4917_v11, %v10421_v60 }
 0x89c   :  { %v10594_v59 = vsel %vm4921_vm15, %v4847_v12, %v4925_v10  ;;  %vm4920_vm15 = vcmp.gt.f32.partialorder %v4845_v38, 0.0  ;;  %v6028_v10 = vmul.f32 0.0, %v10434_v25  ;;  %v10612_v12 = vpop.permute.xlu0 %4969 }
 0x89d   :  { %v10599_v34 = vsel %vm4922_vm9, %v4916_v9, %v4926_v57  ;;  %vm4923_vm14 = vcmp.gt.f32.partialorder %v4918_v46, 0.0  ;;  %v4927_v54 = vmul.f32 0.3, %v4918_v46  ;;  %v6025_v11 = vmul.f32 %v6016_v28, %v10594_v59 }
 0x89e   :  { %v6026_v60 = vmul.f32 %v6017_v8, %v10599_v34  ;;  %v10616_v57 = vsel %vm4920_vm15, %v4845_v38, %v4924_v2  ;;  %v5953_v28 = vmul.f32 %v5944_v63, %v10594_v59  ;;  %v5945_v2 = vsel %vm2259_vm4, %v10449_v15, %v10455_v27 }
 0x89f   :  { %v10606_v4 = vsel %vm4923_vm14, %v4918_v46, %v4927_v54  ;;  %6036 = vrot.lane.b32.xlu0 %v6025_v11, %s11880_s23  ;;  %v6024_v46 = vmul.f32 %v10408_v58, %v10616_v57  ;;  %v5946_v38 = vsel %vm2259_vm4, %v10455_v27, %v10457_v3  ;;  %v5954_v58 = vmul.f32 %v5945_v2, %v10599_v34 }
 0x8a0   :  { %6038 = vrot.lane.b32.xlu1 %v6026_v60, %s11880_s23  ;;  %v6027_v9 = vmul.f32 %v6018_v42, %v10606_v4  ;;  %v10626_v25 = vpop.permute.xlu0 %6656  ;;  %v10628_v42 = vpop.permute.xlu1 %6658  ;;  %v5955_v8 = vmul.f32 %v5946_v38, %v10606_v4  ;;  %v5956_v54 = vmul.f32 0.0, %v10457_v3  ;;  %v5952_v15 = vmul.f32 %v10447_v56, %v10616_v57 }
 0x8a1   :  { %v5872_v27 = vsel %vm2357_vm10, %v10470_v40, %v10472_v21  ;;  %v5874_v56 = vsel %vm2357_vm10, %v10481_v20, %v10483_v45  ;;  %v5765_v2 = vsel %vm2313_vm11, %v10493_v0, %v10495_v22  ;;  %vm11972_vm9 = vcmask 932864  }
 0x8a2   :  { %v5881_v3 = vmul.f32 %v5872_v27, %v10594_v59  ;;  %vm11973_vm12 = vmmov %vm11972_vm9  ;;  %vm11975_vm14 = vcmask 924672  }
 0x8a3   :  { %6040 = vrot.lane.b32.xlu0 %v6027_v9, %s11880_s23  ;;  %v5873_v9 = vsel %vm2357_vm10, %v10472_v21, %v10481_v20  ;;  %v5883_v21 = vmul.f32 %v5874_v56, %v10606_v4  ;;  %v5774_v20 = vmul.f32 %v5765_v2, %v10616_v57  ;;  %vm11974_vm13 = vmmov %vm11972_vm9 }
 0x8a4   :  { %6042 = vrot.lane.b32.xlu1 %v6028_v10, %s11880_s23  ;;  %v10643_v11 = vpop.permute.xlu0 %6660  ;;  %v10645_v60 = vpop.permute.xlu1 %6662  ;;  %v5882_v10 = vmul.f32 %v5873_v9, %v10599_v34  ;;  %vm11976_vm0 = vmmov %vm11975_vm14 }
 0x8a5   :  { %vm11977_vm15 = vmmov %vm11976_vm0 }
 0x8a7   :  { %6034 = vrot.lane.b32.xlu0 %v6024_v46, %s11880_s23  ;;  %s11970_s23 = smov 127  }
 0x8a8   :  { %5964 = vrot.lane.b32.xlu1 %v5953_v28, %s11931_s13  ;;  %v10659_v63 = vpop.permute.xlu0 %6584  ;;  %v10661_v46 = vpop.permute.xlu1 %6586  ;;  %v5884_v28 = vmul.f32 0.0, %v10483_v45  ;;  %v5766_v45 = vsel %vm2313_vm11, %v10495_v22, %v10499_v7  ;;  %v5777_v22 = vmul.f32 %v10501_v26, %v10606_v4 }
 0x8ab   :  { %5966 = vrot.lane.b32.xlu0 %v5954_v58, %s11931_s13 }
 0x8ac   :  { %5968 = vrot.lane.b32.xlu1 %v5955_v8, %s11931_s13  ;;  %v10675_v38 = vpop.permute.xlu0 %6588  ;;  %v10677_v58 = vpop.permute.xlu1 %6590  ;;  %v5880_v8 = vmul.f32 %v10470_v40, %v10616_v57 }
 0x8af   :  { %5970 = vrot.lane.b32.xlu0 %v5956_v54, %s11931_s13  ;;  %v5767_v54 = vsel %vm2313_vm11, %v10499_v7, %v10501_v26  ;;  %v5693_v7 = vsel %vm2216_vm2, %v10503_v17, %v10505_v47 }
 0x8b0   :  { %5962 = vrot.lane.b32.xlu1 %v5952_v15, %s11931_s13  ;;  %v5775_v15 = vmul.f32 %v5766_v45, %v10594_v59  ;;  %v5776_v27 = vmul.f32 %v5767_v54, %v10599_v34  ;;  %v10692_v9 = vpop.permute.xlu0 %6512  ;;  %v10694_v40 = vpop.permute.xlu1 %6514  ;;  %s11971_s13 = smov 2   ;;  %v5621_v45 = vsel %vm11972_vm9, %v10511_v5, %v10513_v61  ;;  %v5701_v54 = vmul.f32 0.0, %v10503_v17 }
 0x8b1   :  { %vm11978_vm9 = vcmask 916480  }
 0x8b3   :  { %5892 = vrot.lane.b32.xlu0 %v5881_v3, %s11970_s23  ;;  %v5773_v3 = vmul.f32 0.0, %v10493_v0  ;;  %v5702_v0 = vmul.f32 %v5693_v7, %v10616_v57  ;;  %v5629_v7 = vmul.f32 0.0, %v10511_v5 }
 0x8b4   :  { %5894 = vrot.lane.b32.xlu1 %v5882_v10, %s11970_s23  ;;  %v5694_v10 = vsel %vm2216_vm2, %v10505_v47, %v10507_v41  ;;  %v10709_v56 = vpop.permute.xlu0 %6516  ;;  %v5705_v47 = vmul.f32 %v10509_v6, %v10606_v4 }
 0x8b5   :  { %v5703_v26 = vmul.f32 %v5694_v10, %v10594_v59 }
 0x8b7   :  { %5896 = vrot.lane.b32.xlu0 %v5883_v21, %s11970_s23  ;;  %v5695_v21 = vsel %vm2216_vm2, %v10507_v41, %v10509_v6  ;;  %v5630_v41 = vmul.f32 %v5621_v45, %v10616_v57  ;;  %v5622_v6 = vsel %vm11973_vm12, %v10513_v61, %v10515_v35  ;;  %v5633_v61 = vmul.f32 %v10517_v49, %v10606_v4  ;;  %vm11979_vm12 = vmmov %vm11978_vm9 }
 0x8b8   :  { %5898 = vrot.lane.b32.xlu1 %v5884_v28, %s11970_s23  ;;  %v10711_v28 = vpop.permute.xlu1 %6518  ;;  %v5704_v2 = vmul.f32 %v5695_v21, %v10599_v34  ;;  %v5631_v17 = vmul.f32 %v5622_v6, %v10594_v59  ;;  %v5551_v21 = vsel %vm11977_vm15, %v10523_v36, %v10525_v16 }
 0x8b9   :  { %v5560_v45 = vmul.f32 %v5551_v21, %v10599_v34 }
 0x8bb   :  { %5890 = vrot.lane.b32.xlu0 %v5880_v8, %s11970_s23  ;;  %v10723_v8 = vpop.permute.xlu0 %6440 }
 0x8bc   :  { %5785 = vrot.lane.b32.xlu1 %v5774_v20, %s11912_s7  ;;  %v10725_v20 = vpop.permute.xlu1 %6442 }
 0x8bf   :  { %5787 = vrot.lane.b32.xlu0 %v5775_v15, %s11912_s7  ;;  %v5623_v15 = vsel %vm11974_vm13, %v10515_v35, %v10517_v49  ;;  %vm11980_vm13 = vmmov %vm11978_vm9 }
 0x8c0   :  { %5789 = vrot.lane.b32.xlu1 %v5776_v27, %s11912_s7  ;;  %v10742_v27 = vpop.permute.xlu0 %6444 }
 0x8c3   :  { %5791 = vrot.lane.b32.xlu0 %v5777_v22, %s11912_s7  ;;  %v5632_v22 = vmul.f32 %v5623_v15, %v10599_v34 }
 0x8c4   :  { %5783 = vrot.lane.b32.xlu1 %v5773_v3, %s11912_s7  ;;  %v10744_v3 = vpop.permute.xlu1 %6446  ;;  %v10753_v10 = vpop.permute.xlu0 %6368 }
 0x8c7   :  { %5713 = vrot.lane.b32.xlu0 %v5702_v0, %s11971_s13  ;;  %v5549_v0 = vsel %vm11975_vm14, %v10519_v31, %v10521_v53  ;;  %vm11981_vm14 = vcmask 908288  }
 0x8c8   :  { %5715 = vrot.lane.b32.xlu1 %v5703_v26, %s11971_s13  ;;  %v10755_v35 = vpop.permute.xlu1 %6370  ;;  %v5550_v26 = vsel %vm11976_vm0, %v10521_v53, %v10523_v36  ;;  %v5558_v5 = vmul.f32 %v5549_v0, %v10616_v57  ;;  %v5561_v53 = vmul.f32 %v10525_v16, %v10606_v4  ;;  %v5478_v16 = vsel %vm11979_vm12, %v10529_v37, %v10531_v43  ;;  %vm11982_vm0 = vmmov %vm11981_vm14 }
 0x8c9   :  { %v5559_v49 = vmul.f32 %v5550_v26, %v10594_v59  ;;  %v5406_v26 = vsel %vm11982_vm0, %v10537_v39, %v10539_v33  ;;  %vm11983_vm15 = vmmov %vm11982_vm0 }
 0x8cb   :  { %5717 = vrot.lane.b32.xlu0 %v5704_v2, %s11971_s13  ;;  %v10772_v2 = vpop.permute.xlu0 %6372 }
 0x8cc   :  { %5719 = vrot.lane.b32.xlu1 %v5705_v47, %s11971_s13  ;;  %v10774_v47 = vpop.permute.xlu1 %6374 }
 0x8cf   :  { %5711 = vrot.lane.b32.xlu0 %v5701_v54, %s11971_s13  ;;  %v5477_v54 = vsel %vm11978_vm9, %v10527_v14, %v10529_v37  ;;  %v10786_v6 = vpop.permute.xlu0 %6296  ;;  %v5489_v37 = vmul.f32 %v10533_v32, %v10606_v4  ;;  %vm11984_vm9 = vcmask 900096  }
 0x8d0   :  { %5641 = vrot.lane.b32.xlu1 %v5630_v41, %s11830_s11  ;;  %v5557_v41 = vmul.f32 0.0, %v10519_v31  ;;  %v5486_v36 = vmul.f32 %v5477_v54, %v10616_v57  ;;  %v10788_v15 = vpop.permute.xlu1 %6298  ;;  %v5487_v31 = vmul.f32 %v5478_v16, %v10594_v59  ;;  %v5413_v54 = vmul.f32 0.0, %v10535_v19  ;;  %vm11985_vm12 = vmmov %vm11984_vm9 }
 0x8d3   :  { %5643 = vrot.lane.b32.xlu0 %v5631_v17, %s11830_s11  ;;  %v5479_v17 = vsel %vm11980_vm13, %v10531_v43, %v10533_v32  ;;  %v5405_v43 = vsel %vm11981_vm14, %v10535_v19, %v10537_v39  ;;  %v5407_v32 = vsel %vm11983_vm15, %v10539_v33, %v10541_v44  ;;  %v5417_v39 = vmul.f32 %v10541_v44, %v10606_v4  ;;  %vm11986_vm13 = vmmov %vm11984_vm9 }
 0x8d4   :  { %5645 = vrot.lane.b32.xlu1 %v5632_v22, %s11830_s11  ;;  %v5488_v22 = vmul.f32 %v5479_v17, %v10599_v34  ;;  %v10805_v0 = vpop.permute.xlu1 %6302  ;;  %v5334_v44 = vsel %vm11985_vm12, %v10545_v29, %v10547_v50  ;;  %v5335_v16 = vsel %vm11986_vm13, %v10547_v50, %v10549_v52  ;;  %v5345_v50 = vmul.f32 %v10549_v52, %v10606_v4 }
 0x8d5   :  { %v5343_v19 = vmul.f32 %v5334_v44, %v10594_v59  ;;  %v5344_v17 = vmul.f32 %v5335_v16, %v10599_v34  ;;  %vm11987_vm14 = vcmask 801792  }
 0x8d6   :  { %vm11988_vm0 = vmmov %vm11987_vm14 }
 0x8d7   :  { %5647 = vrot.lane.b32.xlu0 %v5633_v61, %s11830_s11  ;;  %v10803_v61 = vpop.permute.xlu0 %6300  ;;  %vm11989_vm15 = vmmov %vm11988_vm0 }
 0x8d8   :  { %5639 = vrot.lane.b32.xlu1 %v5629_v7, %s11830_s11  ;;  %v5485_v7 = vmul.f32 0.0, %v10527_v14  ;;  %v5414_v14 = vmul.f32 %v5405_v43, %v10616_v57  ;;  %v10821_v21 = vpop.permute.xlu1 %6226 }
 0x8db   :  { %5569 = vrot.lane.b32.xlu0 %v5558_v5, %s11831_s18  ;;  %v5415_v5 = vmul.f32 %v5406_v26, %v10594_v59 }
 0x8dc   :  { %5571 = vrot.lane.b32.xlu1 %v5559_v49, %s11831_s18  ;;  %v10819_v49 = vpop.permute.xlu0 %6224 }
 0x8df   :  { %5573 = vrot.lane.b32.xlu0 %v5560_v45, %s11831_s18  ;;  %v5416_v45 = vmul.f32 %v5407_v32, %v10599_v34 }
 0x8e0   :  { %5575 = vrot.lane.b32.xlu1 %v5561_v53, %s11831_s18  ;;  %v5333_v53 = vsel %vm11984_vm9, %v10543_v51, %v10545_v29  ;;  %v5341_v29 = vmul.f32 0.0, %v10543_v51  ;;  %vm11990_vm9 = vcmask 793600  }
 0x8e1   :  { %v5342_v33 = vmul.f32 %v5333_v53, %v10616_v57  ;;  %v5189_v32 = vsel %vm11990_vm9, %v10559_v23, %v10561_v1  ;;  %vm11991_vm12 = vmmov %vm11990_vm9 }
 0x8e2   :  { %v5198_v53 = vmul.f32 %v5189_v32, %v10616_v57  ;;  %vm11992_vm13 = vmmov %vm11990_vm9 }
 0x8e3   :  { %5567 = vrot.lane.b32.xlu0 %v5557_v41, %s11831_s18  ;;  %v10837_v41 = vpop.permute.xlu0 %6228 }
 0x8e4   :  { %5497 = vrot.lane.b32.xlu1 %v5486_v36, %s11832_s26  ;;  %v10839_v36 = vpop.permute.xlu1 %6230 }
 0x8e7   :  { %5499 = vrot.lane.b32.xlu0 %v5487_v31, %s11832_s26  ;;  %v10852_v31 = vpop.permute.xlu0 %6152 }
 0x8e8   :  { %5501 = vrot.lane.b32.xlu1 %v5488_v22, %s11832_s26  ;;  %v10854_v22 = vpop.permute.xlu1 %6154 }
 0x8eb   :  { %5503 = vrot.lane.b32.xlu0 %v5489_v37, %s11832_s26  ;;  %v5262_v37 = vsel %vm11988_vm0, %v10553_v62, %v10555_v55  ;;  %v10869_v43 = vpop.permute.xlu0 %6156 }
 0x8ec   :  { %5495 = vrot.lane.b32.xlu1 %v5485_v7, %s11832_s26  ;;  %v5261_v7 = vsel %vm11987_vm14, %v10551_v13, %v10553_v62  ;;  %v10871_v26 = vpop.permute.xlu1 %6158  ;;  %v5271_v52 = vmul.f32 %v5262_v37, %v10594_v59  ;;  %vm11995_vm14 = vcmask 785408   ;;  %v11996_v37 = vld [vmem:[#allocation15_spill] sm:$0xff] }
 0x8ed   :  { %v5270_v51 = vmul.f32 %v5261_v7, %v10616_v57  ;;  %vm11997_vm0 = vmmov %vm11995_vm14 }
 0x8ee   :  { %vm12000_vm9 = vmmov %vm11997_vm0 }
 0x8ef   :  { %5425 = vrot.lane.b32.xlu0 %v5414_v14, %s11956_s10  ;;  %v5263_v14 = vsel %vm11989_vm15, %v10555_v55, %v10557_v48  ;;  %v5269_v55 = vmul.f32 0.0, %v10551_v13  ;;  %vm11998_vm15 = vcmask 932864  }
 0x8f0   :  { %5427 = vrot.lane.b32.xlu1 %v5415_v5, %s11956_s10  ;;  %v5272_v62 = vmul.f32 %v5263_v14, %v10599_v34  ;;  %v5273_v5 = vmul.f32 %v10557_v48, %v10606_v4  ;;  %v5190_v48 = vsel %vm11991_vm12, %v10561_v1, %v10563_v18  ;;  %v5197_v1 = vmul.f32 0.0, %v10559_v23  ;;  %vm12001_vm12 = vmmov %vm11998_vm15 }
 0x8f1   :  { %v5199_v13 = vmul.f32 %v5190_v48, %v10594_v59 }
 0x8f3   :  { %5429 = vrot.lane.b32.xlu0 %v5416_v45, %s11956_s10  ;;  %v10886_v45 = vpop.permute.xlu0 %6080 }
 0x8f4   :  { %5431 = vrot.lane.b32.xlu1 %v5417_v39, %s11956_s10  ;;  %v10888_v39 = vpop.permute.xlu1 %6082 }
 0x8f7   :  { %5423 = vrot.lane.b32.xlu0 %v5413_v54, %s11956_s10  ;;  %v5191_v54 = vsel %vm11992_vm13, %v10563_v18, %v10565_v30  ;;  %vm12002_vm13 = vmmov %vm12001_vm12 }
 0x8f8   :  { %5353 = vrot.lane.b32.xlu1 %v5342_v33, %s11826_s25  ;;  %v10902_v33 = vpop.permute.xlu0 %6084  ;;  %v10904_v44 = vpop.permute.xlu1 %6086  ;;  %v5200_v16 = vmul.f32 %v5191_v54, %v10599_v34 }
 0x8fb   :  { %5355 = vrot.lane.b32.xlu0 %v5343_v19, %s11826_s25 }
 0x8fc   :  { %5357 = vrot.lane.b32.xlu1 %v5344_v17, %s11826_s25  ;;  %v5201_v17 = vmul.f32 %v10565_v30, %v10606_v4 }
 0x8ff   :  { %5359 = vrot.lane.b32.xlu0 %v5345_v50, %s11826_s25  ;;  %v11994_v50 = vld [vmem:[#allocation13_spill] sm:$0xff] }
 0x900   :  { %5351 = vrot.lane.b32.xlu1 %v5341_v29, %s11826_s25  ;;  %v11993_v29 = vld [vmem:[#allocation14_spill] sm:$0xff] }
 0x901   :  { %v5117_v7 = vsel %vm11995_vm14, %v11994_v50, %v11993_v29  ;;  %vm12003_vm14 = vmmov %vm12001_vm12 }
 0x903   :  { %5281 = vrot.lane.b32.xlu0 %v5270_v51, %s11955_s1  ;;  %v5118_v51 = vsel %vm11997_vm0, %v11993_v29, %v11996_v37  ;;  %v12005_v29 = vld [vmem:[#allocation17_spill] sm:$0xff]  ;;  %vm12006_vm0 = vcmask 777216  }
 0x904   :  { %5283 = vrot.lane.b32.xlu1 %v5271_v52, %s11955_s1  ;;  %v5127_v30 = vmul.f32 %v5118_v51, %v10594_v59 }
 0x907   :  { %5285 = vrot.lane.b32.xlu0 %v5272_v62, %s11955_s1  ;;  %v5126_v62 = vmul.f32 %v5117_v7, %v10616_v57 }
 0x908   :  { %5287 = vrot.lane.b32.xlu1 %v5273_v5, %s11955_s1  ;;  %v11999_v5 = vld [vmem:[#allocation16_spill] sm:$0xff] }
 0x909   :  { %v5119_v32 = vsel %vm12000_vm9, %v11996_v37, %v11999_v5  ;;  %vm12010_vm9 = vmmov %vm12006_vm0 }
 0x90b   :  { %5279 = vrot.lane.b32.xlu0 %v5269_v55, %s11955_s1 }
 0x90c   :  { %5209 = vrot.lane.b32.xlu1 %v5198_v53, %s11954_s4 }
 0x90f   :  { %5211 = vrot.lane.b32.xlu0 %v5199_v13, %s11954_s4  ;;  %v5128_v13 = vmul.f32 %v5119_v32, %v10599_v34 }
 0x910   :  { %5213 = vrot.lane.b32.xlu1 %v5200_v16, %s11954_s4 }
 0x911   :  { %v6037_v19 = vpop.permute.xlu0 %6036 }
 0x912   :  { %v6039_v18 = vpop.permute.xlu1 %6038 }
 0x913   :  { %v6045_v52 = vsel %vm11998_vm15, %v6037_v19, %v6039_v18  ;;  %5215 = vrot.lane.b32.xlu0 %v5201_v17, %s11954_s4  ;;  %v12004_v17 = vld [vmem:[#allocation18_spill] sm:$0xff]  ;;  %vm12008_vm15 = vmmov %vm12006_vm0 }
 0x914   :  { %5207 = vrot.lane.b32.xlu1 %v5197_v1, %s11954_s4  ;;  %6827 = vmatprep.subr.mxu0 %v6045_v52  ;;  %v5129_v1 = vmul.f32 %v11999_v5, %v10606_v4  ;;  %v5045_v7 = vsel %vm12006_vm0, %v12005_v29, %v12004_v17  ;;  %v12007_v52 = vld [vmem:[#allocation19_spill] sm:$0xff] }
 0x915   :  { %v6041_v23 = vpop.permute.xlu0 %6040 }
 0x916   :  { %v6043_v14 = vpop.permute.xlu1 %6042  ;;  %v6046_v53 = vsel %vm12002_vm13, %v6039_v18, %v6041_v23  ;;  %v5125_v18 = vmul.f32 0.0, %v11994_v50 }
 0x917   :  { %v6047_v55 = vsel %vm12001_vm12, %v6041_v23, %v6043_v14  ;;  %5137 = vrot.lane.b32.xlu0 %v5126_v62, %s11953_s24  ;;  %v5054_v14 = vmul.f32 %v5045_v7, %v10616_v57  ;;  %v12009_v62 = vld [vmem:[#allocation20_spill] sm:$0xff]  ;;  %v12011_v7 = vld [vmem:[#allocation22_spill] sm:$0xff]  ;;  %vm12013_vm12 = vcmask 769024  }
 0x918   :  { %5139 = vrot.lane.b32.xlu1 %v5127_v30, %s11953_s24  ;;  %6904 = vmatprep.subr.mxu1 %v6047_v55  ;;  %v5047_v30 = vsel %vm12010_vm9, %v12007_v52, %v12009_v62  ;;  %vm12024_vm9 = vcmask 121856  }
 0x919   :  { %v6035_v48 = vpop.permute.xlu0 %6034  ;;  %6905 = vmatpush1.msra.mxu1 %v6046_v53 }
 0x91a   :  { %v5965_v54 = vpop.permute.xlu1 %5964  ;;  %v6044_v16 = vsel %vm12003_vm14, %v6035_v48, %v6037_v19  ;;  %v5046_v19 = vsel %vm12008_vm15, %v12004_v17, %v12007_v52  ;;  %v5056_v48 = vmul.f32 %v5047_v30, %v10599_v34  ;;  %v5057_v17 = vmul.f32 %v12009_v62, %v10606_v4 }
 0x91b   :  { %5141 = vrot.lane.b32.xlu0 %v5128_v13, %s11953_s24  ;;  %6828 = vmatpush1.msra.mxu0 %v6044_v16  ;;  %v5055_v32 = vmul.f32 %v5046_v19, %v10594_v59  ;;  %vm12020_vm14 = vcmask 113664  }
 0x91c   :  { %5143 = vrot.lane.b32.xlu1 %v5129_v1, %s11953_s24 }
 0x91d   :  { %v5967_v37 = vpop.permute.xlu0 %5966 }
 0x91e   :  { %v5969_v51 = vpop.permute.xlu1 %5968  ;;  %v5973_v23 = vsel %vm2216_vm2, %v5965_v54, %v5967_v37 }
 0x91f   :  { %5135 = vrot.lane.b32.xlu0 %v5125_v18, %s11953_s24  ;;  %6829 = vmatprep.subr.mxu0 %v5973_v23  ;;  %v5974_v13 = vsel %vm2216_vm2, %v5967_v37, %v5969_v51  ;;  %v12012_v18 = vld [vmem:[#allocation21_spill] sm:$0xff] }
 0x920   :  { %5065 = vrot.lane.b32.xlu1 %v5054_v14, %s11952_s28  ;;  %v4973_v52 = vsel %vm12013_vm12, %v12012_v18, %v12011_v7  ;;  %v8301_v23 = vld [vmem:[%s11688_s8 + $0x24] ss:$8 sm:$0xf] }
 0x921   :  { %v5971_v50 = vpop.permute.xlu0 %5970 }
 0x922   :  { %v5963_v5 = vpop.permute.xlu1 %5962  ;;  %v5975_v53 = vsel %vm2216_vm2, %v5969_v51, %v5971_v50  ;;  %v12015_v51 = vld [vmem:[#allocation11_spill] sm:$0xff] }
 0x923   :  { %v5972_v55 = vsel %vm2216_vm2, %v5963_v5, %v5965_v54  ;;  %5067 = vrot.lane.b32.xlu0 %v5055_v32, %s11952_s28  ;;  %6906 = vmatprep.subr.mxu1 %v5975_v53  ;;  %v5053_v54 = vmul.f32 0.0, %v12005_v29  ;;  %vm12014_vm2 = vmmov %vm12013_vm12  ;;  %v5827_v14 = vrot.slane %v8301_v23, %v12015_v51  ;;  %v12016_v29 = vld [vmem:[#allocation10_spill] sm:$0xff]  ;;  %v4982_v5 = vmul.f32 %v4973_v52, %v10616_v57 }
 0x924   :  { %5069 = vrot.lane.b32.xlu1 %v5056_v48, %s11952_s28  ;;  %6830 = vmatpush1.msra.mxu0 %v5972_v55  ;;  %v4974_v37 = vsel %vm12014_vm2, %v12011_v7, %v10612_v12  ;;  %v5823_v62 = vrot.slane %v8301_v23, %v12016_v29  ;;  %vm12017_vm13 = vmmov %vm12014_vm2  ;;  %v12018_v48 = vld [vmem:[#allocation9_spill] sm:$0xff]  ;;  %v12019_v7 = vld [vmem:[#allocation8_spill] sm:$0xff] }
 0x925   :  { %6907 = vmatpush1.msra.mxu1 %v5974_v13  ;;  %v5893_v16 = vpop.permute.xlu0 %5892  ;;  %v4975_v32 = vsel %vm12017_vm13, %v10612_v12, %v10614_v24  ;;  %v4983_v55 = vmul.f32 %v4974_v37, %v10594_v59  ;;  %v5819_v13 = vrot.slane %v8301_v23, %v12018_v48  ;;  %vm12025_vm12 = vmmov %vm12024_vm9 }
 0x926   :  { %v5895_v1 = vpop.permute.xlu1 %5894  ;;  %v5834_v12 = vmul.f32 %v5823_v62, %v10599_v34  ;;  %vm12026_vm2 = vmmov %vm12024_vm9 }
 0x927   :  { %v5901_v19 = vsel %vm2313_vm11, %v5893_v16, %v5895_v1  ;;  %5071 = vrot.lane.b32.xlu0 %v5057_v17, %s11952_s28  ;;  %vm12027_vm13 = vmmov %vm12026_vm2 }
 0x928   :  { %6831 = vmatprep.subr.mxu0 %v5901_v19  ;;  %5063 = vrot.lane.b32.xlu1 %v5053_v54, %s11952_s28  ;;  %v5835_v54 = vmul.f32 %v5827_v14, %v10606_v4  ;;  %v5815_v19 = vrot.slane %v8301_v23, %v12019_v7  ;;  %v5833_v14 = vmul.f32 %v5819_v13, %v10594_v59 }
 0x929   :  { %v5897_v30 = vpop.permute.xlu0 %5896  ;;  %v6664_v23 = vsel %vm901_vm8, %v10626_v25, %v10628_v42 }
 0x92a   :  { %v5899_v50 = vpop.permute.xlu1 %5898  ;;  %v5902_v17 = vsel %vm2313_vm11, %v5895_v1, %v5897_v30  ;;  %v4985_v1 = vmul.f32 %v10614_v24, %v10606_v4  ;;  %v5832_v62 = vmul.f32 %v5815_v19, %v10616_v57  ;;  %v6665_v24 = vsel %vm901_vm8, %v10628_v42, %v10643_v11 }
 0x92b   :  { %v5903_v53 = vsel %vm2313_vm11, %v5897_v30, %v5899_v50  ;;  %4993 = vrot.lane.b32.xlu0 %v4982_v5, %s11951_s12  ;;  %v4984_v50 = vmul.f32 %v4975_v32, %v10599_v34  ;;  %v6674_v13 = vmul.f32 %v6665_v24, %v10599_v34  ;;  %v6676_v19 = vmul.f32 0.0, %v10645_v60 }
 0x92c   :  { %6908 = vmatprep.subr.mxu1 %v5903_v53  ;;  %4995 = vrot.lane.b32.xlu1 %v4983_v55, %s11951_s12  ;;  %v6673_v55 = vmul.f32 %v6664_v23, %v10594_v59 }
 0x92d   :  { %6909 = vmatpush1.msra.mxu1 %v5902_v17  ;;  %v5891_v52 = vpop.permute.xlu0 %5890 }
 0x92e   :  { %6910 = vmatprep.subr.mxu1 %v5835_v54  ;;  %v5786_v37 = vpop.permute.xlu1 %5785  ;;  %v5900_v51 = vsel %vm2313_vm11, %v5891_v52, %v5893_v16  ;;  %v4981_v16 = vmul.f32 0.0, %v12012_v18 }
 0x92f   :  { %6911 = vmatpush1.msra.mxu1 %v5834_v12  ;;  %4997 = vrot.lane.b32.xlu0 %v4984_v50, %s11951_s12  ;;  %v6672_v50 = vmul.f32 %v10626_v25, %v10616_v57 }
 0x930   :  { %6832 = vmatpush1.msra.mxu0 %v5900_v51  ;;  %4999 = vrot.lane.b32.xlu1 %v4985_v1, %s11951_s12  ;;  %v6666_v51 = vsel %vm901_vm8, %v10643_v11, %v10645_v60 }
 0x931   :  { %6833 = vmatprep.subr.mxu0 %v5833_v14  ;;  %v5788_v30 = vpop.permute.xlu0 %5787  ;;  %v6675_v54 = vmul.f32 %v6666_v51, %v10606_v4  ;;  %v6593_v14 = vsel %vm998_vm7, %v10661_v46, %v10675_v38  ;;  %v6520_v51 = vsel %vm1095_vm3, %v10692_v9, %v10694_v40 }
 0x932   :  { %6834 = vmatpush1.msra.mxu0 %v5832_v62  ;;  %v5790_v5 = vpop.permute.xlu1 %5789  ;;  %v5794_v32 = vsel %vm2357_vm10, %v5786_v37, %v5788_v30  ;;  %v6602_v25 = vmul.f32 %v6593_v14, %v10599_v34  ;;  %v6448_v14 = vsel %vm1193_vm5, %v10723_v8, %v10725_v20 }
 0x933   :  { %4991 = vrot.lane.b32.xlu0 %v4981_v16, %s11951_s12  ;;  %6835 = vmatprep.subr.mxu0 %v5794_v32  ;;  %v5795_v11 = vsel %vm2357_vm10, %v5788_v30, %v5790_v5  ;;  %v6594_v16 = vsel %vm998_vm7, %v10675_v38, %v10677_v58 }
 0x934   :  { %6684 = vrot.lane.b32.xlu1 %v6673_v55, %s11838_s17  ;;  %v6603_v32 = vmul.f32 %v6594_v16, %v10606_v4  ;;  %v6604_v55 = vmul.f32 0.0, %v10677_v58  ;;  %v6521_v58 = vsel %vm1095_vm3, %v10694_v40, %v10709_v56 }
 0x935   :  { %v5792_v18 = vpop.permute.xlu0 %5791 }
 0x936   :  { %v5784_v53 = vpop.permute.xlu1 %5783  ;;  %v5796_v42 = vsel %vm2357_vm10, %v5790_v5, %v5792_v18 }
 0x937   :  { %v5793_v17 = vsel %vm2357_vm10, %v5784_v53, %v5786_v37  ;;  %6686 = vrot.lane.b32.xlu0 %v6674_v13, %s11838_s17  ;;  %6912 = vmatprep.subr.mxu1 %v5796_v42  ;;  %v6592_v37 = vsel %vm998_vm7, %v10659_v63, %v10661_v46  ;;  %v6600_v13 = vmul.f32 %v10659_v63, %v10616_v57 }
 0x938   :  { %6688 = vrot.lane.b32.xlu1 %v6675_v54, %s11838_s17  ;;  %6836 = vmatpush1.msra.mxu0 %v5793_v17  ;;  %v6601_v62 = vmul.f32 %v6592_v37, %v10594_v59  ;;  %v6529_v42 = vmul.f32 %v6520_v51, %v10594_v59  ;;  %v6522_v54 = vsel %vm1095_vm3, %v10709_v56, %v10711_v28  ;;  %v6532_v37 = vmul.f32 0.0, %v10711_v28 }
 0x939   :  { %6913 = vmatpush1.msra.mxu1 %v5795_v11  ;;  %v5714_v12 = vpop.permute.xlu0 %5713  ;;  %v6530_v63 = vmul.f32 %v6521_v58, %v10599_v34 }
 0x93a   :  { %v5716_v52 = vpop.permute.xlu1 %5715 }
 0x93b   :  { %v5722_v1 = vsel %vm2259_vm4, %v5714_v12, %v5716_v52  ;;  %6690 = vrot.lane.b32.xlu0 %v6676_v19, %s11838_s17 }
 0x93c   :  { %6837 = vmatprep.subr.mxu0 %v5722_v1  ;;  %6682 = vrot.lane.b32.xlu1 %v6672_v50, %s11838_s17 }
 0x93d   :  { %v5718_v60 = vpop.permute.xlu0 %5717 }
 0x93e   :  { %v5720_v23 = vpop.permute.xlu1 %5719  ;;  %v5723_v46 = vsel %vm2259_vm4, %v5716_v52, %v5718_v60  ;;  %v6531_v52 = vmul.f32 %v6522_v54, %v10606_v4 }
 0x93f   :  { %v5724_v30 = vsel %vm2259_vm4, %v5718_v60, %v5720_v23  ;;  %6612 = vrot.lane.b32.xlu0 %v6601_v62, %s11845_s21  ;;  %v6528_v60 = vmul.f32 %v10692_v9, %v10616_v57  ;;  %v6449_v62 = vsel %vm1193_vm5, %v10725_v20, %v10742_v27 }
 0x940   :  { %6914 = vmatprep.subr.mxu1 %v5724_v30  ;;  %6614 = vrot.lane.b32.xlu1 %v6602_v25, %s11845_s21  ;;  %v6457_v25 = vmul.f32 %v6448_v14, %v10594_v59  ;;  %v6450_v30 = vsel %vm1193_vm5, %v10742_v27, %v10744_v3  ;;  %v6458_v9 = vmul.f32 %v6449_v62, %v10599_v34 }
 0x941   :  { %6915 = vmatpush1.msra.mxu1 %v5723_v46  ;;  %v5712_v5 = vpop.permute.xlu0 %5711 }
 0x942   :  { %v5642_v24 = vpop.permute.xlu1 %5641  ;;  %v5721_v38 = vsel %vm2259_vm4, %v5712_v5, %v5714_v12  ;;  %vm12021_vm4 = vmmov %vm12020_vm14 }
 0x943   :  { %6616 = vrot.lane.b32.xlu0 %v6603_v32, %s11845_s21  ;;  %6838 = vmatpush1.msra.mxu0 %v5721_v38  ;;  %vm12022_vm0 = vmmov %vm12021_vm4  ;;  %v6459_v32 = vmul.f32 %v6450_v30, %v10606_v4  ;;  %v6376_v38 = vsel %vm1289_vm1, %v10753_v10, %v10755_v35  ;;  %v6232_v30 = vsel %vm1677_vm6, %v10819_v49, %v10821_v21 }
 0x944   :  { %6618 = vrot.lane.b32.xlu1 %v6604_v55, %s11845_s21  ;;  %vm12023_vm15 = vmmov %vm12022_vm0  ;;  %v6460_v55 = vmul.f32 0.0, %v10744_v3  ;;  %v6377_v3 = vsel %vm1289_vm1, %v10755_v35, %v10772_v2  ;;  %v6385_v58 = vmul.f32 %v6376_v38, %v10594_v59 }
 0x945   :  { %v5644_v18 = vpop.permute.xlu0 %5643 }
 0x946   :  { %v5646_v53 = vpop.permute.xlu1 %5645  ;;  %v5650_v17 = vsel %vm12020_vm14, %v5642_v24, %v5644_v18  ;;  %vm12028_vm14 = vcmask 130048  }
 0x947   :  { %6610 = vrot.lane.b32.xlu0 %v6600_v13, %s11845_s21  ;;  %6839 = vmatprep.subr.mxu0 %v5650_v17  ;;  %v5651_v56 = vsel %vm12023_vm15, %v5644_v18, %v5646_v53  ;;  %v6378_v17 = vsel %vm1289_vm1, %v10772_v2, %v10774_v47 }
 0x948   :  { %6540 = vrot.lane.b32.xlu1 %v6529_v42, %s11844_s27 }
 0x949   :  { %v5648_v11 = vpop.permute.xlu0 %5647 }
 0x94a   :  { %v5640_v19 = vpop.permute.xlu1 %5639  ;;  %v5652_v40 = vsel %vm12022_vm0, %v5646_v53, %v5648_v11  ;;  %v6456_v53 = vmul.f32 %v10723_v8, %v10616_v57  ;;  %v6386_v8 = vmul.f32 %v6377_v3, %v10599_v34 }
 0x94b   :  { %v5649_v12 = vsel %vm12021_vm4, %v5640_v19, %v5642_v24  ;;  %6542 = vrot.lane.b32.xlu0 %v6530_v63, %s11844_s27  ;;  %6916 = vmatprep.subr.mxu1 %v5652_v40  ;;  %vm12029_vm4 = vmmov %vm12028_vm14  ;;  %v6387_v19 = vmul.f32 %v6378_v17, %v10606_v4  ;;  %v6388_v63 = vmul.f32 0.0, %v10774_v47 }
 0x94c   :  { %6544 = vrot.lane.b32.xlu1 %v6531_v52, %s11844_s27  ;;  %6840 = vmatpush1.msra.mxu0 %v5649_v12  ;;  %vm12030_vm0 = vmmov %vm12029_vm4 }
 0x94d   :  { %6917 = vmatpush1.msra.mxu1 %v5651_v56  ;;  %v5570_v50 = vpop.permute.xlu0 %5569  ;;  %vm12031_vm15 = vmmov %vm12030_vm0  ;;  %v6384_v56 = vmul.f32 %v10753_v10, %v10616_v57 }
 0x94e   :  { %v5572_v1 = vpop.permute.xlu1 %5571 }
 0x94f   :  { %v5578_v23 = vsel %vm12024_vm9, %v5570_v50, %v5572_v1  ;;  %6546 = vrot.lane.b32.xlu0 %v6532_v37, %s11844_s27  ;;  %vm12032_vm9 = vcmask 146432  }
 0x950   :  { %6841 = vmatprep.subr.mxu0 %v5578_v23  ;;  %6538 = vrot.lane.b32.xlu1 %v6528_v60, %s11844_s27  ;;  %v6304_v52 = vsel %vm12032_vm9, %v10786_v6, %v10788_v15 }
 0x951   :  { %v5574_v28 = vpop.permute.xlu0 %5573  ;;  %v6313_v14 = vmul.f32 %v6304_v52, %v10594_v59 }
 0x952   :  { %v5576_v16 = vpop.permute.xlu1 %5575  ;;  %v5579_v20 = vsel %vm12026_vm2, %v5572_v1, %v5574_v28  ;;  %vm12034_vm2 = vmmov %vm12032_vm9 }
 0x953   :  { %v5580_v46 = vsel %vm12025_vm12, %v5574_v28, %v5576_v16  ;;  %6468 = vrot.lane.b32.xlu0 %v6457_v25, %s11843_s15  ;;  %vm12033_vm12 = vmmov %vm12032_vm9  ;;  %v6306_v60 = vsel %vm12034_vm2, %v10803_v61, %v10805_v0  ;;  %v6316_v25 = vmul.f32 0.0, %v10805_v0  ;;  %v6233_v0 = vsel %vm1677_vm6, %v10821_v21, %v10837_v41 }
 0x954   :  { %6918 = vmatprep.subr.mxu1 %v5580_v46  ;;  %6470 = vrot.lane.b32.xlu1 %v6458_v9, %s11843_s15  ;;  %v6315_v16 = vmul.f32 %v6306_v60, %v10606_v4  ;;  %vm12039_vm9 = vmmov %vm12031_vm15 }
 0x955   :  { %6919 = vmatpush1.msra.mxu1 %v5579_v20  ;;  %v5568_v5 = vpop.permute.xlu0 %5567  ;;  %v6312_v20 = vmul.f32 %v10786_v6, %v10616_v57  ;;  %v6242_v6 = vmul.f32 %v6233_v0, %v10599_v34 }
 0x956   :  { %v5498_v24 = vpop.permute.xlu1 %5497  ;;  %v5577_v27 = vsel %vm12027_vm13, %v5568_v5, %v5570_v50  ;;  %v6305_v50 = vsel %vm12033_vm12, %v10788_v15, %v10803_v61  ;;  %vm12035_vm13 = vmmov %vm12034_vm2 }
 0x957   :  { %6472 = vrot.lane.b32.xlu0 %v6459_v32, %s11843_s15  ;;  %6842 = vmatpush1.msra.mxu0 %v5577_v27  ;;  %v6314_v10 = vmul.f32 %v6305_v50, %v10599_v34  ;;  %v6234_v32 = vsel %vm1677_vm6, %v10837_v41, %v10839_v36  ;;  %vm12040_vm12 = vmmov %vm12039_vm9 }
 0x958   :  { %6474 = vrot.lane.b32.xlu1 %v6460_v55, %s11843_s15 }
 0x959   :  { %v5500_v51 = vpop.permute.xlu0 %5499 }
 0x95a   :  { %v5502_v18 = vpop.permute.xlu1 %5501  ;;  %v5506_v13 = vsel %vm12028_vm14, %v5498_v24, %v5500_v51  ;;  %vm12036_vm14 = vmmov %vm12034_vm2 }
 0x95b   :  { %6466 = vrot.lane.b32.xlu0 %v6456_v53, %s11843_s15  ;;  %6843 = vmatprep.subr.mxu0 %v5506_v13  ;;  %v5507_v2 = vsel %vm12031_vm15, %v5500_v51, %v5502_v18  ;;  %v6243_v51 = vmul.f32 %v6234_v32, %v10606_v4  ;;  %v6160_v13 = vsel %vm12031_vm15, %v10852_v31, %v10854_v22  ;;  %v12044_v32 = vld [vmem:[#allocation11_spill] sm:$0xff] }
 0x95c   :  { %6396 = vrot.lane.b32.xlu1 %v6385_v58, %s11842_s14  ;;  %v6240_v58 = vmul.f32 %v10819_v49, %v10616_v57 }
 0x95d   :  { %v5504_v42 = vpop.permute.xlu0 %5503 }
 0x95e   :  { %v5496_v54 = vpop.permute.xlu1 %5495  ;;  %v5508_v35 = vsel %vm12030_vm0, %v5502_v18, %v5504_v42  ;;  %vm12038_vm0 = vmmov %vm12034_vm2  ;;  %v6244_v18 = vmul.f32 0.0, %v10839_v36  ;;  %v6161_v42 = vsel %vm12039_vm9, %v10854_v22, %v10869_v43 }
 0x95f   :  { %v5505_v11 = vsel %vm12029_vm4, %v5496_v54, %v5498_v24  ;;  %6398 = vrot.lane.b32.xlu0 %v6386_v8, %s11842_s14  ;;  %6920 = vmatprep.subr.mxu1 %v5508_v35  ;;  %v6241_v24 = vmul.f32 %v6232_v30, %v10594_v59  ;;  %vm12037_vm4 = vmmov %vm12034_vm2  ;;  %v6169_v8 = vmul.f32 %v6160_v13, %v10594_v59  ;;  %vm12041_vm2 = vcmask 121856  }
 0x960   :  { %6400 = vrot.lane.b32.xlu1 %v6387_v19, %s11842_s14  ;;  %6844 = vmatpush1.msra.mxu0 %v5505_v11  ;;  %v6162_v11 = vsel %vm12040_vm12, %v10869_v43, %v10871_v26  ;;  %v6170_v49 = vmul.f32 %v6161_v42, %v10599_v34  ;;  %v8322_v42 = vld [vmem:[%s11693_s9 + $0x5] ss:$8 sm:$0xf]  ;;  %vm12053_vm12 = vcmask 785408  }
 0x961   :  { %6921 = vmatpush1.msra.mxu1 %v5507_v2  ;;  %v5426_v12 = vpop.permute.xlu0 %5425 }
 0x962   :  { %v5428_v40 = vpop.permute.xlu1 %5427 }
 0x963   :  { %v5434_v37 = vsel %vm1677_vm6, %v5426_v12, %v5428_v40  ;;  %6402 = vrot.lane.b32.xlu0 %v6388_v63, %s11842_s14  ;;  %v6171_v63 = vmul.f32 %v6162_v11, %v10606_v4 }
 0x964   :  { %6845 = vmatprep.subr.mxu0 %v5434_v37  ;;  %6394 = vrot.lane.b32.xlu1 %v6384_v56, %s11842_s14  ;;  %v6168_v37 = vmul.f32 %v10852_v31, %v10616_v57 }
 0x965   :  { %v5430_v47 = vpop.permute.xlu0 %5429 }
 0x966   :  { %v5432_v1 = vpop.permute.xlu1 %5431  ;;  %v5435_v15 = vsel %vm1677_vm6, %v5428_v40, %v5430_v47  ;;  %v6088_v40 = vsel %vm12041_vm2, %v10886_v45, %v10888_v39 }
 0x967   :  { %v5436_v23 = vsel %vm1677_vm6, %v5430_v47, %v5432_v1  ;;  %6324 = vrot.lane.b32.xlu0 %v6313_v14, %s11857_s19  ;;  %v6097_v50 = vmul.f32 %v6088_v40, %v10594_v59 }
 0x968   :  { %6922 = vmatprep.subr.mxu1 %v5436_v23  ;;  %6326 = vrot.lane.b32.xlu1 %v6314_v10, %s11857_s19 }
 0x969   :  { %6923 = vmatpush1.msra.mxu1 %v5435_v15  ;;  %v5424_v62 = vpop.permute.xlu0 %5423  ;;  %v6100_v15 = vmul.f32 0.0, %v10904_v44 }
 0x96a   :  { %v5354_v28 = vpop.permute.xlu1 %5353  ;;  %v5433_v61 = vsel %vm1677_vm6, %v5424_v62, %v5426_v12  ;;  %v6172_v12 = vmul.f32 0.0, %v10871_v26  ;;  %v6705_v26 = vld [vmem:[%s11691_s2 + $0x8] sm:$0xff] }
 0x96b   :  { %6328 = vrot.lane.b32.xlu0 %v6315_v16, %s11857_s19  ;;  %6846 = vmatpush1.msra.mxu0 %v5433_v61  ;;  %v6809_v16 = vld [vmem:[%s11692_s5 + $0x8] sm:$0xff] }
 0x96c   :  { %6330 = vrot.lane.b32.xlu1 %v6316_v25, %s11857_s19 }
 0x96d   :  { %v5356_v9 = vpop.permute.xlu0 %5355 }
 0x96e   :  { %v5358_v46 = vpop.permute.xlu1 %5357  ;;  %v5362_v5 = vsel %vm12035_vm13, %v5354_v28, %v5356_v9  ;;  %vm6820_vm13 = vcmask 588800  }
 0x96f   :  { %6322 = vrot.lane.b32.xlu0 %v6312_v20, %s11857_s19  ;;  %6847 = vmatprep.subr.mxu0 %v5362_v5  ;;  %v5363_v41 = vsel %vm12038_vm0, %v5356_v9, %v5358_v46 }
 0x970   :  { %6252 = vrot.lane.b32.xlu1 %v6241_v24, %s11853_s29  ;;  %8314 = vmatprep.mubr.msk.f32.mxu0 %vm6820_vm13, %v6705_v26 }
 0x971   :  { %v5360_v55 = vpop.permute.xlu0 %5359  ;;  %8316 = vmatprep.mubr.msk.f32.mxu1 %vm6820_vm13, %v6705_v26 }
 0x972   :  { %v5352_v27 = vpop.permute.xlu1 %5351  ;;  %v5364_v21 = vsel %vm12037_vm4, %v5358_v46, %v5360_v55  ;;  %vm12049_vm4 = vcmask 777216  }
 0x973   :  { %v5361_v38 = vsel %vm12036_vm14, %v5352_v27, %v5354_v28  ;;  %6254 = vrot.lane.b32.xlu0 %v6242_v6, %s11853_s29  ;;  %6924 = vmatprep.subr.mxu1 %v5364_v21  ;;  %v8323_v27 = vld [vmem:[%s11693_s9 + $0x6] ss:$8 sm:$0xf]  ;;  %vm12050_vm0 = vmmov %vm12049_vm4 }
 0x974   :  { %6256 = vrot.lane.b32.xlu1 %v6243_v51, %s11853_s29  ;;  %6848 = vmatpush1.msra.mxu0 %v5361_v38  ;;  %v7632_v51 = vrot.slane %v8323_v27, %v12019_v7  ;;  %vm12051_vm15 = vmmov %vm12050_vm0 }
 0x975   :  { %6925 = vmatpush1.msra.mxu1 %v5363_v41  ;;  %v5282_v53 = vpop.permute.xlu0 %5281  ;;  %vm12052_vm9 = vmmov %vm12050_vm0 }
 0x976   :  { %v5284_v3 = vpop.permute.xlu1 %5283 }
 0x977   :  { %v5290_v17 = vsel %vm1289_vm1, %v5282_v53, %v5284_v3  ;;  %6258 = vrot.lane.b32.xlu0 %v6244_v18, %s11853_s29  ;;  %v7636_v18 = vrot.slane %v8323_v27, %v12018_v48 }
 0x978   :  { %6849 = vmatprep.subr.mxu0 %v5290_v17  ;;  %6250 = vrot.lane.b32.xlu1 %v6240_v58, %s11853_s29  ;;  %v7640_v17 = vrot.slane %v8323_v27, %v12016_v29 }
 0x979   :  { %v5286_v36 = vpop.permute.xlu0 %5285 }
 0x97a   :  { %v5288_v54 = vpop.permute.xlu1 %5287  ;;  %v5291_v22 = vsel %vm1289_vm1, %v5284_v3, %v5286_v36 }
 0x97b   :  { %v5292_v35 = vsel %vm1289_vm1, %v5286_v36, %v5288_v54  ;;  %6180 = vrot.lane.b32.xlu0 %v6169_v8, %s11889_s20  ;;  %v7644_v54 = vrot.slane %v8323_v27, %v12044_v32  ;;  %v7035_v27 = vld [vmem:[%s11693_s9] ss:$8 sm:$0xf] }
 0x97c   :  { %6926 = vmatprep.subr.mxu1 %v5292_v35  ;;  %6182 = vrot.lane.b32.xlu1 %v6170_v49, %s11889_s20  ;;  %v7523_v49 = vrot.slane %v8322_v42, %v12019_v7 }
 0x97d   :  { %6927 = vmatpush1.msra.mxu1 %v5291_v22  ;;  %v5280_v19 = vpop.permute.xlu0 %5279  ;;  %v7527_v22 = vrot.slane %v8322_v42, %v12018_v48 }
 0x97e   :  { %v5210_v2 = vpop.permute.xlu1 %5209  ;;  %v5289_v43 = vsel %vm1289_vm1, %v5280_v19, %v5282_v53  ;;  %vm12042_vm1 = vmmov %vm12041_vm2 }
 0x97f   :  { %6184 = vrot.lane.b32.xlu0 %v6171_v63, %s11889_s20  ;;  %6850 = vmatpush1.msra.mxu0 %v5289_v43  ;;  %v6089_v47 = vsel %vm12042_vm1, %v10888_v39, %v10902_v33  ;;  %vm12043_vm14 = vmmov %vm12042_vm1  ;;  %v7531_v63 = vrot.slane %v8322_v42, %v12016_v29  ;;  %v8320_v43 = vld [vmem:[%s11693_s9 + $0x3] ss:$8 sm:$0xf] }
 0x980   :  { %6186 = vrot.lane.b32.xlu1 %v6172_v12, %s11889_s20  ;;  %v6090_v31 = vsel %vm12043_vm14, %v10902_v33, %v10904_v44  ;;  %v6098_v59 = vmul.f32 %v6089_v47, %v10599_v34  ;;  %v8324_v44 = vld [vmem:[%s11693_s9 + $0x7] ss:$8 sm:$0xf]  ;;  %v7367_v26 = vrot.slane %v8320_v43, %v12019_v7  ;;  %v7371_v47 = vrot.slane %v8320_v43, %v12018_v48  ;;  %vm12054_vm2 = vmmov %vm12053_vm12 }
 0x981   :  { %v5212_v52 = vpop.permute.xlu0 %5211  ;;  %v6099_v39 = vmul.f32 %v6090_v31, %v10606_v4  ;;  %v6096_v4 = vmul.f32 %v10886_v45, %v10616_v57  ;;  %v6808_v57 = vld [vmem:[%s11692_s5] sm:$0xff]  ;;  %v7741_v30 = vrot.slane %v8324_v44, %v12019_v7  ;;  %v7745_v46 = vrot.slane %v8324_v44, %v12018_v48  ;;  %vm12055_vm1 = vmmov %vm12054_vm2 }
 0x982   :  { %v5214_v56 = vpop.permute.xlu1 %5213  ;;  %v5218_v1 = vsel %vm1193_vm5, %v5210_v2, %v5212_v52  ;;  %v7749_v24 = vrot.slane %v8324_v44, %v12016_v29  ;;  %v7753_v55 = vrot.slane %v8324_v44, %v12044_v32  ;;  %vm12056_vm14 = vmmov %vm12055_vm1 }
 0x983   :  { %6178 = vrot.lane.b32.xlu0 %v6168_v37, %s11889_s20  ;;  %6851 = vmatprep.subr.mxu0 %v5218_v1  ;;  %v5219_v33 = vsel %vm1193_vm5, %v5212_v52, %v5214_v56  ;;  %v7535_v52 = vrot.slane %v8322_v42, %v12044_v32  ;;  %v7048_v42 = vrot.slane %v7035_v27, %v12016_v29 }
 0x984   :  { %6108 = vrot.lane.b32.xlu1 %v6097_v50, %s11885_s30 }
 0x985   :  { %v5216_v14 = vpop.permute.xlu0 %5215 }
 0x986   :  { %v5208_v60 = vpop.permute.xlu1 %5207  ;;  %v5220_v23 = vsel %vm1193_vm5, %v5214_v56, %v5216_v14  ;;  %v8319_v14 = vld [vmem:[%s11693_s9 + $0x2] ss:$8 sm:$0xf] }
 0x987   :  { %v5217_v10 = vsel %vm1193_vm5, %v5208_v60, %v5210_v2  ;;  %6110 = vrot.lane.b32.xlu0 %v6098_v59, %s11885_s30  ;;  %6928 = vmatprep.subr.mxu1 %v5220_v23  ;;  %v7375_v59 = vrot.slane %v8320_v43, %v12016_v29  ;;  %v7266_v44 = vrot.slane %v8319_v14, %v12016_v29 }
 0x988   :  { %6112 = vrot.lane.b32.xlu1 %v6099_v39, %s11885_s30  ;;  %6852 = vmatpush1.msra.mxu0 %v5217_v10  ;;  %v7379_v39 = vrot.slane %v8320_v43, %v12044_v32 }
 0x989   :  { %6929 = vmatpush1.msra.mxu1 %v5219_v33  ;;  %v5138_v34 = vpop.permute.xlu0 %5137 }
 0x98a   :  { %v5140_v62 = vpop.permute.xlu1 %5139 }
 0x98b   :  { %v5146_v28 = vsel %vm1095_vm3, %v5138_v34, %v5140_v62  ;;  %6114 = vrot.lane.b32.xlu0 %v6100_v15, %s11885_s30 }
 0x98c   :  { %6853 = vmatprep.subr.mxu0 %v5146_v28  ;;  %6106 = vrot.lane.b32.xlu1 %v6096_v4, %s11885_s30  ;;  %v7262_v4 = vrot.slane %v8319_v14, %v12018_v48 }
 0x98d   :  { %v5142_v25 = vpop.permute.xlu0 %5141 }
 0x98e   :  { %v5144_v45 = vpop.permute.xlu1 %5143  ;;  %v5147_v9 = vsel %vm1095_vm3, %v5140_v62, %v5142_v25 }
 0x98f   :  { %6817 = vperm.xlu0 %8380, %v6809_v16   ;;  %v5148_v61 = vsel %vm1095_vm3, %v5142_v25, %v5144_v45  ;;  %v8318_v25 = vld [vmem:[%s11693_s9 + $0x1] ss:$8 sm:$0xf]  ;;  %v7270_v45 = vrot.slane %v8319_v14, %v12044_v32 }
 0x990   :  { %6930 = vmatprep.subr.mxu1 %v5148_v61  ;;  %6812 = vperm.xlu1 %8381, %v6808_v57  }
 0x991   :  { %v5136_v20 = vpop.permute.xlu0 %5135  ;;  %6931 = vmatpush1.msra.mxu1 %v5147_v9  ;;  %v7149_v9 = vrot.slane %v8318_v25, %v12019_v7 }
 0x992   :  { %v5145_v0 = vsel %vm1095_vm3, %v5136_v20, %v5138_v34  ;;  %v5066_v5 = vpop.permute.xlu1 %5065  ;;  %vm12045_vm3 = vcmask 769024   ;;  %v7258_v34 = vrot.slane %v8319_v14, %v12019_v7 }
 0x993   :  { %6854 = vmatpush1.msra.mxu0 %v5145_v0  ;;  %7754 = vrot.lane.b32.xlu0 %v7741_v30, %s11832_s26  ;;  %vm12046_vm5 = vmmov %vm12045_vm3  ;;  %v7153_v0 = vrot.slane %v8318_v25, %v12018_v48 }
 0x994   :  { %7756 = vrot.lane.b32.xlu1 %v7745_v46, %s11832_s26 }
 0x995   :  { %v5068_v6 = vpop.permute.xlu0 %5067 }
 0x996   :  { %v5070_v38 = vpop.permute.xlu1 %5069  ;;  %v5074_v21 = vsel %vm998_vm7, %v5066_v5, %v5068_v6 }
 0x997   :  { %6855 = vmatprep.subr.mxu0 %v5074_v21  ;;  %7758 = vrot.lane.b32.xlu0 %v7749_v24, %s11832_s26  ;;  %v5075_v58 = vsel %vm998_vm7, %v5068_v6, %v5070_v38 }
 0x998   :  { %7760 = vrot.lane.b32.xlu1 %v7753_v55, %s11832_s26  ;;  %v7157_v55 = vrot.slane %v8318_v25, %v12016_v29 }
 0x999   :  { %v5072_v41 = vpop.permute.xlu0 %5071 }
 0x99a   :  { %v5064_v53 = vpop.permute.xlu1 %5063  ;;  %v5076_v3 = vsel %vm998_vm7, %v5070_v38, %v5072_v41  ;;  %v7161_v38 = vrot.slane %v8318_v25, %v12044_v32  ;;  %v7040_v41 = vrot.slane %v7035_v27, %v12019_v7 }
 0x99b   :  { %v5073_v13 = vsel %vm998_vm7, %v5064_v53, %v5066_v5  ;;  %6932 = vmatprep.subr.mxu1 %v5076_v3  ;;  %7645 = vrot.lane.b32.xlu0 %v7632_v51, %s11831_s18  ;;  %vm12047_vm7 = vmmov %vm12045_vm3  ;;  %v7044_v53 = vrot.slane %v7035_v27, %v12018_v48 }
 0x99c   :  { %6856 = vmatpush1.msra.mxu0 %v5073_v13  ;;  %6933 = vmatpush1.msra.mxu1 %v5075_v58 }
 0x99d   :  { %v4994_v36 = vpop.permute.xlu0 %4993  ;;  %7647 = vrot.lane.b32.xlu1 %v7636_v18, %s11831_s18 }
 0x99e   :  { %v4996_v8 = vpop.permute.xlu1 %4995 }
 0x99f   :  { %v5002_v11 = vsel %vm901_vm8, %v4994_v36, %v4996_v8  ;;  %7649 = vrot.lane.b32.xlu0 %v7640_v17, %s11831_s18 }
 0x9a0   :  { %6857 = vmatprep.subr.mxu0 %v5002_v11 }
 0x9a1   :  { %v4998_v35 = vpop.permute.xlu0 %4997  ;;  %7651 = vrot.lane.b32.xlu1 %v7644_v54, %s11831_s18 }
 0x9a2   :  { %v5000_v19 = vpop.permute.xlu1 %4999  ;;  %v5003_v12 = vsel %vm901_vm8, %v4996_v8, %v4998_v35  ;;  %v7052_v8 = vrot.slane %v7035_v27, %v12044_v32 }
 0x9a3   :  { %v5004_v2 = vsel %vm901_vm8, %v4998_v35, %v5000_v19  ;;  %7536 = vrot.lane.b32.xlu0 %v7523_v49, %s11912_s7 }
 0x9a4   :  { %6934 = vmatprep.subr.mxu1 %v5004_v2 }
 0x9a5   :  { %v4992_v40 = vpop.permute.xlu0 %4991  ;;  %6935 = vmatpush1.msra.mxu1 %v5003_v12  ;;  %7538 = vrot.lane.b32.xlu1 %v7527_v22, %s11912_s7 }
 0x9a6   :  { %v5001_v56 = vsel %vm901_vm8, %v4992_v40, %v4994_v36  ;;  %v6685_v37 = vpop.permute.xlu1 %6684  ;;  %vm12048_vm8 = vmmov %vm12045_vm3  ;;  %v8325_v36 = vld [vmem:[%s11693_s9 + $0x20] ss:$8 sm:$0xf] }
 0x9a7   :  { %6858 = vmatpush1.msra.mxu0 %v5001_v56  ;;  %7540 = vrot.lane.b32.xlu0 %v7531_v63, %s11912_s7  ;;  %v7850_v35 = vrot.slane %v8325_v36, %v12019_v7  ;;  %v7854_v19 = vrot.slane %v8325_v36, %v12018_v48  ;;  %v7858_v12 = vrot.slane %v8325_v36, %v12016_v29 }
 0x9a9   :  { %v6687_v50 = vpop.permute.xlu0 %6686  ;;  %7542 = vrot.lane.b32.xlu1 %v7535_v52, %s11912_s7  ;;  %v7862_v52 = vrot.slane %v8325_v36, %v12044_v32 }
 0x9aa   :  { %v6689_v1 = vpop.permute.xlu1 %6688  ;;  %v6693_v31 = vsel %vm12045_vm3, %v6685_v37, %v6687_v50  ;;  %vm12057_vm3 = vcmask 793600  }
 0x9ab   :  { %6873 = vmatprep.subr.mxu0 %v6693_v31  ;;  %7380 = vrot.lane.b32.xlu0 %v7367_v26, %s11970_s23  ;;  %v6694_v15 = vsel %vm12048_vm8, %v6687_v50, %v6689_v1  ;;  %vm12060_vm8 = vmmov %vm12057_vm3 }
 0x9ad   :  { %v6691_v60 = vpop.permute.xlu0 %6690  ;;  %7382 = vrot.lane.b32.xlu1 %v7371_v47, %s11970_s23 }
 0x9ae   :  { %v6683_v10 = vpop.permute.xlu1 %6682  ;;  %v6695_v23 = vsel %vm12046_vm5, %v6689_v1, %v6691_v60  ;;  %vm12058_vm5 = vmmov %vm12057_vm3 }
 0x9af   :  { %v6692_v33 = vsel %vm12047_vm7, %v6683_v10, %v6685_v37  ;;  %6950 = vmatprep.subr.mxu1 %v6695_v23  ;;  %7384 = vrot.lane.b32.xlu0 %v7375_v59, %s11970_s23  ;;  %vm12059_vm7 = vmmov %vm12057_vm3 }
 0x9b0   :  { %6874 = vmatpush2.msra.mxu0 %v6692_v33  ;;  %6951 = vmatpush2.msra.mxu1 %v6694_v15 }
 0x9b1   :  { %v6613_v62 = vpop.permute.xlu0 %6612  ;;  %7386 = vrot.lane.b32.xlu1 %v7379_v39, %s11970_s23 }
 0x9b2   :  { %v6615_v28 = vpop.permute.xlu1 %6614 }
 0x9b3   :  { %v6621_v16 = vsel %vm12049_vm4, %v6613_v62, %v6615_v28  ;;  %7271 = vrot.lane.b32.xlu0 %v7258_v34, %s11885_s30  ;;  %vm12061_vm4 = vcmask 801792  }
 0x9b4   :  { %6875 = vmatprep.subr.mxu0 %v6621_v16 }
 0x9b5   :  { %v6617_v57 = vpop.permute.xlu0 %6616  ;;  %7273 = vrot.lane.b32.xlu1 %v7262_v4, %s11885_s30 }
 0x9b6   :  { %v6619_v61 = vpop.permute.xlu1 %6618  ;;  %v6622_v46 = vsel %vm12051_vm15, %v6615_v28, %v6617_v57 }
 0x9b7   :  { %v6623_v30 = vsel %vm12050_vm0, %v6617_v57, %v6619_v61  ;;  %7275 = vrot.lane.b32.xlu0 %v7266_v44, %s11885_s30  ;;  %vm12062_vm0 = vmmov %vm12061_vm4 }
 0x9b8   :  { %6952 = vmatprep.subr.mxu1 %v6623_v30  ;;  %vm12063_vm15 = vmmov %vm12062_vm0 }
 0x9b9   :  { %v6611_v20 = vpop.permute.xlu0 %6610  ;;  %6953 = vmatpush2.msra.mxu1 %v6622_v46  ;;  %7277 = vrot.lane.b32.xlu1 %v7270_v45, %s11885_s30 }
 0x9ba   :  { %v6620_v5 = vsel %vm12052_vm9, %v6611_v20, %v6613_v62  ;;  %v6541_v24 = vpop.permute.xlu1 %6540  ;;  %vm12064_vm9 = vmmov %vm12062_vm0 }
 0x9bb   :  { %6876 = vmatpush2.msra.mxu0 %v6620_v5  ;;  %7162 = vrot.lane.b32.xlu0 %v7149_v9, %s11889_s20 }
 0x9bd   :  { %v6543_v6 = vpop.permute.xlu0 %6542  ;;  %7164 = vrot.lane.b32.xlu1 %v7153_v0, %s11889_s20 }
 0x9be   :  { %v6545_v21 = vpop.permute.xlu1 %6544  ;;  %v6549_v51 = vsel %vm12053_vm12, %v6541_v24, %v6543_v6  ;;  %vm12065_vm12 = vcmask 900096  }
 0x9bf   :  { %6877 = vmatprep.subr.mxu0 %v6549_v51  ;;  %7166 = vrot.lane.b32.xlu0 %v7157_v55, %s11889_s20  ;;  %v6550_v17 = vsel %vm12056_vm14, %v6543_v6, %v6545_v21 }
 0x9c1   :  { %v6547_v18 = vpop.permute.xlu0 %6546  ;;  %7168 = vrot.lane.b32.xlu1 %v7161_v38, %s11889_s20 }
 0x9c2   :  { %v6539_v3 = vpop.permute.xlu1 %6538  ;;  %v6551_v13 = vsel %vm12054_vm2, %v6545_v21, %v6547_v18  ;;  %vm12066_vm2 = vmmov %vm12065_vm12 }
 0x9c3   :  { %v6548_v58 = vsel %vm12055_vm1, %v6539_v3, %v6541_v24  ;;  %6954 = vmatprep.subr.mxu1 %v6551_v13  ;;  %7053 = vrot.lane.b32.xlu0 %v7040_v41, %s11853_s29  ;;  %vm12067_vm1 = vmmov %vm12066_vm2 }
 0x9c4   :  { %6878 = vmatpush2.msra.mxu0 %v6548_v58  ;;  %6955 = vmatpush2.msra.mxu1 %v6550_v17  ;;  %vm12068_vm14 = vmmov %vm12067_vm1  ;;  %v6704_v17 = vld [vmem:[%s11691_s2] sm:$0xff] }
 0x9c5   :  { %v6469_v54 = vpop.permute.xlu0 %6468  ;;  %7055 = vrot.lane.b32.xlu1 %v7044_v53, %s11853_s29 }
 0x9c6   :  { %v6471_v11 = vpop.permute.xlu1 %6470 }
 0x9c7   :  { %v6477_v49 = vsel %vm12057_vm3, %v6469_v54, %v6471_v11  ;;  %7057 = vrot.lane.b32.xlu0 %v7048_v42, %s11853_s29  ;;  %vm12069_vm3 = vcmask 908288  }
 0x9c8   :  { %6879 = vmatprep.subr.mxu0 %v6477_v49 }
 0x9c9   :  { %v6473_v22 = vpop.permute.xlu0 %6472  ;;  %7059 = vrot.lane.b32.xlu1 %v7052_v8, %s11853_s29  ;;  %v6706_v8 = vld [vmem:[%s11691_s2 + $0x10] sm:$0xff] }
 0x9ca   :  { %v6475_v2 = vpop.permute.xlu1 %6474  ;;  %v6478_v43 = vsel %vm12059_vm7, %v6471_v11, %v6473_v22  ;;  %vm12071_vm7 = vmmov %vm12069_vm3 }
 0x9cb   :  { %v6479_v63 = vsel %vm12058_vm5, %v6473_v22, %v6475_v2  ;;  %7863 = vrot.lane.b32.xlu0 %v7850_v35, %s11956_s10  ;;  %vm12070_vm5 = vmmov %vm12069_vm3 }
 0x9cc   :  { %6956 = vmatprep.subr.mxu1 %v6479_v63 }
 0x9cd   :  { %v6467_v40 = vpop.permute.xlu0 %6466  ;;  %6957 = vmatpush2.msra.mxu1 %v6478_v43  ;;  %7865 = vrot.lane.b32.xlu1 %v7854_v19, %s11956_s10 }
 0x9ce   :  { %v6476_v56 = vsel %vm12060_vm8, %v6467_v40, %v6469_v54  ;;  %v6397_v37 = vpop.permute.xlu1 %6396  ;;  %vm12072_vm8 = vmmov %vm12069_vm3  ;;  %v6707_v54 = vld [vmem:[%s11691_s2 + $0x18] sm:$0xff] }
 0x9cf   :  { %6880 = vmatpush2.msra.mxu0 %v6476_v56  ;;  %7867 = vrot.lane.b32.xlu0 %v7858_v12, %s11956_s10 }
 0x9d1   :  { %v6399_v26 = vpop.permute.xlu0 %6398  ;;  %7869 = vrot.lane.b32.xlu1 %v7862_v52, %s11956_s10 }
 0x9d2   :  { %v6401_v50 = vpop.permute.xlu1 %6400  ;;  %v6405_v47 = vsel %vm12061_vm4, %v6397_v37, %v6399_v26  ;;  %vm12073_vm4 = vcmask 916480  }
 0x9d3   :  { %6881 = vmatprep.subr.mxu0 %v6405_v47  ;;  %v6406_v60 = vsel %vm12064_vm9, %v6399_v26, %v6401_v50 }
 0x9d5   :  { %v6403_v1 = vpop.permute.xlu0 %6402 }
 0x9d6   :  { %v6395_v31 = vpop.permute.xlu1 %6394  ;;  %v6407_v59 = vsel %vm12062_vm0, %v6401_v50, %v6403_v1  ;;  %vm12074_vm0 = vmmov %vm12073_vm4 }
 0x9d7   :  { %v6404_v14 = vsel %vm12063_vm15, %v6395_v31, %v6397_v37  ;;  %6958 = vmatprep.subr.mxu1 %v6407_v59  ;;  %vm12075_vm15 = vmmov %vm12074_vm0 }
 0x9d8   :  { %6882 = vmatpush2.msra.mxu0 %v6404_v14  ;;  %6959 = vmatpush2.msra.mxu1 %v6406_v60  ;;  %vm12076_vm9 = vmmov %vm12074_vm0 }
 0x9d9   :  { %v6325_v39 = vpop.permute.xlu0 %6324 }
 0x9da   :  { %v6327_v10 = vpop.permute.xlu1 %6326 }
 0x9db   :  { %v6333_v23 = vsel %vm12065_vm12, %v6325_v39, %v6327_v10  ;;  %vm12077_vm12 = vcmask 924672  }
 0x9dc   :  { %6883 = vmatprep.subr.mxu0 %v6333_v23 }
 0x9dd   :  { %v6329_v33 = vpop.permute.xlu0 %6328 }
 0x9de   :  { %v6331_v15 = vpop.permute.xlu1 %6330  ;;  %v6334_v62 = vsel %vm12067_vm1, %v6327_v10, %v6329_v33 }
 0x9df   :  { %v6335_v34 = vsel %vm12066_vm2, %v6329_v33, %v6331_v15  ;;  %vm12078_vm2 = vmmov %vm12077_vm12 }
 0x9e0   :  { %6960 = vmatprep.subr.mxu1 %v6335_v34  ;;  %vm12079_vm1 = vmmov %vm12078_vm2 }
 0x9e1   :  { %v6323_v4 = vpop.permute.xlu0 %6322  ;;  %6961 = vmatpush2.msra.mxu1 %v6334_v62 }
 0x9e2   :  { %v6332_v28 = vsel %vm12068_vm14, %v6323_v4, %v6325_v39  ;;  %v6253_v16 = vpop.permute.xlu1 %6252  ;;  %vm12080_vm14 = vmmov %vm12079_vm1 }
 0x9e3   :  { %6884 = vmatpush2.msra.mxu0 %v6332_v28 }
 0x9e5   :  { %v6255_v44 = vpop.permute.xlu0 %6254 }
 0x9e6   :  { %v6257_v25 = vpop.permute.xlu1 %6256  ;;  %v6261_v57 = vsel %vm12069_vm3, %v6253_v16, %v6255_v44  ;;  %vm12081_vm3 = vcmask 130048  }
 0x9e7   :  { %6885 = vmatprep.subr.mxu0 %v6261_v57  ;;  %v6262_v46 = vsel %vm12072_vm8, %v6255_v44, %v6257_v25  ;;  %vm12082_vm8 = vmmov %vm12081_vm3 }
 0x9e9   :  { %v6259_v45 = vpop.permute.xlu0 %6258 }
 0x9ea   :  { %v6251_v61 = vpop.permute.xlu1 %6250  ;;  %v6263_v30 = vsel %vm12070_vm5, %v6257_v25, %v6259_v45 }
 0x9eb   :  { %v6260_v9 = vsel %vm12071_vm7, %v6251_v61, %v6253_v16  ;;  %6962 = vmatprep.subr.mxu1 %v6263_v30 }
 0x9ec   :  { %6886 = vmatpush2.msra.mxu0 %v6260_v9  ;;  %6963 = vmatpush2.msra.mxu1 %v6262_v46 }
 0x9ed   :  { %v6181_v20 = vpop.permute.xlu0 %6180 }
 0x9ee   :  { %v6183_v0 = vpop.permute.xlu1 %6182 }
 0x9ef   :  { %v6189_v5 = vsel %vm12073_vm4, %v6181_v20, %v6183_v0 }
 0x9f0   :  { %6887 = vmatprep.subr.mxu0 %v6189_v5 }
 0x9f1   :  { %v6185_v24 = vpop.permute.xlu0 %6184 }
 0x9f2   :  { %v6187_v55 = vpop.permute.xlu1 %6186  ;;  %v6190_v6 = vsel %vm12075_vm15, %v6183_v0, %v6185_v24  ;;  %vm12083_vm15 = vmmov %vm12081_vm3 }
 0x9f3   :  { %v6191_v27 = vsel %vm12074_vm0, %v6185_v24, %v6187_v55 }
 0x9f4   :  { %6964 = vmatprep.subr.mxu1 %v6191_v27 }
 0x9f5   :  { %v6179_v38 = vpop.permute.xlu0 %6178  ;;  %6965 = vmatpush2.msra.mxu1 %v6190_v6 }
 0x9f6   :  { %v6188_v21 = vsel %vm12076_vm9, %v6179_v38, %v6181_v20  ;;  %v6109_v51 = vpop.permute.xlu1 %6108 }
 0x9f7   :  { %6888 = vmatpush2.msra.mxu0 %v6188_v21 }
 0x9f9   :  { %v6111_v41 = vpop.permute.xlu0 %6110 }
 0x9fa   :  { %v6113_v18 = vpop.permute.xlu1 %6112  ;;  %v6117_v53 = vsel %vm12077_vm12, %v6109_v51, %v6111_v41 }
 0x9fb   :  { %6889 = vmatprep.subr.mxu0 %v6117_v53  ;;  %v6118_v36 = vsel %vm12080_vm14, %v6111_v41, %v6113_v18 }
 0x9fd   :  { %v6115_v3 = vpop.permute.xlu0 %6114 }
 0x9fe   :  { %v6107_v13 = vpop.permute.xlu1 %6106  ;;  %v6119_v58 = vsel %vm12078_vm2, %v6113_v18, %v6115_v3 }
 0x9ff   :  { %v6116_v42 = vsel %vm12079_vm1, %v6107_v13, %v6109_v51  ;;  %6966 = vmatprep.subr.mxu1 %v6119_v58  ;;  %vm12084_vm1 = vcmask 121856  }
 0xa00   :  { %6890 = vmatpush2.msra.mxu0 %v6116_v42  ;;  %6967 = vmatpush2.msra.mxu1 %v6118_v36  ;;  %vm12085_vm14 = vmmov %vm12084_vm1 }
 0xa01   :  { %6892 = vmatmul.mubr.f32.vlgmr.msra.gmra.mxu0 %v6704_v17  ;;  %6969 = vmatmul.mubr.f32.vlgmr.msra.gmra.mxu1 %v6704_v17 }
 0xa02   :  { %8315 = vmatprep.mubr.msk.f32.mxu0 %vm6820_vm13, %v6707_v54  ;;  %8317 = vmatprep.mubr.msk.f32.mxu1 %vm6820_vm13, %v6707_v54 }
 0xa05   :  { %6898 = vmatmul.mubr.f32.gmra.mxu0 %v6706_v8  ;;  %6975 = vmatmul.mubr.f32.gmra.mxu1 %v6706_v8 }
 0xa0a   :  { %v6818_v11 = vpop.permute.xlu0 %6817 }
 0xa0b   :  { %v6813_v49 = vpop.permute.xlu1 %6812 }
 0xa0e   :  { %v11372_v19 = vpop.permute.xlu0 %7754 }
 0xa0f   :  { %v7757_v40 = vpop.permute.xlu1 %7756 }
 0xa10   :  { %v7762_v33 = vsel %vm12082_vm8, %v11372_v19, %v7757_v40  ;;  %vm12090_vm8 = vcmask 916480  }
 0xa12   :  { %v7759_v26 = vpop.permute.xlu0 %7758 }
 0xa13   :  { %v7763_v31 = vsel %vm12081_vm3, %v7757_v40, %v7759_v26  ;;  %v7761_v15 = vpop.permute.xlu1 %7760  ;;  %vm12087_vm3 = vcmask 924672  }
 0xa14   :  { %v7774_v28 = vmul.f32 0.0, %v7761_v15  ;;  %v7764_v45 = vsel %vm12083_vm15, %v7759_v26, %v7761_v15  ;;  %vm12093_vm15 = vcmask 908288  }
 0xa16   :  { %v7646_v38 = vpop.permute.xlu0 %7645 }
 0xa17   :  { %v7648_v18 = vpop.permute.xlu1 %7647 }
 0xa18   :  { %v7653_v17 = vsel %vm12085_vm14, %v7646_v38, %v7648_v18 }
 0xa1a   :  { %v7650_v3 = vpop.permute.xlu0 %7649 }
 0xa1b   :  { %v7654_v13 = vsel %vm12084_vm1, %v7648_v18, %v7650_v3  ;;  %v7652_v42 = vpop.permute.xlu1 %7651 }
 0xa1c   :  { %v7665_v36 = vmul.f32 0.0, %v7652_v42 }
 0xac1   :  { %v6893_v35 = vpop.f32.mrf.mxu0  ;;  %v6970_v22 = vpop.f32.mrf.mxu1 }
 0xac2   :  { %v6971_v44 = vadd.f32 %v6970_v22, %v6813_v49  ;;  %v6894_v61 = vadd.f32 %v6893_v35, %v6813_v49  ;;  %v7537_v22 = vpop.permute.xlu0 %7536 }
 0xac3   :  { %v6895_v2 = vpop.f32.mrf.mxu0  ;;  %v6972_v63 = vpop.f32.mrf.mxu1 }
 0xac4   :  { %v6896_v50 = vadd.f32 %v6895_v2, %v6813_v49  ;;  %v6973_v62 = vadd.f32 %v6972_v63, %v6813_v49  ;;  %v6991_v20 = vmul.f32 0.3, %v6971_v44  ;;  %vm6983_vm12 = vcmp.gt.f32.partialorder %v6971_v44, 0.0  ;;  %v7539_v63 = vpop.permute.xlu1 %7538 }
 0xac5   :  { %v6899_v12 = vpop.f32.mrf.mxu0  ;;  %v6976_v43 = vpop.f32.mrf.mxu1  ;;  %v6989_v24 = vmul.f32 0.3, %v6894_v61  ;;  %vm6981_vm2 = vcmp.gt.f32.partialorder %v6894_v61, 0.0 }
 0xac6   :  { %v6977_v52 = vadd.f32 %v6976_v43, %v6818_v11  ;;  %v6900_v14 = vadd.f32 %v6899_v12, %v6818_v11  ;;  %v6990_v34 = vmul.f32 0.3, %v6896_v50  ;;  %vm6982_vm4 = vcmp.gt.f32.partialorder %v6896_v50, 0.0  ;;  %v7541_v43 = vpop.permute.xlu0 %7540 }
 0xac7   :  { %v6901_v56 = vpop.f32.mrf.mxu0  ;;  %v6978_v37 = vpop.f32.mrf.mxu1  ;;  %v6992_v9 = vmul.f32 0.3, %v6973_v62  ;;  %vm6984_vm9 = vcmp.gt.f32.partialorder %v6973_v62, 0.0  ;;  %v11401_v6 = vsel %vm6983_vm12, %v6971_v44, %v6991_v20  ;;  %v11405_v51 = vsel %vm6981_vm2, %v6894_v61, %v6989_v24  ;;  %vm12095_vm12 = vmmov %vm12093_vm15 }
 0xac8   :  { %vm6987_vm13 = vcmp.gt.f32.partialorder %v6977_v52, 0.0  ;;  %v6995_v47 = vmul.f32 0.3, %v6977_v52  ;;  %v6902_v1 = vadd.f32 %v6901_v56, %v6818_v11  ;;  %v6979_v59 = vadd.f32 %v6978_v37, %v6818_v11  ;;  %v7543_v37 = vpop.permute.xlu1 %7542  ;;  %vm12098_vm14 = vmmov %vm12095_vm12 }
 0xac9   :  { %v6993_v25 = vmul.f32 0.3, %v6900_v14  ;;  %vm6985_vm0 = vcmp.gt.f32.partialorder %v6900_v14, 0.0  ;;  %v11388_v30 = vsel %vm6982_vm4, %v6896_v50, %v6990_v34  ;;  %v11396_v55 = vsel %vm6984_vm9, %v6973_v62, %v6992_v9  ;;  %vm12091_vm4 = vmmov %vm12090_vm8 }
 0xaca   :  { %v11375_v60 = vsel %vm6987_vm13, %v6977_v52, %v6995_v47  ;;  %vm6986_vm5 = vcmp.gt.f32.partialorder %v6902_v1, 0.0  ;;  %v6994_v39 = vmul.f32 0.3, %v6902_v1  ;;  %vm6988_vm7 = vcmp.gt.f32.partialorder %v6979_v59, 0.0  ;;  %vm12086_vm13 = vmmov %vm12084_vm1 }
 0xacb   :  { %v6996_v10 = vmul.f32 0.3, %v6979_v59  ;;  %v7777_v23 = vmul.f32 %v7763_v31, %v11375_v60  ;;  %v11392_v0 = vsel %vm6985_vm0, %v6900_v14, %v6993_v25  ;;  %v7771_v5 = vmul.f32 %v7762_v33, %v11388_v30  ;;  %v7381_v14 = vpop.permute.xlu0 %7380  ;;  %vm12092_vm0 = vmmov %vm12091_vm4 }
 0xacc   :  { %v11380_v4 = vsel %vm6986_vm5, %v6902_v1, %v6994_v39  ;;  %v7775_v27 = vmul.f32 %v11372_v19, %v11392_v0  ;;  %v7773_v21 = vmul.f32 %v7764_v45, %v11396_v55  ;;  %v7772_v41 = vmul.f32 %v7763_v31, %v11401_v6  ;;  %vm12088_vm5 = vmmov %vm12087_vm3 }
 0xacd   :  { %7804 = vrot.lane.b32.xlu1 %v7777_v23, %s11889_s20  ;;  %v7776_v16 = vmul.f32 %v7762_v33, %v11380_v4  ;;  %v11384_v57 = vsel %vm6988_vm7, %v6979_v59, %v6996_v10  ;;  %v7770_v53 = vmul.f32 %v11372_v19, %v11405_v51  ;;  %v7668_v58 = vmul.f32 %v7654_v13, %v11375_v60  ;;  %v7383_v33 = vpop.permute.xlu1 %7382  ;;  %vm12089_vm7 = vmmov %vm12087_vm3 }
 0xace   :  { %v7778_v46 = vmul.f32 %v7764_v45, %v11384_v57  ;;  %v7667_v54 = vmul.f32 %v7653_v17, %v11380_v4  ;;  %v7655_v8 = vsel %vm12086_vm13, %v7650_v3, %v7652_v42  ;;  %v7662_v49 = vmul.f32 %v7653_v17, %v11388_v30  ;;  %vm12094_vm9 = vmmov %vm12092_vm0 }
 0xacf   :  { %7802 = vrot.lane.b32.xlu0 %v7776_v16, %s11889_s20  ;;  %v7669_v11 = vmul.f32 %v7655_v8, %v11384_v57  ;;  %v7666_v35 = vmul.f32 %v7646_v38, %v11392_v0  ;;  %v7664_v19 = vmul.f32 %v7655_v8, %v11396_v55  ;;  %v7663_v2 = vmul.f32 %v7654_v13, %v11401_v6  ;;  %v7385_v15 = vpop.permute.xlu0 %7384  ;;  %vm12096_vm2 = vmmov %vm12092_vm0 }
 0xad0   :  { %v7661_v12 = vmul.f32 %v7646_v38, %v11405_v51  ;;  %v7545_v40 = vsel %vm2357_vm10, %v7539_v63, %v7541_v43  ;;  %v7544_v56 = vsel %vm2357_vm10, %v7537_v22, %v7539_v63  ;;  %v7556_v26 = vmul.f32 0.0, %v7543_v37  ;;  %vm12097_vm1 = vmmov %vm12092_vm0 }
 0xad1   :  { %7808 = vrot.lane.b32.xlu1 %v7774_v28, %s11889_s20  ;;  %v7559_v52 = vmul.f32 %v7545_v40, %v11375_v60  ;;  %v7558_v50 = vmul.f32 %v7544_v56, %v11380_v4  ;;  %v7546_v47 = vsel %vm2357_vm10, %v7541_v43, %v7543_v37  ;;  %v7553_v31 = vmul.f32 %v7544_v56, %v11388_v30  ;;  %v7387_v44 = vpop.permute.xlu1 %7386  ;;  %vm12099_vm13 = vmmov %vm12092_vm0 }
 0xad2   :  { %v7560_v1 = vmul.f32 %v7546_v47, %v11384_v57  ;;  %v7557_v59 = vmul.f32 %v7537_v22, %v11392_v0  ;;  %v7555_v39 = vmul.f32 %v7546_v47, %v11396_v55  ;;  %v7554_v10 = vmul.f32 %v7545_v40, %v11401_v6 }
 0xad3   :  { %7806 = vrot.lane.b32.xlu0 %v7778_v46, %s11889_s20  ;;  %v7552_v23 = vmul.f32 %v7537_v22, %v11405_v51  ;;  %v7389_v34 = vsel %vm2313_vm11, %v7383_v33, %v7385_v15  ;;  %v7405_v25 = vmul.f32 %v7387_v44, %v11384_v57  ;;  %v7390_v45 = vsel %vm2313_vm11, %v7385_v15, %v7387_v44 }
 0xad4   :  { %v7403_v62 = vmul.f32 %v7389_v34, %v11380_v4  ;;  %v7404_v61 = vmul.f32 %v7390_v45, %v11375_v60  ;;  %v7396_v46 = vmul.f32 0.0, %v7381_v14  ;;  %v7399_v24 = vmul.f32 %v7390_v45, %v11401_v6 }
 0xad5   :  { %7792 = vrot.lane.b32.xlu1 %v7771_v5, %s11889_s20  ;;  %v7274_v20 = vpop.permute.xlu1 %7273  ;;  %v7272_v5 = vpop.permute.xlu0 %7271 }
 0xad6   :  { %v7279_v3 = vsel %vm12088_vm5, %v7272_v5, %v7274_v20  ;;  %vm12101_vm5 = vmmov %vm12092_vm0 }
 0xad7   :  { %7800 = vrot.lane.b32.xlu0 %v7775_v27, %s11889_s20  ;;  %v7398_v27 = vmul.f32 %v7389_v34, %v11388_v30 }
 0xad9   :  { %7796 = vrot.lane.b32.xlu1 %v7773_v21, %s11889_s20  ;;  %v7278_v38 = vpop.permute.xlu1 %7277  ;;  %v7276_v21 = vpop.permute.xlu0 %7275 }
 0xada   :  { %v7280_v18 = vsel %vm12087_vm3, %v7274_v20, %v7276_v21  ;;  %v7296_v42 = vmul.f32 %v7278_v38, %v11384_v57  ;;  %vm12100_vm3 = vmmov %vm12092_vm0 }
 0xadb   :  { %7794 = vrot.lane.b32.xlu0 %v7772_v41, %s11889_s20  ;;  %v7400_v41 = vmul.f32 %v7387_v44, %v11396_v55 }
 0xadd   :  { %7790 = vrot.lane.b32.xlu1 %v7770_v53, %s11889_s20  ;;  %v7294_v53 = vmul.f32 %v7280_v18, %v11380_v4  ;;  %v7165_v13 = vpop.permute.xlu1 %7164  ;;  %v7163_v17 = vpop.permute.xlu0 %7162 }
 0xade   :  { %v7170_v56 = vsel %vm12091_vm4, %v7163_v17, %v7165_v13  ;;  %vm12104_vm4 = vcmask 924672  }
 0xadf   :  { %7798 = vrot.lane.b32.xlu0 %v7774_v28, %s11889_s20  ;;  %v7388_v28 = vsel %vm2313_vm11, %v7381_v14, %v7383_v33  ;;  %v7179_v14 = vmul.f32 %v7170_v56, %v11405_v51 }
 0xae0   :  { %v7402_v16 = vmul.f32 %v7388_v28, %v11392_v0  ;;  %v7397_v9 = vmul.f32 %v7388_v28, %v11405_v51 }
 0xae1   :  { %7695 = vrot.lane.b32.xlu1 %v7668_v58, %s11885_s30  ;;  %v7293_v58 = vmul.f32 %v7279_v3, %v11392_v0  ;;  %v7169_v8 = vpop.permute.xlu1 %7168 }
 0xae2   :  { %v7182_v28 = vmul.f32 %v7169_v8, %v11396_v55 }
 0xae3   :  { %7693 = vrot.lane.b32.xlu0 %v7667_v54, %s11885_s30 }
 0xae5   :  { %7699 = vrot.lane.b32.xlu1 %v7665_v36, %s11885_s30 }
 0xae7   :  { %7697 = vrot.lane.b32.xlu0 %v7669_v11, %s11885_s30  ;;  %v7288_v11 = vmul.f32 %v7279_v3, %v11405_v51 }
 0xae9   :  { %7683 = vrot.lane.b32.xlu1 %v7662_v49, %s11885_s30  ;;  %v7287_v49 = vmul.f32 0.0, %v7272_v5 }
 0xaeb   :  { %7691 = vrot.lane.b32.xlu0 %v7666_v35, %s11885_s30  ;;  %v7167_v35 = vpop.permute.xlu0 %7166 }
 0xaec   :  { %v7171_v43 = vsel %vm12090_vm8, %v7165_v13, %v7167_v35  ;;  %v7172_v47 = vsel %vm12092_vm0, %v7167_v35, %v7169_v8  ;;  %vm12103_vm8 = vmmov %vm12092_vm0 }
 0xaed   :  { %7687 = vrot.lane.b32.xlu1 %v7664_v19, %s11885_s30  ;;  %v7056_v19 = vpop.permute.xlu1 %7055  ;;  %v7180_v15 = vmul.f32 %v7171_v43, %v11388_v30 }
 0xaef   :  { %7685 = vrot.lane.b32.xlu0 %v7663_v2, %s11885_s30  ;;  %v7289_v2 = vmul.f32 %v7280_v18, %v11388_v30  ;;  %v7054_v63 = vpop.permute.xlu0 %7053 }
 0xaf0   :  { %v7069_v13 = vmul.f32 0.0, %v7054_v63 }
 0xaf1   :  { %7681 = vrot.lane.b32.xlu1 %v7661_v12, %s11885_s30  ;;  %v7291_v12 = vmul.f32 %v7278_v38, %v11396_v55  ;;  %v11498_v40 = vpop.permute.xlu1 %7059 }
 0xaf3   :  { %7689 = vrot.lane.b32.xlu0 %v7665_v36, %s11885_s30  ;;  %v7281_v36 = vsel %vm12089_vm7, %v7276_v21, %v7278_v38  ;;  %v7058_v37 = vpop.permute.xlu0 %7057  ;;  %vm12102_vm7 = vmmov %vm12092_vm0 }
 0xaf4   :  { %v7295_v54 = vmul.f32 %v7281_v36, %v11375_v60  ;;  %v7290_v22 = vmul.f32 %v7281_v36, %v11401_v6  ;;  %v7063_v38 = vsel %vm12098_vm14, %v7058_v37, %v11498_v40  ;;  %vm12105_vm0 = vmmov %vm12104_vm4 }
 0xaf5   :  { %7586 = vrot.lane.b32.xlu1 %v7559_v52, %s11970_s23  ;;  %v7185_v52 = vmul.f32 %v7171_v43, %v11380_v4  ;;  %v7072_v36 = vmul.f32 %v7063_v38, %v11401_v6  ;;  %vm12111_vm14 = vmmov %vm12105_vm0 }
 0xaf7   :  { %7584 = vrot.lane.b32.xlu0 %v7558_v50, %s11970_s23  ;;  %v7187_v50 = vmul.f32 %v7169_v8, %v11384_v57 }
 0xaf9   :  { %7590 = vrot.lane.b32.xlu1 %v7556_v26, %s11970_s23 }
 0xafb   :  { %7588 = vrot.lane.b32.xlu0 %v7560_v1, %s11970_s23  ;;  %v11508_v1 = vpop.permute.xlu1 %7865 }
 0xafd   :  { %7574 = vrot.lane.b32.xlu1 %v7553_v31, %s11970_s23  ;;  %v7186_v31 = vmul.f32 %v7172_v47, %v11375_v60 }
 0xaff   :  { %7582 = vrot.lane.b32.xlu0 %v7557_v59, %s11970_s23  ;;  %v11512_v59 = vpop.permute.xlu0 %7863 }
 0xb01   :  { %7578 = vrot.lane.b32.xlu1 %v7555_v39, %s11970_s23  ;;  %v7178_v39 = vmul.f32 0.0, %v7163_v17 }
 0xb03   :  { %7576 = vrot.lane.b32.xlu0 %v7554_v10, %s11970_s23  ;;  %v11517_v10 = vpop.permute.xlu1 %7869  ;;  %v11521_v33 = vpop.permute.xlu0 %7867 }
 0xb05   :  { %7572 = vrot.lane.b32.xlu1 %v7552_v23, %s11970_s23  ;;  %v7181_v23 = vmul.f32 %v7172_v47, %v11401_v6  ;;  %v7883_v47 = vmul.f32 0.0, %v11517_v10 }
 0xb07   :  { %7580 = vrot.lane.b32.xlu0 %v7556_v26, %s11970_s23  ;;  %v7184_v26 = vmul.f32 %v7170_v56, %v11392_v0  ;;  %v7871_v56 = vsel %vm1677_vm6, %v11512_v59, %v11508_v1 }
 0xb09   :  { %7430 = vrot.lane.b32.xlu1 %v7403_v62, %s11912_s7 }
 0xb0b   :  { %7428 = vrot.lane.b32.xlu0 %v7402_v16, %s11912_s7  ;;  %v7062_v16 = vsel %vm12093_vm15, %v7056_v19, %v7058_v37  ;;  %vm12106_vm15 = vmmov %vm12105_vm0 }
 0xb0c   :  { %v7076_v45 = vmul.f32 %v7062_v16, %v11380_v4 }
 0xb0d   :  { %7434 = vrot.lane.b32.xlu1 %v7405_v25, %s11912_s7 }
 0xb0f   :  { %7432 = vrot.lane.b32.xlu0 %v7404_v61, %s11912_s7  ;;  %v7061_v61 = vsel %vm12095_vm12, %v7054_v63, %v7056_v19  ;;  %v7872_v63 = vsel %vm1677_vm6, %v11508_v1, %v11521_v33  ;;  %vm12108_vm12 = vcmask 130048  }
 0xb10   :  { %v7070_v3 = vmul.f32 %v7061_v61, %v11405_v51  ;;  %v7886_v43 = vmul.f32 %v7872_v63, %v11375_v60 }
 0xb11   :  { %7418 = vrot.lane.b32.xlu1 %v7397_v9, %s11912_s7 }
 0xb13   :  { %7426 = vrot.lane.b32.xlu0 %v7396_v46, %s11912_s7 }
 0xb15   :  { %7422 = vrot.lane.b32.xlu1 %v7399_v24, %s11912_s7 }
 0xb17   :  { %7420 = vrot.lane.b32.xlu0 %v7398_v27, %s11912_s7  ;;  %v7078_v27 = vmul.f32 %v11498_v40, %v11384_v57 }
 0xb19   :  { %7416 = vrot.lane.b32.xlu1 %v7396_v46, %s11912_s7  ;;  %v7075_v46 = vmul.f32 %v7061_v61, %v11392_v0  ;;  %v7881_v61 = vmul.f32 %v7872_v63, %v11401_v6 }
 0xb1b   :  { %7424 = vrot.lane.b32.xlu0 %v7400_v41, %s11912_s7  ;;  %v7077_v41 = vmul.f32 %v7063_v38, %v11375_v60 }
 0xb1d   :  { %7321 = vrot.lane.b32.xlu1 %v7294_v53, %s11831_s18 }
 0xb1f   :  { %7319 = vrot.lane.b32.xlu0 %v7293_v58, %s11831_s18 }
 0xb21   :  { %7325 = vrot.lane.b32.xlu1 %v7296_v42, %s11831_s18 }
 0xb23   :  { %7323 = vrot.lane.b32.xlu0 %v7295_v54, %s11831_s18 }
 0xb25   :  { %7309 = vrot.lane.b32.xlu1 %v7288_v11, %s11831_s18  ;;  %v7071_v11 = vmul.f32 %v7062_v16, %v11388_v30 }
 0xb27   :  { %7317 = vrot.lane.b32.xlu0 %v7287_v49, %s11831_s18 }
 0xb29   :  { %7313 = vrot.lane.b32.xlu1 %v7290_v22, %s11831_s18 }
 0xb2b   :  { %7311 = vrot.lane.b32.xlu0 %v7289_v2, %s11831_s18  ;;  %v7073_v2 = vmul.f32 %v11498_v40, %v11396_v55  ;;  %v7885_v40 = vmul.f32 %v7871_v56, %v11380_v4 }
 0xb2d   :  { %7307 = vrot.lane.b32.xlu1 %v7287_v49, %s11831_s18 }
 0xb2f   :  { %7315 = vrot.lane.b32.xlu0 %v7291_v12, %s11831_s18 }
 0xb31   :  { %7212 = vrot.lane.b32.xlu1 %v7185_v52, %s11832_s26 }
 0xb33   :  { %7210 = vrot.lane.b32.xlu0 %v7184_v26, %s11832_s26 }
 0xb35   :  { %7216 = vrot.lane.b32.xlu1 %v7187_v50, %s11832_s26 }
 0xb37   :  { %7214 = vrot.lane.b32.xlu0 %v7186_v31, %s11832_s26 }
 0xb39   :  { %7200 = vrot.lane.b32.xlu1 %v7179_v14, %s11832_s26  ;;  %v7873_v14 = vsel %vm1677_vm6, %v11521_v33, %v11517_v10 }
 0xb3a   :  { %v7887_v1 = vmul.f32 %v7873_v14, %v11384_v57 }
 0xb3b   :  { %7208 = vrot.lane.b32.xlu0 %v7178_v39, %s11832_s26 }
 0xb3d   :  { %7204 = vrot.lane.b32.xlu1 %v7181_v23, %s11832_s26  ;;  %v11583_v23 = vld.sshfl [vmem:[%s11694_s3] sm:$0x33 pattern:$0x76325410] }
 0xb3f   :  { %7202 = vrot.lane.b32.xlu0 %v7180_v15, %s11832_s26  ;;  %v7805_v34 = vpop.permute.xlu1 %7804 }
 0xb41   :  { %v7803_v62 = vpop.permute.xlu0 %7802  ;;  %7198 = vrot.lane.b32.xlu1 %v7178_v39, %s11832_s26 }
 0xb42   :  { %v7815_v44 = vsel %vm12094_vm9, %v7803_v62, %v7805_v34  ;;  %vm12107_vm9 = vmmov %vm12105_vm0 }
 0xb43   :  { %7206 = vrot.lane.b32.xlu0 %v7182_v28, %s11832_s26  ;;  %8034 = vmatprep.subr.mxu0 %v7815_v44  ;;  %v7809_v25 = vpop.permute.xlu1 %7808  ;;  %v7884_v28 = vmul.f32 %v11512_v59, %v11392_v0  ;;  %v7882_v44 = vmul.f32 %v7873_v14, %v11396_v55 }
 0xb45   :  { %v7807_v9 = vpop.permute.xlu0 %7806  ;;  %7103 = vrot.lane.b32.xlu1 %v7076_v45, %s11956_s10 }
 0xb46   :  { %v7816_v20 = vsel %vm12096_vm2, %v7805_v34, %v7807_v9  ;;  %v7817_v5 = vsel %vm12097_vm1, %v7807_v9, %v7809_v25  ;;  %v8030_v34 = vcombine.high %v11583_v23, %v11583_v23  ;;  %vm12109_vm2 = vmmov %vm12108_vm12 }
 0xb47   :  { %7101 = vrot.lane.b32.xlu0 %v7075_v46, %s11956_s10  ;;  %8105 = vmatprep.subr.mxu1 %v7817_v5  ;;  %v7793_v24 = vpop.permute.xlu1 %7792  ;;  %vm12110_vm1 = vmmov %vm12105_vm0 }
 0xb48   :  { %8106 = vmatpush1.msra.mxu1 %v7816_v20  ;;  %8327 = vmatprep.mubr.msk.f32.mxu0 %vm12108_vm12, %v8030_v34  ;;  %v7879_v20 = vmul.f32 %v11512_v59, %v11405_v51  ;;  %v8016_v59 = vld [vmem:[%s11695_s6] sm:$0x3]  ;;  %vm12123_vm12 = vmmov %vm12109_vm2 }
 0xb49   :  { %v7801_v21 = vpop.permute.xlu0 %7800  ;;  %7107 = vrot.lane.b32.xlu1 %v7078_v27, %s11956_s10  ;;  %8328 = vmatprep.mubr.msk.f32.mxu1 %vm12109_vm2, %v8030_v34 }
 0xb4a   :  { %v7814_v18 = vsel %vm12099_vm13, %v7801_v21, %v7803_v62  ;;  %v7880_v62 = vmul.f32 %v7871_v56, %v11388_v30  ;;  %vm12112_vm13 = vmmov %vm12105_vm0 }
 0xb4b   :  { %7105 = vrot.lane.b32.xlu0 %v7077_v41, %s11956_s10  ;;  %8035 = vmatpush1.msra.mxu0 %v7814_v18  ;;  %v7797_v53 = vpop.permute.xlu1 %7796 }
 0xb4d   :  { %v7795_v58 = vpop.permute.xlu0 %7794  ;;  %7091 = vrot.lane.b32.xlu1 %v7070_v3, %s11956_s10 }
 0xb4e   :  { %v7811_v17 = vsel %vm12100_vm3, %v7793_v24, %v7795_v58  ;;  %v7812_v35 = vsel %vm12103_vm8, %v7795_v58, %v7797_v53  ;;  %vm12113_vm3 = vmmov %vm12105_vm0 }
 0xb4f   :  { %7099 = vrot.lane.b32.xlu0 %v7069_v13, %s11956_s10  ;;  %8036 = vmatprep.subr.mxu0 %v7811_v17  ;;  %v7791_v42 = vpop.permute.xlu1 %7790 }
 0xb50   :  { %v7810_v54 = vsel %vm12101_vm5, %v7791_v42, %v7793_v24  ;;  %v8321_v42 = vld [vmem:[%s11693_s9 + $0x4] ss:$8 sm:$0xf] }
 0xb51   :  { %v7799_v8 = vpop.permute.xlu0 %7798  ;;  %7095 = vrot.lane.b32.xlu1 %v7072_v36, %s11956_s10  ;;  %8037 = vmatpush1.msra.mxu0 %v7810_v54  ;;  %v7486_v63 = vrot.slane %v8321_v42, %v12044_v32 }
 0xb52   :  { %v7813_v49 = vsel %vm12102_vm7, %v7797_v53, %v7799_v8  ;;  %v7478_v8 = vrot.slane %v8321_v42, %v12018_v48  ;;  %v7482_v48 = vrot.slane %v8321_v42, %v12016_v29 }
 0xb53   :  { %7093 = vrot.lane.b32.xlu0 %v7071_v11, %s11956_s10  ;;  %8107 = vmatprep.subr.mxu1 %v7813_v49  ;;  %v7696_v22 = vpop.permute.xlu1 %7695  ;;  %v7474_v49 = vrot.slane %v8321_v42, %v12019_v7  ;;  %v7498_v56 = vmul.f32 %v7486_v63, %v11384_v57 }
 0xb54   :  { %8108 = vmatpush1.msra.mxu1 %v7812_v35  ;;  %v7497_v32 = vmul.f32 %v7482_v48, %v11375_v60 }
 0xb55   :  { %v7694_v19 = vpop.permute.xlu0 %7693  ;;  %7089 = vrot.lane.b32.xlu1 %v7069_v13, %s11956_s10 }
 0xb56   :  { %v7706_v12 = vsel %vm12104_vm4, %v7694_v19, %v7696_v22 }
 0xb57   :  { %7097 = vrot.lane.b32.xlu0 %v7073_v2, %s11956_s10  ;;  %8038 = vmatprep.subr.mxu0 %v7706_v12  ;;  %v7700_v52 = vpop.permute.xlu1 %7699  ;;  %v7495_v2 = vmul.f32 %v7474_v49, %v11392_v0 }
 0xb59   :  { %v7698_v37 = vpop.permute.xlu0 %7697  ;;  %7913 = vrot.lane.b32.xlu1 %v7886_v43, %s11853_s29  ;;  %v7492_v43 = vmul.f32 %v7478_v8, %v11388_v30  ;;  %v7494_v30 = vmul.f32 %v7486_v63, %v11396_v55 }
 0xb5a   :  { %v7707_v26 = vsel %vm12105_vm0, %v7696_v22, %v7698_v37  ;;  %v7708_v50 = vsel %vm12106_vm15, %v7698_v37, %v7700_v52  ;;  %v7496_v22 = vmul.f32 %v7478_v8, %v11380_v4  ;;  %v7491_v4 = vmul.f32 %v7474_v49, %v11405_v51 }
 0xb5b   :  { %7911 = vrot.lane.b32.xlu0 %v7885_v40, %s11853_s29  ;;  %8109 = vmatprep.subr.mxu1 %v7708_v50  ;;  %v7684_v31 = vpop.permute.xlu1 %7683  ;;  %v7493_v37 = vmul.f32 %v7482_v48, %v11401_v6 }
 0xb5c   :  { %8110 = vmatpush1.msra.mxu1 %v7707_v26 }
 0xb5d   :  { %v7692_v39 = vpop.permute.xlu0 %7691  ;;  %7917 = vrot.lane.b32.xlu1 %v7883_v47, %s11853_s29 }
 0xb5e   :  { %v7705_v15 = vsel %vm12107_vm9, %v7692_v39, %v7694_v19  ;;  %vm12122_vm9 = vmmov %vm12109_vm2 }
 0xb5f   :  { %7915 = vrot.lane.b32.xlu0 %v7887_v1, %s11853_s29  ;;  %8039 = vmatpush1.msra.mxu0 %v7705_v15  ;;  %v7688_v10 = vpop.permute.xlu1 %7687 }
 0xb61   :  { %v7686_v33 = vpop.permute.xlu0 %7685  ;;  %7901 = vrot.lane.b32.xlu1 %v7880_v62, %s11853_s29 }
 0xb62   :  { %v7702_v16 = vsel %vm12110_vm1, %v7684_v31, %v7686_v33  ;;  %v7703_v5 = vsel %vm12113_vm3, %v7686_v33, %v7688_v10  ;;  %vm12124_vm1 = vmmov %vm12109_vm2 }
 0xb63   :  { %7909 = vrot.lane.b32.xlu0 %v7884_v28, %s11853_s29  ;;  %8040 = vmatprep.subr.mxu0 %v7702_v16  ;;  %v7682_v25 = vpop.permute.xlu1 %7681  ;;  %vm12127_vm3 = vmmov %vm12124_vm1 }
 0xb64   :  { %v7701_v45 = vsel %vm12111_vm14, %v7682_v25, %v7684_v31  ;;  %vm12125_vm14 = vmmov %vm12124_vm1 }
 0xb65   :  { %v7690_v9 = vpop.permute.xlu0 %7689  ;;  %7905 = vrot.lane.b32.xlu1 %v7882_v44, %s11853_s29  ;;  %8041 = vmatpush1.msra.mxu0 %v7701_v45 }
 0xb66   :  { %v7704_v46 = vsel %vm12112_vm13, %v7688_v10, %v7690_v9  ;;  %vm12126_vm13 = vmmov %vm12124_vm1 }
 0xb67   :  { %7903 = vrot.lane.b32.xlu0 %v7881_v61, %s11853_s29  ;;  %8111 = vmatprep.subr.mxu1 %v7704_v46  ;;  %v7587_v24 = vpop.permute.xlu1 %7586 }
 0xb68   :  { %8112 = vmatpush1.msra.mxu1 %v7703_v5 }
 0xb69   :  { %v7585_v27 = vpop.permute.xlu0 %7584  ;;  %7899 = vrot.lane.b32.xlu1 %v7879_v20, %s11853_s29 }
 0xb6a   :  { %v7597_v38 = vsel %vm2313_vm11, %v7585_v27, %v7587_v24 }
 0xb6b   :  { %7907 = vrot.lane.b32.xlu0 %v7883_v47, %s11853_s29  ;;  %8042 = vmatprep.subr.mxu0 %v7597_v38  ;;  %v7591_v21 = vpop.permute.xlu1 %7590  ;;  %s12138_s29 = sld [smem:[#allocation23_spill]] }
 0xb6d   :  { %v7589_v41 = vpop.permute.xlu0 %7588 }
 0xb6e   :  { %v7598_v18 = vsel %vm2313_vm11, %v7587_v24, %v7589_v41  ;;  %v7599_v53 = vsel %vm2313_vm11, %v7589_v41, %v7591_v21 }
 0xb6f   :  { %8019 = vperm.xlu0 %8380, %v8016_v59   ;;  %8113 = vmatprep.subr.mxu1 %v7599_v53  ;;  %v7575_v3 = vpop.permute.xlu1 %7574 }
 0xb70   :  { %8114 = vmatpush1.msra.mxu1 %v7598_v18 }
 0xb71   :  { %v7583_v13 = vpop.permute.xlu0 %7582 }
 0xb72   :  { %v7596_v58 = vsel %vm2313_vm11, %v7583_v13, %v7585_v27 }
 0xb73   :  { %8043 = vmatpush1.msra.mxu0 %v7596_v58  ;;  %v7579_v17 = vpop.permute.xlu1 %7578 }
 0xb75   :  { %v7577_v36 = vpop.permute.xlu0 %7576 }
 0xb76   :  { %v7593_v54 = vsel %vm2313_vm11, %v7575_v3, %v7577_v36  ;;  %v7594_v52 = vsel %vm2313_vm11, %v7577_v36, %v7579_v17 }
 0xb77   :  { %8044 = vmatprep.subr.mxu0 %v7593_v54  ;;  %v7573_v11 = vpop.permute.xlu1 %7572 }
 0xb78   :  { %v7592_v35 = vsel %vm2313_vm11, %v7573_v11, %v7575_v3 }
 0xb79   :  { %v7581_v19 = vpop.permute.xlu0 %7580  ;;  %8045 = vmatpush1.msra.mxu0 %v7592_v35 }
 0xb7a   :  { %8046 = vmatprep.subr.mxu0 %v7496_v22  ;;  %v7595_v12 = vsel %vm2313_vm11, %v7579_v17, %v7581_v19  ;;  %vm12114_vm11 = vcmask 121856  }
 0xb7b   :  { %8047 = vmatpush1.msra.mxu0 %v7495_v2  ;;  %8115 = vmatprep.subr.mxu1 %v7595_v12  ;;  %v7431_v7 = vpop.permute.xlu1 %7430  ;;  %vm12115_vm5 = vmmov %vm12114_vm11 }
 0xb7c   :  { %8048 = vmatprep.subr.mxu0 %v7492_v43  ;;  %8116 = vmatpush1.msra.mxu1 %v7594_v52  ;;  %vm12116_vm7 = vmmov %vm12115_vm5 }
 0xb7d   :  { %v7429_v0 = vpop.permute.xlu0 %7428  ;;  %8049 = vmatpush1.msra.mxu0 %v7491_v4  ;;  %8117 = vmatprep.subr.mxu1 %v7498_v56  ;;  %vm12117_vm8 = vmmov %vm12115_vm5 }
 0xb7e   :  { %8118 = vmatpush1.msra.mxu1 %v7497_v32  ;;  %v7441_v29 = vsel %vm2357_vm10, %v7429_v0, %v7431_v7  ;;  %vm12119_vm4 = vmmov %vm12115_vm5 }
 0xb7f   :  { %8050 = vmatprep.subr.mxu0 %v7441_v29  ;;  %8119 = vmatprep.subr.mxu1 %v7494_v30  ;;  %v7435_v40 = vpop.permute.xlu1 %7434  ;;  %vm12120_vm0 = vmmov %vm12119_vm4 }
 0xb80   :  { %8120 = vmatpush1.msra.mxu1 %v7493_v37  ;;  %vm12121_vm15 = vmmov %vm12120_vm0 }
 0xb81   :  { %v7433_v51 = vpop.permute.xlu0 %7432 }
 0xb82   :  { %v7442_v57 = vsel %vm2357_vm10, %v7431_v7, %v7433_v51  ;;  %v7443_v26 = vsel %vm2357_vm10, %v7433_v51, %v7435_v40 }
 0xb83   :  { %8121 = vmatprep.subr.mxu1 %v7443_v26  ;;  %v7419_v60 = vpop.permute.xlu1 %7418 }
 0xb84   :  { %8122 = vmatpush1.msra.mxu1 %v7442_v57 }
 0xb85   :  { %v7427_v50 = vpop.permute.xlu0 %7426 }
 0xb86   :  { %v7440_v55 = vsel %vm2357_vm10, %v7427_v50, %v7429_v0 }
 0xb87   :  { %8051 = vmatpush1.msra.mxu0 %v7440_v55  ;;  %v7423_v47 = vpop.permute.xlu1 %7422 }
 0xb89   :  { %v7421_v31 = vpop.permute.xlu0 %7420 }
 0xb8a   :  { %v7437_v6 = vsel %vm2357_vm10, %v7419_v60, %v7421_v31  ;;  %v7438_v34 = vsel %vm2357_vm10, %v7421_v31, %v7423_v47 }
 0xb8b   :  { %8052 = vmatprep.subr.mxu0 %v7437_v6  ;;  %v7417_v14 = vpop.permute.xlu1 %7416 }
 0xb8c   :  { %v7436_v1 = vsel %vm2357_vm10, %v7417_v14, %v7419_v60 }
 0xb8d   :  { %v7425_v39 = vpop.permute.xlu0 %7424  ;;  %8053 = vmatpush1.msra.mxu0 %v7436_v1 }
 0xb8e   :  { %v7439_v15 = vsel %vm2357_vm10, %v7423_v47, %v7425_v39  ;;  %vm12118_vm10 = vmmov %vm12115_vm5 }
 0xb8f   :  { %8123 = vmatprep.subr.mxu1 %v7439_v15  ;;  %v7322_v62 = vpop.permute.xlu1 %7321 }
 0xb90   :  { %8124 = vmatpush1.msra.mxu1 %v7438_v34 }
 0xb91   :  { %v7320_v10 = vpop.permute.xlu0 %7319 }
 0xb92   :  { %v7332_v33 = vsel %vm12114_vm11, %v7320_v10, %v7322_v62  ;;  %vm12128_vm11 = vmmov %vm12124_vm1 }
 0xb93   :  { %8054 = vmatprep.subr.mxu0 %v7332_v33  ;;  %v7326_v28 = vpop.permute.xlu1 %7325 }
 0xb95   :  { %v7324_v16 = vpop.permute.xlu0 %7323 }
 0xb96   :  { %v7333_v44 = vsel %vm12115_vm5, %v7322_v62, %v7324_v16  ;;  %v7334_v25 = vsel %vm12116_vm7, %v7324_v16, %v7326_v28  ;;  %vm12129_vm5 = vcmask 908288  }
 0xb97   :  { %8125 = vmatprep.subr.mxu1 %v7334_v25  ;;  %v7310_v45 = vpop.permute.xlu1 %7309  ;;  %vm12130_vm7 = vmmov %vm12129_vm5 }
 0xb98   :  { %8126 = vmatpush1.msra.mxu1 %v7333_v44 }
 0xb99   :  { %v7318_v61 = vpop.permute.xlu0 %7317 }
 0xb9a   :  { %v7331_v9 = vsel %vm12117_vm8, %v7318_v61, %v7320_v10  ;;  %vm12131_vm8 = vmmov %vm12129_vm5 }
 0xb9b   :  { %8055 = vmatpush1.msra.mxu0 %v7331_v9  ;;  %v7314_v46 = vpop.permute.xlu1 %7313 }
 0xb9d   :  { %v7312_v20 = vpop.permute.xlu0 %7311 }
 0xb9e   :  { %v7328_v5 = vsel %vm12118_vm10, %v7310_v45, %v7312_v20  ;;  %v7329_v59 = vsel %vm12121_vm15, %v7312_v20, %v7314_v46  ;;  %vm12132_vm10 = vmmov %vm12129_vm5 }
 0xb9f   :  { %8056 = vmatprep.subr.mxu0 %v7328_v5  ;;  %v7308_v24 = vpop.permute.xlu1 %7307 }
 0xba0   :  { %v7327_v27 = vsel %vm12119_vm4, %v7308_v24, %v7310_v45  ;;  %vm12134_vm4 = vmmov %vm12129_vm5 }
 0xba1   :  { %v7316_v38 = vpop.permute.xlu0 %7315  ;;  %8057 = vmatpush1.msra.mxu0 %v7327_v27 }
 0xba2   :  { %v7330_v21 = vsel %vm12120_vm0, %v7314_v46, %v7316_v38  ;;  %vm12135_vm0 = vmmov %vm12134_vm4 }
 0xba3   :  { %8127 = vmatprep.subr.mxu1 %v7330_v21  ;;  %v7213_v41 = vpop.permute.xlu1 %7212  ;;  %vm12136_vm15 = vmmov %vm12135_vm0 }
 0xba4   :  { %8128 = vmatpush1.msra.mxu1 %v7329_v59 }
 0xba5   :  { %v7211_v18 = vpop.permute.xlu0 %7210 }
 0xba6   :  { %v7223_v53 = vsel %vm12122_vm9, %v7211_v18, %v7213_v41 }
 0xba7   :  { %8058 = vmatprep.subr.mxu0 %v7223_v53  ;;  %v7217_v3 = vpop.permute.xlu1 %7216  ;;  %v12137_v53 = vld [vmem:[#allocation12_spill] sm:$0xff] }
 0xba9   :  { %v7215_v13 = vpop.permute.xlu0 %7214 }
 0xbaa   :  { %v7224_v58 = vsel %vm12123_vm12, %v7213_v41, %v7215_v13  ;;  %v7225_v17 = vsel %vm12109_vm2, %v7215_v13, %v7217_v3  ;;  %v8180_v41 = vld [vmem:[%s11687_s0] sm:$0xff] }
 0xbab   :  { %8129 = vmatprep.subr.mxu1 %v7225_v17  ;;  %v7201_v42 = vpop.permute.xlu1 %7200 }
 0xbac   :  { %8130 = vmatpush1.msra.mxu1 %v7224_v58 }
 0xbad   :  { %v7209_v36 = vpop.permute.xlu0 %7208 }
 0xbae   :  { %v7222_v54 = vsel %vm12124_vm1, %v7209_v36, %v7211_v18  ;;  %v8182_v18 = vcombine.high %v8180_v41, %v8180_v41 }
 0xbaf   :  { %8059 = vmatpush1.msra.mxu0 %v7222_v54  ;;  %v7205_v8 = vpop.permute.xlu1 %7204 }
 0xbb0   :  { %v8196_v3 = vrot.slane %v8182_v18, %v12137_v53 }
 0xbb1   :  { %v7203_v11 = vpop.permute.xlu0 %7202 }
 0xbb2   :  { %v7219_v49 = vsel %vm12125_vm14, %v7201_v42, %v7203_v11  ;;  %v7220_v63 = vsel %vm12128_vm11, %v7203_v11, %v7205_v8  ;;  %v8198_v36 = vcombine.high %v8196_v3, %v8196_v3 }
 0xbb3   :  { %8060 = vmatprep.subr.mxu0 %v7219_v49  ;;  %v7199_v35 = vpop.permute.xlu1 %7198 }
 0xbb4   :  { %v7218_v22 = vsel %vm12126_vm13, %v7199_v35, %v7201_v42 }
 0xbb5   :  { %v7207_v19 = vpop.permute.xlu0 %7206  ;;  %8061 = vmatpush1.msra.mxu0 %v7218_v22 }
 0xbb6   :  { %v7221_v2 = vsel %vm12127_vm3, %v7205_v8, %v7207_v19 }
 0xbb7   :  { %8131 = vmatprep.subr.mxu1 %v7221_v2  ;;  %v7104_v12 = vpop.permute.xlu1 %7103 }
 0xbb8   :  { %8132 = vmatpush1.msra.mxu1 %v7220_v63 }
 0xbb9   :  { %v7102_v43 = vpop.permute.xlu0 %7101 }
 0xbba   :  { %v7114_v48 = vsel %vm1677_vm6, %v7102_v43, %v7104_v12 }
 0xbbb   :  { %8062 = vmatprep.subr.mxu0 %v7114_v48  ;;  %v7108_v52 = vpop.permute.xlu1 %7107 }
 0xbbd   :  { %v7106_v7 = vpop.permute.xlu0 %7105 }
 0xbbe   :  { %v7115_v4 = vsel %vm1677_vm6, %v7104_v12, %v7106_v7  ;;  %v7116_v56 = vsel %vm1677_vm6, %v7106_v7, %v7108_v52 }
 0xbbf   :  { %8133 = vmatprep.subr.mxu1 %v7116_v56  ;;  %v7092_v32 = vpop.permute.xlu1 %7091 }
 0xbc0   :  { %8134 = vmatpush1.msra.mxu1 %v7115_v4 }
 0xbc1   :  { %v7100_v0 = vpop.permute.xlu0 %7099 }
 0xbc2   :  { %v7113_v30 = vsel %vm1677_vm6, %v7100_v0, %v7102_v43 }
 0xbc3   :  { %8063 = vmatpush1.msra.mxu0 %v7113_v30  ;;  %v7096_v29 = vpop.permute.xlu1 %7095 }
 0xbc5   :  { %v7094_v37 = vpop.permute.xlu0 %7093 }
 0xbc6   :  { %v7110_v40 = vsel %vm1677_vm6, %v7092_v32, %v7094_v37  ;;  %v7111_v50 = vsel %vm1677_vm6, %v7094_v37, %v7096_v29 }
 0xbc7   :  { %8064 = vmatprep.subr.mxu0 %v7110_v40  ;;  %v7090_v51 = vpop.permute.xlu1 %7089 }
 0xbc8   :  { %v7109_v57 = vsel %vm1677_vm6, %v7090_v51, %v7092_v32 }
 0xbc9   :  { %v7098_v26 = vpop.permute.xlu0 %7097  ;;  %8065 = vmatpush1.msra.mxu0 %v7109_v57 }
 0xbca   :  { %v7112_v60 = vsel %vm1677_vm6, %v7096_v29, %v7098_v26  ;;  %vm12133_vm6 = vmmov %vm12129_vm5 }
 0xbcb   :  { %8135 = vmatprep.subr.mxu1 %v7112_v60  ;;  %v7914_v55 = vpop.permute.xlu1 %7913 }
 0xbcc   :  { %8136 = vmatpush1.msra.mxu1 %v7111_v50 }
 0xbcd   :  { %v7912_v47 = vpop.permute.xlu0 %7911 }
 0xbce   :  { %v7924_v31 = vsel %vm12129_vm5, %v7912_v47, %v7914_v55 }
 0xbcf   :  { %8094 = vmatprep.subr.mxu0 %v7924_v31  ;;  %v7918_v6 = vpop.permute.xlu1 %7917 }
 0xbd1   :  { %v7916_v14 = vpop.permute.xlu0 %7915 }
 0xbd2   :  { %v7925_v1 = vsel %vm12130_vm7, %v7914_v55, %v7916_v14  ;;  %v7926_v39 = vsel %vm12131_vm8, %v7916_v14, %v7918_v6 }
 0xbd3   :  { %8165 = vmatprep.subr.mxu1 %v7926_v39  ;;  %v7902_v15 = vpop.permute.xlu1 %7901 }
 0xbd4   :  { %8166 = vmatpush2.msra.mxu1 %v7925_v1 }
 0xbd5   :  { %v7910_v34 = vpop.permute.xlu0 %7909 }
 0xbd6   :  { %v7923_v62 = vsel %vm12132_vm10, %v7910_v34, %v7912_v47 }
 0xbd7   :  { %8095 = vmatpush2.msra.mxu0 %v7923_v62  ;;  %v7906_v10 = vpop.permute.xlu1 %7905 }
 0xbd9   :  { %v7904_v33 = vpop.permute.xlu0 %7903 }
 0xbda   :  { %v7920_v28 = vsel %vm12133_vm6, %v7902_v15, %v7904_v33  ;;  %v7921_v61 = vsel %vm12136_vm15, %v7904_v33, %v7906_v10 }
 0xbdb   :  { %8096 = vmatprep.subr.mxu0 %v7920_v28  ;;  %v7900_v16 = vpop.permute.xlu1 %7899 }
 0xbdc   :  { %v7919_v44 = vsel %vm12134_vm4, %v7900_v16, %v7902_v15 }
 0xbdd   :  { %v7908_v25 = vpop.permute.xlu0 %7907  ;;  %8097 = vmatpush2.msra.mxu0 %v7919_v44 }
 0xbde   :  { %8099 = vmatmul.mubr.f32.vlgmr.msra.gmra.mxu0 %v11583_v23  ;;  %v7922_v45 = vsel %vm12135_vm0, %v7906_v10, %v7908_v25 }
 0xbdf   :  { %8167 = vmatprep.subr.mxu1 %v7922_v45 }
 0xbe0   :  { %8168 = vmatpush2.msra.mxu1 %v7921_v61 }
 0xbe1   :  { %8170 = vmatmul.mubr.f32.vlgmr.msra.gmra.mxu1 %v11583_v23  ;;  %v8189_v23 = vrot.slane %v8180_v41, %v12137_v53 }
 0xbe3   :  { %v8197_v13 = vcombine.high %v8189_v23, %v8189_v23 }
 0xbea   :  { %v8020_v9 = vpop.permute.xlu0 %8019 }
 0xc9e   :  { %v8100_v46 = vpop.f32.mrf.mxu0 }
 0xc9f   :  { %v8101_v20 = vadd.f32 %v8100_v46, %v8020_v9 }
 0xca0   :  { %v8102_v5 = vpop.f32.mrf.mxu0 }
 0xca1   :  { %8383 = vtanh.f32 %v8101_v20  ;;  %v8103_v24 = vadd.f32 %v8102_v5, %v8020_v9  ;;  %v8171_v27 = vpop.f32.mrf.mxu1 }
 0xca2   :  { %v8172_v38 = vadd.f32 %v8171_v27, %v8020_v9 }
 0xca3   :  { %8385 = vtanh.f32 %v8103_v24  ;;  %v8173_v21 = vpop.f32.mrf.mxu1 }
 0xca4   :  { %8387 = vtanh.f32 %v8172_v38  ;;  %v8174_v59 = vadd.f32 %v8173_v21, %v8020_v9 }
 0xca6   :  { %8389 = vtanh.f32 %v8174_v59 }
 0xcae   :  { %v8384_v58 = vpop.eup %8383 }
 0xcaf   :  { %v8203_v42 = vadd.f32 %v8384_v58, %v8189_v23 }
 0xcb0   :  { %v8386_v17 = vpop.eup %8385 }
 0xcb1   :  { %v8388_v54 = vpop.eup %8387  ;;  %v8204_v8 = vadd.f32 %v8386_v17, %v8197_v13  ;;  %v8207_v22 = vmax.f32 %v8203_v42, 0.0 }
 0xcb2   :  { %v8205_v11 = vadd.f32 %v8388_v54, %v8196_v3 }
 0xcb3   :  { %v8390_v49 = vpop.eup %8389  ;;  %v8208_v35 = vmax.f32 %v8204_v8, 0.0 }
 0xcb4   :  { %v8206_v19 = vadd.f32 %v8390_v49, %v8198_v36  ;;  %v8209_v63 = vmax.f32 %v8205_v11, 0.0 }
 0xcb5   :  { %v8215_v2 = vcombine.low %v8207_v22, %v8208_v35 }
 0xcb6   :  { %v8210_v12 = vmax.f32 %v8206_v19, 0.0 }
 0xcb7   :  { %v8223_v48 = vrot.slane %v8215_v2, %v12137_v53 }
 0xcb8   :  { %v8216_v43 = vcombine.low %v8209_v63, %v8210_v12 }
 0xcba   :  { %v8230_v52 = vrot.slane %v8216_v43, %v12137_v53 }
 0xcbc   :  { %v8231_v7 = vcombine.low %v8223_v48, %v8230_v52 }
 0xcbe   :  { %8233 = vst [vmem:[%s12138_s29] sm:$0xff] %v8231_v7 }

</bundles_post_ra>
